<compile_context>
chip_gen: v5e
topology: v5e:2x2
jax: 0.10.0
libtpu: 0.0.40
codegen_flags: <defaults>
</compile_context>

<pallas_src>
import jax
import jax.numpy as jnp
from jax.experimental import pallas as pl
from jax.experimental.pallas import tpu as pltpu

FEATURE_DIM = 2048

# Compatibility shims (behavior-identical fallbacks on older jax versions).
_SQUEEZED = pl.Squeezed() if hasattr(pl, "Squeezed") else None
_COMPILER_PARAMS = (pltpu.CompilerParams if hasattr(pltpu, "CompilerParams")
                    else pltpu.TPUCompilerParams)


# ----------------------------------------------------------------------------
# Wrapper-side transposed im2col for layer 1 ("same" 3x3, padding folded into
# the packing).  Output is (N, 9*Cin, H*W): the spatial dim lands on lanes.
# Tap ordering on axis 1 is (kh, kw, cin) to match w.reshape(9*Cin, Cout).
# ----------------------------------------------------------------------------
def _im2col_3x3_transposed(x_nhwc):
    N, H, W, C = x_nhwc.shape
    xp = jnp.pad(x_nhwc, ((0, 0), (1, 1), (1, 1), (0, 0)))
    taps = []
    for kh in range(3):
        for kw in range(3):
            t = xp[:, kh:kh + H, kw:kw + W, :]                      # (N,H,W,C)
            taps.append(jnp.transpose(t, (0, 3, 1, 2)).reshape(N, C, H * W))
    return jnp.concatenate(taps, axis=1)                            # (N,9C,HW)


# ----------------------------------------------------------------------------
# Kernel 1: fused conv1 -> ReLU -> conv2 -> ReLU -> global average pool, in
# transposed lane-dense (C, HW) layout.  One image per grid step; the (C, HW)
# activation never leaves VMEM.
# ----------------------------------------------------------------------------
def _make_conv_stack_pool_kernel(H, W):
    HW = H * W

    def kernel(p1t_ref, w1t_ref, b1_ref, w2t_ref, b2_ref, o_ref):
        # p1t_ref : (K1P, HW)   bf16  transposed layer-1 im2col patches
        # w1t_ref : (C1, K1P)   bf16
        # b1_ref  : (C1, 1)     f32
        # w2t_ref : (9, C2, C1) bf16  per-tap transposed conv2 weights
        # b2_ref  : (C2, 1)     f32
        # o_ref   : (C2, 1)     f32   globally averaged conv2 features
        C1 = w1t_ref.shape[0]

        # ---- layer 1: one lane-dense MXU matmul, bias + ReLU on the VPU ----
        y1 = jnp.dot(w1t_ref[...], p1t_ref[...],
                     preferred_element_type=jnp.float32)            # (C1, HW)
        y1 = jnp.maximum(y1 + b1_ref[...], 0.0)
        y1b = y1.astype(jnp.bfloat16)

        # Zero-extend along the flattened lane axis: any tap read that falls
        # off the top/bottom image rows lands in these zeros ("same" halo in
        # the height direction), so no padded VMEM scratch is needed.
        zpad = jnp.zeros((C1, W + 1), jnp.bfloat16)
        y1p = jnp.concatenate([zpad, y1b, zpad], axis=1)         # (C1,HW+2W+2)

        # Width-boundary masks: the flattened lane shift wraps across image
        # rows, so only the kw=0 / kw=2 taps need the left/right column zeroed.
        col = jax.lax.broadcasted_iota(jnp.int32, (1, HW), 1) % W
        mask_l = (col >= 1).astype(jnp.bfloat16)                    # dw = -1
        mask_r = (col <= W - 2).astype(jnp.bfloat16)                # dw = +1

        # ---- layer 2: nine per-tap K=C1 MXU matmuls accumulated in f32 ----
        acc = None
        for kh in range(3):
            for kw in range(3):
                off = (W + 1) + (kh - 1) * W + (kw - 1)
                sh = y1p[:, off:off + HW]                           # (C1, HW)
                if kw == 0:
                    sh = sh * mask_l
                elif kw == 2:
                    sh = sh * mask_r
                d = jnp.dot(w2t_ref[kh * 3 + kw], sh,
                            preferred_element_type=jnp.float32)     # (C2, HW)
                acc = d if acc is None else acc + d
        y2 = jnp.maximum(acc + b2_ref[...], 0.0)                    # (C2, HW)

        # ---- fused global average pool (XLU lane reduction) ----
        o_ref[...] = jnp.sum(y2, axis=1, keepdims=True) * (1.0 / HW)

    return kernel


def conv_stack_pool(p1t, w1t, b1, w2t, b2, H, W):
    N, K1P, HW = p1t.shape
    C1 = w1t.shape[0]
    C2 = w2t.shape[1]
    return pl.pallas_call(
        _make_conv_stack_pool_kernel(H, W),
        out_shape=jax.ShapeDtypeStruct((N, C2, 1), jnp.float32),
        grid=(N,),
        in_specs=[
            pl.BlockSpec((_SQUEEZED, K1P, HW), lambda n: (n, 0, 0)),
            pl.BlockSpec((C1, K1P), lambda n: (0, 0)),
            pl.BlockSpec((C1, 1), lambda n: (0, 0)),
            pl.BlockSpec((9, C2, C1), lambda n: (0, 0, 0)),
            pl.BlockSpec((C2, 1), lambda n: (0, 0)),
        ],
        out_specs=pl.BlockSpec((_SQUEEZED, C2, 1), lambda n: (n, 0, 0)),
        compiler_params=_COMPILER_PARAMS(dimension_semantics=("parallel",)),
    )(p1t, w1t, b1.reshape(C1, 1), w2t, b2.reshape(C2, 1))


# ----------------------------------------------------------------------------
# Kernel 2: final linear projection in a single grid-free step with a
# lane-dense (M, 2048) output block.  M (batch) is padded to a multiple of 8.
# ----------------------------------------------------------------------------
def _fc_kernel(p_ref, w_ref, b_ref, o_ref):
    o_ref[...] = (jnp.dot(p_ref[...], w_ref[...],
                          preferred_element_type=jnp.float32) + b_ref[...])


def global_fc(pooled, w_fc, b_fc):
    M, C = pooled.shape
    F = w_fc.shape[-1]
    return pl.pallas_call(
        _fc_kernel,
        out_shape=jax.ShapeDtypeStruct((M, F), jnp.float32),
    )(pooled, w_fc, b_fc.reshape(1, F))


# ----------------------------------------------------------------------------
# Forward pass: x (NCHW) -> features (N, 2048)
# ----------------------------------------------------------------------------
@jax.jit
def inception_v3_features(x_nchw, params):
    x = jnp.transpose(x_nchw, (0, 2, 3, 1)).astype(jnp.bfloat16)  # NCHW->NHWC
    N, H, W, Cin = x.shape
    C1 = params["w1"].shape[-1]
    C2 = params["w2"].shape[-1]

    # Transposed layer-1 im2col in the wrapper (bf16 before the 9x expansion),
    # K padded up to a sublane multiple of 8.
    K1 = 9 * Cin
    K1P = ((K1 + 7) // 8) * 8
    p1t = _im2col_3x3_transposed(x)                                # (N,K1,HW)
    p1t = jnp.pad(p1t, ((0, 0), (0, K1P - K1), (0, 0)))
    w1t = jnp.pad(params["w1"].reshape(K1, C1).T.astype(jnp.bfloat16),
                  ((0, 0), (0, K1P - K1)))                         # (C1, K1P)
    w2t = jnp.transpose(params["w2"], (0, 1, 3, 2)).reshape(9, C2, C1)
    w2t = w2t.astype(jnp.bfloat16)                                 # (9,C2,C1)

    pooled = conv_stack_pool(p1t, w1t, params["b1"], w2t, params["b2"], H, W)
    pooled = pooled.reshape(N, C2)                                 # (N,C2) f32

    # FC: pad the batch dim to a sublane multiple of 8, bf16 MXU inputs.
    M = max(8, ((N + 7) // 8) * 8)
    pooled_p = jnp.pad(pooled, ((0, M - N), (0, 0))).astype(jnp.bfloat16)
    feats = global_fc(pooled_p, params["w_fc"].astype(jnp.bfloat16),
                      params["b_fc"])
    return feats[:N]


# Pure-JAX reference (same bf16-matmul / f32-accumulation precision policy).
def reference_features(x_nchw, params):
    x = jnp.transpose(x_nchw, (0, 2, 3, 1)).astype(jnp.float32)

    def conv_relu(x, w, b):
        y = jax.lax.conv_general_dilated(
            x.astype(jnp.bfloat16), w.astype(jnp.bfloat16),
            window_strides=(1, 1), padding="SAME",
            dimension_numbers=("NHWC", "HWIO", "NHWC"),
            preferred_element_type=jnp.float32)
        return jnp.maximum(y + b.reshape(1, 1, 1, -1), 0.0)

    x = conv_relu(x, params["w1"], params["b1"])
    x = conv_relu(x, params["w2"], params["b2"])
    pooled = jnp.mean(x, axis=(1, 2))
    return (jnp.dot(pooled.astype(jnp.bfloat16),
                    params["w_fc"].astype(jnp.bfloat16),
                    preferred_element_type=jnp.float32) + params["b_fc"])


def make_params(key, cin=3, c1=32, c2=64, feature_dim=FEATURE_DIM):
    k1, k2, k3 = jax.random.split(key, 3)
    return {
        "w1": 0.1 * jax.random.normal(k1, (3, 3, cin, c1), jnp.float32),
        "b1": jnp.zeros((c1,), jnp.float32),
        "w2": 0.1 * jax.random.normal(k2, (3, 3, c1, c2), jnp.float32),
        "b2": jnp.zeros((c2,), jnp.float32),
        "w_fc": 0.05 * jax.random.normal(k3, (c2, feature_dim), jnp.float32),
        "b_fc": jnp.zeros((feature_dim,), jnp.float32),
    }


if __name__ == "__main__":
    key = jax.random.PRNGKey(0)
    kx, kp = jax.random.split(key)

    # Small synthetic image batch, NCHW like the PyTorch module's input.
    x = jax.random.normal(kx, (2, 3, 32, 32), jnp.float32)
    params = make_params(kp)

    feats = jax.block_until_ready(inception_v3_features(x, params))
    ref = jax.block_until_ready(reference_features(x, params))

    assert feats.shape == (2, FEATURE_DIM), feats.shape
    assert feats.dtype == jnp.float32
    # Both paths use bf16 matmul inputs with f32 accumulation, so remaining
    # differences are accumulation-order only; tolerance has ample cushion.
    assert jnp.allclose(feats, ref, rtol=1e-2, atol=1e-2), (
        float(jnp.max(jnp.abs(feats - ref))))

    print("KERNEL_OK")
</pallas_src>

<mosaic_0001>
module attributes {stable_mosaic.version = 11 : i64} {
  func.func @kernel(%arg0: i32, %arg1: memref<1x32x1024xbf16, #tpu.memory_space<vmem>>, %arg2: memref<32x32xbf16, #tpu.memory_space<vmem>>, %arg3: memref<32x1xf32, #tpu.memory_space<vmem>>, %arg4: memref<9x64x32xbf16, #tpu.memory_space<vmem>>, %arg5: memref<64x1xf32, #tpu.memory_space<vmem>>, %arg6: memref<1x64x1xf32, #tpu.memory_space<vmem>>) attributes {dimension_semantics = [#tpu.dimension_semantics<parallel>], iteration_bounds = array<i64: 2>, scalar_prefetch = 0 : i64, scratch_operands = 0 : i64, tpu.core_type = #tpu.core_type<tc>, window_params = [{transform_indices = @transform_0, window_bounds = array<i64: 1, 32, 1024>}, {pipeline_mode = #tpu.pipeline_mode<synchronous>, transform_indices = @transform_1, window_bounds = array<i64: 32, 32>}, {pipeline_mode = #tpu.pipeline_mode<synchronous>, transform_indices = @transform_2, window_bounds = array<i64: 32, 1>}, {pipeline_mode = #tpu.pipeline_mode<synchronous>, transform_indices = @transform_3, window_bounds = array<i64: 9, 64, 32>}, {pipeline_mode = #tpu.pipeline_mode<synchronous>, transform_indices = @transform_4, window_bounds = array<i64: 64, 1>}, {transform_indices = @transform_5, window_bounds = array<i64: 1, 64, 1>}]} {
    %c0 = arith.constant 0 : index
    %c0_0 = arith.constant 0 : index
    %0 = vector.load %arg2[%c0, %c0_0] : memref<32x32xbf16, #tpu.memory_space<vmem>>, vector<32x32xbf16>
    %c0_1 = arith.constant 0 : index
    %c0_2 = arith.constant 0 : index
    %c0_3 = arith.constant 0 : index
    %1 = vector.load %arg1[%c0_1, %c0_2, %c0_3] : memref<1x32x1024xbf16, #tpu.memory_space<vmem>>, vector<1x32x1024xbf16>
    %2 = vector.shape_cast %1 : vector<1x32x1024xbf16> to vector<32x1024xbf16>
    %cst = arith.constant dense<0.000000e+00> : vector<32x1024xf32>
    %3 = tpu.matmul %0, %2, %cst {dimension_numbers = #tpu.dot_dimension_numbers<[1], [0], [0], [1], [0, 0, 1, 1], [], []>} : vector<32x32xbf16>, vector<32x1024xbf16>, vector<32x1024xf32> -> vector<32x1024xf32>
    %c0_4 = arith.constant 0 : index
    %c0_5 = arith.constant 0 : index
    %4 = vector.load %arg3[%c0_4, %c0_5] : memref<32x1xf32, #tpu.memory_space<vmem>>, vector<32x1xf32>
    %5 = vector.broadcast %4 : vector<32x1xf32> to vector<32x1024xf32>
    %6 = arith.addf %3, %5 : vector<32x1024xf32>
    %cst_6 = arith.constant 0.000000e+00 : f32
    %7 = vector.broadcast %cst_6 : f32 to vector<32x1024xf32>
    %8 = arith.maximumf %6, %7 : vector<32x1024xf32>
    %9 = arith.truncf %8 : vector<32x1024xf32> to vector<32x1024xbf16>
    %cst_7 = arith.constant 0.000000e+00 : bf16
    %10 = vector.broadcast %cst_7 : bf16 to vector<32x33xbf16>
    %11 = tpu.concatenate %10, %9, %10 in 1 : vector<32x33xbf16>, vector<32x1024xbf16>, vector<32x33xbf16> -> vector<32x1090xbf16>
    %12 = tpu.iota {dimensions = array<i32: 1>} : vector<1x1024xi32>
    %c32_i32 = arith.constant 32 : i32
    %c0_i32 = arith.constant 0 : i32
    %13 = arith.cmpi eq, %c32_i32, %c0_i32 : i32
    %c1_i32 = arith.constant 1 : i32
    %14 = arith.select %13, %c1_i32, %c32_i32 : i32
    %15 = vector.broadcast %14 : i32 to vector<1x1024xi32>
    %16 = arith.remsi %12, %15 : vector<1x1024xi32>
    %c0_i32_8 = arith.constant 0 : i32
    %17 = vector.broadcast %c0_i32_8 : i32 to vector<1x1024xi32>
    %18 = arith.cmpi ne, %16, %17 : vector<1x1024xi32>
    %c0_i32_9 = arith.constant 0 : i32
    %19 = vector.broadcast %c0_i32_9 : i32 to vector<1x1024xi32>
    %20 = arith.cmpi slt, %16, %19 : vector<1x1024xi32>
    %c0_i32_10 = arith.constant 0 : i32
    %21 = arith.cmpi slt, %14, %c0_i32_10 : i32
    %22 = vector.broadcast %21 : i1 to vector<1x1024xi1>
    %23 = vector.broadcast %22 : vector<1x1024xi1> to vector<1x1024xi1>
    %24 = arith.xori %20, %23 : vector<1x1024xi1>
    %25 = arith.andi %24, %18 : vector<1x1024xi1>
    %26 = vector.broadcast %14 : i32 to vector<1x1024xi32>
    %27 = arith.addi %16, %26 : vector<1x1024xi32>
    %28 = arith.select %25, %27, %16 : vector<1x1024xi1>, vector<1x1024xi32>
    %c1_i32_11 = arith.constant 1 : i32
    %29 = vector.broadcast %c1_i32_11 : i32 to vector<1x1024xi32>
    %30 = arith.cmpi sge, %28, %29 : vector<1x1024xi32>
    %31 = arith.extui %30 : vector<1x1024xi1> to vector<1x1024xi32>
    %32 = arith.sitofp %31 : vector<1x1024xi32> to vector<1x1024xf32>
    %33 = arith.truncf %32 : vector<1x1024xf32> to vector<1x1024xbf16>
    %c30_i32 = arith.constant 30 : i32
    %34 = vector.broadcast %c30_i32 : i32 to vector<1x1024xi32>
    %35 = arith.cmpi sle, %28, %34 : vector<1x1024xi32>
    %36 = arith.extui %35 : vector<1x1024xi1> to vector<1x1024xi32>
    %37 = arith.sitofp %36 : vector<1x1024xi32> to vector<1x1024xf32>
    %38 = arith.truncf %37 : vector<1x1024xf32> to vector<1x1024xbf16>
    %39 = vector.extract_strided_slice %11 {offsets = [0, 0], sizes = [32, 1024], strides = [1, 1]} : vector<32x1090xbf16> to vector<32x1024xbf16>
    %40 = vector.broadcast %33 : vector<1x1024xbf16> to vector<32x1024xbf16>
    %41 = arith.mulf %39, %40 : vector<32x1024xbf16>
    %c0_12 = arith.constant 0 : index
    %c0_13 = arith.constant 0 : index
    %c0_14 = arith.constant 0 : index
    %42 = vector.load %arg4[%c0_12, %c0_13, %c0_14] : memref<9x64x32xbf16, #tpu.memory_space<vmem>>, vector<1x64x32xbf16>
    %43 = vector.shape_cast %42 : vector<1x64x32xbf16> to vector<64x32xbf16>
    %cst_15 = arith.constant dense<0.000000e+00> : vector<64x1024xf32>
    %44 = tpu.matmul %43, %41, %cst_15 {dimension_numbers = #tpu.dot_dimension_numbers<[1], [0], [0], [1], [0, 0, 1, 1], [], []>} : vector<64x32xbf16>, vector<32x1024xbf16>, vector<64x1024xf32> -> vector<64x1024xf32>
    %45 = vector.extract_strided_slice %11 {offsets = [0, 1], sizes = [32, 1024], strides = [1, 1]} : vector<32x1090xbf16> to vector<32x1024xbf16>
    %c1 = arith.constant 1 : index
    %c0_16 = arith.constant 0 : index
    %c0_17 = arith.constant 0 : index
    %46 = vector.load %arg4[%c1, %c0_16, %c0_17] : memref<9x64x32xbf16, #tpu.memory_space<vmem>>, vector<1x64x32xbf16>
    %47 = vector.shape_cast %46 : vector<1x64x32xbf16> to vector<64x32xbf16>
    %cst_18 = arith.constant dense<0.000000e+00> : vector<64x1024xf32>
    %48 = tpu.matmul %47, %45, %cst_18 {dimension_numbers = #tpu.dot_dimension_numbers<[1], [0], [0], [1], [0, 0, 1, 1], [], []>} : vector<64x32xbf16>, vector<32x1024xbf16>, vector<64x1024xf32> -> vector<64x1024xf32>
    %49 = arith.addf %44, %48 : vector<64x1024xf32>
    %50 = vector.extract_strided_slice %11 {offsets = [0, 2], sizes = [32, 1024], strides = [1, 1]} : vector<32x1090xbf16> to vector<32x1024xbf16>
    %51 = vector.broadcast %38 : vector<1x1024xbf16> to vector<32x1024xbf16>
    %52 = arith.mulf %50, %51 : vector<32x1024xbf16>
    %c2 = arith.constant 2 : index
    %c0_19 = arith.constant 0 : index
    %c0_20 = arith.constant 0 : index
    %53 = vector.load %arg4[%c2, %c0_19, %c0_20] : memref<9x64x32xbf16, #tpu.memory_space<vmem>>, vector<1x64x32xbf16>
    %54 = vector.shape_cast %53 : vector<1x64x32xbf16> to vector<64x32xbf16>
    %cst_21 = arith.constant dense<0.000000e+00> : vector<64x1024xf32>
    %55 = tpu.matmul %54, %52, %cst_21 {dimension_numbers = #tpu.dot_dimension_numbers<[1], [0], [0], [1], [0, 0, 1, 1], [], []>} : vector<64x32xbf16>, vector<32x1024xbf16>, vector<64x1024xf32> -> vector<64x1024xf32>
    %56 = arith.addf %49, %55 : vector<64x1024xf32>
    %57 = vector.extract_strided_slice %11 {offsets = [0, 32], sizes = [32, 1024], strides = [1, 1]} : vector<32x1090xbf16> to vector<32x1024xbf16>
    %58 = vector.broadcast %33 : vector<1x1024xbf16> to vector<32x1024xbf16>
    %59 = arith.mulf %57, %58 : vector<32x1024xbf16>
    %c3 = arith.constant 3 : index
    %c0_22 = arith.constant 0 : index
    %c0_23 = arith.constant 0 : index
    %60 = vector.load %arg4[%c3, %c0_22, %c0_23] : memref<9x64x32xbf16, #tpu.memory_space<vmem>>, vector<1x64x32xbf16>
    %61 = vector.shape_cast %60 : vector<1x64x32xbf16> to vector<64x32xbf16>
    %cst_24 = arith.constant dense<0.000000e+00> : vector<64x1024xf32>
    %62 = tpu.matmul %61, %59, %cst_24 {dimension_numbers = #tpu.dot_dimension_numbers<[1], [0], [0], [1], [0, 0, 1, 1], [], []>} : vector<64x32xbf16>, vector<32x1024xbf16>, vector<64x1024xf32> -> vector<64x1024xf32>
    %63 = arith.addf %56, %62 : vector<64x1024xf32>
    %64 = vector.extract_strided_slice %11 {offsets = [0, 33], sizes = [32, 1024], strides = [1, 1]} : vector<32x1090xbf16> to vector<32x1024xbf16>
    %c4 = arith.constant 4 : index
    %c0_25 = arith.constant 0 : index
    %c0_26 = arith.constant 0 : index
    %65 = vector.load %arg4[%c4, %c0_25, %c0_26] : memref<9x64x32xbf16, #tpu.memory_space<vmem>>, vector<1x64x32xbf16>
    %66 = vector.shape_cast %65 : vector<1x64x32xbf16> to vector<64x32xbf16>
    %cst_27 = arith.constant dense<0.000000e+00> : vector<64x1024xf32>
    %67 = tpu.matmul %66, %64, %cst_27 {dimension_numbers = #tpu.dot_dimension_numbers<[1], [0], [0], [1], [0, 0, 1, 1], [], []>} : vector<64x32xbf16>, vector<32x1024xbf16>, vector<64x1024xf32> -> vector<64x1024xf32>
    %68 = arith.addf %63, %67 : vector<64x1024xf32>
    %69 = vector.extract_strided_slice %11 {offsets = [0, 34], sizes = [32, 1024], strides = [1, 1]} : vector<32x1090xbf16> to vector<32x1024xbf16>
    %70 = vector.broadcast %38 : vector<1x1024xbf16> to vector<32x1024xbf16>
    %71 = arith.mulf %69, %70 : vector<32x1024xbf16>
    %c5 = arith.constant 5 : index
    %c0_28 = arith.constant 0 : index
    %c0_29 = arith.constant 0 : index
    %72 = vector.load %arg4[%c5, %c0_28, %c0_29] : memref<9x64x32xbf16, #tpu.memory_space<vmem>>, vector<1x64x32xbf16>
    %73 = vector.shape_cast %72 : vector<1x64x32xbf16> to vector<64x32xbf16>
    %cst_30 = arith.constant dense<0.000000e+00> : vector<64x1024xf32>
    %74 = tpu.matmul %73, %71, %cst_30 {dimension_numbers = #tpu.dot_dimension_numbers<[1], [0], [0], [1], [0, 0, 1, 1], [], []>} : vector<64x32xbf16>, vector<32x1024xbf16>, vector<64x1024xf32> -> vector<64x1024xf32>
    %75 = arith.addf %68, %74 : vector<64x1024xf32>
    %76 = vector.extract_strided_slice %11 {offsets = [0, 64], sizes = [32, 1024], strides = [1, 1]} : vector<32x1090xbf16> to vector<32x1024xbf16>
    %77 = vector.broadcast %33 : vector<1x1024xbf16> to vector<32x1024xbf16>
    %78 = arith.mulf %76, %77 : vector<32x1024xbf16>
    %c6 = arith.constant 6 : index
    %c0_31 = arith.constant 0 : index
    %c0_32 = arith.constant 0 : index
    %79 = vector.load %arg4[%c6, %c0_31, %c0_32] : memref<9x64x32xbf16, #tpu.memory_space<vmem>>, vector<1x64x32xbf16>
    %80 = vector.shape_cast %79 : vector<1x64x32xbf16> to vector<64x32xbf16>
    %cst_33 = arith.constant dense<0.000000e+00> : vector<64x1024xf32>
    %81 = tpu.matmul %80, %78, %cst_33 {dimension_numbers = #tpu.dot_dimension_numbers<[1], [0], [0], [1], [0, 0, 1, 1], [], []>} : vector<64x32xbf16>, vector<32x1024xbf16>, vector<64x1024xf32> -> vector<64x1024xf32>
    %82 = arith.addf %75, %81 : vector<64x1024xf32>
    %83 = vector.extract_strided_slice %11 {offsets = [0, 65], sizes = [32, 1024], strides = [1, 1]} : vector<32x1090xbf16> to vector<32x1024xbf16>
    %c7 = arith.constant 7 : index
    %c0_34 = arith.constant 0 : index
    %c0_35 = arith.constant 0 : index
    %84 = vector.load %arg4[%c7, %c0_34, %c0_35] : memref<9x64x32xbf16, #tpu.memory_space<vmem>>, vector<1x64x32xbf16>
    %85 = vector.shape_cast %84 : vector<1x64x32xbf16> to vector<64x32xbf16>
    %cst_36 = arith.constant dense<0.000000e+00> : vector<64x1024xf32>
    %86 = tpu.matmul %85, %83, %cst_36 {dimension_numbers = #tpu.dot_dimension_numbers<[1], [0], [0], [1], [0, 0, 1, 1], [], []>} : vector<64x32xbf16>, vector<32x1024xbf16>, vector<64x1024xf32> -> vector<64x1024xf32>
    %87 = arith.addf %82, %86 : vector<64x1024xf32>
    %88 = vector.extract_strided_slice %11 {offsets = [0, 66], sizes = [32, 1024], strides = [1, 1]} : vector<32x1090xbf16> to vector<32x1024xbf16>
    %89 = vector.broadcast %38 : vector<1x1024xbf16> to vector<32x1024xbf16>
    %90 = arith.mulf %88, %89 : vector<32x1024xbf16>
    %c8 = arith.constant 8 : index
    %c0_37 = arith.constant 0 : index
    %c0_38 = arith.constant 0 : index
    %91 = vector.load %arg4[%c8, %c0_37, %c0_38] : memref<9x64x32xbf16, #tpu.memory_space<vmem>>, vector<1x64x32xbf16>
    %92 = vector.shape_cast %91 : vector<1x64x32xbf16> to vector<64x32xbf16>
    %cst_39 = arith.constant dense<0.000000e+00> : vector<64x1024xf32>
    %93 = tpu.matmul %92, %90, %cst_39 {dimension_numbers = #tpu.dot_dimension_numbers<[1], [0], [0], [1], [0, 0, 1, 1], [], []>} : vector<64x32xbf16>, vector<32x1024xbf16>, vector<64x1024xf32> -> vector<64x1024xf32>
    %94 = arith.addf %87, %93 : vector<64x1024xf32>
    %c0_40 = arith.constant 0 : index
    %c0_41 = arith.constant 0 : index
    %95 = vector.load %arg5[%c0_40, %c0_41] : memref<64x1xf32, #tpu.memory_space<vmem>>, vector<64x1xf32>
    %96 = vector.broadcast %95 : vector<64x1xf32> to vector<64x1024xf32>
    %97 = arith.addf %94, %96 : vector<64x1024xf32>
    %cst_42 = arith.constant 0.000000e+00 : f32
    %98 = vector.broadcast %cst_42 : f32 to vector<64x1024xf32>
    %99 = arith.maximumf %97, %98 : vector<64x1024xf32>
    %cst_43 = arith.constant dense<0.000000e+00> : vector<64xf32>
    %100 = vector.multi_reduction <add>, %99, %cst_43 [1] : vector<64x1024xf32> to vector<64xf32>
    %101 = vector.shape_cast %100 : vector<64xf32> to vector<64x1xf32>
    %cst_44 = arith.constant 9.765625E-4 : f32
    %102 = vector.broadcast %cst_44 : f32 to vector<64x1xf32>
    %103 = arith.mulf %101, %102 : vector<64x1xf32>
    %c0_45 = arith.constant 0 : index
    %c0_46 = arith.constant 0 : index
    %c0_47 = arith.constant 0 : index
    %104 = vector.load %arg6[%c0_45, %c0_46, %c0_47] : memref<1x64x1xf32, #tpu.memory_space<vmem>>, vector<1x64x1xf32>
    %105 = vector.shape_cast %104 : vector<1x64x1xf32> to vector<64x1xf32>
    %106 = vector.shape_cast %103 : vector<64x1xf32> to vector<1x64x1xf32>
    tpu.vector_store %arg6[%c0_45, %c0_46, %c0_47], %106 {strides = array<i32>} : memref<1x64x1xf32, #tpu.memory_space<vmem>>, vector<1x64x1xf32>,
    return
  }
  func.func @transform_0(%arg0: i32) -> (i32, i32, i32) {
    %c0_i32 = arith.constant 0 : i32
    %c0_i32_0 = arith.constant 0 : i32
    %c0_i32_1 = arith.constant 0 : i32
    return %arg0, %c0_i32, %c0_i32_0 : i32, i32, i32
  }
  func.func @transform_1(%arg0: i32) -> (i32, i32) {
    %c0_i32 = arith.constant 0 : i32
    %c0_i32_0 = arith.constant 0 : i32
    %c0_i32_1 = arith.constant 0 : i32
    return %c0_i32, %c0_i32_0 : i32, i32
  }
  func.func @transform_2(%arg0: i32) -> (i32, i32) {
    %c0_i32 = arith.constant 0 : i32
    %c0_i32_0 = arith.constant 0 : i32
    %c0_i32_1 = arith.constant 0 : i32
    return %c0_i32, %c0_i32_0 : i32, i32
  }
  func.func @transform_3(%arg0: i32) -> (i32, i32, i32) {
    %c0_i32 = arith.constant 0 : i32
    %c0_i32_0 = arith.constant 0 : i32
    %c0_i32_1 = arith.constant 0 : i32
    %c0_i32_2 = arith.constant 0 : i32
    return %c0_i32, %c0_i32_0, %c0_i32_1 : i32, i32, i32
  }
  func.func @transform_4(%arg0: i32) -> (i32, i32) {
    %c0_i32 = arith.constant 0 : i32
    %c0_i32_0 = arith.constant 0 : i32
    %c0_i32_1 = arith.constant 0 : i32
    return %c0_i32, %c0_i32_0 : i32, i32
  }
  func.func @transform_5(%arg0: i32) -> (i32, i32, i32) {
    %c0_i32 = arith.constant 0 : i32
    %c0_i32_0 = arith.constant 0 : i32
    %c0_i32_1 = arith.constant 0 : i32
    return %arg0, %c0_i32, %c0_i32_0 : i32, i32, i32
  }
}

module attributes {stable_mosaic.version = 11 : i64} {
  func.func @_fc_kernel(%arg0: memref<8x64xbf16, #tpu.memory_space<vmem>>, %arg1: memref<64x2048xbf16, #tpu.memory_space<vmem>>, %arg2: memref<1x2048xf32, #tpu.memory_space<vmem>>, %arg3: memref<8x2048xf32, #tpu.memory_space<vmem>>) attributes {dimension_semantics = [], scalar_prefetch = 0 : i64, scratch_operands = 0 : i64, tpu.core_type = #tpu.core_type<tc>} {
    %c0 = arith.constant 0 : index
    %c0_0 = arith.constant 0 : index
    %0 = vector.load %arg0[%c0, %c0_0] : memref<8x64xbf16, #tpu.memory_space<vmem>>, vector<8x64xbf16>
    %c0_1 = arith.constant 0 : index
    %c0_2 = arith.constant 0 : index
    %1 = vector.load %arg1[%c0_1, %c0_2] : memref<64x2048xbf16, #tpu.memory_space<vmem>>, vector<64x2048xbf16>
    %cst = arith.constant dense<0.000000e+00> : vector<8x2048xf32>
    %2 = tpu.matmul %0, %1, %cst {dimension_numbers = #tpu.dot_dimension_numbers<[1], [0], [0], [1], [0, 0, 1, 1], [], []>} : vector<8x64xbf16>, vector<64x2048xbf16>, vector<8x2048xf32> -> vector<8x2048xf32>
    %c0_3 = arith.constant 0 : index
    %c0_4 = arith.constant 0 : index
    %3 = vector.load %arg2[%c0_3, %c0_4] : memref<1x2048xf32, #tpu.memory_space<vmem>>, vector<1x2048xf32>
    %4 = vector.broadcast %3 : vector<1x2048xf32> to vector<8x2048xf32>
    %5 = arith.addf %2, %4 : vector<8x2048xf32>
    %c0_5 = arith.constant 0 : index
    %c0_6 = arith.constant 0 : index
    %6 = vector.load %arg3[%c0_5, %c0_6] : memref<8x2048xf32, #tpu.memory_space<vmem>>, vector<8x2048xf32>
    tpu.vector_store %arg3[%c0_5, %c0_6], %5 {strides = array<i32>} : memref<8x2048xf32, #tpu.memory_space<vmem>>, vector<8x2048xf32>,
    return
  }
}

</mosaic_0001>

<bundles_post_ra>
// kernel: inception_v3_features.3
= control target key start
LH: loop header
LB: loop body
LE: loop exit
PB: predicated region body
PF: predicated region fallthrough
CT: control target
= control target key end

     0   :  { %vm436_vm0 = vcmask 523264   ;;  %s1499_s1 = inlined_call_operand.vmem [shape: bf16[64,2048], index: 1, kind: input, shape index: {}]   ;;  %s1500_s0 = inlined_call_operand.vmem [shape: bf16[8,64], index: 0, kind: input, shape index: {}]   ;;  %s1501_s2 = inlined_call_operand.vmem [shape: f32[1,2048], index: 2, kind: input, shape index: {}]   ;;  %s1502_s3 = inlined_call_operand.vmem [shape: f32[8,2048], index: 3, kind: output, shape index: {}]  }
   0x1   :  { %v862_v0 = vld [vmem:[%s1499_s1 + $0x180] sm:$0xf]  ;;  %v988_v2 = vld [vmem:[%s1499_s1 + $0x184] sm:$0xf]  ;;  %v870_v5 = vld [vmem:[%s1499_s1 + $0x188] sm:$0xf] }
   0x2   :  { %v996_v1 = vld [vmem:[%s1499_s1 + $0x1bc] sm:$0xf0]  ;;  %v864_v4 = vld [vmem:[%s1499_s1 + $0x1c0] sm:$0xf0]  ;;  %v997_v6 = vld [vmem:[%s1499_s1 + $0x1c4] sm:$0xf0] }
   0x3   :  { %v863_v3 = vor.u32 %v996_v1, %v862_v0  ;;  %v867_v7 = vor.u32 %v988_v2, %v864_v4  ;;  %v871_v8 = vor.u32 %v997_v6, %v870_v5  ;;  %v989_v9 = vld [vmem:[%s1499_s1 + $0x18c] sm:$0xf]  ;;  %v798_v11 = vld [vmem:[%s1499_s1 + $0x100] sm:$0xf]  ;;  %v972_v14 = vld [vmem:[%s1499_s1 + $0x104] sm:$0xf] }
   0x4   :  { %v872_v10 = vld [vmem:[%s1499_s1 + $0x1c8] sm:$0xf0]  ;;  %v980_v13 = vld [vmem:[%s1499_s1 + $0x13c] sm:$0xf0]  ;;  %v800_v15 = vld [vmem:[%s1499_s1 + $0x140] sm:$0xf0] }
   0x5   :  { %444 = vmatpush.bf16.msra.mxu0 %v863_v3  ;;  %v875_v12 = vor.u32 %v989_v9, %v872_v10  ;;  %457 = vmatpush.bf16.msra.mxu1 %v867_v7  ;;  %v799_v16 = vor.u32 %v980_v13, %v798_v11  ;;  %v803_v17 = vor.u32 %v972_v14, %v800_v15  ;;  %v806_v18 = vld [vmem:[%s1499_s1 + $0x108] sm:$0xf]  ;;  %v973_v20 = vld [vmem:[%s1499_s1 + $0x10c] sm:$0xf]  ;;  %v734_v23 = vld [vmem:[%s1499_s1 + $0x80] sm:$0xf] }
   0x6   :  { %470 = vmatpush.bf16.msra.mxu2 %v871_v8  ;;  %v981_v19 = vld [vmem:[%s1499_s1 + $0x144] sm:$0xf0]  ;;  %v808_v22 = vld [vmem:[%s1499_s1 + $0x148] sm:$0xf0]  ;;  %v964_v24 = vld [vmem:[%s1499_s1 + $0xbc] sm:$0xf0] }
   0x7   :  { %483 = vmatpush.bf16.msra.mxu3 %v875_v12  ;;  %v807_v21 = vor.u32 %v981_v19, %v806_v18  ;;  %v811_v25 = vor.u32 %v973_v20, %v808_v22  ;;  %v956_v26 = vld [vmem:[%s1499_s1 + $0x84] sm:$0xf]  ;;  %v742_v28 = vld [vmem:[%s1499_s1 + $0x88] sm:$0xf]  ;;  %v735_v29 = vor.u32 %v964_v24, %v734_v23  ;;  %v957_v31 = vld [vmem:[%s1499_s1 + $0x8c] sm:$0xf] }
   0x8   :  { %v736_v27 = vld [vmem:[%s1499_s1 + $0xc0] sm:$0xf0]  ;;  %v965_v30 = vld [vmem:[%s1499_s1 + $0xc4] sm:$0xf0]  ;;  %v744_v32 = vld [vmem:[%s1499_s1 + $0xc8] sm:$0xf0] }
   0x9   :  { %445 = vmatpush.bf16.msra.mxu0 %v799_v16  ;;  %458 = vmatpush.bf16.msra.mxu1 %v803_v17  ;;  %v739_v33 = vor.u32 %v956_v26, %v736_v27  ;;  %v743_v34 = vor.u32 %v965_v30, %v742_v28  ;;  %v670_v35 = vld [vmem:[%s1499_s1] sm:$0xf]  ;;  %v940_v37 = vld [vmem:[%s1499_s1 + $0x4] sm:$0xf]  ;;  %v747_v38 = vor.u32 %v957_v31, %v744_v32  ;;  %v678_v40 = vld [vmem:[%s1499_s1 + $0x8] sm:$0xf] }
   0xa   :  { %471 = vmatpush.bf16.msra.mxu2 %v807_v21  ;;  %v948_v36 = vld [vmem:[%s1499_s1 + $0x3c] sm:$0xf0]  ;;  %v672_v39 = vld [vmem:[%s1499_s1 + $0x40] sm:$0xf0]  ;;  %v949_v41 = vld [vmem:[%s1499_s1 + $0x44] sm:$0xf0] }
   0xb   :  { %484 = vmatpush.bf16.msra.mxu3 %v811_v25  ;;  %v941_v42 = vld [vmem:[%s1499_s1 + $0xc] sm:$0xf]  ;;  %v671_v44 = vor.u32 %v948_v36, %v670_v35  ;;  %v886_v45 = vld [vmem:[%s1499_s1 + $0x198] sm:$0xf]  ;;  %v991_v47 = vld [vmem:[%s1499_s1 + $0x19c] sm:$0xf]  ;;  %v675_v48 = vor.u32 %v940_v37, %v672_v39  ;;  %v679_v49 = vor.u32 %v949_v41, %v678_v40 }
   0xc   :  { %v680_v43 = vld [vmem:[%s1499_s1 + $0x48] sm:$0xf0]  ;;  %v999_v46 = vld [vmem:[%s1499_s1 + $0x1d4] sm:$0xf0]  ;;  %v888_v50 = vld [vmem:[%s1499_s1 + $0x1d8] sm:$0xf0] }
   0xd   :  { %446 = vmatpush.bf16.msra.mxu0 %v735_v29  ;;  %459 = vmatpush.bf16.msra.mxu1 %v739_v33  ;;  %v683_v51 = vor.u32 %v941_v42, %v680_v43  ;;  %v887_v52 = vor.u32 %v999_v46, %v886_v45  ;;  %v878_v53 = vld [vmem:[%s1499_s1 + $0x190] sm:$0xf]  ;;  %v990_v55 = vld [vmem:[%s1499_s1 + $0x194] sm:$0xf]  ;;  %v891_v56 = vor.u32 %v991_v47, %v888_v50  ;;  %v822_v58 = vld [vmem:[%s1499_s1 + $0x118] sm:$0xf] }
   0xe   :  { %472 = vmatpush.bf16.msra.mxu2 %v743_v34  ;;  %v998_v54 = vld [vmem:[%s1499_s1 + $0x1cc] sm:$0xf0]  ;;  %v880_v57 = vld [vmem:[%s1499_s1 + $0x1d0] sm:$0xf0]  ;;  %v983_v59 = vld [vmem:[%s1499_s1 + $0x154] sm:$0xf0] }
   0xf   :  { %485 = vmatpush.bf16.msra.mxu3 %v747_v38  ;;  %v1153_v60 = vld [vmem:[%s1500_s0] sm:$0xf]  ;;  %v975_v61 = vld [vmem:[%s1499_s1 + $0x11c] sm:$0xf]  ;;  %v879_v63 = vor.u32 %v998_v54, %v878_v53  ;;  %v883_v0 = vor.u32 %v990_v55, %v880_v57  ;;  %v823_v1 = vor.u32 %v983_v59, %v822_v58  ;;  %v814_v2 = vld [vmem:[%s1499_s1 + $0x110] sm:$0xf] }
  0x10   :  { %v824_v62 = vld [vmem:[%s1499_s1 + $0x158] sm:$0xf0]  ;;  %v982_v3 = vld [vmem:[%s1499_s1 + $0x14c] sm:$0xf0]  ;;  %v974_v4 = vld [vmem:[%s1499_s1 + $0x114] sm:$0xf] }
  0x11   :  { %447 = vmatpush.bf16.msra.mxu0 %v671_v44  ;;  %460 = vmatpush.bf16.msra.mxu1 %v675_v48  ;;  %v827_v5 = vor.u32 %v975_v61, %v824_v62  ;;  %v816_v6 = vld [vmem:[%s1499_s1 + $0x150] sm:$0xf0]  ;;  %v758_v7 = vld [vmem:[%s1499_s1 + $0x98] sm:$0xf]  ;;  %v959_v9 = vld [vmem:[%s1499_s1 + $0x9c] sm:$0xf]  ;;  %v815_v11 = vor.u32 %v982_v3, %v814_v2 }
  0x12   :  { %473 = vmatpush.bf16.msra.mxu2 %v679_v49  ;;  %v967_v8 = vld [vmem:[%s1499_s1 + $0xd4] sm:$0xf0]  ;;  %v760_v10 = vld [vmem:[%s1499_s1 + $0xd8] sm:$0xf0]  ;;  %v750_v12 = vld [vmem:[%s1499_s1 + $0x90] sm:$0xf]  ;;  %v819_v13 = vor.u32 %v974_v4, %v816_v6 }
  0x13   :  { %486 = vmatpush.bf16.msra.mxu3 %v683_v51  ;;  %v759_v14 = vor.u32 %v967_v8, %v758_v7  ;;  %v966_v15 = vld [vmem:[%s1499_s1 + $0xcc] sm:$0xf0]  ;;  %v958_v16 = vld [vmem:[%s1499_s1 + $0x94] sm:$0xf]  ;;  %v763_v18 = vor.u32 %v959_v9, %v760_v10  ;;  %v694_v19 = vld [vmem:[%s1499_s1 + $0x18] sm:$0xf] }
  0x14   :  { %924 = vmatmul.msk.bf16.vlgmr.msra.gmra.mxu0 %vm436_vm0, %v1153_v60  ;;  %925 = vmatmul.msk.bf16.vlgmr.msra.gmra.mxu1 %vm436_vm0, %v1153_v60  ;;  %v752_v17 = vld [vmem:[%s1499_s1 + $0xd0] sm:$0xf0]  ;;  %v951_v20 = vld [vmem:[%s1499_s1 + $0x54] sm:$0xf0]  ;;  %v943_v21 = vld [vmem:[%s1499_s1 + $0x1c] sm:$0xf]  ;;  %v751_v25 = vor.u32 %v966_v15, %v750_v12 }
  0x15   :  { %926 = vmatmul.msk.bf16.vlgmr.msra.gmra.mxu2 %vm436_vm0, %v1153_v60  ;;  %496 = vmatpush.bf16.msrb.mxu0 %v879_v63  ;;  %v696_v22 = vld [vmem:[%s1499_s1 + $0x58] sm:$0xf0]  ;;  %v902_v23 = vld [vmem:[%s1499_s1 + $0x1a8] sm:$0xf]  ;;  %v686_v26 = vld [vmem:[%s1499_s1 + $0x10] sm:$0xf]  ;;  %v755_v29 = vor.u32 %v958_v16, %v752_v17  ;;  %v695_v30 = vor.u32 %v951_v20, %v694_v19 }
  0x16   :  { %522 = vmatpush.bf16.msrb.mxu2 %v887_v52  ;;  %927 = vmatmul.msk.bf16.vlgmr.msra.gmra.mxu3 %vm436_vm0, %v1153_v60  ;;  %v1001_v24 = vld [vmem:[%s1499_s1 + $0x1e4] sm:$0xf0]  ;;  %v993_v27 = vld [vmem:[%s1499_s1 + $0x1ac] sm:$0xf]  ;;  %v950_v31 = vld [vmem:[%s1499_s1 + $0x4c] sm:$0xf0]  ;;  %v699_v34 = vor.u32 %v943_v21, %v696_v22 }
  0x17   :  { %535 = vmatpush.bf16.msrb.mxu3 %v891_v56  ;;  %509 = vmatpush.bf16.msrb.mxu1 %v883_v0  ;;  %v904_v28 = vld [vmem:[%s1499_s1 + $0x1e8] sm:$0xf0]  ;;  %v942_v32 = vld [vmem:[%s1499_s1 + $0x14] sm:$0xf]  ;;  %v903_v35 = vor.u32 %v1001_v24, %v902_v23  ;;  %v894_v36 = vld [vmem:[%s1499_s1 + $0x1a0] sm:$0xf]  ;;  %v687_v43 = vor.u32 %v950_v31, %v686_v26 }
  0x18   :  { %v688_v33 = vld [vmem:[%s1499_s1 + $0x50] sm:$0xf0]  ;;  %v1000_v37 = vld [vmem:[%s1499_s1 + $0x1dc] sm:$0xf0]  ;;  %v992_v38 = vld [vmem:[%s1499_s1 + $0x1a4] sm:$0xf]  ;;  %v907_v39 = vor.u32 %v993_v27, %v904_v28 }
  0x19   :  { %497 = vmatpush.bf16.msrb.mxu0 %v815_v11  ;;  %v896_v40 = vld [vmem:[%s1499_s1 + $0x1e0] sm:$0xf0]  ;;  %v838_v41 = vld [vmem:[%s1499_s1 + $0x128] sm:$0xf]  ;;  %v691_v44 = vor.u32 %v942_v32, %v688_v33  ;;  %v895_v45 = vor.u32 %v1000_v37, %v894_v36  ;;  %v977_v46 = vld [vmem:[%s1499_s1 + $0x12c] sm:$0xf] }
  0x1a   :  { %523 = vmatpush.bf16.msrb.mxu2 %v823_v1  ;;  %v985_v42 = vld [vmem:[%s1499_s1 + $0x164] sm:$0xf0]  ;;  %v840_v47 = vld [vmem:[%s1499_s1 + $0x168] sm:$0xf0]  ;;  %v899_v48 = vor.u32 %v992_v38, %v896_v40  ;;  %v830_v50 = vld [vmem:[%s1499_s1 + $0x120] sm:$0xf] }
  0x1b   :  { %536 = vmatpush.bf16.msrb.mxu3 %v827_v5  ;;  %510 = vmatpush.bf16.msrb.mxu1 %v819_v13  ;;  %v839_v49 = vor.u32 %v985_v42, %v838_v41  ;;  %v984_v51 = vld [vmem:[%s1499_s1 + $0x15c] sm:$0xf0]  ;;  %v976_v52 = vld [vmem:[%s1499_s1 + $0x124] sm:$0xf]  ;;  %v774_v54 = vld [vmem:[%s1499_s1 + $0xa8] sm:$0xf]  ;;  %v843_v56 = vor.u32 %v977_v46, %v840_v47 }
  0x1c   :  { %v832_v53 = vld [vmem:[%s1499_s1 + $0x160] sm:$0xf0]  ;;  %v969_v55 = vld [vmem:[%s1499_s1 + $0xe4] sm:$0xf0]  ;;  %v831_v57 = vor.u32 %v984_v51, %v830_v50  ;;  %v961_v58 = vld [vmem:[%s1499_s1 + $0xac] sm:$0xf] }
  0x1d   :  { %498 = vmatpush.bf16.msrb.mxu0 %v751_v25  ;;  %v776_v59 = vld [vmem:[%s1499_s1 + $0xe8] sm:$0xf0]  ;;  %v835_v61 = vor.u32 %v976_v52, %v832_v53  ;;  %v775_v62 = vor.u32 %v969_v55, %v774_v54  ;;  %v766_v63 = vld [vmem:[%s1499_s1 + $0xa0] sm:$0xf]  ;;  %v960_v1 = vld [vmem:[%s1499_s1 + $0xa4] sm:$0xf] }
  0x1e   :  { %524 = vmatpush.bf16.msrb.mxu2 %v759_v14  ;;  %v968_v0 = vld [vmem:[%s1499_s1 + $0xdc] sm:$0xf0]  ;;  %v768_v2 = vld [vmem:[%s1499_s1 + $0xe0] sm:$0xf0]  ;;  %v710_v3 = vld [vmem:[%s1499_s1 + $0x28] sm:$0xf]  ;;  %v779_v7 = vor.u32 %v961_v58, %v776_v59 }
  0x1f   :  { %537 = vmatpush.bf16.msrb.mxu3 %v763_v18  ;;  %511 = vmatpush.bf16.msrb.mxu1 %v755_v29  ;;  %v953_v4 = vld [vmem:[%s1499_s1 + $0x64] sm:$0xf0]  ;;  %v918_v5 = vld [vmem:[%s1499_s1 + $0x1b8] sm:$0xf]  ;;  %v767_v8 = vor.u32 %v968_v0, %v766_v63  ;;  %v945_v9 = vld [vmem:[%s1499_s1 + $0x2c] sm:$0xf]  ;;  %v771_v12 = vor.u32 %v960_v1, %v768_v2 }
  0x20   :  { %v1003_v6 = vld [vmem:[%s1499_s1 + $0x1f4] sm:$0xf0]  ;;  %v712_v10 = vld [vmem:[%s1499_s1 + $0x68] sm:$0xf0]  ;;  %v702_v11 = vld [vmem:[%s1499_s1 + $0x20] sm:$0xf]  ;;  %v711_v13 = vor.u32 %v953_v4, %v710_v3 }
  0x21   :  { %499 = vmatpush.bf16.msrb.mxu0 %v687_v43  ;;  %v952_v14 = vld [vmem:[%s1499_s1 + $0x5c] sm:$0xf0]  ;;  %v944_v15 = vld [vmem:[%s1499_s1 + $0x24] sm:$0xf]  ;;  %v919_v17 = vor.u32 %v1003_v6, %v918_v5  ;;  %v995_v18 = vld [vmem:[%s1499_s1 + $0x1bc] sm:$0xf]  ;;  %v715_v24 = vor.u32 %v945_v9, %v712_v10 }
  0x22   :  { %525 = vmatpush.bf16.msrb.mxu2 %v695_v30  ;;  %v704_v16 = vld [vmem:[%s1499_s1 + $0x60] sm:$0xf0]  ;;  %v920_v19 = vld [vmem:[%s1499_s1 + $0x1f8] sm:$0xf0]  ;;  %v910_v20 = vld [vmem:[%s1499_s1 + $0x1b0] sm:$0xf]  ;;  %v703_v25 = vor.u32 %v952_v14, %v702_v11 }
  0x23   :  { %538 = vmatpush.bf16.msrb.mxu3 %v699_v34  ;;  %512 = vmatpush.bf16.msrb.mxu1 %v691_v44  ;;  %v1002_v21 = vld [vmem:[%s1499_s1 + $0x1ec] sm:$0xf0]  ;;  %v994_v22 = vld [vmem:[%s1499_s1 + $0x1b4] sm:$0xf]  ;;  %v854_v26 = vld [vmem:[%s1499_s1 + $0x138] sm:$0xf]  ;;  %v707_v28 = vor.u32 %v944_v15, %v704_v16  ;;  %v923_v29 = vor.u32 %v995_v18, %v920_v19 }
  0x24   :  { %928 = vmatmul.msk.bf16.vlgmr.msrb.gmra.mxu0 %vm436_vm0, %v1153_v60  ;;  %v912_v23 = vld [vmem:[%s1499_s1 + $0x1f0] sm:$0xf0]  ;;  %v987_v27 = vld [vmem:[%s1499_s1 + $0x174] sm:$0xf0]  ;;  %v911_v30 = vor.u32 %v1002_v21, %v910_v20  ;;  %v979_v32 = vld [vmem:[%s1499_s1 + $0x13c] sm:$0xf] }
  0x25   :  { %548 = vmatpush.bf16.msra.mxu0 %v895_v45  ;;  %930 = vmatmul.msk.bf16.vlgmr.msrb.gmra.mxu2 %vm436_vm0, %v1153_v60  ;;  %v915_v31 = vor.u32 %v994_v22, %v912_v23  ;;  %v856_v33 = vld [vmem:[%s1499_s1 + $0x178] sm:$0xf0]  ;;  %v855_v34 = vor.u32 %v987_v27, %v854_v26  ;;  %v986_v36 = vld [vmem:[%s1499_s1 + $0x16c] sm:$0xf0]  ;;  %v978_v38 = vld [vmem:[%s1499_s1 + $0x134] sm:$0xf] }
  0x26   :  { %574 = vmatpush.bf16.msra.mxu2 %v903_v35  ;;  %929 = vmatmul.msk.bf16.vlgmr.msrb.gmra.mxu1 %vm436_vm0, %v1153_v60  ;;  %v846_v35 = vld [vmem:[%s1499_s1 + $0x130] sm:$0xf]  ;;  %v859_v37 = vor.u32 %v979_v32, %v856_v33  ;;  %v790_v40 = vld [vmem:[%s1499_s1 + $0xb8] sm:$0xf]  ;;  %v963_v42 = vld [vmem:[%s1499_s1 + $0xbc] sm:$0xf] }
  0x27   :  { %587 = vmatpush.bf16.msra.mxu3 %v907_v39  ;;  %561 = vmatpush.bf16.msra.mxu1 %v899_v48  ;;  %v848_v39 = vld [vmem:[%s1499_s1 + $0x170] sm:$0xf0]  ;;  %v971_v41 = vld [vmem:[%s1499_s1 + $0xf4] sm:$0xf0]  ;;  %v792_v43 = vld [vmem:[%s1499_s1 + $0xf8] sm:$0xf0]  ;;  %v847_v44 = vor.u32 %v986_v36, %v846_v35 }
  0x28   :  { %931 = vmatmul.msk.bf16.vlgmr.msrb.gmra.mxu3 %vm436_vm0, %v1153_v60  ;;  %v851_v45 = vor.u32 %v978_v38, %v848_v39  ;;  %v782_v46 = vld [vmem:[%s1499_s1 + $0xb0] sm:$0xf]  ;;  %v791_v48 = vor.u32 %v971_v41, %v790_v40  ;;  %v962_v50 = vld [vmem:[%s1499_s1 + $0xb4] sm:$0xf]  ;;  %v726_v52 = vld [vmem:[%s1499_s1 + $0x38] sm:$0xf] }
  0x29   :  { %549 = vmatpush.bf16.msra.mxu0 %v831_v57  ;;  %v970_v47 = vld [vmem:[%s1499_s1 + $0xec] sm:$0xf0]  ;;  %v784_v51 = vld [vmem:[%s1499_s1 + $0xf0] sm:$0xf0]  ;;  %v955_v53 = vld [vmem:[%s1499_s1 + $0x74] sm:$0xf0] }
  0x2a   :  { %575 = vmatpush.bf16.msra.mxu2 %v839_v49  ;;  %v795_v49 = vor.u32 %v963_v42, %v792_v43  ;;  %v947_v54 = vld [vmem:[%s1499_s1 + $0x3c] sm:$0xf]  ;;  %v787_v57 = vor.u32 %v962_v50, %v784_v51  ;;  %v718_v58 = vld [vmem:[%s1499_s1 + $0x30] sm:$0xf]  ;;  %v727_v59 = vor.u32 %v955_v53, %v726_v52  ;;  %v946_v63 = vld [vmem:[%s1499_s1 + $0x34] sm:$0xf] }
  0x2b   :  { %588 = vmatpush.bf16.msra.mxu3 %v843_v56  ;;  %562 = vmatpush.bf16.msra.mxu1 %v835_v61  ;;  %v728_v55 = vld [vmem:[%s1499_s1 + $0x78] sm:$0xf0]  ;;  %v783_v56 = vor.u32 %v970_v47, %v782_v46  ;;  %v720_v0 = vld [vmem:[%s1499_s1 + $0x70] sm:$0xf0]  ;;  %v80_v3 = vld [vmem:[%s1501_s2] sm:$0xff] }
  0x2c   :  { %v731_v61 = vor.u32 %v947_v54, %v728_v55  ;;  %v723_v2 = vor.u32 %v946_v63, %v720_v0  ;;  %v84_v4 = vperm.slane %v80_v3, 0  ;;  %v85_v5 = vperm.slane %v80_v3, 1  ;;  %v81_v33 = vld [vmem:[%s1501_s2 + $0x8] sm:$0xff] }
  0x2d   :  { %550 = vmatpush.bf16.msra.mxu0 %v767_v8  ;;  %v86_v10 = vperm.slane %v80_v3, 2  ;;  %v89_v19 = vperm.slane %v80_v3, 5  ;;  %v91_v26 = vperm.slane %v80_v3, 7  ;;  %v93_v36 = vperm.slane %v81_v33, 1 }
  0x2e   :  { %576 = vmatpush.bf16.msra.mxu2 %v775_v62  ;;  %v954_v62 = vld [vmem:[%s1499_s1 + $0x6c] sm:$0xf0]  ;;  %v94_v42 = vperm.slane %v81_v33, 2  ;;  %v95_v43 = vperm.slane %v81_v33, 3  ;;  %v96_v50 = vperm.slane %v81_v33, 4  ;;  %v97_v52 = vperm.slane %v81_v33, 5 }
  0x2f   :  { %589 = vmatpush.bf16.msra.mxu3 %v779_v7  ;;  %563 = vmatpush.bf16.msra.mxu1 %v771_v12  ;;  %v719_v1 = vor.u32 %v954_v62, %v718_v58  ;;  %v98_v58 = vperm.slane %v81_v33, 6 }
  0x31   :  { %551 = vmatpush.bf16.msra.mxu0 %v703_v25  ;;  %v90_v25 = vperm.slane %v80_v3, 6 }
  0x32   :  { %577 = vmatpush.bf16.msra.mxu2 %v711_v13 }
  0x33   :  { %590 = vmatpush.bf16.msra.mxu3 %v715_v24  ;;  %564 = vmatpush.bf16.msra.mxu1 %v707_v28 }
  0x34   :  { %932 = vmatmul.msk.bf16.vlgmr.msra.gmra.mxu0 %vm436_vm0, %v1153_v60 }
  0x35   :  { %600 = vmatpush.bf16.msrb.mxu0 %v911_v30  ;;  %934 = vmatmul.msk.bf16.vlgmr.msra.gmra.mxu2 %vm436_vm0, %v1153_v60 }
  0x36   :  { %626 = vmatpush.bf16.msrb.mxu2 %v919_v17  ;;  %933 = vmatmul.msk.bf16.vlgmr.msra.gmra.mxu1 %vm436_vm0, %v1153_v60  ;;  %v88_v17 = vperm.slane %v80_v3, 4 }
  0x37   :  { %639 = vmatpush.bf16.msrb.mxu3 %v923_v29  ;;  %613 = vmatpush.bf16.msrb.mxu1 %v915_v31 }
  0x38   :  { %935 = vmatmul.msk.bf16.vlgmr.msra.gmra.mxu3 %vm436_vm0, %v1153_v60 }
  0x39   :  { %601 = vmatpush.bf16.msrb.mxu0 %v847_v44 }
  0x3a   :  { %627 = vmatpush.bf16.msrb.mxu2 %v855_v34  ;;  %v92_v34 = vperm.slane %v81_v33, 0 }
  0x3b   :  { %640 = vmatpush.bf16.msrb.mxu3 %v859_v37  ;;  %614 = vmatpush.bf16.msrb.mxu1 %v851_v45 }
  0x3d   :  { %602 = vmatpush.bf16.msrb.mxu0 %v783_v56 }
  0x3e   :  { %628 = vmatpush.bf16.msrb.mxu2 %v791_v48 }
  0x3f   :  { %641 = vmatpush.bf16.msrb.mxu3 %v795_v49  ;;  %615 = vmatpush.bf16.msrb.mxu1 %v787_v57 }
  0x41   :  { %603 = vmatpush.bf16.msrb.mxu0 %v719_v1 }
  0x42   :  { %629 = vmatpush.bf16.msrb.mxu2 %v727_v59  ;;  %v99_v59 = vperm.slane %v81_v33, 7 }
  0x43   :  { %642 = vmatpush.bf16.msrb.mxu3 %v731_v61  ;;  %616 = vmatpush.bf16.msrb.mxu1 %v723_v2 }
  0x44   :  { %936 = vmatmul.msk.bf16.vlgmr.msrb.gmra.mxu0 %vm436_vm0, %v1153_v60 }
  0x45   :  { %938 = vmatmul.msk.bf16.vlgmr.msrb.gmra.mxu2 %vm436_vm0, %v1153_v60 }
  0x46   :  { %937 = vmatmul.msk.bf16.vlgmr.msrb.gmra.mxu1 %vm436_vm0, %v1153_v60 }
  0x48   :  { %939 = vmatmul.msk.bf16.vlgmr.msrb.gmra.mxu3 %vm436_vm0, %v1153_v60  ;;  %v87_v60 = vperm.slane %v80_v3, 3 }
  0x91   :  { %v449_v6 = vpop.f32.mrf.mxu0  ;;  %v462_v8 = vpop.f32.mrf.mxu1 }
  0x92   :  { %v450_v7 = vadd.f32 %v449_v6, %v84_v4  ;;  %v463_v9 = vadd.f32 %v462_v8, %v85_v5 }
  0x94   :  { %648 = vst [vmem:[%s1502_s3] sm:$0xff] %v450_v7 }
  0x95   :  { %649 = vst [vmem:[%s1502_s3 + $0x8] sm:$0xff] %v463_v9 }
  0x98   :  { %v475_v11 = vpop.f32.mrf.mxu2 }
  0x99   :  { %v476_v12 = vadd.f32 %v475_v11, %v86_v10  ;;  %v488_v13 = vpop.f32.mrf.mxu3  ;;  %v451_v14 = vpop.f32.mrf.mxu0 }
  0x9a   :  { %v489_v15 = vadd.f32 %v488_v13, %v87_v60  ;;  %v464_v16 = vpop.f32.mrf.mxu1 }
  0x9b   :  { %650 = vst [vmem:[%s1502_s3 + $0x10] sm:$0xff] %v476_v12 }
  0x9c   :  { %651 = vst [vmem:[%s1502_s3 + $0x18] sm:$0xff] %v489_v15 }
  0xa0   :  { %v477_v18 = vpop.f32.mrf.mxu2 }
  0xa1   :  { %v490_v20 = vpop.f32.mrf.mxu3  ;;  %v501_v21 = vpop.f32.mrf.mxu0 }
  0xa2   :  { %v502_v22 = vadd.f32 %v501_v21, %v88_v17 }
  0xa3   :  { %v514_v23 = vpop.f32.mrf.mxu1 }
  0xa4   :  { %v515_v24 = vadd.f32 %v514_v23, %v89_v19  ;;  %652 = vst [vmem:[%s1502_s3 + $0x20] sm:$0xff] %v502_v22 }
  0xa6   :  { %653 = vst [vmem:[%s1502_s3 + $0x28] sm:$0xff] %v515_v24 }
  0xa8   :  { %v527_v27 = vpop.f32.mrf.mxu2 }
  0xa9   :  { %v528_v28 = vadd.f32 %v527_v27, %v90_v25  ;;  %v503_v31 = vpop.f32.mrf.mxu0 }
  0xab   :  { %v540_v29 = vpop.f32.mrf.mxu3  ;;  %654 = vst [vmem:[%s1502_s3 + $0x30] sm:$0xff] %v528_v28  ;;  %v516_v32 = vpop.f32.mrf.mxu1 }
  0xac   :  { %v541_v30 = vadd.f32 %v540_v29, %v91_v26 }
  0xae   :  { %655 = vst [vmem:[%s1502_s3 + $0x38] sm:$0xff] %v541_v30 }
  0xb0   :  { %v529_v35 = vpop.f32.mrf.mxu2 }
  0xb1   :  { %v553_v38 = vpop.f32.mrf.mxu0 }
  0xb2   :  { %v554_v39 = vadd.f32 %v553_v38, %v92_v34 }
  0xb3   :  { %v542_v37 = vpop.f32.mrf.mxu3  ;;  %v566_v40 = vpop.f32.mrf.mxu1 }
  0xb4   :  { %v567_v41 = vadd.f32 %v566_v40, %v93_v36  ;;  %656 = vst [vmem:[%s1502_s3 + $0x40] sm:$0xff] %v554_v39 }
  0xb6   :  { %657 = vst [vmem:[%s1502_s3 + $0x48] sm:$0xff] %v567_v41 }
  0xb8   :  { %v579_v44 = vpop.f32.mrf.mxu2 }
  0xb9   :  { %v580_v45 = vadd.f32 %v579_v44, %v94_v42  ;;  %v555_v48 = vpop.f32.mrf.mxu0 }
  0xbb   :  { %v592_v46 = vpop.f32.mrf.mxu3  ;;  %658 = vst [vmem:[%s1502_s3 + $0x50] sm:$0xff] %v580_v45  ;;  %v568_v49 = vpop.f32.mrf.mxu1 }
  0xbc   :  { %v593_v47 = vadd.f32 %v592_v46, %v95_v43 }
  0xbe   :  { %659 = vst [vmem:[%s1502_s3 + $0x58] sm:$0xff] %v593_v47 }
  0xc0   :  { %v581_v51 = vpop.f32.mrf.mxu2 }
  0xc1   :  { %v605_v54 = vpop.f32.mrf.mxu0 }
  0xc2   :  { %v606_v55 = vadd.f32 %v605_v54, %v96_v50 }
  0xc3   :  { %v594_v53 = vpop.f32.mrf.mxu3  ;;  %v618_v56 = vpop.f32.mrf.mxu1 }
  0xc4   :  { %v619_v57 = vadd.f32 %v618_v56, %v97_v52  ;;  %660 = vst [vmem:[%s1502_s3 + $0x60] sm:$0xff] %v606_v55 }
  0xc6   :  { %661 = vst [vmem:[%s1502_s3 + $0x68] sm:$0xff] %v619_v57 }
  0xc8   :  { %v631_v61 = vpop.f32.mrf.mxu2 }
  0xc9   :  { %v632_v62 = vadd.f32 %v631_v61, %v98_v58  ;;  %v607_v1 = vpop.f32.mrf.mxu0 }
  0xcb   :  { %v644_v63 = vpop.f32.mrf.mxu3  ;;  %662 = vst [vmem:[%s1502_s3 + $0x70] sm:$0xff] %v632_v62  ;;  %v620_v2 = vpop.f32.mrf.mxu1 }
  0xcc   :  { %v645_v0 = vadd.f32 %v644_v63, %v99_v59 }
  0xce   :  { %663 = vst [vmem:[%s1502_s3 + $0x78] sm:$0xff] %v645_v0 }
  0xd0   :  { %v633_v3 = vpop.f32.mrf.mxu2 }
  0xd3   :  { %v646_v4 = vpop.f32.mrf.mxu3 }

// kernel: inception_v3_features.2
= control target key start
LH: loop header
LB: loop body
LE: loop exit
PB: predicated region body
PF: predicated region fallthrough
CT: control target
= control target key end

     0   :  { %s6108_s18 = smov 0   ;;  %s9818_s0 = inlined_call_operand.vmem [shape: bf16[2,32,1024], index: 0, kind: input, shape index: {}]   ;;  %s9819_s1 = inlined_call_operand.vmem [shape: bf16[32,32], index: 1, kind: input, shape index: {}]   ;;  %s9820_s2 = inlined_call_operand.vmem [shape: f32[32,1], index: 2, kind: input, shape index: {}]   ;;  %s9821_s3 = inlined_call_operand.vmem [shape: bf16[9,64,32], index: 3, kind: input, shape index: {}]   ;;  %s9822_s4 = inlined_call_operand.vmem [shape: f32[64,1], index: 4, kind: input, shape index: {}]   ;;  %s9823_s5 = inlined_call_operand.vmem [shape: f32[2,64,1], index: 5, kind: output, shape index: {}]  }
   0x1 LB: > { %s5287_s19 = sadd.s32 4294967295, %s6061_s18   ;;  %p5291_p0 = scmp.ge.s32.totalorder %s6061_s18, 1  ;;  %s6061_s18 = sphi %s6108_s18, %s15_s18  }
   0x2   : > { %p187_p1 = scmp.lt.s32.totalorder %s6061_s18, 3 }
   0x4   : > { %p188_p2 = pnand %p5291_p0, %p187_p1 }
   0x6   : > { %191 = sbr.rel (%p188_p2) target bundleno = 2409 (0x969), region = 40 }
   0xb   : > { %p215_p3 = scmp.lt.s32.totalorder %s5287_s19, 1  ;;  %v246_v0 = vld [vmem:[%s9820_s2] sm:$0xff]  ;;  %v6063_v1 = vmov 0   ;;  %v248_v2 = vld [vmem:[%s9820_s2 + $0x10] sm:$0xff]  ;;  %vm360_vm0 = vcmask 261120   ;;  %v247_v6 = vld [vmem:[%s9820_s2 + $0x8] sm:$0xff] }
   0xc   : > { %5978 = vset.pattern.permute.xlu1 %v6063_v1  ;;  %5977 = vset.pattern.permute.xlu0 %v6063_v1  ;;  %v5900_v25 = vld [vmem:[%s9819_s1] sm:$0xff]  ;;  %v249_v52 = vld [vmem:[%s9820_s2 + $0x18] sm:$0xff]  ;;  %v5901_v54 = vld [vmem:[%s9819_s1 + $0x8] sm:$0xff]  ;;  %s6064_s11 = smov 33   ;;  %vm663_vm1 = vcmask 269312   ;;  %s6065_s12 = smov 127  }
   0xd   : > { %s10789_s19 = smov (!%p215_p3, %s5287_s19), 1  ;;  %252 = vperm.xlu1 %5978, %v246_v0   ;;  %6054 = vset.pattern.permute.xlu2 %v6063_v1  ;;  %vm1032_vm2 = vcmask 1039360   ;;  %s6067_s17 = smov 2   ;;  %vm1609_vm8 = vcmask 15360  }
   0xe   : > { %262 = vperm.xlu0 %5977, %v248_v2   ;;  %s5898_s24 = sshll.u32 %s10789_s19, 7  ;;  %s6069_s6 = smov 32  }
   0xf   : > { %s6128_s27 = scalar_lea.vmem %s9818_s0, %s5898_s24  ;;  %s6068_s24 = smov 126  }
  0x10   : > { %v5338_v3 = vld [vmem:[%s6128_s27 + $0x40] sm:$0xf]  ;;  %v5910_v5 = vld [vmem:[%s6128_s27 + $0x44] sm:$0xf]  ;;  %v5346_v9 = vld [vmem:[%s6128_s27 + $0x48] sm:$0xf] }
  0x11   : > { %v5914_v4 = vld [vmem:[%s6128_s27 + $0x5c] sm:$0xf0]  ;;  %v5340_v8 = vld [vmem:[%s6128_s27 + $0x60] sm:$0xf0]  ;;  %v5915_v10 = vld [vmem:[%s6128_s27 + $0x64] sm:$0xf0] }
  0x12   : > { %v5339_v7 = vor.u32 %v5914_v4, %v5338_v3  ;;  %v5343_v11 = vor.u32 %v5910_v5, %v5340_v8  ;;  %v5347_v12 = vor.u32 %v5915_v10, %v5346_v9  ;;  %v5911_v13 = vld [vmem:[%s6128_s27 + $0x4c] sm:$0xf]  ;;  %v5306_v15 = vld [vmem:[%s6128_s27] sm:$0xf]  ;;  %v5902_v18 = vld [vmem:[%s6128_s27 + $0x4] sm:$0xf] }
  0x13   : > { %v5348_v14 = vld [vmem:[%s6128_s27 + $0x68] sm:$0xf0]  ;;  %v5906_v17 = vld [vmem:[%s6128_s27 + $0x1c] sm:$0xf0]  ;;  %v5308_v19 = vld [vmem:[%s6128_s27 + $0x20] sm:$0xf0] }
  0x14   : > { %373 = vmatpush.bf16.msra.mxu0 %v5339_v7  ;;  %v5351_v16 = vor.u32 %v5911_v13, %v5348_v14  ;;  %392 = vmatpush.bf16.msra.mxu1 %v5343_v11  ;;  %v5307_v20 = vor.u32 %v5906_v17, %v5306_v15  ;;  %v5311_v21 = vor.u32 %v5902_v18, %v5308_v19  ;;  %v5314_v22 = vld [vmem:[%s6128_s27 + $0x8] sm:$0xf]  ;;  %v5903_v24 = vld [vmem:[%s6128_s27 + $0xc] sm:$0xf]  ;;  %v5354_v28 = vld [vmem:[%s6128_s27 + $0x50] sm:$0xf] }
  0x15   : > { %411 = vmatpush.bf16.msra.mxu2 %v5347_v12  ;;  %v5907_v23 = vld [vmem:[%s6128_s27 + $0x24] sm:$0xf0]  ;;  %v5316_v27 = vld [vmem:[%s6128_s27 + $0x28] sm:$0xf0]  ;;  %257 = vperm.xlu1 %5978, %v247_v6   ;;  %v5916_v29 = vld [vmem:[%s6128_s27 + $0x6c] sm:$0xf0] }
  0x16   : > { %430 = vmatpush.bf16.msra.mxu3 %v5351_v16  ;;  %v5315_v26 = vor.u32 %v5907_v23, %v5314_v22  ;;  %v5319_v30 = vor.u32 %v5903_v24, %v5316_v27  ;;  %v5355_v31 = vor.u32 %v5916_v29, %v5354_v28  ;;  %v5912_v32 = vld [vmem:[%s6128_s27 + $0x54] sm:$0xf]  ;;  %v5362_v34 = vld [vmem:[%s6128_s27 + $0x58] sm:$0xf]  ;;  %v5913_v37 = vld [vmem:[%s6128_s27 + $0x5c] sm:$0xf]  ;;  %267 = vperm.xlu0 %5977, %v249_v52  }
  0x17   : > { %v5356_v33 = vld [vmem:[%s6128_s27 + $0x70] sm:$0xf0]  ;;  %v5917_v36 = vld [vmem:[%s6128_s27 + $0x74] sm:$0xf0]  ;;  %v5364_v38 = vld [vmem:[%s6128_s27 + $0x78] sm:$0xf0] }
  0x18   : > { %374 = vmatpush.bf16.msra.mxu0 %v5307_v20  ;;  %v5359_v35 = vor.u32 %v5912_v32, %v5356_v33  ;;  %393 = vmatpush.bf16.msra.mxu1 %v5311_v21  ;;  %v5363_v39 = vor.u32 %v5917_v36, %v5362_v34  ;;  %v5322_v40 = vld [vmem:[%s6128_s27 + $0x10] sm:$0xf]  ;;  %v5904_v42 = vld [vmem:[%s6128_s27 + $0x14] sm:$0xf]  ;;  %v5367_v43 = vor.u32 %v5913_v37, %v5364_v38  ;;  %v5330_v46 = vld [vmem:[%s6128_s27 + $0x18] sm:$0xf] }
  0x19   : > { %412 = vmatpush.bf16.msra.mxu2 %v5315_v26  ;;  %v5908_v41 = vld [vmem:[%s6128_s27 + $0x2c] sm:$0xf0]  ;;  %v5324_v45 = vld [vmem:[%s6128_s27 + $0x30] sm:$0xf0]  ;;  %v5909_v47 = vld [vmem:[%s6128_s27 + $0x34] sm:$0xf0] }
  0x1a   : > { %431 = vmatpush.bf16.msra.mxu3 %v5319_v30  ;;  %v5323_v44 = vor.u32 %v5908_v41, %v5322_v40  ;;  %v5327_v48 = vor.u32 %v5904_v42, %v5324_v45  ;;  %v5905_v49 = vld [vmem:[%s6128_s27 + $0x1c] sm:$0xf]  ;;  %v5331_v51 = vor.u32 %v5909_v47, %v5330_v46  ;;  %s6072_s29 = smov 34   ;;  %s6073_s30 = smov 94  }
  0x1b   : > { %5368 = vmatmul.msk.bf16.vlgmr.msra.gmra.mxu0 %vm360_vm0, %v5900_v25  ;;  %v5332_v50 = vld [vmem:[%s6128_s27 + $0x38] sm:$0xf0]  ;;  %5370 = vmatmul.msk.bf16.vlgmr.msra.gmra.mxu1 %vm360_vm0, %v5900_v25  ;;  %s6074_s22 = smov 64   ;;  %s6076_s9 = smov 66  }
  0x1c   : > { %449 = vmatpush.bf16.msrb.mxu0 %v5355_v31  ;;  %468 = vmatpush.bf16.msrb.mxu1 %v5359_v35  ;;  %v5335_v53 = vor.u32 %v5905_v49, %v5332_v50  ;;  %s6077_s10 = smov 62  }
  0x1d   : > { %5372 = vmatmul.msk.bf16.vlgmr.msra.gmra.mxu2 %vm360_vm0, %v5900_v25  ;;  %5374 = vmatmul.msk.bf16.vlgmr.msra.gmra.mxu3 %vm360_vm0, %v5900_v25 }
  0x1e   : > { %487 = vmatpush.bf16.msrb.mxu2 %v5363_v39  ;;  %506 = vmatpush.bf16.msrb.mxu3 %v5367_v43 }
  0x20   : > { %450 = vmatpush.bf16.msrb.mxu0 %v5323_v44  ;;  %469 = vmatpush.bf16.msrb.mxu1 %v5327_v48 }
  0x22   : > { %488 = vmatpush.bf16.msrb.mxu2 %v5331_v51  ;;  %507 = vmatpush.bf16.msrb.mxu3 %v5335_v53 }
  0x2b   : > { %5369 = vmatmul.msk.bf16.gmra.mxu0 %vm360_vm0, %v5901_v54  ;;  %5371 = vmatmul.msk.bf16.gmra.mxu1 %vm360_vm0, %v5901_v54 }
  0x2d   : > { %5373 = vmatmul.msk.bf16.gmra.mxu2 %vm360_vm0, %v5901_v54  ;;  %5375 = vmatmul.msk.bf16.gmra.mxu3 %vm360_vm0, %v5901_v54 }
  0x3b   : > { %5376 = vmatmul.msk.bf16.vlgmr.msrb.gmra.mxu0 %vm360_vm0, %v5900_v25  ;;  %5378 = vmatmul.msk.bf16.vlgmr.msrb.gmra.mxu1 %vm360_vm0, %v5900_v25 }
  0x3d   : > { %5380 = vmatmul.msk.bf16.vlgmr.msrb.gmra.mxu2 %vm360_vm0, %v5900_v25  ;;  %5382 = vmatmul.msk.bf16.vlgmr.msrb.gmra.mxu3 %vm360_vm0, %v5900_v25 }
  0x4b   : > { %5377 = vmatmul.msk.bf16.gmra.mxu0 %vm360_vm0, %v5901_v54  ;;  %5379 = vmatmul.msk.bf16.gmra.mxu1 %vm360_vm0, %v5901_v54 }
  0x4d   : > { %5381 = vmatmul.msk.bf16.gmra.mxu2 %vm360_vm0, %v5901_v54  ;;  %5383 = vmatmul.msk.bf16.gmra.mxu3 %vm360_vm0, %v5901_v54 }
  0x7f   : > { %v6190_v55 = vpop.permute.xlu1 %252 }
  0x80   : > { %v6202_v10 = vpop.permute.xlu0 %262 }
  0x87   : > { %v6194_v60 = vpop.permute.xlu1 %257 }
  0x88   : > { %v6218_v32 = vpop.permute.xlu0 %267 }
  0x98   : > { %v376_v56 = vpop.f32.mrf.mxu0  ;;  %v395_v57 = vpop.f32.mrf.mxu1 }
  0x99   : > { %v377_v58 = vadd.f32 %v376_v56, %v6190_v55  ;;  %v396_v59 = vadd.f32 %v395_v57, %v6190_v55 }
  0x9b   : > { %v519_v62 = vmax.f32 %v377_v58, 0.0  ;;  %v520_v63 = vmax.f32 %v396_v59, 0.0 }
  0x9d   : > { %v6200_v8 = vpack.c.bf16 %v520_v63, %v519_v62 }
  0x9f   : > { %v584_v15 = vunpack.c.h.b16 %v6200_v8 }
  0xa0   : > { %v414_v61 = vpop.f32.mrf.mxu2  ;;  %v433_v0 = vpop.f32.mrf.mxu3 }
  0xa1   : > { %v378_v1 = vpop.f32.mrf.mxu0  ;;  %v397_v3 = vpop.f32.mrf.mxu1  ;;  %v415_v5 = vadd.f32 %v414_v61, %v6190_v55  ;;  %v434_v6 = vadd.f32 %v433_v0, %v6190_v55 }
  0xa2   : > { %v379_v2 = vadd.f32 %v378_v1, %v6194_v60  ;;  %v398_v4 = vadd.f32 %v397_v3, %v6194_v60 }
  0xa3   : > { %v521_v12 = vmax.f32 %v415_v5, 0.0  ;;  %v522_v13 = vmax.f32 %v434_v6, 0.0 }
  0xa4   : > { %v527_v7 = vmax.f32 %v379_v2, 0.0  ;;  %v528_v9 = vmax.f32 %v398_v4, 0.0 }
  0xa5   : > { %v6210_v24 = vpack.c.bf16 %v522_v13, %v521_v12 }
  0xa6   : > { %v6204_v11 = vpack.c.bf16 %v528_v9, %v527_v7 }
  0xa7   : > { %v585_v29 = vunpack.c.l.b16 %v6210_v24 }
  0xa8   : > { %v416_v14 = vpop.f32.mrf.mxu2  ;;  %v435_v17 = vpop.f32.mrf.mxu3  ;;  %v592_v19 = vunpack.c.h.b16 %v6204_v11 }
  0xa9   : > { %v417_v16 = vadd.f32 %v416_v14, %v6194_v60  ;;  %v381_v18 = vpop.f32.mrf.mxu0  ;;  %v436_v20 = vadd.f32 %v435_v17, %v6194_v60  ;;  %v400_v21 = vpop.f32.mrf.mxu1 }
  0xaa   : > { %v616_v23 = vpack.c.b16 %v592_v19, %v584_v15  ;;  %v382_v26 = vadd.f32 %v381_v18, %v6202_v10  ;;  %v401_v27 = vadd.f32 %v400_v21, %v6202_v10 }
  0xab   : > { %v529_v22 = vmax.f32 %v417_v16, 0.0  ;;  %v530_v25 = vmax.f32 %v436_v20, 0.0 }
  0xac   : > { %633 = vrot.lane.b32.xlu0 %v616_v23, %s6064_s11  ;;  %v535_v30 = vmax.f32 %v382_v26, 0.0  ;;  %v536_v31 = vmax.f32 %v401_v27, 0.0  ;;  %v591_v23 = vunpack.c.l.b16 %v6204_v11  ;;  %v583_v26 = vunpack.c.l.b16 %v6200_v8 }
  0xad   : > { %v6215_v28 = vpack.c.bf16 %v530_v25, %v529_v22 }
  0xae   : > { %v559_v41 = vpack.c.bf16 %v536_v31, %v535_v30 }
  0xaf   : > { %v593_v34 = vunpack.c.l.b16 %v6215_v28 }
  0xb0   : > { %v419_v33 = vpop.f32.mrf.mxu2  ;;  %v438_v35 = vpop.f32.mrf.mxu3  ;;  %v599_v47 = vunpack.c.l.b16 %v559_v41  ;;  %v600_v54 = vunpack.c.h.b16 %v559_v41 }
  0xb1   : > { %v383_v36 = vpop.f32.mrf.mxu0  ;;  %v402_v38 = vpop.f32.mrf.mxu1  ;;  %v617_v39 = vpack.c.b16 %v593_v34, %v585_v29  ;;  %v420_v42 = vadd.f32 %v419_v33, %v6202_v10  ;;  %v439_v43 = vadd.f32 %v438_v35, %v6202_v10  ;;  %v615_v35 = vpack.c.b16 %v591_v23, %v583_v26 }
  0xb2   : > { %v384_v37 = vadd.f32 %v383_v36, %v6218_v32  ;;  %v403_v40 = vadd.f32 %v402_v38, %v6218_v32 }
  0xb3   : > { %635 = vrot.lane.b32.xlu1 %v617_v39, %s6064_s11  ;;  %v537_v48 = vmax.f32 %v420_v42, 0.0  ;;  %v538_v49 = vmax.f32 %v439_v43, 0.0 }
  0xb4   : > { %v543_v44 = vmax.f32 %v384_v37, 0.0  ;;  %v544_v45 = vmax.f32 %v403_v40, 0.0 }
  0xb5   : > { %v560_v0 = vpack.c.bf16 %v538_v49, %v537_v48 }
  0xb6   : > { %v563_v46 = vpack.c.bf16 %v544_v45, %v543_v44 }
  0xb7   : > { %v602_v5 = vunpack.c.h.b16 %v560_v0  ;;  %v601_v9 = vunpack.c.l.b16 %v560_v0 }
  0xb8   : > { %v421_v50 = vpop.f32.mrf.mxu2  ;;  %v440_v52 = vpop.f32.mrf.mxu3  ;;  %v608_v56 = vunpack.c.h.b16 %v563_v46  ;;  %v607_v57 = vunpack.c.l.b16 %v563_v46 }
  0xb9   : > { %v422_v51 = vadd.f32 %v421_v50, %v6218_v32  ;;  %v452_v53 = vpop.f32.mrf.mxu0  ;;  %v441_v58 = vadd.f32 %v440_v52, %v6218_v32  ;;  %v471_v59 = vpop.f32.mrf.mxu1 }
  0xba   : > { %v624_v62 = vpack.c.b16 %v608_v56, %v600_v54  ;;  %v623_v63 = vpack.c.b16 %v607_v57, %v599_v47  ;;  %v453_v2 = vadd.f32 %v452_v53, %v6190_v55  ;;  %v472_v3 = vadd.f32 %v471_v59, %v6190_v55 }
  0xbb   : > { %v545_v61 = vmax.f32 %v422_v51, 0.0  ;;  %v546_v1 = vmax.f32 %v441_v58, 0.0  ;;  %v594_v54 = vunpack.c.h.b16 %v6215_v28  ;;  %v586_v56 = vunpack.c.h.b16 %v6210_v24 }
  0xbc   : > { %649 = vrot.lane.b32.xlu2 %v624_v62, %s6064_s11  ;;  %647 = vrot.lane.b32.xlu1 %v623_v63, %s6064_s11  ;;  %v523_v12 = vmax.f32 %v453_v2, 0.0  ;;  %v524_v13 = vmax.f32 %v472_v3, 0.0 }
  0xbd   : > { %v564_v4 = vpack.c.bf16 %v546_v1, %v545_v61  ;;  %v618_v57 = vpack.c.b16 %v594_v54, %v586_v56 }
  0xbe   : > { %v553_v21 = vpack.c.bf16 %v524_v13, %v523_v12 }
  0xbf   : > { %v610_v6 = vunpack.c.h.b16 %v564_v4  ;;  %v609_v7 = vunpack.c.l.b16 %v564_v4 }
  0xc0   : > { %v587_v27 = vunpack.c.l.b16 %v553_v21  ;;  %v588_v29 = vunpack.c.h.b16 %v553_v21  ;;  %v490_v58 = vpop.f32.mrf.mxu2  ;;  %v509_v59 = vpop.f32.mrf.mxu3 }
  0xc1   : > { %v454_v14 = vpop.f32.mrf.mxu0  ;;  %v473_v16 = vpop.f32.mrf.mxu1  ;;  %v626_v17 = vpack.c.b16 %v610_v6, %v602_v5  ;;  %v625_v19 = vpack.c.b16 %v609_v7, %v601_v9 }
  0xc2   : > { %v455_v15 = vadd.f32 %v454_v14, %v6194_v60  ;;  %v474_v18 = vadd.f32 %v473_v16, %v6194_v60 }
  0xc3   : > { %653 = vrot.lane.b32.xlu0 %v626_v17, %s6064_s11 }
  0xc4   : > { %v531_v20 = vmax.f32 %v455_v15, 0.0  ;;  %v532_v22 = vmax.f32 %v474_v18, 0.0  ;;  %651 = vrot.lane.b32.xlu2 %v625_v19, %s6064_s11 }
  0xc6   : > { %v557_v25 = vpack.c.bf16 %v532_v22, %v531_v20 }
  0xc8   : > { %v595_v31 = vunpack.c.l.b16 %v557_v25  ;;  %v596_v33 = vunpack.c.h.b16 %v557_v25  ;;  %v492_v61 = vpop.f32.mrf.mxu2  ;;  %v511_v62 = vpop.f32.mrf.mxu3 }
  0xc9   : > { %v457_v30 = vpop.f32.mrf.mxu0  ;;  %v476_v34 = vpop.f32.mrf.mxu1  ;;  %v493_v22 = vadd.f32 %v492_v61, %v6194_v60 }
  0xca   : > { %v619_v36 = vpack.c.b16 %v595_v31, %v587_v27  ;;  %v6238_v37 = vpack.c.b16 %v596_v33, %v588_v29  ;;  %v458_v38 = vadd.f32 %v457_v30, %v6202_v10  ;;  %v477_v39 = vadd.f32 %v476_v34, %v6202_v10 }
  0xcb   : > { %631 = vrot.lane.b32.xlu0 %v615_v35, %s6064_s11  ;;  %v491_v29 = vadd.f32 %v490_v58, %v6190_v55  ;;  %v510_v30 = vadd.f32 %v509_v59, %v6190_v55  ;;  %v533_v33 = vmax.f32 %v493_v22, 0.0 }
  0xcc   : > { %639 = vrot.lane.b32.xlu1 %v619_v36, %s6064_s11  ;;  %v539_v11 = vmax.f32 %v458_v38, 0.0  ;;  %v540_v8 = vmax.f32 %v477_v39, 0.0 }
  0xcd   : > { %v525_v36 = vmax.f32 %v491_v29, 0.0  ;;  %v526_v38 = vmax.f32 %v510_v30, 0.0 }
  0xce   : > { %v561_v45 = vpack.c.bf16 %v540_v8, %v539_v11 }
  0xd0   : > { %v603_v48 = vunpack.c.l.b16 %v561_v45  ;;  %v604_v49 = vunpack.c.h.b16 %v561_v45  ;;  %v495_v28 = vpop.f32.mrf.mxu2  ;;  %v514_v24 = vpop.f32.mrf.mxu3 }
  0xd1   : > { %v459_v40 = vpop.f32.mrf.mxu0  ;;  %v478_v42 = vpop.f32.mrf.mxu1  ;;  %v496_v16 = vadd.f32 %v495_v28, %v6202_v10  ;;  %v515_v17 = vadd.f32 %v514_v24, %v6202_v10 }
  0xd2   : > { %v460_v41 = vadd.f32 %v459_v40, %v6218_v32  ;;  %v479_v43 = vadd.f32 %v478_v42, %v6218_v32  ;;  %v554_v40 = vpack.c.bf16 %v526_v38, %v525_v36 }
  0xd3   : > { %v541_v20 = vmax.f32 %v496_v16, 0.0  ;;  %v542_v21 = vmax.f32 %v515_v17, 0.0 }
  0xd4   : > { %v547_v44 = vmax.f32 %v460_v41, 0.0  ;;  %v548_v46 = vmax.f32 %v479_v43, 0.0  ;;  %v589_v43 = vunpack.c.l.b16 %v554_v40 }
  0xd5   : > { %v562_v31 = vpack.c.bf16 %v542_v21, %v541_v20 }
  0xd6   : > { %v565_v47 = vpack.c.bf16 %v548_v46, %v547_v44 }
  0xd7   : > { %v605_v39 = vunpack.c.l.b16 %v562_v31 }
  0xd8   : > { %v611_v50 = vunpack.c.l.b16 %v565_v47  ;;  %v612_v51 = vunpack.c.h.b16 %v565_v47  ;;  %v497_v6 = vpop.f32.mrf.mxu2  ;;  %v516_v7 = vpop.f32.mrf.mxu3 }
  0xd9   : > { %v498_v9 = vadd.f32 %v497_v6, %v6218_v32  ;;  %v517_v12 = vadd.f32 %v516_v7, %v6218_v32  ;;  %v512_v32 = vadd.f32 %v511_v62, %v6194_v60 }
  0xda   : > { %v627_v52 = vpack.c.b16 %v611_v50, %v603_v48  ;;  %v6246_v53 = vpack.c.b16 %v612_v51, %v604_v49  ;;  %v606_v49 = vunpack.c.h.b16 %v562_v31 }
  0xdb   : > { %v549_v18 = vmax.f32 %v498_v9, 0.0  ;;  %v550_v19 = vmax.f32 %v517_v12, 0.0  ;;  %v534_v34 = vmax.f32 %v512_v32, 0.0  ;;  %v706_v12 = vlaneseq }
  0xdc   : > { %655 = vrot.lane.b32.xlu2 %v627_v52, %s6064_s11  ;;  %v590_v52 = vunpack.c.h.b16 %v554_v40 }
  0xdd   : > { %v566_v23 = vpack.c.bf16 %v550_v19, %v549_v18  ;;  %v558_v55 = vpack.c.bf16 %v534_v34, %v533_v33  ;;  %v6338_v17 = vand.u32 127, %v706_v12 }
  0xdf   : > { %v613_v35 = vunpack.c.l.b16 %v566_v23  ;;  %v597_v42 = vunpack.c.l.b16 %v558_v55  ;;  %v614_v48 = vunpack.c.h.b16 %v566_v23  ;;  %v598_v51 = vunpack.c.h.b16 %v558_v55 }
  0xe0   : > { %v6352_v21 = vadd.s32 128, %v6338_v17  ;;  %v6355_v22 = vadd.s32 256, %v6338_v17  ;;  %v710_v34 = vadd.s32 384, %v6338_v17  ;;  %v719_v55 = vand.u32 31, %v6338_v17 }
  0xe1   : > { %v629_v11 = vpack.c.b16 %v613_v35, %v605_v39  ;;  %v621_v44 = vpack.c.b16 %v597_v42, %v589_v43  ;;  %v630_v50 = vpack.c.b16 %v614_v48, %v606_v49  ;;  %v9826_v35 = vmov 0.0   ;;  %v6404_v42 = vld [vmem:[%s9821_s3 + $0x28] sm:$0xff] }
  0xe2   : > { %v726_v23 = vand.u32 31, %v6352_v21  ;;  %vm839_vm5 = vcmp.le.s32.totalorder %v719_v55, 30  ;;  %v711_v49 = vadd.s32 512, %v6338_v17  ;;  %vm811_vm11 = vcmp.ge.s32.totalorder %v719_v55, 1 }
  0xe4   : > { %637 = vrot.lane.b32.xlu2 %v618_v57, %s6064_s11  ;;  %vm840_vm3 = vcmp.le.s32.totalorder %v726_v23, 30  ;;  %vm812_vm10 = vcmp.ge.s32.totalorder %v726_v23, 1 }
  0xe5   : > { %v5393_v36 = vsel %vm840_vm3, 1.0, %v9826_v35  ;;  %v6507_v12 = vsel %vm812_vm10, 1.0, %v9826_v35  ;;  %vm3555_vm10 = vcmask 523264  }
  0xe6   : > { %9999 = vst [vmem:[#allocation29_spill] sm:$0xff] %v6507_v12 }
 0x116   : > { %v650_v63 = vpop.permute.xlu2 %649 }
 0x11e   : > { %v634_v0 = vpop.permute.xlu0 %633  ;;  %v652_v3 = vpop.permute.xlu2 %651 }
 0x11f   : > { %v6308_v45 = vsel %vm663_vm1, %v650_v63, %v652_v3 }
 0x120   : > { %9980 = vst [vmem:[#allocation10_spill] sm:$0xff] %v6308_v45 }
 0x125   : > { %v636_v1 = vpop.permute.xlu1 %635 }
 0x126   : > { %v6253_v2 = vsel %vm663_vm1, %v634_v0, %v636_v1 }
 0x127   : > { %9972 = vst [vmem:[#allocation2_spill] sm:$0xff] %v6253_v2  ;;  %1000 = vrot.lane.b32.xlu1 %v6253_v2, %s6065_s12 }
 0x12e   : > { %v648_v4 = vpop.permute.xlu1 %647 }
 0x12f   : > { %v6258_v5 = vsel %vm663_vm1, 0, %v648_v4  ;;  %v6300_v41 = vsel %vm663_vm1, %v648_v4, %v650_v63 }
 0x130   : > { %9973 = vst [vmem:[#allocation3_spill] sm:$0xff] %v6258_v5  ;;  %1014 = vrot.lane.b32.xlu1 %v6258_v5, %s6065_s12  ;;  %v6519_v21 = vunpack.c.l.bf16 %v6300_v41 }
 0x131   : > { %9979 = vst [vmem:[#allocation9_spill] sm:$0xff] %v6300_v41 }
 0x132   : > { %10003 = vst [vmem:[#allocation33_spill] sm:$0xff] %v6519_v21 }
 0x135   : > { %v654_v13 = vpop.permute.xlu0 %653 }
 0x136   : > { %v6265_v14 = vsel %vm663_vm1, %v652_v3, %v654_v13  ;;  %v6267_v15 = vpop.permute.xlu2 %655 }
 0x137   : > { %9974 = vst [vmem:[#allocation4_spill] sm:$0xff] %v6265_v14  ;;  %1020 = vrot.lane.b32.xlu0 %v6265_v14, %s6065_s12  ;;  %v6277_v26 = vsel %vm663_vm1, %v654_v13, %v6267_v15 }
 0x138   : > { %9975 = vst [vmem:[#allocation5_spill] sm:$0xff] %v6277_v26 }
 0x13d   : > { %v632_v25 = vpop.permute.xlu0 %631 }
 0x13e   : > { %v6280_v27 = vsel %vm663_vm1, %v632_v25, %v634_v0  ;;  %v638_v10 = vpop.permute.xlu2 %637  ;;  %v6294_v8 = vsel %vm663_vm1, 0, %v632_v25  ;;  %v6312_v46 = vpop.permute.xlu1 %639  ;;  %v733_v25 = vand.u32 31, %v6355_v22  ;;  %v6522_v22 = vunpack.c.h.bf16 %v6300_v41 }
 0x13f   : > { %9976 = vst [vmem:[#allocation6_spill] sm:$0xff] %v6280_v27  ;;  %1022 = vrot.lane.b32.xlu0 %v6277_v26, %s6065_s12  ;;  %998 = vrot.lane.b32.xlu1 %v6280_v27, %s6065_s12  ;;  %v6289_v60 = vsel %vm663_vm1, %v636_v1, %v638_v10  ;;  %v6318_v47 = vsel %vm663_vm1, %v638_v10, %v6312_v46 }
 0x140   : > { %9977 = vst [vmem:[#allocation7_spill] sm:$0xff] %v6289_v60  ;;  %1002 = vrot.lane.b32.xlu2 %v6289_v60, %s6065_s12  ;;  %vm841_vm4 = vcmp.le.s32.totalorder %v733_v25, 30  ;;  %vm813_vm9 = vcmp.ge.s32.totalorder %v733_v25, 1  ;;  %v6531_v25 = vunpack.c.l.bf16 %v6265_v14 }
 0x141   : > { %9978 = vst [vmem:[#allocation8_spill] sm:$0xff] %v6294_v8  ;;  %v5394_v38 = vsel %vm841_vm4, 1.0, %v9826_v35 }
 0x142   : > { %9981 = vst [vmem:[#allocation11_spill] sm:$0xff] %v6318_v47  ;;  %v6394_v39 = vpack.i.bf16 %v5394_v38, %v5393_v36 }
 0x143   : > { %10004 = vst [vmem:[#allocation34_spill] sm:$0xff] %v6522_v22 }
 0x144   : > { %9987 = vst [vmem:[#allocation17_spill] sm:$0xff] %v6394_v39 }
 0x145   : > { %10006 = vst [vmem:[#allocation36_spill] sm:$0xff] %v6531_v25 }
 0x147   : > { %996 = vrot.lane.b32.xlu0 %v6294_v8, %s6065_s12  ;;  %659 = vrot.lane.b32.xlu1 %v629_v11, %s6064_s11  ;;  %v740_v11 = vand.u32 31, %v710_v34  ;;  %v6540_v34 = vadd.s32 768, %v6338_v17 }
 0x148   : > { %1016 = vrot.lane.b32.xlu2 %v6300_v41, %s6065_s12 }
 0x149   : > { %vm842_vm6 = vcmp.le.s32.totalorder %v740_v11, 30  ;;  %vm814_vm12 = vcmp.ge.s32.totalorder %v740_v11, 1  ;;  %10009 = vst [vmem:[#allocation39_spill] sm:$0xff] %v6540_v34 }
 0x14a   : > { %v6528_v23 = vsel %vm814_vm12, 1.0, %v9826_v35  ;;  %vm4472_vm12 = vcmask 539648  }
 0x14f   : > { %657 = vrot.lane.b32.xlu0 %v6246_v53, %s6064_s11  ;;  %643 = vrot.lane.b32.xlu1 %v621_v44, %s6064_s11  ;;  %v622_v53 = vpack.c.b16 %v598_v51, %v590_v52  ;;  %v5392_v44 = vsel %vm839_vm5, 1.0, %v9826_v35  ;;  %v747_v51 = vand.u32 31, %v711_v49  ;;  %vm1763_vm5 = vcmask 1031168  }
 0x150   : > { %1018 = vrot.lane.b32.xlu2 %v6308_v45, %s6065_s12 }
 0x151   : > { %vm843_vm7 = vcmp.le.s32.totalorder %v747_v51, 30  ;;  %vm815_vm13 = vcmp.ge.s32.totalorder %v747_v51, 1  ;;  %v6566_v51 = vadd.s32 896, %v6338_v17 }
 0x152   : > { %v6436_v52 = vsel %vm843_vm7, 1.0, %v9826_v35  ;;  %v6543_v36 = vsel %vm815_vm13, 1.0, %v9826_v35  ;;  %vm2687_vm7 = vcmask 777216   ;;  %vm4626_vm13 = vcmask 506880  }
 0x153   : > { %9992 = vst [vmem:[#allocation22_spill] sm:$0xff] %v6436_v52 }
 0x154   : > { %10010 = vst [vmem:[#allocation40_spill] sm:$0xff] %v6543_v36 }
 0x155   : > { %10011 = vst [vmem:[#allocation41_spill] sm:$0xff] %v6566_v51 }
 0x157   : > { %641 = vrot.lane.b32.xlu0 %v6238_v37, %s6064_s11 }
 0x158   : > { %1004 = vrot.lane.b32.xlu2 %v6318_v47, %s6065_s12 }
 0x160   : > { %661 = vrot.lane.b32.xlu2 %v630_v50, %s6064_s11 }
 0x168   : > { %645 = vrot.lane.b32.xlu2 %v622_v53, %s6064_s11  ;;  %v6443_v53 = vld [vmem:[%s9821_s3 + $0x30] sm:$0xff]  ;;  %s6070_s11 = smov 96  }
 0x169   : > { %9993 = vst [vmem:[#allocation23_spill] sm:$0xff] %v6443_v53 }
 0x199   : > { %v1001_v54 = vpop.permute.xlu1 %1000 }
 0x19a   : > { %v1003_v56 = vpop.permute.xlu2 %1002 }
 0x19b   : > { %v1035_v0 = vsel %vm1032_vm2, %v1001_v54, %v1003_v56 }
 0x1a2   : > { %v1015_v37 = vpop.permute.xlu1 %1014  ;;  %v1017_v57 = vpop.permute.xlu2 %1016 }
 0x1a3   : > { %v1041_v58 = vsel %vm1032_vm2, %v1015_v37, %v1017_v57 }
 0x1a4   : > { %1083 = vmatpush.bf16.msra.mxu0 %v1041_v58 }
 0x1a9   : > { %v1021_v59 = vpop.permute.xlu0 %1020 }
 0x1aa   : > { %v1019_v61 = vpop.permute.xlu2 %1018 }
 0x1ab   : > { %v1042_v62 = vsel %vm1032_vm2, %v1017_v57, %v1019_v61  ;;  %v1043_v63 = vsel %vm1032_vm2, %v1019_v61, %v1021_v59 }
 0x1ac   : > { %1112 = vmatpush.bf16.msra.mxu1 %v1042_v62  ;;  %1141 = vmatpush.bf16.msra.mxu2 %v1043_v63  ;;  %v6475_v62 = vunpack.c.l.bf16 %v6308_v45  ;;  %v6478_v63 = vunpack.c.h.bf16 %v6308_v45 }
 0x1ae   : > { %9995 = vst [vmem:[#allocation25_spill] sm:$0xff] %v6475_v62 }
 0x1af   : > { %9996 = vst [vmem:[#allocation26_spill] sm:$0xff] %v6478_v63 }
 0x1b0   : > { %1142 = vmatpush.bf16.msra.mxu2 %v1035_v0 }
 0x1b1   : > { %v999_v1 = vpop.permute.xlu1 %998  ;;  %v6328_v28 = vpop.permute.xlu0 %1022 }
 0x1b2   : > { %v1034_v24 = vsel %vm1032_vm2, %v999_v1, %v1001_v54  ;;  %v1044_v3 = vsel %vm1032_vm2, %v1021_v59, %v6328_v28  ;;  %v6333_v4 = vpop.permute.xlu2 %1004  ;;  %v6456_v54 = vld [vmem:[%s9821_s3 + $0x38] sm:$0xff] }
 0x1b3   : > { %1113 = vmatpush.bf16.msra.mxu1 %v1034_v24  ;;  %1170 = vmatpush.bf16.msra.mxu3 %v1044_v3  ;;  %v1036_v6 = vsel %vm1032_vm2, %v1003_v56, %v6333_v4  ;;  %9994 = vst [vmem:[#allocation24_spill] sm:$0xff] %v6456_v54 }
 0x1b7   : > { %1171 = vmatpush.bf16.msra.mxu3 %v1036_v6 }
 0x1b9   : > { %v997_v7 = vpop.permute.xlu0 %996  ;;  %v660_v16 = vpop.permute.xlu1 %659 }
 0x1ba   : > { %v1033_v9 = vsel %vm1032_vm2, %v997_v7, %v999_v1  ;;  %v662_v13 = vpop.permute.xlu2 %661  ;;  %v6501_v7 = vunpack.c.l.bf16 %v6253_v2 }
 0x1bb   : > { %1084 = vmatpush.bf16.msra.mxu0 %v1033_v9  ;;  %v6377_v30 = vsel %vm663_vm1, %v662_v13, 0  ;;  %v6407_v43 = vsel %vm663_vm1, %v660_v16, %v662_v13  ;;  %v6504_v9 = vsel %vm813_vm9, 1.0, %v9826_v35  ;;  %v6510_v13 = vunpack.c.h.bf16 %v6253_v2 }
 0x1bc   : > { %9984 = vst [vmem:[#allocation14_spill] sm:$0xff] %v6377_v30  ;;  %v6547_v38 = vmul.f32 %v6504_v9, %v6475_v62  ;;  %v6551_v55 = vmul.f32 %v6504_v9, %v6478_v63  ;;  %v6555_v11 = vmul.f32 %v6504_v9, %v6501_v7  ;;  %v6602_v2 = vunpack.c.h.bf16 %v6280_v27 }
 0x1bd   : > { %9989 = vst [vmem:[#allocation19_spill] sm:$0xff] %v6407_v43  ;;  %v6563_v49 = vmul.f32 %v6504_v9, %v6510_v13  ;;  %vm3198_vm9 = vcmask 769024  }
 0x1be   : > { %9997 = vst [vmem:[#allocation27_spill] sm:$0xff] %v6501_v7  ;;  %v916_v45 = vmul.f32 %v6507_v12, %v6602_v2 }
 0x1bf   : > { %9998 = vst [vmem:[#allocation28_spill] sm:$0xff] %v6504_v9  ;;  %v10027_v9 = vmov 0.0  }
 0x1c0   : > { %10000 = vst [vmem:[#allocation30_spill] sm:$0xff] %v6510_v13 }
 0x1c1   : > { %v658_v18 = vpop.permute.xlu0 %657  ;;  %v644_v10 = vpop.permute.xlu1 %643  ;;  %10017 = vst [vmem:[#allocation47_spill] sm:$0xff] %v6602_v2 }
 0x1c2   : > { %v6342_v19 = vsel %vm663_vm1, %v6267_v15, %v658_v18  ;;  %v6345_v20 = vsel %vm663_vm1, %v658_v18, %v660_v16  ;;  %v6360_v15 = vld [vmem:[%s9821_s3 + $0x20] sm:$0xff]  ;;  %v646_v32 = vpop.permute.xlu2 %645  ;;  %v6513_v16 = vunpack.c.l.bf16 %v6258_v5  ;;  %v6516_v18 = vunpack.c.h.bf16 %v6258_v5 }
 0x1c3   : > { %9982 = vst [vmem:[#allocation12_spill] sm:$0xff] %v6342_v19  ;;  %1026 = vrot.lane.b32.xlu0 %v6345_v20, %s6065_s12  ;;  %1024 = vrot.lane.b32.xlu2 %v6342_v19, %s6065_s12  ;;  %v6380_v31 = vsel %vm663_vm1, %v644_v10, %v646_v32  ;;  %v6429_v50 = vsel %vm663_vm1, %v646_v32, 0  ;;  %v6525_v32 = vsel %vm811_vm11, 1.0, %v9826_v35  ;;  %vm4115_vm11 = vcmask 515072  }
 0x1c4   : > { %9983 = vst [vmem:[#allocation13_spill] sm:$0xff] %v6345_v20  ;;  %5424 = vmatmul.msk.bf16.vlgmr.msra.gmra.mxu0 %vm360_vm0, %v6360_v15  ;;  %5428 = vmatmul.msk.bf16.vlgmr.msra.gmra.mxu1 %vm360_vm0, %v6360_v15 }
 0x1c5   : > { %5432 = vmatmul.msk.bf16.vlgmr.msra.gmra.mxu2 %vm360_vm0, %v6360_v15  ;;  %5436 = vmatmul.msk.bf16.vlgmr.msra.gmra.mxu3 %vm360_vm0, %v6360_v15  ;;  %9985 = vst [vmem:[#allocation15_spill] sm:$0xff] %v6380_v31 }
 0x1c6   : > { %9991 = vst [vmem:[#allocation21_spill] sm:$0xff] %v6429_v50 }
 0x1c7   : > { %10001 = vst [vmem:[#allocation31_spill] sm:$0xff] %v6513_v16 }
 0x1c8   : > { %10002 = vst [vmem:[#allocation32_spill] sm:$0xff] %v6516_v18 }
 0x1c9   : > { %v642_v29 = vpop.permute.xlu0 %641  ;;  %10005 = vst [vmem:[#allocation35_spill] sm:$0xff] %v6525_v32 }
 0x1ca   : > { %v6383_v33 = vsel %vm663_vm1, %v642_v29, %v644_v10  ;;  %v6399_v40 = vsel %vm663_vm1, %v6312_v46, %v642_v29  ;;  %v5395_v46 = vsel %vm842_vm6, 1.0, %v9826_v35  ;;  %v6534_v10 = vunpack.c.h.bf16 %v6265_v14 }
 0x1cb   : > { %9986 = vst [vmem:[#allocation16_spill] sm:$0xff] %v6383_v33  ;;  %1030 = vrot.lane.b32.xlu0 %v6377_v30, %s6065_s12  ;;  %1010 = vrot.lane.b32.xlu2 %v6380_v31, %s6065_s12  ;;  %v6421_v48 = vpack.i.bf16 %v5392_v44, %v5395_v46  ;;  %v6537_v29 = vadd.s32 640, %v6338_v17  ;;  %v923_v44 = vmul.f32 %v6525_v32, %v6513_v16  ;;  %v9863_v35 = vand.u32 31, %v6566_v51 }
 0x1cc   : > { %1008 = vrot.lane.b32.xlu1 %v6383_v33, %s6065_s12  ;;  %9988 = vst [vmem:[#allocation18_spill] sm:$0xff] %v6399_v40  ;;  %v931_v46 = vmul.f32 %v6525_v32, %v6516_v18  ;;  %v6583_v17 = vmul.f32 %v6528_v23, %v6531_v25  ;;  %v6661_v30 = vunpack.c.l.bf16 %v6345_v20  ;;  %v6671_v51 = vunpack.c.l.bf16 %v6399_v40 }
 0x1cd   : > { %9990 = vst [vmem:[#allocation20_spill] sm:$0xff] %v6421_v48  ;;  %vm6644_vm1 = vcmp.ge.s32.totalorder %v9863_v35, 1  ;;  %v6664_v35 = vunpack.c.h.bf16 %v6345_v20  ;;  %vm2281_vm6 = vcmask 785408  }
 0x1ce   : > { %10007 = vst [vmem:[#allocation37_spill] sm:$0xff] %v6534_v10  ;;  %v947_v41 = vpack.c.bf16 %v931_v46, %v923_v44  ;;  %v10020_v44 = vand.u32 31, %v6540_v34  ;;  %v6625_v46 = vunpack.c.l.bf16 %v6289_v60  ;;  %v6674_v34 = vunpack.c.h.bf16 %v6399_v40 }
 0x1cf   : > { %10008 = vst [vmem:[#allocation38_spill] sm:$0xff] %v6537_v29 }
 0x1d0   : > { %vm817_vm15 = vcmp.ge.s32.totalorder %v10020_v44, 1  ;;  %10021 = vst [vmem:[#allocation49_spill] sm:$0xff] %v6625_v46 }
 0x1d1   : > { %10029 = vst [vmem:[#allocation54_spill] sm:$0xff] %v6661_v30 }
 0x1d2   : > { %10030 = vst [vmem:[#allocation55_spill] sm:$0xff] %v6671_v51 }
 0x1d3   : > { %5980 = vrot.lane.b32.xlu2 %v6394_v39, %s6067_s17  ;;  %1006 = vrot.lane.b32.xlu0 %v6399_v40, %s6065_s12  ;;  %10031 = vst [vmem:[#allocation56_spill] sm:$0xff] %v6674_v34  ;;  %v6685_v40 = vunpack.c.l.bf16 %v6407_v43 }
 0x1d4   : > { %1028 = vrot.lane.b32.xlu1 %v6407_v43, %s6065_s12  ;;  %5425 = vmatmul.msk.bf16.gmra.mxu0 %vm360_vm0, %v6404_v42 }
 0x1d5   : > { %5429 = vmatmul.msk.bf16.gmra.mxu1 %vm360_vm0, %v6404_v42  ;;  %5433 = vmatmul.msk.bf16.gmra.mxu2 %vm360_vm0, %v6404_v42  ;;  %10033 = vst [vmem:[#allocation58_spill] sm:$0xff] %v6685_v40 }
 0x1d6   : > { %5437 = vmatmul.msk.bf16.gmra.mxu3 %vm360_vm0, %v6404_v42 }
 0x1db   : > { %5985 = vrot.lane.b32.xlu0 %v6421_v48, %s6067_s17  ;;  %v6594_v48 = vunpack.c.h.bf16 %v6294_v8 }
 0x1dc   : > { %1012 = vrot.lane.b32.xlu1 %v6429_v50, %s6065_s12 }
 0x1dd   : > { %10015 = vst [vmem:[#allocation45_spill] sm:$0xff] %v6594_v48  ;;  %v915_v39 = vmul.f32 %v6525_v32, %v6594_v48  ;;  %v6680_v48 = vunpack.c.h.bf16 %v6289_v60 }
 0x1df   : > { %10032 = vst [vmem:[#allocation57_spill] sm:$0xff] %v6680_v48 }
 0x1e4   : > { %1601 = vrot.lane.b32.xlu1 %v6436_v52, %s6067_s17  ;;  %5426 = vmatmul.msk.bf16.gmra.mxu0 %vm360_vm0, %v6443_v53  ;;  %v6591_v52 = vunpack.c.l.bf16 %v6294_v8 }
 0x1e5   : > { %5430 = vmatmul.msk.bf16.gmra.mxu1 %vm360_vm0, %v6443_v53  ;;  %5434 = vmatmul.msk.bf16.gmra.mxu2 %vm360_vm0, %v6443_v53 }
 0x1e6   : > { %5438 = vmatmul.msk.bf16.gmra.mxu3 %vm360_vm0, %v6443_v53  ;;  %10014 = vst [vmem:[#allocation44_spill] sm:$0xff] %v6591_v52 }
 0x1f4   : > { %5427 = vmatmul.msk.bf16.gmra.mxu0 %vm360_vm0, %v6456_v54 }
 0x1f5   : > { %5431 = vmatmul.msk.bf16.gmra.mxu1 %vm360_vm0, %v6456_v54  ;;  %5435 = vmatmul.msk.bf16.gmra.mxu2 %vm360_vm0, %v6456_v54 }
 0x1f6   : > { %5439 = vmatmul.msk.bf16.gmra.mxu3 %vm360_vm0, %v6456_v54 }
 0x21d   : > { %v1025_v56 = vpop.permute.xlu2 %1024 }
 0x21e   : > { %v1045_v37 = vsel %vm1032_vm2, %v6328_v28, %v1025_v56 }
 0x21f   : > { %1199 = vmatpush.bf16.msrb.mxu0 %v1045_v37  ;;  %v6572_v37 = vunpack.c.h.bf16 %v6277_v26 }
 0x221   : > { %10013 = vst [vmem:[#allocation43_spill] sm:$0xff] %v6572_v37  ;;  %v6616_v14 = vmul.f32 %v6543_v36, %v6572_v37 }
 0x225   : > { %v6468_v57 = vpop.permute.xlu2 %1010 }
 0x22d   : > { %v6470_v58 = vpop.permute.xlu2 %5980 }
 0x22e   : > { %v9825_v59 = vunpack.i.h.bf16 %v6470_v58  ;;  %v9824_v61 = vunpack.i.l.bf16 %v6470_v58 }
 0x230   : > { %v6485_v0 = vsel %vm1609_vm8, %v9824_v61, %v9825_v59  ;;  %v6587_v59 = vmul.f32 %v6528_v23, %v6534_v10  ;;  %v6599_v61 = vunpack.c.l.bf16 %v6280_v27  ;;  %v10019_v27 = vand.u32 31, %v6537_v29 }
 0x231   : > { %v1646_v1 = vmul.f32 %v6485_v0, %v6475_v62  ;;  %v1655_v28 = vmul.f32 %v6485_v0, %v6478_v63  ;;  %v6649_v63 = vunpack.c.l.bf16 %v6342_v19  ;;  %v6652_v62 = vunpack.c.h.bf16 %v6342_v19 }
 0x232   : > { %10016 = vst [vmem:[#allocation46_spill] sm:$0xff] %v6599_v61  ;;  %vm816_vm14 = vcmp.ge.s32.totalorder %v10019_v27, 1  ;;  %v908_v27 = vmul.f32 %v6507_v12, %v6599_v61 }
 0x233   : > { %v1673_v24 = vpack.c.bf16 %v1655_v28, %v1646_v1  ;;  %v924_v28 = vmul.f32 %v6507_v12, %v6519_v21  ;;  %10025 = vst [vmem:[#allocation51_spill] sm:$0xff] %v6649_v63  ;;  %v6655_v50 = vsel %vm816_vm14, 1.0, %v10027_v9 }
 0x234   : > { %10026 = vst [vmem:[#allocation52_spill] sm:$0xff] %v6652_v62 }
 0x235   : > { %1749 = vrot.lane.b32.xlu2 %v1673_v24, %s6068_s24  ;;  %v6496_v3 = vpop.permute.xlu0 %1026  ;;  %v932_v24 = vmul.f32 %v6507_v12, %v6522_v22  ;;  %10028 = vst [vmem:[#allocation53_spill] sm:$0xff] %v6655_v50  ;;  %v6658_v12 = vsel %vm817_vm15, 1.0, %v10027_v9 }
 0x236   : > { %v1046_v6 = vsel %vm1032_vm2, %v1025_v56, %v6496_v3  ;;  %v6569_v56 = vunpack.c.l.bf16 %v6277_v26  ;;  %v6605_v26 = vunpack.c.l.bf16 %v6318_v47 }
 0x237   : > { %1228 = vmatpush.bf16.msrb.mxu1 %v1046_v6  ;;  %v948_v5 = vpack.c.bf16 %v932_v24, %v924_v28  ;;  %v6628_v28 = vunpack.c.h.bf16 %v6318_v47  ;;  %v907_v24 = vmul.f32 %v6525_v32, %v6591_v52 }
 0x238   : > { %10012 = vst [vmem:[#allocation42_spill] sm:$0xff] %v6569_v56  ;;  %v6610_v8 = vmul.f32 %v6543_v36, %v6569_v56  ;;  %v6640_v44 = vmul.f32 %v6543_v36, %v6605_v26 }
 0x239   : > { %10018 = vst [vmem:[#allocation48_spill] sm:$0xff] %v6605_v26  ;;  %v919_v52 = vmul.f32 %v6543_v36, %v6628_v28 }
 0x23a   : > { %10022 = vst [vmem:[#allocation50_spill] sm:$0xff] %v6628_v28 }
 0x23b   : > { %v943_v47 = vpack.c.bf16 %v919_v52, %v6640_v44 }
 0x23d   : > { %v1031_v1 = vpop.permute.xlu0 %1030 }
 0x23e   : > { %v6578_v6 = vpop.permute.xlu1 %1008 }
 0x245   : > { %v1007_v32 = vpop.permute.xlu0 %1006 }
 0x246   : > { %v1029_v54 = vpop.permute.xlu1 %1028  ;;  %v1037_v53 = vsel %vm1032_vm2, %v6333_v4, %v1007_v32  ;;  %v1038_v19 = vsel %vm1032_vm2, %v1007_v32, %v6578_v6  ;;  %v939_v4 = vpack.c.bf16 %v915_v39, %v907_v24  ;;  %v940_v32 = vpack.c.bf16 %v916_v45, %v908_v27 }
 0x247   : > { %1200 = vmatpush.bf16.msrb.mxu0 %v1037_v53  ;;  %1229 = vmatpush.bf16.msrb.mxu1 %v1038_v19  ;;  %v1047_v29 = vsel %vm1032_vm2, %v6496_v3, %v1029_v54  ;;  %v1048_v20 = vsel %vm1032_vm2, %v1029_v54, %v1031_v1  ;;  %v6688_v19 = vunpack.c.h.bf16 %v6407_v43  ;;  %v928_v53 = vmul.f32 %v6655_v50, %v6649_v63 }
 0x248   : > { %1257 = vmatpush.bf16.msrb.mxu2 %v1047_v29  ;;  %1286 = vmatpush.bf16.msrb.mxu3 %v1048_v20  ;;  %v936_v54 = vmul.f32 %v6655_v50, %v6652_v62  ;;  %v6695_v20 = vunpack.c.l.bf16 %v6383_v33  ;;  %v929_v45 = vmul.f32 %v6658_v12, %v6661_v30  ;;  %v6711_v39 = vunpack.c.h.bf16 %v6383_v33 }
 0x249   : > { %10034 = vst [vmem:[#allocation59_spill] sm:$0xff] %v6688_v19  ;;  %v1039_v3 = vsel %vm1032_vm2, %v6578_v6, %v6468_v57  ;;  %v912_v29 = vmul.f32 %v6655_v50, %v6671_v51  ;;  %v920_v1 = vmul.f32 %v6655_v50, %v6674_v34  ;;  %v951_v24 = vpack.c.bf16 %v6616_v14, %v6610_v8 }
 0x24a   : > { %10035 = vst [vmem:[#allocation60_spill] sm:$0xff] %v6695_v20  ;;  %5440 = vmatmul.msk.bf16.vlgmr.msrb.gmra.mxu0 %vm360_vm0, %v6360_v15  ;;  %5444 = vmatmul.msk.bf16.vlgmr.msrb.gmra.mxu1 %vm360_vm0, %v6360_v15  ;;  %v910_v27 = vmul.f32 %v6528_v23, %v6625_v46  ;;  %v918_v33 = vmul.f32 %v6528_v23, %v6680_v48  ;;  %v6728_v6 = vunpack.c.l.bf16 %v6380_v31 }
 0x24b   : > { %1347 = vmatpush.bf16.msra.mxu0 %v947_v41  ;;  %1376 = vmatpush.bf16.msra.mxu1 %v948_v5  ;;  %v937_v5 = vmul.f32 %v6658_v12, %v6664_v35  ;;  %v6708_v41 = vsel %vm6644_vm1, 1.0, %v10027_v9  ;;  %10037 = vst [vmem:[#allocation62_spill] sm:$0xff] %v6711_v39  ;;  %v952_v43 = vpack.c.bf16 %v936_v54, %v928_v53 }
 0x24c   : > { %10036 = vst [vmem:[#allocation61_spill] sm:$0xff] %v6708_v41  ;;  %1258 = vmatpush.bf16.msrb.mxu2 %v1039_v3  ;;  %v930_v3 = vmul.f32 %v6708_v41, %v6685_v40  ;;  %v938_v14 = vmul.f32 %v6708_v41, %v6688_v19  ;;  %v10039_v8 = vpack.c.bf16 %v6551_v55, %v6547_v38 }
 0x24d   : > { %10038 = vst [vmem:[#allocation63_spill] sm:$0xff] %v6728_v6  ;;  %v5986_v60 = vpop.permute.xlu0 %5985  ;;  %v953_v36 = vpack.c.bf16 %v937_v5, %v929_v45  ;;  %v944_v38 = vpack.c.bf16 %v920_v1, %v912_v29  ;;  %v921_v55 = vmul.f32 %v6658_v12, %v6711_v39  ;;  %v10043_v29 = vpack.c.bf16 %v6587_v59, %v6583_v17 }
 0x24e   : > { %v1013_v52 = vpop.permute.xlu1 %1012  ;;  %v6737_v44 = vunpack.i.h.bf16 %v5986_v60  ;;  %v5987_v50 = vunpack.i.l.bf16 %v5986_v60  ;;  %v10041_v60 = vunpack.i.h.bf16 %v6470_v58  ;;  %v954_v17 = vpack.c.bf16 %v938_v14, %v930_v3 }
 0x24f   : > { %1348 = vmatpush.bf16.msra.mxu0 %v939_v4  ;;  %1377 = vmatpush.bf16.msra.mxu1 %v940_v32  ;;  %v913_v4 = vmul.f32 %v6658_v12, %v6695_v20  ;;  %v6742_v32 = vunpack.c.h.bf16 %v6380_v31  ;;  %v1040_v53 = vsel %vm1032_vm2, %v6468_v57, %v1013_v52  ;;  %v10042_v57 = vunpack.i.l.bf16 %v6470_v58 }
 0x250   : > { %1405 = vmatpush.bf16.msra.mxu2 %v10039_v8  ;;  %v1612_v54 = vsel %vm1609_vm8, %v10041_v60, %v5987_v50  ;;  %1287 = vmatpush.bf16.msrb.mxu3 %v1040_v53  ;;  %v1644_v45 = vmul.f32 %v6737_v44, %v6513_v16  ;;  %v10044_v53 = vpack.c.bf16 %v6563_v49, %v6555_v11 }
 0x251   : > { %10040 = vst [vmem:[#allocation64_spill] sm:$0xff] %v6742_v32  ;;  %5448 = vmatmul.msk.bf16.vlgmr.msrb.gmra.mxu2 %vm360_vm0, %v6360_v15  ;;  %v1610_v5 = vsel %vm1609_vm8, %v6737_v44, %v10042_v57  ;;  %v1647_v8 = vmul.f32 %v1612_v54, %v6531_v25  ;;  %v1656_v52 = vmul.f32 %v1612_v54, %v6534_v10 }
 0x252   : > { %v1645_v1 = vmul.f32 %v1610_v5, %v6519_v21  ;;  %v942_v60 = vpack.c.bf16 %v918_v33, %v910_v27  ;;  %v922_v11 = vmul.f32 %v6708_v41, %v6742_v32  ;;  %v945_v49 = vpack.c.bf16 %v921_v55, %v913_v4 }
 0x253   : > { %1463 = vmatpush.bf16.msrb.mxu0 %v951_v24  ;;  %1492 = vmatpush.bf16.msrb.mxu1 %v952_v43  ;;  %v1653_v43 = vmul.f32 %v6737_v44, %v6516_v18  ;;  %v1654_v24 = vmul.f32 %v1610_v5, %v6522_v22  ;;  %v1674_v59 = vpack.c.bf16 %v1656_v52, %v1647_v8  ;;  %v10046_v52 = vld [vmem:[#allocation45_spill] sm:$0xff] }
 0x254   : > { %1434 = vmatpush.bf16.msra.mxu3 %v10043_v29  ;;  %1406 = vmatpush.bf16.msra.mxu2 %v10044_v53  ;;  %v914_v29 = vmul.f32 %v6708_v41, %v6728_v6  ;;  %v1628_v33 = vmul.f32 %v6485_v0, %v6501_v7  ;;  %v1629_v27 = vmul.f32 %v1612_v54, %v6625_v46 }
 0x255   : > { %v1671_v58 = vpack.c.bf16 %v1653_v43, %v1644_v45  ;;  %v1672_v57 = vpack.c.bf16 %v1654_v24, %v1645_v1  ;;  %5452 = vmatmul.msk.bf16.vlgmr.msrb.gmra.mxu3 %vm360_vm0, %v6360_v15  ;;  %1751 = vrot.lane.b32.xlu0 %v1674_v59, %s6068_s24  ;;  %v1637_v15 = vmul.f32 %v6485_v0, %v6510_v13  ;;  %v10045_v24 = vld [vmem:[#allocation44_spill] sm:$0xff]  ;;  %v10047_v59 = vld [vmem:[#allocation38_spill] sm:$0xff] }
 0x256   : > { %v1638_v3 = vmul.f32 %v1612_v54, %v6680_v48  ;;  %v946_v14 = vpack.c.bf16 %v922_v11, %v914_v29  ;;  %v1627_v0 = vmul.f32 %v1610_v5, %v6599_v61  ;;  %v1636_v54 = vmul.f32 %v1610_v5, %v6602_v2  ;;  %v10051_v11 = vld [vmem:[#allocation41_spill] sm:$0xff] }
 0x257   : > { %1464 = vmatpush.bf16.msrb.mxu0 %v943_v47  ;;  %1493 = vmatpush.bf16.msrb.mxu1 %v944_v38  ;;  %v1664_v55 = vpack.c.bf16 %v1637_v15, %v1628_v33  ;;  %v1626_v8 = vmul.f32 %v6737_v44, %v10045_v24  ;;  %v1635_v53 = vmul.f32 %v6737_v44, %v10046_v52  ;;  %v10048_v5 = vand.u32 31, %v10047_v59 }
 0x258   : > { %1521 = vmatpush.bf16.msrb.mxu2 %v953_v36  ;;  %1745 = vrot.lane.b32.xlu1 %v1671_v58, %s6068_s24  ;;  %v6779_v36 = vpop.permute.xlu1 %1601  ;;  %v1665_v45 = vpack.c.bf16 %v1638_v3, %v1629_v27  ;;  %v1663_v58 = vpack.c.bf16 %v1636_v54, %v1627_v0  ;;  %v10052_v44 = vand.u32 31, %v10051_v11  ;;  %v10055_v27 = vld [vmem:[#allocation23_spill] sm:$0xff] }
 0x259   : > { %1435 = vmatpush.bf16.msra.mxu3 %v942_v60  ;;  %1747 = vrot.lane.b32.xlu2 %v1672_v57, %s6068_s24  ;;  %v1613_v47 = vsel %vm1609_vm8, %v5987_v50, %v6779_v36  ;;  %v1662_v57 = vpack.c.bf16 %v1635_v53, %v1626_v8  ;;  %vm844_vm2 = vcmp.le.s32.totalorder %v10048_v5, 30  ;;  %v6875_v5 = vpop.f32.mrf.mxu1 }
 0x25a   : > { %v1648_v4 = vmul.f32 %v1613_v47, %v6569_v56  ;;  %v1657_v38 = vmul.f32 %v1613_v47, %v6572_v37  ;;  %5445 = vmatmul.msk.bf16.gmra.mxu1 %vm360_vm0, %v6404_v42  ;;  %5441 = vmatmul.msk.bf16.gmra.mxu0 %vm360_vm0, %v6404_v42  ;;  %v1630_v43 = vmul.f32 %v1613_v47, %v6605_v26  ;;  %vm846_vm4 = vcmp.le.s32.totalorder %v10052_v44, 30 }
 0x25b   : > { %v1639_v1 = vmul.f32 %v1613_v47, %v6628_v28  ;;  %v6823_v15 = vsel %vm846_vm4, 1.0, %v10027_v9 }
 0x25c   : > { %1522 = vmatpush.bf16.msrb.mxu2 %v945_v49  ;;  %v1675_v50 = vpack.c.bf16 %v1657_v38, %v1648_v4  ;;  %v5397_v49 = vsel %vm844_vm2, 1.0, %v10027_v9  ;;  %10053 = vst [vmem:[#allocation38_spill] sm:$0xff] %v6823_v15 }
 0x25d   : > { %1550 = vmatpush.bf16.msrb.mxu3 %v954_v17  ;;  %v1666_v60 = vpack.c.bf16 %v1639_v1, %v1630_v43  ;;  %v10049_v17 = vld [vmem:[#allocation39_spill] sm:$0xff] }
 0x25e   : > { %1753 = vrot.lane.b32.xlu0 %v1675_v50, %s6068_s24  ;;  %v10050_v29 = vand.u32 31, %v10049_v17 }
 0x260   : > { %1731 = vrot.lane.b32.xlu1 %v1664_v55, %s6068_s24  ;;  %vm845_vm3 = vcmp.le.s32.totalorder %v10050_v29, 30 }
 0x261   : > { %1551 = vmatpush.bf16.msrb.mxu3 %v946_v14  ;;  %1733 = vrot.lane.b32.xlu2 %v1665_v45, %s6068_s24  ;;  %v5398_v33 = vsel %vm845_vm3, 1.0, %v10027_v9  ;;  %v6850_v9 = vld [vmem:[%s9821_s3] sm:$0xff]  ;;  %v6880_v44 = vpop.f32.mrf.mxu1 }
 0x262   : > { %5449 = vmatmul.msk.bf16.gmra.mxu2 %vm360_vm0, %v6404_v42  ;;  %v6825_v47 = vpack.i.bf16 %v5398_v33, %v5397_v49  ;;  %10058 = vst [vmem:[#allocation23_spill] sm:$0xff] %v6880_v44  ;;  %v6882_v33 = vpop.f32.mrf.mxu2 }
 0x264   : > { %10054 = vst [vmem:[#allocation39_spill] sm:$0xff] %v6825_v47 }
 0x265   : > { %5453 = vmatmul.msk.bf16.gmra.mxu3 %vm360_vm0, %v6404_v42  ;;  %v10056_v42 = vld [vmem:[#allocation24_spill] sm:$0xff] }
 0x266   : > { %1727 = vrot.lane.b32.xlu0 %v1662_v57, %s6068_s24  ;;  %v6872_v57 = vpop.f32.mrf.mxu0 }
 0x268   : > { %1729 = vrot.lane.b32.xlu1 %v1663_v58, %s6068_s24 }
 0x269   : > { %1735 = vrot.lane.b32.xlu2 %v1666_v60, %s6068_s24 }
 0x26a   : > { %5446 = vmatmul.msk.bf16.gmra.mxu1 %vm360_vm0, %v10055_v27  ;;  %5442 = vmatmul.msk.bf16.gmra.mxu0 %vm360_vm0, %v10055_v27 }
 0x26e   : > { %5990 = vrot.lane.b32.xlu0 %v6825_v47, %s6067_s17  ;;  %v6878_v11 = vpop.f32.mrf.mxu0  ;;  %v10067_v47 = vld [vmem:[#allocation21_spill] sm:$0xff] }
 0x26f   : > { %10057 = vst [vmem:[#allocation41_spill] sm:$0xff] %v6878_v11 }
 0x270   : > { %1607 = vrot.lane.b32.xlu1 %v6823_v15, %s6067_s17  ;;  %v6942_v15 = vunpack.c.l.bf16 %v10067_v47 }
 0x272   : > { %5450 = vmatmul.msk.bf16.gmra.mxu2 %vm360_vm0, %v10055_v27  ;;  %10068 = vst [vmem:[#allocation71_spill] sm:$0xff] %v6942_v15 }
 0x275   : > { %5454 = vmatmul.msk.bf16.gmra.mxu3 %vm360_vm0, %v10055_v27 }
 0x27a   : > { %5447 = vmatmul.msk.bf16.gmra.mxu1 %vm360_vm0, %v10056_v42  ;;  %5443 = vmatmul.msk.bf16.gmra.mxu0 %vm360_vm0, %v10056_v42 }
 0x282   : > { %5451 = vmatmul.msk.bf16.gmra.mxu2 %vm360_vm0, %v10056_v42 }
 0x285   : > { %5455 = vmatmul.msk.bf16.gmra.mxu3 %vm360_vm0, %v10056_v42 }
 0x28a   : > { %5476 = vmatmul.msk.bf16.vlgmr.msra.gmra.mxu1 %vm360_vm0, %v6850_v9  ;;  %5472 = vmatmul.msk.bf16.vlgmr.msra.gmra.mxu0 %vm360_vm0, %v6850_v9 }
 0x28f   : > { %v1750_v3 = vpop.permute.xlu2 %1749 }
 0x292   : > { %5480 = vmatmul.msk.bf16.vlgmr.msra.gmra.mxu2 %vm360_vm0, %v6850_v9 }
 0x295   : > { %5484 = vmatmul.msk.bf16.vlgmr.msra.gmra.mxu3 %vm360_vm0, %v6850_v9 }
 0x2b3   : > { %v1748_v14 = vpop.permute.xlu2 %1747 }
 0x2b4   : > { %v1773_v4 = vsel %vm1763_vm5, %v1748_v14, %v1750_v3 }
 0x2b5   : > { %1843 = vmatpush.bf16.msra.mxu1 %v1773_v4 }
 0x2bb   : > { %v1734_v45 = vpop.permute.xlu2 %1733 }
 0x2c3   : > { %v6868_v53 = vpop.permute.xlu2 %1735 }
 0x2c4   : > { %v1767_v58 = vsel %vm1763_vm5, %v1734_v45, %v6868_v53 }
 0x2c7   : > { %v1752_v50 = vpop.permute.xlu0 %1751 }
 0x2c8   : > { %v1774_v0 = vsel %vm1763_vm5, %v1750_v3, %v1752_v50  ;;  %v6884_v3 = vpop.f32.mrf.mxu3 }
 0x2c9   : > { %1872 = vmatpush.bf16.msra.mxu2 %v1774_v0 }
 0x2ca   : > { %v1746_v38 = vpop.permute.xlu1 %1745 }
 0x2cb   : > { %v1772_v55 = vsel %vm1763_vm5, %v1746_v38, %v1748_v14  ;;  %v6889_v14 = vld [vmem:[%s9821_s3 + $0x8] sm:$0xff] }
 0x2cc   : > { %1814 = vmatpush.bf16.msra.mxu0 %v1772_v55  ;;  %5481 = vmatmul.msk.bf16.gmra.mxu2 %vm360_vm0, %v6889_v14 }
 0x2cd   : > { %5473 = vmatmul.msk.bf16.gmra.mxu0 %vm360_vm0, %v6889_v14  ;;  %5485 = vmatmul.msk.bf16.gmra.mxu3 %vm360_vm0, %v6889_v14 }
 0x2ce   : > { %5477 = vmatmul.msk.bf16.gmra.mxu1 %vm360_vm0, %v6889_v14 }
 0x2d0   : > { %v6864_v1 = vpop.permute.xlu0 %1753 }
 0x2d1   : > { %v1775_v8 = vsel %vm1763_vm5, %v1752_v50, %v6864_v1 }
 0x2d2   : > { %v1732_v54 = vpop.permute.xlu1 %1731  ;;  %1901 = vmatpush.bf16.msra.mxu3 %v1775_v8 }
 0x2d3   : > { %v1766_v43 = vsel %vm1763_vm5, %v1732_v54, %v1734_v45 }
 0x2d4   : > { %1873 = vmatpush.bf16.msra.mxu2 %v1766_v43 }
 0x2d6   : > { %1902 = vmatpush.bf16.msra.mxu3 %v1767_v58 }
 0x2d8   : > { %v1728_v17 = vpop.permute.xlu0 %1727 }
 0x2da   : > { %v1730_v60 = vpop.permute.xlu1 %1729 }
 0x2db   : > { %v1765_v59 = vsel %vm1763_vm5, %v1730_v60, %v1732_v54  ;;  %v1764_v29 = vsel %vm1763_vm5, %v1728_v17, %v1730_v60  ;;  %v6908_v60 = vpop.f32.mrf.mxu0 }
 0x2dc   : > { %1844 = vmatpush.bf16.msra.mxu1 %v1765_v59  ;;  %1815 = vmatpush.bf16.msra.mxu0 %v1764_v29  ;;  %v6911_v29 = vpop.f32.mrf.mxu1 }
 0x2dd   : > { %10059 = vst [vmem:[#allocation24_spill] sm:$0xff] %v6911_v29 }
 0x2e0   : > { %v5991_v49 = vpop.permute.xlu0 %5990 }
 0x2e1   : > { %v5993_v27 = vunpack.i.h.bf16 %v5991_v49  ;;  %v5992_v42 = vunpack.i.l.bf16 %v5991_v49  ;;  %v6915_v49 = vpop.f32.mrf.mxu2 }
 0x2e2   : > { %v1608_v43 = vpop.permute.xlu1 %1607  ;;  %10060 = vst [vmem:[#allocation65_spill] sm:$0xff] %v6915_v49 }
 0x2e3   : > { %v1614_v4 = vsel %vm1609_vm8, %v6779_v36, %v5992_v42  ;;  %v1615_v38 = vsel %vm1609_vm8, %v5992_v42, %v5993_v27  ;;  %v1616_v59 = vsel %vm1609_vm8, %v5993_v27, %v1608_v43  ;;  %v10061_v42 = vld [vmem:[#allocation14_spill] sm:$0xff]  ;;  %v6932_v49 = vpop.f32.mrf.mxu0  ;;  %vm3044_vm8 = vcmask 277504  }
 0x2e4   : > { %v1632_v55 = vmul.f32 %v1615_v38, %v6695_v20  ;;  %v1641_v45 = vmul.f32 %v1615_v38, %v6711_v39  ;;  %v1649_v50 = vmul.f32 %v1614_v4, %v6649_v63  ;;  %v1658_v0 = vmul.f32 %v1614_v4, %v6652_v62  ;;  %10065 = vst [vmem:[#allocation69_spill] sm:$0xff] %v6932_v49 }
 0x2e5   : > { %v1650_v36 = vmul.f32 %v1615_v38, %v6661_v30  ;;  %v1659_v54 = vmul.f32 %v1615_v38, %v6664_v35  ;;  %v6918_v38 = vunpack.c.l.bf16 %v10061_v42  ;;  %v6921_v11 = vunpack.c.h.bf16 %v10061_v42 }
 0x2e6   : > { %v1668_v8 = vpack.c.bf16 %v1641_v45, %v1632_v55  ;;  %v1676_v58 = vpack.c.bf16 %v1658_v0, %v1649_v50  ;;  %v6924_v55 = vpop.f32.mrf.mxu3  ;;  %v1651_v27 = vmul.f32 %v1616_v59, %v6685_v40  ;;  %v1660_v45 = vmul.f32 %v1616_v59, %v6688_v19 }
 0x2e7   : > { %v1677_v17 = vpack.c.bf16 %v1659_v54, %v1650_v36  ;;  %10062 = vst [vmem:[#allocation66_spill] sm:$0xff] %v6918_v38  ;;  %v1633_v50 = vmul.f32 %v1616_v59, %v6728_v6  ;;  %v1642_v0 = vmul.f32 %v1616_v59, %v6742_v32  ;;  %v1652_v36 = vmul.f32 %v1608_v43, %v6918_v38 }
 0x2e8   : > { %1739 = vrot.lane.b32.xlu0 %v1668_v8, %s6068_s24  ;;  %1755 = vrot.lane.b32.xlu1 %v1676_v58, %s6068_s24  ;;  %10063 = vst [vmem:[#allocation67_spill] sm:$0xff] %v6921_v11  ;;  %v1661_v54 = vmul.f32 %v1608_v43, %v6921_v11  ;;  %v1678_v8 = vpack.c.bf16 %v1660_v45, %v1651_v27  ;;  %v6945_v59 = vunpack.c.h.bf16 %v10067_v47  ;;  %v10079_v47 = vld [vmem:[#allocation35_spill] sm:$0xff] }
 0x2e9   : > { %1757 = vrot.lane.b32.xlu2 %v1677_v17, %s6068_s24  ;;  %10064 = vst [vmem:[#allocation68_spill] sm:$0xff] %v6924_v55  ;;  %v1669_v58 = vpack.c.bf16 %v1642_v0, %v1633_v50  ;;  %v6934_v17 = vpop.f32.mrf.mxu1  ;;  %v6939_v55 = vld [vmem:[%s9821_s3 + $0x10] sm:$0xff]  ;;  %v6949_v27 = vpop.f32.mrf.mxu2  ;;  %v1634_v45 = vmul.f32 %v1608_v43, %v6942_v15 }
 0x2ea   : > { %v1679_v44 = vpack.c.bf16 %v1661_v54, %v1652_v36  ;;  %10066 = vst [vmem:[#allocation70_spill] sm:$0xff] %v6934_v17  ;;  %v1643_v50 = vmul.f32 %v1608_v43, %v6945_v59  ;;  %v1631_v36 = vmul.f32 %v1614_v4, %v6671_v51  ;;  %v1640_v54 = vmul.f32 %v1614_v4, %v6674_v34 }
 0x2eb   : > { %10069 = vst [vmem:[#allocation72_spill] sm:$0xff] %v6945_v59  ;;  %5482 = vmatmul.msk.bf16.gmra.mxu2 %vm360_vm0, %v6939_v55  ;;  %5474 = vmatmul.msk.bf16.gmra.mxu0 %vm360_vm0, %v6939_v55  ;;  %v6970_v43 = vpop.f32.mrf.mxu0 }
 0x2ec   : > { %10070 = vst [vmem:[#allocation73_spill] sm:$0xff] %v6949_v27  ;;  %5486 = vmatmul.msk.bf16.gmra.mxu3 %vm360_vm0, %v6939_v55  ;;  %5478 = vmatmul.msk.bf16.gmra.mxu1 %vm360_vm0, %v6939_v55  ;;  %v1667_v4 = vpack.c.bf16 %v1640_v54, %v1631_v36  ;;  %v10083_v54 = vld [vmem:[#allocation40_spill] sm:$0xff] }
 0x2ee   : > { %v6954_v0 = vpop.f32.mrf.mxu3 }
 0x2ef   : > { %10071 = vst [vmem:[#allocation74_spill] sm:$0xff] %v6954_v0 }
 0x2f0   : > { %1759 = vrot.lane.b32.xlu0 %v1678_v8, %s6068_s24  ;;  %1741 = vrot.lane.b32.xlu1 %v1669_v58, %s6068_s24  ;;  %v10072_v8 = vld [vmem:[#allocation29_spill] sm:$0xff]  ;;  %v10073_v58 = vld [vmem:[#allocation28_spill] sm:$0xff] }
 0x2f1   : > { %1761 = vrot.lane.b32.xlu2 %v1679_v44, %s6068_s24  ;;  %v6964_v17 = vpack.i.bf16 %v10073_v58, %v10072_v8  ;;  %v1670_v44 = vpack.c.bf16 %v1643_v50, %v1634_v45  ;;  %10075 = vst [vmem:[#allocation28_spill] sm:$0xff] %v6970_v43  ;;  %v6972_v49 = vpop.f32.mrf.mxu1  ;;  %v6977_v8 = vpop.f32.mrf.mxu2  ;;  %v6984_v45 = vpack.i.bf16 %v10079_v47, %v6528_v23  ;;  %v5921_v23 = vld [vmem:[%s9821_s3 + $0x18] sm:$0xff]  ;;  %v10134_v43 = vld [vmem:[#allocation26_spill] sm:$0xff] }
 0x2f2   : > { %10076 = vst [vmem:[#allocation75_spill] sm:$0xff] %v6972_v49 }
 0x2f3   : > { %10074 = vst [vmem:[#allocation29_spill] sm:$0xff] %v6964_v17  ;;  %v6986_v50 = vpop.f32.mrf.mxu0 }
 0x2f4   : > { %10077 = vst [vmem:[#allocation76_spill] sm:$0xff] %v6977_v8 }
 0x2f5   : > { %10080 = vst [vmem:[#allocation35_spill] sm:$0xff] %v6984_v45 }
 0x2f6   : > { %v6980_v58 = vpop.f32.mrf.mxu3  ;;  %10081 = vst [vmem:[#allocation78_spill] sm:$0xff] %v6986_v50 }
 0x2f7   : > { %10078 = vst [vmem:[#allocation77_spill] sm:$0xff] %v6980_v58 }
 0x2f8   : > { %1743 = vrot.lane.b32.xlu0 %v1670_v44, %s6068_s24  ;;  %5995 = vrot.lane.b32.xlu1 %v6964_v17, %s6069_s6 }
 0x2f9   : > { %1737 = vrot.lane.b32.xlu2 %v1667_v4, %s6068_s24  ;;  %v6988_v36 = vpop.f32.mrf.mxu1  ;;  %v6992_v44 = vpop.f32.mrf.mxu2  ;;  %s6071_s24 = smov 95  }
 0x2fa   : > { %10082 = vst [vmem:[#allocation79_spill] sm:$0xff] %v6988_v36 }
 0x2fb   : > { %10084 = vst [vmem:[#allocation80_spill] sm:$0xff] %v6992_v44  ;;  %v6998_v4 = vpop.f32.mrf.mxu0  ;;  %5483 = vmatmul.msk.bf16.gmra.mxu2 %vm360_vm0, %v5921_v23  ;;  %5475 = vmatmul.msk.bf16.gmra.mxu0 %vm360_vm0, %v5921_v23 }
 0x2fc   : > { %10086 = vst [vmem:[#allocation82_spill] sm:$0xff] %v6998_v4  ;;  %5487 = vmatmul.msk.bf16.gmra.mxu3 %vm360_vm0, %v5921_v23  ;;  %5479 = vmatmul.msk.bf16.gmra.mxu1 %vm360_vm0, %v5921_v23 }
 0x2fe   : > { %v6996_v8 = vpop.f32.mrf.mxu3 }
 0x2ff   : > { %10085 = vst [vmem:[#allocation81_spill] sm:$0xff] %v6996_v8 }
 0x300   : > { %2120 = vrot.lane.b32.xlu0 %v10083_v54, %s6069_s6 }
 0x301   : > { %6000 = vrot.lane.b32.xlu2 %v6984_v45, %s6069_s6  ;;  %v7003_v47 = vpop.f32.mrf.mxu1  ;;  %v7005_v58 = vpop.f32.mrf.mxu2 }
 0x302   : > { %10087 = vst [vmem:[#allocation83_spill] sm:$0xff] %v7003_v47 }
 0x303   : > { %10088 = vst [vmem:[#allocation84_spill] sm:$0xff] %v7005_v58  ;;  %v7011_v36 = vpop.f32.mrf.mxu0 }
 0x304   : > { %10089 = vst [vmem:[#allocation85_spill] sm:$0xff] %v7011_v36 }
 0x306   : > { %v7015_v45 = vpop.f32.mrf.mxu3 }
 0x307   : > { %10091 = vst [vmem:[#allocation87_spill] sm:$0xff] %v7015_v45 }
 0x309   : > { %v7013_v50 = vpop.f32.mrf.mxu1  ;;  %v7017_v54 = vpop.f32.mrf.mxu2 }
 0x30a   : > { %10090 = vst [vmem:[#allocation86_spill] sm:$0xff] %v7013_v50 }
 0x30b   : > { %10092 = vst [vmem:[#allocation88_spill] sm:$0xff] %v7017_v54  ;;  %v7019_v17 = vpop.f32.mrf.mxu0  ;;  %5496 = vmatmul.msk.bf16.vlgmr.msrb.gmra.mxu2 %vm360_vm0, %v6850_v9  ;;  %5488 = vmatmul.msk.bf16.vlgmr.msrb.gmra.mxu0 %vm360_vm0, %v6850_v9 }
 0x30c   : > { %10093 = vst [vmem:[#allocation89_spill] sm:$0xff] %v7019_v17  ;;  %5500 = vmatmul.msk.bf16.vlgmr.msrb.gmra.mxu3 %vm360_vm0, %v6850_v9  ;;  %5492 = vmatmul.msk.bf16.vlgmr.msrb.gmra.mxu1 %vm360_vm0, %v6850_v9 }
 0x30e   : > { %v7023_v58 = vpop.f32.mrf.mxu3 }
 0x30f   : > { %10095 = vst [vmem:[#allocation91_spill] sm:$0xff] %v7023_v58 }
 0x311   : > { %v7021_v31 = vpop.f32.mrf.mxu1  ;;  %v7025_v42 = vpop.f32.mrf.mxu2 }
 0x312   : > { %10094 = vst [vmem:[#allocation90_spill] sm:$0xff] %v7021_v31 }
 0x313   : > { %10096 = vst [vmem:[#allocation92_spill] sm:$0xff] %v7025_v42  ;;  %v7035_v45 = vpop.f32.mrf.mxu0 }
 0x314   : > { %10097 = vst [vmem:[#allocation93_spill] sm:$0xff] %v7035_v45 }
 0x316   : > { %v7039_v36 = vpop.f32.mrf.mxu3 }
 0x317   : > { %10099 = vst [vmem:[#allocation95_spill] sm:$0xff] %v7039_v36 }
 0x319   : > { %v7037_v50 = vpop.f32.mrf.mxu1  ;;  %v7041_v31 = vpop.f32.mrf.mxu2 }
 0x31a   : > { %10098 = vst [vmem:[#allocation94_spill] sm:$0xff] %v7037_v50 }
 0x31b   : > { %10100 = vst [vmem:[#allocation96_spill] sm:$0xff] %v7041_v31  ;;  %v7043_v42 = vpop.f32.mrf.mxu0  ;;  %5497 = vmatmul.msk.bf16.gmra.mxu2 %vm360_vm0, %v6889_v14  ;;  %5489 = vmatmul.msk.bf16.gmra.mxu0 %vm360_vm0, %v6889_v14 }
 0x31c   : > { %10101 = vst [vmem:[#allocation97_spill] sm:$0xff] %v7043_v42  ;;  %5501 = vmatmul.msk.bf16.gmra.mxu3 %vm360_vm0, %v6889_v14  ;;  %5493 = vmatmul.msk.bf16.gmra.mxu1 %vm360_vm0, %v6889_v14 }
 0x31e   : > { %v7047_v58 = vpop.f32.mrf.mxu3 }
 0x31f   : > { %10103 = vst [vmem:[#allocation99_spill] sm:$0xff] %v7047_v58 }
 0x321   : > { %v7045_v17 = vpop.f32.mrf.mxu1  ;;  %v7049_v54 = vpop.f32.mrf.mxu2 }
 0x322   : > { %10102 = vst [vmem:[#allocation98_spill] sm:$0xff] %v7045_v17 }
 0x323   : > { %10104 = vst [vmem:[#allocation100_spill] sm:$0xff] %v7049_v54  ;;  %v7059_v9 = vpop.f32.mrf.mxu0 }
 0x324   : > { %10105 = vst [vmem:[#allocation101_spill] sm:$0xff] %v7059_v9 }
 0x326   : > { %v7063_v50 = vpop.f32.mrf.mxu3 }
 0x327   : > { %10107 = vst [vmem:[#allocation103_spill] sm:$0xff] %v7063_v50 }
 0x329   : > { %v7061_v36 = vpop.f32.mrf.mxu1  ;;  %v7065_v45 = vpop.f32.mrf.mxu2 }
 0x32a   : > { %10106 = vst [vmem:[#allocation102_spill] sm:$0xff] %v7061_v36 }
 0x32b   : > { %10108 = vst [vmem:[#allocation104_spill] sm:$0xff] %v7065_v45  ;;  %v7067_v54 = vpop.f32.mrf.mxu0  ;;  %5498 = vmatmul.msk.bf16.gmra.mxu2 %vm360_vm0, %v6939_v55  ;;  %5490 = vmatmul.msk.bf16.gmra.mxu0 %vm360_vm0, %v6939_v55 }
 0x32c   : > { %10109 = vst [vmem:[#allocation105_spill] sm:$0xff] %v7067_v54  ;;  %5502 = vmatmul.msk.bf16.gmra.mxu3 %vm360_vm0, %v6939_v55  ;;  %5494 = vmatmul.msk.bf16.gmra.mxu1 %vm360_vm0, %v6939_v55 }
 0x32e   : > { %v7071_v42 = vpop.f32.mrf.mxu3 }
 0x32f   : > { %10111 = vst [vmem:[#allocation107_spill] sm:$0xff] %v7071_v42 }
 0x331   : > { %v7069_v17 = vpop.f32.mrf.mxu1  ;;  %v7073_v58 = vpop.f32.mrf.mxu2 }
 0x332   : > { %10110 = vst [vmem:[#allocation106_spill] sm:$0xff] %v7069_v17 }
 0x333   : > { %10112 = vst [vmem:[#allocation108_spill] sm:$0xff] %v7073_v58  ;;  %v7083_v14 = vpop.f32.mrf.mxu0 }
 0x334   : > { %10113 = vst [vmem:[#allocation109_spill] sm:$0xff] %v7083_v14 }
 0x336   : > { %v7087_v50 = vpop.f32.mrf.mxu3 }
 0x337   : > { %10115 = vst [vmem:[#allocation111_spill] sm:$0xff] %v7087_v50 }
 0x339   : > { %v7085_v36 = vpop.f32.mrf.mxu1  ;;  %v7089_v9 = vpop.f32.mrf.mxu2 }
 0x33a   : > { %10114 = vst [vmem:[#allocation110_spill] sm:$0xff] %v7085_v36 }
 0x33b   : > { %10116 = vst [vmem:[#allocation112_spill] sm:$0xff] %v7089_v9  ;;  %v7091_v17 = vpop.f32.mrf.mxu0  ;;  %5499 = vmatmul.msk.bf16.gmra.mxu2 %vm360_vm0, %v5921_v23  ;;  %5491 = vmatmul.msk.bf16.gmra.mxu0 %vm360_vm0, %v5921_v23 }
 0x33c   : > { %10117 = vst [vmem:[#allocation113_spill] sm:$0xff] %v7091_v17  ;;  %5503 = vmatmul.msk.bf16.gmra.mxu3 %vm360_vm0, %v5921_v23  ;;  %5495 = vmatmul.msk.bf16.gmra.mxu1 %vm360_vm0, %v5921_v23 }
 0x33e   : > { %v7095_v42 = vpop.f32.mrf.mxu3 }
 0x33f   : > { %10119 = vst [vmem:[#allocation115_spill] sm:$0xff] %v7095_v42 }
 0x341   : > { %v7093_v54 = vpop.f32.mrf.mxu1  ;;  %v7097_v45 = vpop.f32.mrf.mxu2 }
 0x342   : > { %10118 = vst [vmem:[#allocation114_spill] sm:$0xff] %v7093_v54 }
 0x343   : > { %v1758_v58 = vpop.permute.xlu2 %1757  ;;  %10120 = vst [vmem:[#allocation116_spill] sm:$0xff] %v7097_v45  ;;  %v7103_v36 = vpop.f32.mrf.mxu0  ;;  %v7116_v45 = vld [vmem:[%s9821_s3 + $0x40] sm:$0xff] }
 0x344   : > { %10121 = vst [vmem:[#allocation117_spill] sm:$0xff] %v7103_v36 }
 0x346   : > { %v7107_v14 = vpop.f32.mrf.mxu3 }
 0x347   : > { %10123 = vst [vmem:[#allocation119_spill] sm:$0xff] %v7107_v14 }
 0x349   : > { %v7105_v50 = vpop.f32.mrf.mxu1  ;;  %v7109_v54 = vpop.f32.mrf.mxu2 }
 0x34a   : > { %10122 = vst [vmem:[#allocation118_spill] sm:$0xff] %v7105_v50 }
 0x34b   : > { %v1762_v55 = vpop.permute.xlu2 %1761  ;;  %10124 = vst [vmem:[#allocation120_spill] sm:$0xff] %v7109_v54  ;;  %v7111_v42 = vpop.f32.mrf.mxu0  ;;  %5536 = vmatmul.msk.bf16.vlgmr.msra.gmra.mxu2 %vm360_vm0, %v7116_v45  ;;  %5528 = vmatmul.msk.bf16.vlgmr.msra.gmra.mxu0 %vm360_vm0, %v7116_v45 }
 0x34c   : > { %5540 = vmatmul.msk.bf16.vlgmr.msra.gmra.mxu3 %vm360_vm0, %v7116_v45  ;;  %5532 = vmatmul.msk.bf16.vlgmr.msra.gmra.mxu1 %vm360_vm0, %v7116_v45 }
 0x34e   : > { %v7120_v23 = vpop.f32.mrf.mxu3 }
 0x34f   : > { %10125 = vst [vmem:[#allocation121_spill] sm:$0xff] %v7120_v23 }
 0x351   : > { %v7118_v9 = vpop.f32.mrf.mxu1  ;;  %v7122_v31 = vpop.f32.mrf.mxu2 }
 0x352   : > { %10126 = vst [vmem:[#allocation122_spill] sm:$0xff] %v7122_v31 }
 0x353   : > { %v1738_v17 = vpop.permute.xlu2 %1737  ;;  %v7144_v8 = vpop.f32.mrf.mxu0 }
 0x354   : > { %10127 = vst [vmem:[#allocation123_spill] sm:$0xff] %v7144_v8  ;;  %v1768_v44 = vsel %vm1763_vm5, %v6868_v53, %v1738_v17 }
 0x359   : > { %v7149_v49 = vpop.f32.mrf.mxu1 }
 0x35a   : > { %v1740_v50 = vpop.permute.xlu0 %1739  ;;  %v1756_v14 = vpop.permute.xlu1 %1755  ;;  %10128 = vst [vmem:[#allocation124_spill] sm:$0xff] %v7149_v49  ;;  %v10133_v49 = vld [vmem:[#allocation25_spill] sm:$0xff] }
 0x35b   : > { %v7132_v36 = vpop.permute.xlu2 %6000  ;;  %v1776_v23 = vsel %vm1763_vm5, %v6864_v1, %v1756_v14  ;;  %v1777_v31 = vsel %vm1763_vm5, %v1756_v14, %v1758_v58  ;;  %v1769_v1 = vsel %vm1763_vm5, %v1738_v17, %v1740_v50  ;;  %v7158_v17 = vpop.f32.mrf.mxu0 }
 0x35c   : > { %v7138_v54 = vunpack.i.h.bf16 %v7132_v36  ;;  %1930 = vmatpush.bf16.msrb.mxu0 %v1776_v23  ;;  %1959 = vmatpush.bf16.msrb.mxu1 %v1777_v31  ;;  %v7151_v23 = vpop.f32.mrf.mxu3  ;;  %v7153_v31 = vpop.f32.mrf.mxu2  ;;  %10130 = vst [vmem:[#allocation126_spill] sm:$0xff] %v7158_v17 }
 0x35d   : > { %10129 = vst [vmem:[#allocation125_spill] sm:$0xff] %v7151_v23 }
 0x35e   : > { %v2162_v47 = vmul.f32 %v7138_v54, %v6513_v16  ;;  %v2171_v4 = vmul.f32 %v7138_v54, %v6516_v18 }
 0x360   : > { %1931 = vmatpush.bf16.msrb.mxu0 %v1768_v44  ;;  %1960 = vmatpush.bf16.msrb.mxu1 %v1769_v1  ;;  %v2189_v14 = vpack.c.bf16 %v2171_v4, %v2162_v47  ;;  %v7164_v4 = vld [vmem:[%s9821_s3 + $0x48] sm:$0xff] }
 0x361   : > { %v7166_v47 = vpop.f32.mrf.mxu1  ;;  %5537 = vmatmul.msk.bf16.gmra.mxu2 %vm360_vm0, %v7164_v4  ;;  %5529 = vmatmul.msk.bf16.gmra.mxu0 %vm360_vm0, %v7164_v4 }
 0x362   : > { %2263 = vrot.lane.b32.xlu0 %v2189_v14, %s6070_s11  ;;  %v1760_v18 = vpop.permute.xlu0 %1759  ;;  %v1742_v16 = vpop.permute.xlu1 %1741  ;;  %10131 = vst [vmem:[#allocation127_spill] sm:$0xff] %v7166_v47  ;;  %5541 = vmatmul.msk.bf16.gmra.mxu3 %vm360_vm0, %v7164_v4 }
 0x363   : > { %v1778_v8 = vsel %vm1763_vm5, %v1758_v58, %v1760_v18  ;;  %v1779_v53 = vsel %vm1763_vm5, %v1760_v18, %v1762_v55  ;;  %v1770_v44 = vsel %vm1763_vm5, %v1740_v50, %v1742_v16  ;;  %5533 = vmatmul.msk.bf16.gmra.mxu1 %vm360_vm0, %v7164_v4  ;;  %v6002_v58 = vunpack.i.l.bf16 %v7132_v36  ;;  %v7188_v29 = vpop.f32.mrf.mxu0 }
 0x364   : > { %1988 = vmatpush.bf16.msrb.mxu2 %v1778_v8  ;;  %2017 = vmatpush.bf16.msrb.mxu3 %v1779_v53  ;;  %v7168_v1 = vpop.f32.mrf.mxu3  ;;  %v7170_v14 = vpop.f32.mrf.mxu2  ;;  %10135 = vst [vmem:[#allocation129_spill] sm:$0xff] %v7188_v29 }
 0x365   : > { %10132 = vst [vmem:[#allocation128_spill] sm:$0xff] %v7170_v14 }
 0x368   : > { %1989 = vmatpush.bf16.msrb.mxu2 %v1770_v44 }
 0x36a   : > { %v1744_v18 = vpop.permute.xlu0 %1743  ;;  %v5996_v8 = vpop.permute.xlu1 %5995 }
 0x36b   : > { %v5998_v50 = vunpack.i.h.bf16 %v5996_v8  ;;  %v5997_v55 = vunpack.i.l.bf16 %v5996_v8  ;;  %v1771_v53 = vsel %vm1763_vm5, %v1742_v16, %v1744_v18  ;;  %v7192_v16 = vpop.f32.mrf.mxu1 }
 0x36c   : > { %2018 = vmatpush.bf16.msrb.mxu3 %v1771_v53  ;;  %10136 = vst [vmem:[#allocation130_spill] sm:$0xff] %v7192_v16  ;;  %v7194_v17 = vpop.f32.mrf.mxu3 }
 0x36d   : > { %v2129_v44 = vsel %vm360_vm0, %v5997_v55, %v5998_v50  ;;  %v2130_v14 = vsel %vm360_vm0, %v5998_v50, %v6002_v58  ;;  %10137 = vst [vmem:[#allocation131_spill] sm:$0xff] %v7194_v17  ;;  %v7196_v50 = vpop.f32.mrf.mxu2 }
 0x36e   : > { %v2164_v23 = vmul.f32 %v2129_v44, %v10133_v49  ;;  %v2173_v0 = vmul.f32 %v2129_v44, %v10134_v43  ;;  %v2146_v27 = vmul.f32 %v2129_v44, %v6501_v7  ;;  %v2155_v47 = vmul.f32 %v2129_v44, %v6510_v13 }
 0x36f   : > { %v2165_v36 = vmul.f32 %v2130_v14, %v6531_v25  ;;  %v2174_v8 = vmul.f32 %v2130_v14, %v6534_v10  ;;  %v2128_v43 = vsel %vm360_vm0, %v7138_v54, %v5997_v55 }
 0x370   : > { %v2191_v18 = vpack.c.bf16 %v2173_v0, %v2164_v23  ;;  %v2182_v53 = vpack.c.bf16 %v2155_v47, %v2146_v27  ;;  %v2163_v27 = vmul.f32 %v2128_v43, %v6519_v21  ;;  %v2172_v0 = vmul.f32 %v2128_v43, %v6522_v22 }
 0x371   : > { %v2192_v7 = vpack.c.bf16 %v2174_v8, %v2165_v36  ;;  %v2145_v23 = vmul.f32 %v2128_v43, %v6599_v61  ;;  %v2154_v47 = vmul.f32 %v2128_v43, %v6602_v2  ;;  %v7216_v8 = vld [vmem:[%s9821_s3 + $0x50] sm:$0xff] }
 0x372   : > { %v7200_v49 = vpop.permute.xlu0 %2120  ;;  %2267 = vrot.lane.b32.xlu1 %v2191_v18, %s6070_s11  ;;  %2249 = vrot.lane.b32.xlu0 %v2182_v53, %s6070_s11  ;;  %v2190_v18 = vpack.c.bf16 %v2172_v0, %v2163_v27  ;;  %v2147_v27 = vmul.f32 %v2130_v14, %v6625_v46  ;;  %v2156_v0 = vmul.f32 %v2130_v14, %v6680_v48 }
 0x373   : > { %v2131_v44 = vsel %vm360_vm0, %v6002_v58, %v7200_v49  ;;  %2269 = vrot.lane.b32.xlu2 %v2192_v7, %s6070_s11  ;;  %v7218_v58 = vpop.f32.mrf.mxu0  ;;  %v7220_v7 = vpop.f32.mrf.mxu1  ;;  %v2181_v53 = vpack.c.bf16 %v2154_v47, %v2145_v23  ;;  %5538 = vmatmul.msk.bf16.gmra.mxu2 %vm360_vm0, %v7216_v8  ;;  %v2144_v23 = vmul.f32 %v7138_v54, %v10045_v24 }
 0x374   : > { %v2166_v55 = vmul.f32 %v2131_v44, %v6569_v56  ;;  %v2175_v36 = vmul.f32 %v2131_v44, %v6572_v37  ;;  %v7222_v17 = vpop.f32.mrf.mxu3  ;;  %5530 = vmatmul.msk.bf16.gmra.mxu0 %vm360_vm0, %v7216_v8  ;;  %5542 = vmatmul.msk.bf16.gmra.mxu3 %vm360_vm0, %v7216_v8  ;;  %v2153_v47 = vmul.f32 %v7138_v54, %v10046_v52 }
 0x375   : > { %v7224_v16 = vpop.f32.mrf.mxu2  ;;  %5534 = vmatmul.msk.bf16.gmra.mxu1 %vm360_vm0, %v7216_v8  ;;  %v2148_v14 = vmul.f32 %v2131_v44, %v6605_v26  ;;  %v2157_v54 = vmul.f32 %v2131_v44, %v6628_v28 }
 0x376   : > { %10138 = vst [vmem:[#allocation132_spill] sm:$0xff] %v7224_v16  ;;  %v2193_v43 = vpack.c.bf16 %v2175_v36, %v2166_v55  ;;  %v2180_v16 = vpack.c.bf16 %v2153_v47, %v2144_v23 }
 0x37a   : > { %2265 = vrot.lane.b32.xlu1 %v2190_v18, %s6070_s11  ;;  %2247 = vrot.lane.b32.xlu0 %v2181_v53, %s6070_s11  ;;  %v2183_v18 = vpack.c.bf16 %v2156_v0, %v2147_v27  ;;  %v5929_v27 = vld [vmem:[%s9821_s3 + $0x58] sm:$0xff] }
 0x37b   : > { %2271 = vrot.lane.b32.xlu2 %v2193_v43, %s6070_s11  ;;  %v7243_v55 = vpop.f32.mrf.mxu0  ;;  %v7245_v36 = vpop.f32.mrf.mxu1 }
 0x37c   : > { %10139 = vst [vmem:[#allocation133_spill] sm:$0xff] %v7243_v55  ;;  %v7247_v53 = vpop.f32.mrf.mxu3 }
 0x37d   : > { %10140 = vst [vmem:[#allocation134_spill] sm:$0xff] %v7245_v36  ;;  %v7249_v43 = vpop.f32.mrf.mxu2  ;;  %v2184_v36 = vpack.c.bf16 %v2157_v54, %v2148_v14 }
 0x37e   : > { %10141 = vst [vmem:[#allocation135_spill] sm:$0xff] %v7247_v53  ;;  %v10142_v53 = vld [vmem:[#allocation53_spill] sm:$0xff] }
 0x37f   : > { %v7264_v23 = vpack.i.bf16 %v6658_v12, %v10142_v53 }
 0x381   : > { %10143 = vst [vmem:[#allocation53_spill] sm:$0xff] %v7264_v23 }
 0x382   : > { %2126 = vrot.lane.b32.xlu0 %v6708_v41, %s6069_s6  ;;  %2251 = vrot.lane.b32.xlu1 %v2183_v18, %s6070_s11 }
 0x383   : > { %2245 = vrot.lane.b32.xlu2 %v2180_v16, %s6070_s11  ;;  %v7260_v0 = vpop.f32.mrf.mxu0  ;;  %v7266_v47 = vpop.f32.mrf.mxu1  ;;  %5539 = vmatmul.msk.bf16.gmra.mxu2 %vm360_vm0, %v5929_v27 }
 0x384   : > { %v7268_v18 = vpop.f32.mrf.mxu3  ;;  %5531 = vmatmul.msk.bf16.gmra.mxu0 %vm360_vm0, %v5929_v27  ;;  %5543 = vmatmul.msk.bf16.gmra.mxu3 %vm360_vm0, %v5929_v27 }
 0x385   : > { %v7270_v16 = vpop.f32.mrf.mxu2  ;;  %5535 = vmatmul.msk.bf16.gmra.mxu1 %vm360_vm0, %v5929_v27 }
 0x386   : > { %10144 = vst [vmem:[#allocation136_spill] sm:$0xff] %v7270_v16 }
 0x38a   : > { %2253 = vrot.lane.b32.xlu1 %v2184_v36, %s6070_s11 }
 0x38b   : > { %6005 = vrot.lane.b32.xlu2 %v7264_v23, %s6069_s6  ;;  %v7279_v12 = vpop.f32.mrf.mxu0  ;;  %v7281_v44 = vpop.f32.mrf.mxu1  ;;  %s6075_s6 = smov 63  }
 0x38c   : > { %10145 = vst [vmem:[#allocation137_spill] sm:$0xff] %v7279_v12  ;;  %v7283_v53 = vpop.f32.mrf.mxu3 }
 0x38d   : > { %10146 = vst [vmem:[#allocation138_spill] sm:$0xff] %v7281_v44  ;;  %v7285_v14 = vpop.f32.mrf.mxu2 }
 0x38e   : > { %10147 = vst [vmem:[#allocation139_spill] sm:$0xff] %v7283_v53 }
 0x393   : > { %v7287_v54 = vpop.f32.mrf.mxu0  ;;  %v7289_v16 = vpop.f32.mrf.mxu1  ;;  %5552 = vmatmul.msk.bf16.vlgmr.msrb.gmra.mxu2 %vm360_vm0, %v7116_v45 }
 0x394   : > { %v7291_v36 = vpop.f32.mrf.mxu3  ;;  %5544 = vmatmul.msk.bf16.vlgmr.msrb.gmra.mxu0 %vm360_vm0, %v7116_v45  ;;  %5556 = vmatmul.msk.bf16.vlgmr.msrb.gmra.mxu3 %vm360_vm0, %v7116_v45 }
 0x395   : > { %v7293_v55 = vpop.f32.mrf.mxu2  ;;  %5548 = vmatmul.msk.bf16.vlgmr.msrb.gmra.mxu1 %vm360_vm0, %v7116_v45 }
 0x396   : > { %10148 = vst [vmem:[#allocation140_spill] sm:$0xff] %v7293_v55 }
 0x39b   : > { %v7303_v53 = vpop.f32.mrf.mxu0  ;;  %v7305_v44 = vpop.f32.mrf.mxu1 }
 0x39c   : > { %10149 = vst [vmem:[#allocation141_spill] sm:$0xff] %v7303_v53  ;;  %v7307_v12 = vpop.f32.mrf.mxu3 }
 0x39d   : > { %10150 = vst [vmem:[#allocation142_spill] sm:$0xff] %v7305_v44  ;;  %v7309_v29 = vpop.f32.mrf.mxu2 }
 0x39e   : > { %10151 = vst [vmem:[#allocation143_spill] sm:$0xff] %v7307_v12 }
 0x3a3   : > { %v7311_v55 = vpop.f32.mrf.mxu0  ;;  %v7313_v23 = vpop.f32.mrf.mxu1  ;;  %5553 = vmatmul.msk.bf16.gmra.mxu2 %vm360_vm0, %v7164_v4 }
 0x3a4   : > { %10152 = vst [vmem:[#allocation144_spill] sm:$0xff] %v7311_v55  ;;  %v7315_v41 = vpop.f32.mrf.mxu3  ;;  %5545 = vmatmul.msk.bf16.gmra.mxu0 %vm360_vm0, %v7164_v4  ;;  %5557 = vmatmul.msk.bf16.gmra.mxu3 %vm360_vm0, %v7164_v4 }
 0x3a5   : > { %10153 = vst [vmem:[#allocation145_spill] sm:$0xff] %v7313_v23  ;;  %v7317_v28 = vpop.f32.mrf.mxu2  ;;  %5549 = vmatmul.msk.bf16.gmra.mxu1 %vm360_vm0, %v7164_v4 }
 0x3a6   : > { %10154 = vst [vmem:[#allocation146_spill] sm:$0xff] %v7317_v28 }
 0x3ab   : > { %v7327_v45 = vpop.f32.mrf.mxu0  ;;  %v7329_v12 = vpop.f32.mrf.mxu1 }
 0x3ac   : > { %10155 = vst [vmem:[#allocation147_spill] sm:$0xff] %v7327_v45  ;;  %v7331_v44 = vpop.f32.mrf.mxu3 }
 0x3ad   : > { %10156 = vst [vmem:[#allocation148_spill] sm:$0xff] %v7329_v12  ;;  %v7333_v53 = vpop.f32.mrf.mxu2 }
 0x3ae   : > { %10157 = vst [vmem:[#allocation149_spill] sm:$0xff] %v7331_v44 }
 0x3af   : > { %10158 = vst [vmem:[#allocation150_spill] sm:$0xff] %v7333_v53 }
 0x3b3   : > { %v7335_v28 = vpop.f32.mrf.mxu0  ;;  %v7337_v26 = vpop.f32.mrf.mxu1  ;;  %5554 = vmatmul.msk.bf16.gmra.mxu2 %vm360_vm0, %v7216_v8 }
 0x3b4   : > { %10159 = vst [vmem:[#allocation151_spill] sm:$0xff] %v7335_v28  ;;  %v7339_v52 = vpop.f32.mrf.mxu3  ;;  %5546 = vmatmul.msk.bf16.gmra.mxu0 %vm360_vm0, %v7216_v8  ;;  %5558 = vmatmul.msk.bf16.gmra.mxu3 %vm360_vm0, %v7216_v8 }
 0x3b5   : > { %10160 = vst [vmem:[#allocation152_spill] sm:$0xff] %v7337_v26  ;;  %v7341_v24 = vpop.f32.mrf.mxu2  ;;  %5550 = vmatmul.msk.bf16.gmra.mxu1 %vm360_vm0, %v7216_v8 }
 0x3b6   : > { %10161 = vst [vmem:[#allocation153_spill] sm:$0xff] %v7339_v52 }
 0x3b7   : > { %10162 = vst [vmem:[#allocation154_spill] sm:$0xff] %v7341_v24 }
 0x3bb   : > { %v7351_v4 = vpop.f32.mrf.mxu0  ;;  %v7353_v12 = vpop.f32.mrf.mxu1 }
 0x3bc   : > { %10163 = vst [vmem:[#allocation155_spill] sm:$0xff] %v7351_v4  ;;  %v7355_v44 = vpop.f32.mrf.mxu3 }
 0x3bd   : > { %10164 = vst [vmem:[#allocation156_spill] sm:$0xff] %v7353_v12  ;;  %v7357_v45 = vpop.f32.mrf.mxu2 }
 0x3be   : > { %10165 = vst [vmem:[#allocation157_spill] sm:$0xff] %v7355_v44 }
 0x3bf   : > { %10166 = vst [vmem:[#allocation158_spill] sm:$0xff] %v7357_v45 }
 0x3c3   : > { %v7359_v24 = vpop.f32.mrf.mxu0  ;;  %v7361_v2 = vpop.f32.mrf.mxu1  ;;  %5555 = vmatmul.msk.bf16.gmra.mxu2 %vm360_vm0, %v5929_v27 }
 0x3c4   : > { %10167 = vst [vmem:[#allocation159_spill] sm:$0xff] %v7359_v24  ;;  %v7363_v61 = vpop.f32.mrf.mxu3  ;;  %5547 = vmatmul.msk.bf16.gmra.mxu0 %vm360_vm0, %v5929_v27  ;;  %5559 = vmatmul.msk.bf16.gmra.mxu3 %vm360_vm0, %v5929_v27 }
 0x3c5   : > { %10168 = vst [vmem:[#allocation160_spill] sm:$0xff] %v7361_v2  ;;  %v7365_v48 = vpop.f32.mrf.mxu2  ;;  %5551 = vmatmul.msk.bf16.gmra.mxu1 %vm360_vm0, %v5929_v27 }
 0x3c6   : > { %10169 = vst [vmem:[#allocation161_spill] sm:$0xff] %v7363_v61 }
 0x3c7   : > { %10170 = vst [vmem:[#allocation162_spill] sm:$0xff] %v7365_v48 }
 0x3cb   : > { %v7371_v12 = vpop.f32.mrf.mxu0  ;;  %v7373_v44 = vpop.f32.mrf.mxu1 }
 0x3cc   : > { %10171 = vst [vmem:[#allocation163_spill] sm:$0xff] %v7371_v12  ;;  %v7375_v4 = vpop.f32.mrf.mxu3 }
 0x3cd   : > { %v2270_v8 = vpop.permute.xlu2 %2269  ;;  %10172 = vst [vmem:[#allocation164_spill] sm:$0xff] %v7373_v44  ;;  %v7377_v46 = vpop.f32.mrf.mxu2 }
 0x3ce   : > { %10173 = vst [vmem:[#allocation165_spill] sm:$0xff] %v7375_v4 }
 0x3cf   : > { %10174 = vst [vmem:[#allocation166_spill] sm:$0xff] %v7377_v46 }
 0x3d3   : > { %v1817_v56 = vpop.f32.mrf.mxu0  ;;  %v1846_v13 = vpop.f32.mrf.mxu1 }
 0x3d4   : > { %v7383_v22 = vpop.f32.mrf.mxu3  ;;  %v2264_v12 = vpop.permute.xlu0 %2263 }
 0x3d5   : > { %v7379_v37 = vpop.permute.xlu2 %2271  ;;  %10176 = vst [vmem:[#allocation168_spill] sm:$0xff] %v7383_v22  ;;  %v7385_v27 = vpop.f32.mrf.mxu2 }
 0x3d6   : > { %10175 = vst [vmem:[#allocation167_spill] sm:$0xff] %v7379_v37  ;;  %v2293_v48 = vsel %vm2281_vm6, %v2270_v8, %v7379_v37 }
 0x3d7   : > { %2419 = vmatpush.bf16.msra.mxu3 %v2293_v48  ;;  %10177 = vst [vmem:[#allocation169_spill] sm:$0xff] %v7385_v27 }
 0x3db   : > { %v7387_v44 = vpop.f32.mrf.mxu0  ;;  %v7389_v4 = vpop.f32.mrf.mxu1 }
 0x3dc   : > { %10178 = vst [vmem:[#allocation170_spill] sm:$0xff] %v7387_v44  ;;  %v7391_v10 = vpop.f32.mrf.mxu3 }
 0x3dd   : > { %v2246_v21 = vpop.permute.xlu2 %2245  ;;  %10179 = vst [vmem:[#allocation171_spill] sm:$0xff] %v7389_v4  ;;  %v7393_v25 = vpop.f32.mrf.mxu2 }
 0x3de   : > { %10180 = vst [vmem:[#allocation172_spill] sm:$0xff] %v7391_v10 }
 0x3e3   : > { %v7396_v22 = vpop.f32.mrf.mxu0  ;;  %v7398_v27 = vpop.f32.mrf.mxu1 }
 0x3e4   : > { %v2268_v46 = vpop.permute.xlu1 %2267  ;;  %v2250_v2 = vpop.permute.xlu0 %2249 }
 0x3e5   : > { %v2292_v24 = vsel %vm2281_vm6, %v2268_v46, %v2270_v8  ;;  %v6006_v48 = vpop.permute.xlu2 %6005  ;;  %v1904_v10 = vpop.f32.mrf.mxu3 }
 0x3e6   : > { %v6008_v37 = vunpack.i.h.bf16 %v6006_v48  ;;  %v6007_v61 = vunpack.i.l.bf16 %v6006_v48  ;;  %2390 = vmatpush.bf16.msra.mxu2 %v2292_v24  ;;  %v7405_v45 = vpop.f32.mrf.mxu2 }
 0x3e7   : > { %10181 = vst [vmem:[#allocation173_spill] sm:$0xff] %v7405_v45 }
 0x3e8   : > { %v7402_v44 = vsel %vm360_vm0, %v7200_v49, %v6007_v61  ;;  %v2133_v4 = vsel %vm360_vm0, %v6007_v61, %v6008_v37 }
 0x3e9   : > { %v2150_v26 = vmul.f32 %v2133_v4, %v6695_v20  ;;  %v2159_v8 = vmul.f32 %v2133_v4, %v6711_v39  ;;  %v2167_v24 = vmul.f32 %v7402_v44, %v6649_v63  ;;  %v2176_v48 = vmul.f32 %v7402_v44, %v6652_v62 }
 0x3ea   : > { %v2168_v28 = vmul.f32 %v2133_v4, %v6661_v30  ;;  %v2177_v49 = vmul.f32 %v2133_v4, %v6664_v35  ;;  %v1351_v62 = vadd.f32 %v7111_v42, %v6872_v57  ;;  %v1380_v30 = vadd.f32 %v7118_v9, %v6875_v5 }
 0x3eb   : > { %v2186_v52 = vpack.c.bf16 %v2159_v8, %v2150_v26  ;;  %v2194_v53 = vpack.c.bf16 %v2176_v48, %v2167_v24  ;;  %v7424_v26 = vpop.f32.mrf.mxu0  ;;  %v7436_v57 = vpop.f32.mrf.mxu1  ;;  %v1409_v9 = vadd.f32 %v7153_v31, %v6882_v33 }
 0x3ec   : > { %v2266_v61 = vpop.permute.xlu1 %2265  ;;  %v2248_v23 = vpop.permute.xlu0 %2247  ;;  %v2195_v55 = vpack.c.bf16 %v2177_v49, %v2168_v28  ;;  %10182 = vst [vmem:[#allocation174_spill] sm:$0xff] %v7424_v26  ;;  %v7439_v42 = vadd.f32 %v1817_v56, %v1351_v62  ;;  %v2149_v49 = vmul.f32 %v7402_v44, %v6671_v51  ;;  %v10219_v26 = vld [vmem:[#allocation91_spill] sm:$0xff]  ;;  %v10267_v51 = vld [vmem:[#allocation166_spill] sm:$0xff] }
 0x3ed   : > { %v2290_v45 = vsel %vm2281_vm6, %v2264_v12, %v2266_v61  ;;  %v2291_v20 = vsel %vm2281_vm6, %v2266_v61, %v2268_v46  ;;  %2257 = vrot.lane.b32.xlu2 %v2186_v52, %s6070_s11  ;;  %2273 = vrot.lane.b32.xlu0 %v2194_v53, %s6070_s11  ;;  %v7426_v28 = vpop.f32.mrf.mxu3  ;;  %v2282_v46 = vsel %vm2281_vm6, %v2246_v21, %v2248_v23  ;;  %v7434_v52 = vld [vmem:[%s9821_s3 + $0x60] sm:$0xff] }
 0x3ee   : > { %2275 = vrot.lane.b32.xlu1 %v2195_v55, %s6070_s11  ;;  %2332 = vmatpush.bf16.msra.mxu0 %v2290_v45  ;;  %10183 = vst [vmem:[#allocation175_spill] sm:$0xff] %v7426_v28  ;;  %v7428_v12 = vpop.f32.mrf.mxu2  ;;  %v2283_v5 = vsel %vm2281_vm6, %v2248_v23, %v2250_v2  ;;  %v1438_v21 = vadd.f32 %v7168_v1, %v6884_v3  ;;  %v10218_v28 = vld [vmem:[#allocation88_spill] sm:$0xff] }
 0x3ef   : > { %2361 = vmatpush.bf16.msra.mxu1 %v2291_v20  ;;  %10184 = vst [vmem:[#allocation176_spill] sm:$0xff] %v7436_v57  ;;  %v7441_v20 = vadd.f32 %v1846_v13, %v1380_v30  ;;  %v7467_v23 = vadd.f32 %v7393_v25, %v1409_v9  ;;  %v2158_v61 = vmul.f32 %v7402_v44, %v6674_v34  ;;  %v10266_v34 = vld [vmem:[#allocation120_spill] sm:$0xff] }
 0x3f0   : > { %v7469_v24 = vadd.f32 %v1904_v10, %v1438_v21  ;;  %v10186_v10 = vld [vmem:[#allocation126_spill] sm:$0xff]  ;;  %v10187_v21 = vld [vmem:[#allocation24_spill] sm:$0xff]  ;;  %v1424_v57 = vadd.f32 %v7285_v14, %v10218_v28 }
 0x3f1   : > { %v1356_v9 = vadd.f32 %v10186_v10, %v6908_v60  ;;  %v10190_v60 = vld [vmem:[#allocation10_spill] sm:$0xff] }
 0x3f2   : > { %2333 = vmatpush.bf16.msra.mxu0 %v2282_v46  ;;  %v10221_v14 = vld [vmem:[#allocation14_spill] sm:$0xff] }
 0x3f3   : > { %2362 = vmatpush.bf16.msra.mxu1 %v2283_v5  ;;  %v1827_v48 = vpop.f32.mrf.mxu0  ;;  %v1856_v46 = vpop.f32.mrf.mxu1 }
 0x3f4   : > { %v2127_v55 = vpop.permute.xlu0 %2126  ;;  %v2252_v53 = vpop.permute.xlu1 %2251 }
 0x3f5   : > { %v2134_v45 = vsel %vm360_vm0, %v6008_v37, %v2127_v55  ;;  %v2284_v4 = vsel %vm2281_vm6, %v2250_v2, %v2252_v53  ;;  %v2170_v8 = vmul.f32 %v2127_v55, %v6918_v38  ;;  %v2179_v62 = vmul.f32 %v2127_v55, %v6921_v11  ;;  %5584 = vmatmul.msk.bf16.vlgmr.msra.gmra.mxu0 %vm360_vm0, %v7434_v52  ;;  %v1909_v31 = vpop.f32.mrf.mxu3  ;;  %v10269_v11 = vld [vmem:[#allocation168_spill] sm:$0xff] }
 0x3f6   : > { %2391 = vmatpush.bf16.msra.mxu2 %v2284_v4  ;;  %v2169_v30 = vmul.f32 %v2134_v45, %v6685_v40  ;;  %v2178_v13 = vmul.f32 %v2134_v45, %v6688_v19  ;;  %v2151_v56 = vmul.f32 %v2134_v45, %v6728_v6  ;;  %v2160_v33 = vmul.f32 %v2134_v45, %v6742_v32  ;;  %v7462_v1 = vpop.f32.mrf.mxu2 }
 0x3f7   : > { %v2197_v3 = vpack.c.bf16 %v2179_v62, %v2170_v8  ;;  %5588 = vmatmul.msk.bf16.vlgmr.msra.gmra.mxu1 %vm360_vm0, %v7434_v52  ;;  %10185 = vst [vmem:[#allocation177_spill] sm:$0xff] %v7462_v1  ;;  %v2152_v45 = vmul.f32 %v2127_v55, %v6942_v15  ;;  %v2161_v4 = vmul.f32 %v2127_v55, %v6945_v59  ;;  %v10188_v8 = vld [vmem:[#allocation127_spill] sm:$0xff] }
 0x3f8   : > { %v2196_v2 = vpack.c.bf16 %v2178_v13, %v2169_v30  ;;  %v2187_v37 = vpack.c.bf16 %v2160_v33, %v2151_v56  ;;  %v1385_v62 = vadd.f32 %v10188_v8, %v10187_v21  ;;  %v2185_v30 = vpack.c.bf16 %v2158_v61, %v2149_v49  ;;  %v7493_v55 = vld [vmem:[%s9821_s3 + $0x68] sm:$0xff]  ;;  %v10194_v61 = vld [vmem:[#allocation74_spill] sm:$0xff]  ;;  %v10199_v21 = vld [vmem:[#allocation28_spill] sm:$0xff] }
 0x3f9   : > { %2279 = vrot.lane.b32.xlu1 %v2197_v3, %s6070_s11  ;;  %5592 = vmatmul.msk.bf16.vlgmr.msra.gmra.mxu2 %vm360_vm0, %v7434_v52  ;;  %v2188_v13 = vpack.c.bf16 %v2161_v4, %v2152_v45  ;;  %v1443_v45 = vadd.f32 %v7222_v17, %v10194_v61  ;;  %v10196_v4 = vld [vmem:[#allocation3_spill] sm:$0xff]  ;;  %v1361_v8 = vadd.f32 %v7218_v58, %v10199_v21 }
 0x3fa   : > { %2277 = vrot.lane.b32.xlu2 %v2196_v2, %s6070_s11  ;;  %2259 = vrot.lane.b32.xlu0 %v2187_v37, %s6070_s11  ;;  %v7502_v56 = vadd.f32 %v7398_v27, %v1385_v62  ;;  %v10193_v37 = vld [vmem:[#allocation73_spill] sm:$0xff]  ;;  %v10195_v27 = vld [vmem:[#allocation4_spill] sm:$0xff]  ;;  %v10200_v62 = vld [vmem:[#allocation75_spill] sm:$0xff]  ;;  %v1540_v59 = vadd.f32 %v10267_v51, %v10266_v34 }
 0x3fb   : > { %v7504_v3 = vpop.f32.mrf.mxu0  ;;  %v7508_v2 = vpop.f32.mrf.mxu1  ;;  %v1414_v49 = vadd.f32 %v7196_v50, %v10193_v37  ;;  %v7527_v17 = vadd.f32 %v1909_v31, %v1443_v45  ;;  %v10201_v37 = vld [vmem:[#allocation5_spill] sm:$0xff]  ;;  %v10204_v58 = vld [vmem:[#allocation7_spill] sm:$0xff]  ;;  %v10205_v45 = vld [vmem:[#allocation80_spill] sm:$0xff] }
 0x3fc   : > { %v7475_v5 = vpop.permute.xlu1 %2253  ;;  %10191 = vst [vmem:[#allocation24_spill] sm:$0xff] %v7504_v3  ;;  %v1419_v21 = vadd.f32 %v7249_v43, %v10205_v45  ;;  %v10217_v3 = vld [vmem:[#allocation83_spill] sm:$0xff] }
 0x3fd   : > { %v2285_v25 = vsel %vm2281_vm6, %v2252_v53, %v7475_v5  ;;  %v7485_v44 = vpop.f32.mrf.mxu3  ;;  %v7499_v53 = vadd.f32 %v7396_v22, %v1356_v9  ;;  %10192 = vst [vmem:[#allocation127_spill] sm:$0xff] %v7508_v2  ;;  %v7525_v50 = vadd.f32 %v7428_v12, %v1414_v49  ;;  %v7542_v12 = vld [vmem:[%s9821_s3 + $0x70] sm:$0xff]  ;;  %v10203_v49 = vld [vmem:[#allocation2_spill] sm:$0xff]  ;;  %v1395_v1 = vadd.f32 %v7266_v47, %v10217_v3  ;;  %v10226_v3 = vld [vmem:[#allocation89_spill] sm:$0xff] }
 0x3fe   : > { %2420 = vmatpush.bf16.msra.mxu3 %v2285_v25  ;;  %10189 = vst [vmem:[#allocation126_spill] sm:$0xff] %v7485_v44  ;;  %v1885_v33 = vpop.f32.mrf.mxu2  ;;  %v10197_v25 = vld [vmem:[#allocation9_spill] sm:$0xff] }
 0x401   : > { %2255 = vrot.lane.b32.xlu1 %v2185_v30, %s6070_s11  ;;  %5596 = vmatmul.msk.bf16.vlgmr.msra.gmra.mxu3 %vm360_vm0, %v7434_v52  ;;  %v1390_v30 = vadd.f32 %v7220_v7, %v10200_v62  ;;  %v7550_v7 = vadd.f32 %v1827_v48, %v1361_v8  ;;  %v10206_v62 = vld [vmem:[#allocation81_spill] sm:$0xff]  ;;  %v10208_v48 = vld [vmem:[#allocation8_spill] sm:$0xff]  ;;  %v10210_v8 = vld [vmem:[#allocation6_spill] sm:$0xff] }
 0x402   : > { %2261 = vrot.lane.b32.xlu2 %v2188_v13, %s6070_s11  ;;  %2673 = vrot.lane.b32.xlu0 %v10190_v60, %s6071_s24 }
 0x403   : > { %v1832_v9 = vpop.f32.mrf.mxu0  ;;  %v1861_v13 = vpop.f32.mrf.mxu1  ;;  %v7552_v61 = vadd.f32 %v1856_v46, %v1390_v30  ;;  %v7568_v46 = vadd.f32 %v1885_v33, %v1419_v21  ;;  %v10211_v30 = vld [vmem:[#allocation11_spill] sm:$0xff]  ;;  %v7585_v33 = vld [vmem:[%s9821_s3 + $0x78] sm:$0xff]  ;;  %v10215_v21 = vld [vmem:[#allocation12_spill] sm:$0xff] }
 0x405   : > { %5585 = vmatmul.msk.bf16.gmra.mxu0 %vm360_vm0, %v7493_v55  ;;  %v1914_v22 = vpop.f32.mrf.mxu3 }
 0x406   : > { %v7529_v10 = vpop.f32.mrf.mxu2 }
 0x407   : > { %5589 = vmatmul.msk.bf16.gmra.mxu1 %vm360_vm0, %v7493_v55  ;;  %10198 = vst [vmem:[#allocation73_spill] sm:$0xff] %v7529_v10  ;;  %v1448_v10 = vadd.f32 %v7268_v18, %v10206_v62  ;;  %v10212_v62 = vld [vmem:[#allocation13_spill] sm:$0xff] }
 0x409   : > { %2675 = vrot.lane.b32.xlu1 %v10195_v27, %s6071_s24  ;;  %5593 = vmatmul.msk.bf16.gmra.mxu2 %vm360_vm0, %v7493_v55  ;;  %v7570_v43 = vadd.f32 %v1914_v22, %v1448_v10  ;;  %v10214_v10 = vld [vmem:[#allocation19_spill] sm:$0xff] }
 0x40a   : > { %2669 = vrot.lane.b32.xlu2 %v10196_v4, %s6071_s24  ;;  %2671 = vrot.lane.b32.xlu0 %v10197_v25, %s6071_s24 }
 0x40b   : > { %v7562_v44 = vpop.f32.mrf.mxu0  ;;  %v7572_v18 = vpop.f32.mrf.mxu1 }
 0x40c   : > { %10207 = vst [vmem:[#allocation28_spill] sm:$0xff] %v7562_v44  ;;  %v10216_v44 = vld [vmem:[#allocation82_spill] sm:$0xff] }
 0x40d   : > { %v7544_v31 = vpop.f32.mrf.mxu3  ;;  %10209 = vst [vmem:[#allocation75_spill] sm:$0xff] %v7572_v18  ;;  %v1366_v2 = vadd.f32 %v7260_v0, %v10216_v44 }
 0x40e   : > { %10202 = vst [vmem:[#allocation74_spill] sm:$0xff] %v7544_v31  ;;  %v1890_v31 = vpop.f32.mrf.mxu2 }
 0x40f   : > { %v7609_v0 = vadd.f32 %v1890_v31, %v1424_v57  ;;  %v10228_v31 = vld [vmem:[#allocation96_spill] sm:$0xff] }
 0x411   : > { %2677 = vrot.lane.b32.xlu1 %v10201_v37, %s6071_s24  ;;  %5597 = vmatmul.msk.bf16.gmra.mxu3 %vm360_vm0, %v7493_v55  ;;  %v10246_v37 = vld [vmem:[#allocation153_spill] sm:$0xff] }
 0x412   : > { %2655 = vrot.lane.b32.xlu2 %v10203_v49, %s6071_s24  ;;  %2657 = vrot.lane.b32.xlu0 %v10204_v58, %s6071_s24  ;;  %v10254_v49 = vld [vmem:[#allocation158_spill] sm:$0xff] }
 0x413   : > { %v1933_v18 = vpop.f32.mrf.mxu0 }
 0x415   : > { %5586 = vmatmul.msk.bf16.gmra.mxu0 %vm360_vm0, %v7542_v12  ;;  %v1919_v45 = vpop.f32.mrf.mxu3 }
 0x416   : > { %v7587_v22 = vpop.f32.mrf.mxu2 }
 0x417   : > { %5590 = vmatmul.msk.bf16.gmra.mxu1 %vm360_vm0, %v7542_v12  ;;  %10213 = vst [vmem:[#allocation80_spill] sm:$0xff] %v7587_v22  ;;  %v1962_v22 = vpop.f32.mrf.mxu1 }
 0x419   : > { %2651 = vrot.lane.b32.xlu1 %v10208_v48, %s6071_s24  ;;  %5594 = vmatmul.msk.bf16.gmra.mxu2 %vm360_vm0, %v7542_v12  ;;  %v7607_v48 = vadd.f32 %v1861_v13, %v1395_v1 }
 0x41a   : > { %2653 = vrot.lane.b32.xlu2 %v10210_v8, %s6071_s24  ;;  %2659 = vrot.lane.b32.xlu0 %v10211_v30, %s6071_s24  ;;  %v10242_v30 = vld [vmem:[#allocation150_spill] sm:$0xff] }
 0x41b   : > { %v7623_v57 = vpop.f32.mrf.mxu0 }
 0x41c   : > { %10224 = vst [vmem:[#allocation82_spill] sm:$0xff] %v7623_v57  ;;  %v10233_v57 = vld [vmem:[#allocation99_spill] sm:$0xff] }
 0x41e   : > { %v1991_v28 = vpop.f32.mrf.mxu2 }
 0x41f   : > { %v7625_v1 = vpop.f32.mrf.mxu1 }
 0x420   : > { %10225 = vst [vmem:[#allocation83_spill] sm:$0xff] %v7625_v1  ;;  %v10231_v1 = vld [vmem:[#allocation17_spill] sm:$0xff] }
 0x421   : > { %2681 = vrot.lane.b32.xlu1 %v10212_v62, %s6071_s24  ;;  %5598 = vmatmul.msk.bf16.gmra.mxu3 %vm360_vm0, %v7542_v12  ;;  %v1453_v62 = vadd.f32 %v7291_v36, %v10219_v26  ;;  %v10222_v36 = vld [vmem:[#allocation16_spill] sm:$0xff]  ;;  %v10223_v26 = vld [vmem:[#allocation15_spill] sm:$0xff] }
 0x422   : > { %2683 = vrot.lane.b32.xlu2 %v10214_v10, %s6071_s24  ;;  %2679 = vrot.lane.b32.xlu0 %v10215_v21, %s6071_s24  ;;  %v7603_v10 = vpop.f32.mrf.mxu3  ;;  %v7605_v21 = vadd.f32 %v1832_v9, %v1366_v2  ;;  %v1467_v2 = vadd.f32 %v7287_v54, %v10226_v3  ;;  %v10227_v9 = vld [vmem:[#allocation90_spill] sm:$0xff] }
 0x423   : > { %10220 = vst [vmem:[#allocation81_spill] sm:$0xff] %v7603_v10  ;;  %v7613_v47 = vadd.f32 %v1919_v45, %v1453_v62  ;;  %v1496_v13 = vadd.f32 %v7289_v16, %v10227_v9  ;;  %v1525_v45 = vadd.f32 %v7309_v29, %v10228_v31  ;;  %v10229_v62 = vld [vmem:[#allocation18_spill] sm:$0xff]  ;;  %v10230_v10 = vld [vmem:[#allocation21_spill] sm:$0xff]  ;;  %v1938_v9 = vpop.f32.mrf.mxu0 }
 0x424   : > { %v7641_v54 = vadd.f32 %v1933_v18, %v1467_v2  ;;  %v10238_v2 = vld [vmem:[#allocation144_spill] sm:$0xff] }
 0x425   : > { %5587 = vmatmul.msk.bf16.gmra.mxu0 %vm360_vm0, %v7585_v33  ;;  %v7643_v3 = vadd.f32 %v1962_v22, %v1496_v13  ;;  %v7645_v16 = vadd.f32 %v1991_v28, %v1525_v45  ;;  %v10237_v28 = vld [vmem:[#allocation97_spill] sm:$0xff]  ;;  %v10239_v45 = vld [vmem:[#allocation98_spill] sm:$0xff] }
 0x426   : > { %v7647_v29 = vpop.f32.mrf.mxu2  ;;  %v1472_v13 = vadd.f32 %v10238_v2, %v10237_v28 }
 0x427   : > { %5591 = vmatmul.msk.bf16.gmra.mxu1 %vm360_vm0, %v7585_v33  ;;  %10232 = vst [vmem:[#allocation88_spill] sm:$0xff] %v7647_v29  ;;  %v1967_v31 = vpop.f32.mrf.mxu1  ;;  %v10240_v29 = vld [vmem:[#allocation145_spill] sm:$0xff] }
 0x428   : > { %v7669_v8 = vadd.f32 %v1938_v9, %v1472_v13 }
 0x429   : > { %2685 = vrot.lane.b32.xlu1 %v10221_v14, %s6071_s24  ;;  %5595 = vmatmul.msk.bf16.gmra.mxu2 %vm360_vm0, %v7585_v33  ;;  %v10234_v14 = vld [vmem:[#allocation20_spill] sm:$0xff] }
 0x42a   : > { %2663 = vrot.lane.b32.xlu2 %v10222_v36, %s6071_s24  ;;  %2665 = vrot.lane.b32.xlu0 %v10223_v26, %s6071_s24  ;;  %v2020_v44 = vpop.f32.mrf.mxu3  ;;  %v1501_v26 = vadd.f32 %v10240_v29, %v10239_v45  ;;  %v10241_v36 = vld [vmem:[#allocation104_spill] sm:$0xff] }
 0x42e   : > { %v1996_v22 = vpop.f32.mrf.mxu2 }
 0x431   : > { %2661 = vrot.lane.b32.xlu1 %v10229_v62, %s6071_s24  ;;  %5599 = vmatmul.msk.bf16.gmra.mxu3 %vm360_vm0, %v7585_v33  ;;  %v1554_v62 = vadd.f32 %v7315_v41, %v10233_v57  ;;  %v1530_v41 = vadd.f32 %v10242_v30, %v10241_v36  ;;  %v7665_v57 = vpop.f32.mrf.mxu0 }
 0x432   : > { %2667 = vrot.lane.b32.xlu2 %v10230_v10, %s6071_s24  ;;  %6010 = vrot.lane.b32.xlu0 %v10231_v1, %s6072_s29  ;;  %v7653_v10 = vpop.f32.mrf.mxu3  ;;  %v10236_v1 = vld [vmem:[#allocation22_spill] sm:$0xff]  ;;  %10243 = vst [vmem:[#allocation89_spill] sm:$0xff] %v7665_v57  ;;  %v10250_v57 = vld [vmem:[#allocation151_spill] sm:$0xff] }
 0x433   : > { %10235 = vst [vmem:[#allocation91_spill] sm:$0xff] %v7653_v10  ;;  %v7657_v18 = vadd.f32 %v2020_v44, %v1554_v62  ;;  %v7673_v44 = vadd.f32 %v1996_v22, %v1530_v41  ;;  %v10245_v62 = vld [vmem:[#allocation107_spill] sm:$0xff]  ;;  %v10253_v41 = vld [vmem:[#allocation112_spill] sm:$0xff] }
 0x434   : > { %v1559_v28 = vadd.f32 %v10246_v37, %v10245_v62  ;;  %v1535_v27 = vadd.f32 %v10254_v49, %v10253_v41 }
 0x436   : > { %v7677_v2 = vpop.f32.mrf.mxu2 }
 0x437   : > { %10247 = vst [vmem:[#allocation96_spill] sm:$0xff] %v7677_v2 }
 0x439   : > { %6015 = vrot.lane.b32.xlu1 %v10234_v14, %s6072_s29  ;;  %v7667_v14 = vpop.f32.mrf.mxu1  ;;  %v1943_v29 = vpop.f32.mrf.mxu0 }
 0x43a   : > { %3036 = vrot.lane.b32.xlu2 %v10236_v1, %s6072_s29  ;;  %10244 = vst [vmem:[#allocation90_spill] sm:$0xff] %v7667_v14  ;;  %v2025_v10 = vpop.f32.mrf.mxu3  ;;  %v7671_v1 = vadd.f32 %v1967_v31, %v1501_v26  ;;  %v10249_v14 = vld [vmem:[#allocation105_spill] sm:$0xff]  ;;  %v10251_v26 = vld [vmem:[#allocation106_spill] sm:$0xff]  ;;  %v10252_v31 = vld [vmem:[#allocation152_spill] sm:$0xff] }
 0x43b   : > { %v7679_v58 = vadd.f32 %v2025_v10, %v1559_v28  ;;  %v1477_v9 = vadd.f32 %v10250_v57, %v10249_v14  ;;  %v1506_v22 = vadd.f32 %v10252_v31, %v10251_v26  ;;  %v10257_v14 = vld [vmem:[#allocation115_spill] sm:$0xff]  ;;  %v10258_v57 = vld [vmem:[#allocation161_spill] sm:$0xff] }
 0x43c   : > { %v1564_v4 = vadd.f32 %v10258_v57, %v10257_v14  ;;  %v10264_v14 = vld [vmem:[#allocation114_spill] sm:$0xff]  ;;  %v10265_v57 = vld [vmem:[#allocation160_spill] sm:$0xff] }
 0x43d   : > { %v7691_v62 = vadd.f32 %v1943_v29, %v1477_v9  ;;  %v10260_v9 = vld [vmem:[#allocation167_spill] sm:$0xff] }
 0x43e   : > { %v2001_v13 = vpop.f32.mrf.mxu2 }
 0x43f   : > { %v7697_v25 = vadd.f32 %v2001_v13, %v1535_v27 }
 0x441   : > { %v1972_v45 = vpop.f32.mrf.mxu1  ;;  %v7689_v37 = vpop.f32.mrf.mxu0 }
 0x442   : > { %v7681_v30 = vpop.f32.mrf.mxu3  ;;  %10255 = vst [vmem:[#allocation97_spill] sm:$0xff] %v7689_v37 }
 0x443   : > { %10248 = vst [vmem:[#allocation99_spill] sm:$0xff] %v7681_v30  ;;  %v7695_v30 = vadd.f32 %v1972_v45, %v1506_v22  ;;  %v10262_v22 = vld [vmem:[#allocation113_spill] sm:$0xff] }
 0x446   : > { %v7703_v26 = vpop.f32.mrf.mxu2 }
 0x447   : > { %v2258_v36 = vpop.permute.xlu2 %2257  ;;  %10259 = vst [vmem:[#allocation98_spill] sm:$0xff] %v7703_v26  ;;  %v1511_v26 = vadd.f32 %v10265_v57, %v10264_v14 }
 0x449   : > { %v7693_v2 = vpop.f32.mrf.mxu1  ;;  %v1948_v49 = vpop.f32.mrf.mxu0 }
 0x44a   : > { %10256 = vst [vmem:[#allocation144_spill] sm:$0xff] %v7693_v2  ;;  %v2030_v28 = vpop.f32.mrf.mxu3 }
 0x44b   : > { %v7701_v60 = vadd.f32 %v2030_v28, %v1564_v4  ;;  %v10263_v4 = vld [vmem:[#allocation159_spill] sm:$0xff] }
 0x44c   : > { %v1482_v28 = vadd.f32 %v10263_v4, %v10262_v22 }
 0x44e   : > { %v2006_v15 = vpop.f32.mrf.mxu2 }
 0x451   : > { %v1977_v41 = vpop.f32.mrf.mxu1  ;;  %v7725_v38 = vpop.f32.mrf.mxu0 }
 0x452   : > { %v7709_v13 = vpop.f32.mrf.mxu3  ;;  %10270 = vst [vmem:[#allocation104_spill] sm:$0xff] %v7725_v38 }
 0x453   : > { %10261 = vst [vmem:[#allocation145_spill] sm:$0xff] %v7709_v13  ;;  %v7723_v13 = vadd.f32 %v2006_v15, %v1540_v59 }
 0x454   : > { %v2278_v10 = vpop.permute.xlu2 %2277 }
 0x45a   : > { %v2035_v4 = vpop.f32.mrf.mxu3 }
 0x45c   : > { %v2262_v29 = vpop.permute.xlu2 %2261 }
 0x45f   : > { %v2274_v31 = vpop.permute.xlu0 %2273 }
 0x460   : > { %v2294_v2 = vsel %vm2281_vm6, %v10260_v9, %v2274_v31  ;;  %v2276_v37 = vpop.permute.xlu1 %2275  ;;  %v7717_v9 = vadd.f32 %v1948_v49, %v1482_v28 }
 0x461   : > { %v2295_v45 = vsel %vm2281_vm6, %v2274_v31, %v2276_v37  ;;  %v2296_v27 = vsel %vm2281_vm6, %v2276_v37, %v2278_v10  ;;  %2448 = vmatpush.bf16.msrb.mxu0 %v2294_v2  ;;  %v10268_v31 = vld [vmem:[#allocation121_spill] sm:$0xff]  ;;  %v7721_v2 = vadd.f32 %v1977_v41, %v1511_v26  ;;  %v7736_v26 = vpop.f32.mrf.mxu2 }
 0x462   : > { %2477 = vmatpush.bf16.msrb.mxu1 %v2295_v45  ;;  %2506 = vmatpush.bf16.msrb.mxu2 %v2296_v27  ;;  %v1569_v37 = vadd.f32 %v10269_v11, %v10268_v31  ;;  %v7727_v27 = vpop.f32.mrf.mxu1  ;;  %10272 = vst [vmem:[#allocation107_spill] sm:$0xff] %v7736_v26  ;;  %v10293_v26 = vld [vmem:[#allocation34_spill] sm:$0xff] }
 0x463   : > { %10271 = vst [vmem:[#allocation150_spill] sm:$0xff] %v7727_v27 }
 0x464   : > { %v2670_v45 = vpop.permute.xlu2 %2669  ;;  %v7730_v51 = vadd.f32 %v2035_v4, %v1569_v37  ;;  %v7755_v4 = vpop.f32.mrf.mxu3 }
 0x465   : > { %10274 = vst [vmem:[#allocation105_spill] sm:$0xff] %v7755_v4  ;;  %v10292_v4 = vld [vmem:[#allocation33_spill] sm:$0xff] }
 0x46b   : > { %v2280_v22 = vpop.permute.xlu1 %2279 }
 0x46c   : > { %v2297_v14 = vsel %vm2281_vm6, %v2278_v10, %v2280_v22  ;;  %v2260_v34 = vpop.permute.xlu0 %2259  ;;  %v2656_v10 = vpop.permute.xlu2 %2655 }
 0x46d   : > { %2535 = vmatpush.bf16.msrb.mxu3 %v2297_v14  ;;  %v2288_v49 = vsel %vm2281_vm6, %v2258_v36, %v2260_v34  ;;  %v2289_v11 = vsel %vm2281_vm6, %v2260_v34, %v2262_v29 }
 0x46e   : > { %2507 = vmatpush.bf16.msrb.mxu2 %v2288_v49 }
 0x471   : > { %5608 = vmatmul.msk.bf16.vlgmr.msrb.gmra.mxu2 %vm360_vm0, %v7434_v52  ;;  %2536 = vmatpush.bf16.msrb.mxu3 %v2289_v11 }
 0x472   : > { %v2335_v15 = vpop.f32.mrf.mxu0 }
 0x473   : > { %v2256_v59 = vpop.permute.xlu1 %2255  ;;  %v7739_v41 = vadd.f32 %v2335_v15, %v7439_v42 }
 0x474   : > { %v2674_v28 = vpop.permute.xlu0 %2673  ;;  %5612 = vmatmul.msk.bf16.vlgmr.msrb.gmra.mxu3 %vm360_vm0, %v7434_v52  ;;  %v2286_v57 = vsel %vm2281_vm6, %v7475_v5, %v2256_v59  ;;  %v2287_v29 = vsel %vm2281_vm6, %v2256_v59, %v2258_v36  ;;  %v2364_v31 = vpop.f32.mrf.mxu1 }
 0x475   : > { %2449 = vmatpush.bf16.msrb.mxu0 %v2286_v57  ;;  %2478 = vmatpush.bf16.msrb.mxu1 %v2287_v29  ;;  %v7747_v37 = vadd.f32 %v2364_v31, %v7441_v20  ;;  %v2654_v11 = vpop.permute.xlu2 %2653 }
 0x476   : > { %v2689_v15 = vsel %vm2687_vm7, %v2654_v11, %v2656_v10 }
 0x478   : > { %5600 = vmatmul.msk.bf16.vlgmr.msrb.gmra.mxu0 %vm360_vm0, %v7434_v52  ;;  %5604 = vmatmul.msk.bf16.vlgmr.msrb.gmra.mxu1 %vm360_vm0, %v7434_v52 }
 0x47a   : > { %v7753_v42 = vpop.f32.mrf.mxu0 }
 0x47b   : > { %10273 = vst [vmem:[#allocation153_spill] sm:$0xff] %v7753_v42  ;;  %v2676_v22 = vpop.permute.xlu1 %2675  ;;  %v10291_v42 = vld [vmem:[#allocation37_spill] sm:$0xff] }
 0x47c   : > { %v2698_v5 = vsel %vm2687_vm7, %v2674_v28, %v2676_v22  ;;  %v2672_v36 = vpop.permute.xlu0 %2671  ;;  %v2393_v34 = vpop.f32.mrf.mxu2 }
 0x47d   : > { %v2696_v14 = vsel %vm2687_vm7, %v2670_v45, %v2672_v36  ;;  %v2697_v20 = vsel %vm2687_vm7, %v2672_v36, %v2674_v28  ;;  %2796 = vmatpush.bf16.msra.mxu2 %v2698_v5  ;;  %v7760_v49 = vpop.f32.mrf.mxu1  ;;  %v7763_v52 = vadd.f32 %v2393_v34, %v7467_v23 }
 0x47e   : > { %10275 = vst [vmem:[#allocation151_spill] sm:$0xff] %v7760_v49  ;;  %2738 = vmatpush.bf16.msra.mxu0 %v2696_v14  ;;  %2767 = vmatpush.bf16.msra.mxu1 %v2697_v20 }
 0x481   : > { %5609 = vmatmul.msk.bf16.gmra.mxu2 %vm360_vm0, %v7493_v55 }
 0x482   : > { %2768 = vmatpush.bf16.msra.mxu1 %v2689_v15  ;;  %v2340_v59 = vpop.f32.mrf.mxu0 }
 0x483   : > { %v2678_v45 = vpop.permute.xlu1 %2677  ;;  %v7769_v28 = vadd.f32 %v2340_v59, %v7499_v53 }
 0x484   : > { %v2699_v57 = vsel %vm2687_vm7, %v2676_v22, %v2678_v45  ;;  %v2658_v29 = vpop.permute.xlu0 %2657  ;;  %5613 = vmatmul.msk.bf16.gmra.mxu3 %vm360_vm0, %v7493_v55  ;;  %v2422_v31 = vpop.f32.mrf.mxu3 }
 0x485   : > { %2825 = vmatpush.bf16.msra.mxu3 %v2699_v57  ;;  %v2690_v23 = vsel %vm2687_vm7, %v2656_v10, %v2658_v29  ;;  %v7775_v5 = vpop.f32.mrf.mxu2  ;;  %v7778_v36 = vadd.f32 %v2422_v31, %v7469_v24  ;;  %v2369_v14 = vpop.f32.mrf.mxu1 }
 0x486   : > { %10276 = vst [vmem:[#allocation106_spill] sm:$0xff] %v7775_v5  ;;  %2797 = vmatpush.bf16.msra.mxu2 %v2690_v23  ;;  %v7781_v53 = vadd.f32 %v2369_v14, %v7502_v56  ;;  %v2684_v22 = vpop.permute.xlu2 %2683 }
 0x488   : > { %5601 = vmatmul.msk.bf16.gmra.mxu0 %vm360_vm0, %v7493_v55  ;;  %5605 = vmatmul.msk.bf16.gmra.mxu1 %vm360_vm0, %v7493_v55 }
 0x48a   : > { %v7787_v20 = vpop.f32.mrf.mxu0 }
 0x48b   : > { %10277 = vst [vmem:[#allocation152_spill] sm:$0xff] %v7787_v20  ;;  %v2652_v10 = vpop.permute.xlu1 %2651  ;;  %v10289_v20 = vld [vmem:[#allocation32_spill] sm:$0xff] }
 0x48c   : > { %v2660_v34 = vpop.permute.xlu0 %2659  ;;  %v2688_v15 = vsel %vm2687_vm7, %v2652_v10, %v2654_v11  ;;  %v7791_v59 = vpop.f32.mrf.mxu3 }
 0x48d   : > { %2739 = vmatpush.bf16.msra.mxu0 %v2688_v15  ;;  %v2691_v24 = vsel %vm2687_vm7, %v2658_v29, %v2660_v34  ;;  %10278 = vst [vmem:[#allocation112_spill] sm:$0xff] %v7791_v59  ;;  %v2398_v56 = vpop.f32.mrf.mxu2  ;;  %v7796_v23 = vpop.f32.mrf.mxu1 }
 0x48e   : > { %2826 = vmatpush.bf16.msra.mxu3 %v2691_v24  ;;  %v7794_v57 = vadd.f32 %v2398_v56, %v7525_v50  ;;  %10279 = vst [vmem:[#allocation158_spill] sm:$0xff] %v7796_v23  ;;  %v2664_v11 = vpop.permute.xlu2 %2663 }
 0x491   : > { %5610 = vmatmul.msk.bf16.gmra.mxu2 %vm360_vm0, %v7542_v12 }
 0x492   : > { %v2345_v55 = vpop.f32.mrf.mxu0 }
 0x493   : > { %v2682_v31 = vpop.permute.xlu1 %2681  ;;  %v7801_v14 = vadd.f32 %v2345_v55, %v7550_v7 }
 0x494   : > { %v2702_v29 = vsel %vm2687_vm7, %v2682_v31, %v2684_v22  ;;  %v2680_v10 = vpop.permute.xlu0 %2679  ;;  %5614 = vmatmul.msk.bf16.gmra.mxu3 %vm360_vm0, %v7542_v12  ;;  %v2427_v24 = vpop.f32.mrf.mxu3 }
 0x495   : > { %v2700_v50 = vsel %vm2687_vm7, %v2678_v45, %v2680_v10  ;;  %v2701_v15 = vsel %vm2687_vm7, %v2680_v10, %v2682_v31  ;;  %2912 = vmatpush.bf16.msrb.mxu2 %v2702_v29  ;;  %v7808_v56 = vpop.f32.mrf.mxu2  ;;  %v7811_v7 = vadd.f32 %v2427_v24, %v7527_v17  ;;  %v2374_v55 = vpop.f32.mrf.mxu1 }
 0x496   : > { %10280 = vst [vmem:[#allocation115_spill] sm:$0xff] %v7808_v56  ;;  %2854 = vmatpush.bf16.msrb.mxu0 %v2700_v50  ;;  %2883 = vmatpush.bf16.msrb.mxu1 %v2701_v15  ;;  %v7814_v59 = vadd.f32 %v2374_v55, %v7552_v61  ;;  %v2668_v55 = vpop.permute.xlu2 %2667  ;;  %v10288_v56 = vld [vmem:[#allocation31_spill] sm:$0xff] }
 0x498   : > { %5602 = vmatmul.msk.bf16.gmra.mxu0 %vm360_vm0, %v7542_v12  ;;  %5606 = vmatmul.msk.bf16.gmra.mxu1 %vm360_vm0, %v7542_v12 }
 0x49a   : > { %v7820_v45 = vpop.f32.mrf.mxu0 }
 0x49b   : > { %10281 = vst [vmem:[#allocation161_spill] sm:$0xff] %v7820_v45  ;;  %v2686_v31 = vpop.permute.xlu1 %2685 }
 0x49c   : > { %v2703_v29 = vsel %vm2687_vm7, %v2684_v22, %v2686_v31  ;;  %v2666_v10 = vpop.permute.xlu0 %2665  ;;  %v7824_v50 = vpop.f32.mrf.mxu3 }
 0x49d   : > { %2941 = vmatpush.bf16.msrb.mxu3 %v2703_v29  ;;  %v2694_v17 = vsel %vm2687_vm7, %v2664_v11, %v2666_v10  ;;  %10282 = vst [vmem:[#allocation167_spill] sm:$0xff] %v7824_v50  ;;  %v2403_v15 = vpop.f32.mrf.mxu2  ;;  %v7829_v24 = vpop.f32.mrf.mxu1  ;;  %v2695_v12 = vsel %vm2687_vm7, %v2666_v10, %v2668_v55 }
 0x49e   : > { %2913 = vmatpush.bf16.msrb.mxu2 %v2694_v17  ;;  %v7827_v61 = vadd.f32 %v2403_v15, %v7568_v46  ;;  %10283 = vst [vmem:[#allocation113_spill] sm:$0xff] %v7829_v24 }
 0x4a1   : > { %5611 = vmatmul.msk.bf16.gmra.mxu2 %vm360_vm0, %v7585_v33  ;;  %2942 = vmatpush.bf16.msrb.mxu3 %v2695_v12 }
 0x4a2   : > { %v2350_v22 = vpop.f32.mrf.mxu0 }
 0x4a3   : > { %v2662_v31 = vpop.permute.xlu1 %2661  ;;  %v7835_v29 = vadd.f32 %v2350_v22, %v7605_v21 }
 0x4a4   : > { %v6011_v50 = vpop.permute.xlu0 %6010  ;;  %5615 = vmatmul.msk.bf16.gmra.mxu3 %vm360_vm0, %v7585_v33  ;;  %v2692_v46 = vsel %vm2687_vm7, %v2660_v34, %v2662_v31  ;;  %v2693_v17 = vsel %vm2687_vm7, %v2662_v31, %v2664_v11  ;;  %v2432_v55 = vpop.f32.mrf.mxu3  ;;  %v10284_v34 = vld [vmem:[#allocation25_spill] sm:$0xff] }
 0x4a5   : > { %v6013_v15 = vunpack.i.h.bf16 %v6011_v50  ;;  %v6012_v10 = vunpack.i.l.bf16 %v6011_v50  ;;  %2855 = vmatpush.bf16.msrb.mxu0 %v2692_v46  ;;  %2884 = vmatpush.bf16.msrb.mxu1 %v2693_v17  ;;  %v7842_v12 = vadd.f32 %v2432_v55, %v7570_v43  ;;  %v2379_v24 = vpop.f32.mrf.mxu1  ;;  %v10285_v50 = vld [vmem:[#allocation26_spill] sm:$0xff]  ;;  %v7854_v46 = vpop.f32.mrf.mxu2 }
 0x4a6   : > { %v7846_v22 = vadd.f32 %v2379_v24, %v7607_v48  ;;  %10286 = vst [vmem:[#allocation159_spill] sm:$0xff] %v7854_v46  ;;  %v7860_v48 = vld [vmem:[%s9821_s3 + $0x80] sm:$0xff] }
 0x4a7   : > { %v3046_v21 = vsel %vm3044_vm8, %v6012_v10, %v6013_v15 }
 0x4a8   : > { %5603 = vmatmul.msk.bf16.gmra.mxu0 %vm360_vm0, %v7585_v33  ;;  %5607 = vmatmul.msk.bf16.gmra.mxu1 %vm360_vm0, %v7585_v33  ;;  %v3081_v11 = vmul.f32 %v3046_v21, %v10284_v34  ;;  %v3090_v31 = vmul.f32 %v3046_v21, %v10285_v50 }
 0x4aa   : > { %v3108_v43 = vpack.c.bf16 %v3090_v31, %v3081_v11  ;;  %v7867_v11 = vpop.permute.xlu2 %3036 }
 0x4ab   : > { %v6016_v17 = vpop.permute.xlu1 %6015 }
 0x4ac   : > { %v6018_v55 = vunpack.i.h.bf16 %v6016_v17  ;;  %v6017_v45 = vunpack.i.l.bf16 %v6016_v17  ;;  %3184 = vrot.lane.b32.xlu0 %v3108_v43, %s6073_s30  ;;  %v7862_v24 = vpop.f32.mrf.mxu3  ;;  %v10290_v17 = vld [vmem:[#allocation36_spill] sm:$0xff] }
 0x4ad   : > { %10287 = vst [vmem:[#allocation114_spill] sm:$0xff] %v7862_v24  ;;  %v2408_v38 = vpop.f32.mrf.mxu2 }
 0x4ae   : > { %v3047_v33 = vsel %vm3044_vm8, %v6013_v15, %v6017_v45  ;;  %v3079_v23 = vmul.f32 %v6018_v55, %v10288_v56  ;;  %v3088_v46 = vmul.f32 %v6018_v55, %v10289_v20  ;;  %v3045_v49 = vsel %vm3044_vm8, %v6018_v55, %v6012_v10  ;;  %v10294_v10 = vld [vmem:[#allocation27_spill] sm:$0xff]  ;;  %v10299_v56 = vld [vmem:[#allocation57_spill] sm:$0xff] }
 0x4af   : > { %v3082_v5 = vmul.f32 %v3047_v33, %v10290_v17  ;;  %v3091_v43 = vmul.f32 %v3047_v33, %v10291_v42  ;;  %v3080_v24 = vmul.f32 %v3045_v49, %v10292_v4  ;;  %v3089_v15 = vmul.f32 %v3045_v49, %v10293_v26  ;;  %v10295_v17 = vld [vmem:[#allocation30_spill] sm:$0xff]  ;;  %v10297_v4 = vld [vmem:[#allocation43_spill] sm:$0xff] }
 0x4b0   : > { %v3106_v31 = vpack.c.bf16 %v3088_v46, %v3079_v23  ;;  %v3048_v23 = vsel %vm3044_vm8, %v6017_v45, %v7867_v11  ;;  %v3063_v42 = vmul.f32 %v3046_v21, %v10294_v10  ;;  %v3072_v20 = vmul.f32 %v3046_v21, %v10295_v17 }
 0x4b1   : > { %5648 = vmatmul.msk.bf16.vlgmr.msra.gmra.mxu2 %vm360_vm0, %v7860_v48  ;;  %v3109_v27 = vpack.c.bf16 %v3091_v43, %v3082_v5  ;;  %v3107_v46 = vpack.c.bf16 %v3089_v15, %v3080_v24  ;;  %v7886_v26 = vadd.f32 %v2408_v38, %v7609_v0  ;;  %v3092_v45 = vmul.f32 %v3048_v23, %v10297_v4 }
 0x4b2   : > { %3180 = vrot.lane.b32.xlu2 %v3106_v31, %s6073_s30  ;;  %v10296_v31 = vld [vmem:[#allocation42_spill] sm:$0xff]  ;;  %v3073_v50 = vmul.f32 %v3047_v33, %v10299_v56  ;;  %v3099_v38 = vpack.c.bf16 %v3072_v20, %v3063_v42  ;;  %v10302_v56 = vld [vmem:[#allocation44_spill] sm:$0xff] }
 0x4b3   : > { %3186 = vrot.lane.b32.xlu1 %v3109_v27, %s6073_s30  ;;  %v3083_v43 = vmul.f32 %v3048_v23, %v10296_v31  ;;  %v10298_v27 = vld [vmem:[#allocation49_spill] sm:$0xff]  ;;  %v10304_v20 = vld [vmem:[#allocation48_spill] sm:$0xff] }
 0x4b4   : > { %5652 = vmatmul.msk.bf16.vlgmr.msra.gmra.mxu3 %vm360_vm0, %v7860_v48  ;;  %3182 = vrot.lane.b32.xlu0 %v3107_v46, %s6073_s30  ;;  %v2437_v5 = vpop.f32.mrf.mxu3  ;;  %v3064_v15 = vmul.f32 %v3047_v33, %v10298_v27  ;;  %v10300_v46 = vld [vmem:[#allocation46_spill] sm:$0xff]  ;;  %v5935_v33 = vld [vmem:[%s9821_s3 + $0x88] sm:$0xff]  ;;  %v3061_v27 = vmul.f32 %v6018_v55, %v10302_v56  ;;  %v10303_v31 = vld [vmem:[#allocation45_spill] sm:$0xff] }
 0x4b5   : > { %v7891_v24 = vadd.f32 %v2437_v5, %v7613_v47  ;;  %v3110_v0 = vpack.c.bf16 %v3092_v45, %v3083_v43  ;;  %v3062_v47 = vmul.f32 %v3045_v49, %v10300_v46  ;;  %v10301_v5 = vld [vmem:[#allocation47_spill] sm:$0xff]  ;;  %v3070_v42 = vmul.f32 %v6018_v55, %v10303_v31  ;;  %v10305_v43 = vld [vmem:[#allocation50_spill] sm:$0xff] }
 0x4b6   : > { %v3100_v21 = vpack.c.bf16 %v3073_v50, %v3064_v15  ;;  %v3071_v4 = vmul.f32 %v3045_v49, %v10301_v5  ;;  %v3074_v50 = vmul.f32 %v3048_v23, %v10305_v43  ;;  %v10306_v55 = vld [vmem:[#allocation38_spill] sm:$0xff] }
 0x4b7   : > { %v3097_v49 = vpack.c.bf16 %v3070_v42, %v3061_v27  ;;  %v7932_v27 = vld [vmem:[%s9821_s3 + $0x98] sm:$0xff] }
 0x4b8   : > { %5640 = vmatmul.msk.bf16.vlgmr.msra.gmra.mxu0 %vm360_vm0, %v7860_v48  ;;  %5644 = vmatmul.msk.bf16.vlgmr.msra.gmra.mxu1 %vm360_vm0, %v7860_v48  ;;  %v3098_v45 = vpack.c.bf16 %v3071_v4, %v3062_v47  ;;  %v10307_v4 = vld [vmem:[#allocation39_spill] sm:$0xff]  ;;  %v7946_v47 = vpop.f32.mrf.mxu1 }
 0x4b9   : > { %10310 = vst [vmem:[#allocation166_spill] sm:$0xff] %v7946_v47 }
 0x4ba   : > { %3166 = vrot.lane.b32.xlu2 %v3099_v38, %s6073_s30  ;;  %v3065_v38 = vmul.f32 %v3048_v23, %v10304_v20  ;;  %v5936_v23 = vld [vmem:[%s9821_s3 + $0x90] sm:$0xff] }
 0x4bb   : > { %3188 = vrot.lane.b32.xlu1 %v3110_v0, %s6073_s30  ;;  %v7942_v0 = vpop.f32.mrf.mxu2 }
 0x4bc   : > { %3168 = vrot.lane.b32.xlu0 %v3100_v21, %s6073_s30  ;;  %v3101_v15 = vpack.c.bf16 %v3074_v50, %v3065_v38  ;;  %10308 = vst [vmem:[#allocation160_spill] sm:$0xff] %v7942_v0  ;;  %v7944_v21 = vpop.f32.mrf.mxu0  ;;  %v7948_v42 = vpop.f32.mrf.mxu3 }
 0x4bd   : > { %10309 = vst [vmem:[#allocation120_spill] sm:$0xff] %v7944_v21 }
 0x4be   : > { %10311 = vst [vmem:[#allocation121_spill] sm:$0xff] %v7948_v42 }
 0x4c1   : > { %5649 = vmatmul.msk.bf16.gmra.mxu2 %vm360_vm0, %v5935_v33 }
 0x4c2   : > { %3164 = vrot.lane.b32.xlu2 %v3098_v45, %s6073_s30 }
 0x4c3   : > { %3162 = vrot.lane.b32.xlu1 %v3097_v49, %s6073_s30 }
 0x4c4   : > { %5653 = vmatmul.msk.bf16.gmra.mxu3 %vm360_vm0, %v5935_v33  ;;  %3170 = vrot.lane.b32.xlu0 %v3101_v15, %s6073_s30 }
 0x4c8   : > { %5641 = vmatmul.msk.bf16.gmra.mxu0 %vm360_vm0, %v5935_v33  ;;  %5645 = vmatmul.msk.bf16.gmra.mxu1 %vm360_vm0, %v5935_v33 }
 0x4ca   : > { %3042 = vrot.lane.b32.xlu2 %v10306_v55, %s6072_s29 }
 0x4cb   : > { %6020 = vrot.lane.b32.xlu1 %v10307_v4, %s6072_s29 }
 0x4d1   : > { %5650 = vmatmul.msk.bf16.gmra.mxu2 %vm360_vm0, %v5936_v23 }
 0x4d4   : > { %5654 = vmatmul.msk.bf16.gmra.mxu3 %vm360_vm0, %v5936_v23 }
 0x4d8   : > { %5642 = vmatmul.msk.bf16.gmra.mxu0 %vm360_vm0, %v5936_v23  ;;  %5646 = vmatmul.msk.bf16.gmra.mxu1 %vm360_vm0, %v5936_v23 }
 0x4e1   : > { %5651 = vmatmul.msk.bf16.gmra.mxu2 %vm360_vm0, %v7932_v27 }
 0x4e4   : > { %5655 = vmatmul.msk.bf16.gmra.mxu3 %vm360_vm0, %v7932_v27 }
 0x4e8   : > { %5643 = vmatmul.msk.bf16.gmra.mxu0 %vm360_vm0, %v7932_v27  ;;  %5647 = vmatmul.msk.bf16.gmra.mxu1 %vm360_vm0, %v7932_v27 }
 0x4f1   : > { %5664 = vmatmul.msk.bf16.vlgmr.msrb.gmra.mxu2 %vm360_vm0, %v7860_v48 }
 0x4f4   : > { %v2509_v38 = vpop.f32.mrf.mxu2  ;;  %5668 = vmatmul.msk.bf16.vlgmr.msrb.gmra.mxu3 %vm360_vm0, %v7860_v48 }
 0x4f5   : > { %v7955_v50 = vadd.f32 %v2509_v38, %v7645_v16  ;;  %v2451_v45 = vpop.f32.mrf.mxu0  ;;  %v2480_v49 = vpop.f32.mrf.mxu1 }
 0x4f6   : > { %v7958_v15 = vadd.f32 %v2451_v45, %v7641_v54  ;;  %v7961_v0 = vadd.f32 %v2480_v49, %v7643_v3 }
 0x4f7   : > { %v2538_v47 = vpop.f32.mrf.mxu3 }
 0x4f8   : > { %v7964_v42 = vadd.f32 %v2538_v47, %v7657_v18  ;;  %5656 = vmatmul.msk.bf16.vlgmr.msrb.gmra.mxu0 %vm360_vm0, %v7860_v48  ;;  %5660 = vmatmul.msk.bf16.vlgmr.msrb.gmra.mxu1 %vm360_vm0, %v7860_v48 }
 0x4fc   : > { %v7970_v16 = vpop.f32.mrf.mxu2 }
 0x4fd   : > { %10312 = vst [vmem:[#allocation168_spill] sm:$0xff] %v7970_v16  ;;  %v7972_v38 = vpop.f32.mrf.mxu0  ;;  %v7974_v21 = vpop.f32.mrf.mxu1 }
 0x4fe   : > { %10313 = vst [vmem:[#allocation27_spill] sm:$0xff] %v7972_v38 }
 0x4ff   : > { %10314 = vst [vmem:[#allocation30_spill] sm:$0xff] %v7974_v21  ;;  %v7976_v54 = vpop.f32.mrf.mxu3 }
 0x500   : > { %10315 = vst [vmem:[#allocation178_spill] sm:$0xff] %v7976_v54 }
 0x501   : > { %5665 = vmatmul.msk.bf16.gmra.mxu2 %vm360_vm0, %v5935_v33 }
 0x504   : > { %v2514_v3 = vpop.f32.mrf.mxu2  ;;  %5669 = vmatmul.msk.bf16.gmra.mxu3 %vm360_vm0, %v5935_v33 }
 0x505   : > { %v7981_v18 = vadd.f32 %v2514_v3, %v7673_v44  ;;  %v2456_v47 = vpop.f32.mrf.mxu0  ;;  %v2485_v45 = vpop.f32.mrf.mxu1 }
 0x506   : > { %v7984_v48 = vadd.f32 %v2456_v47, %v7669_v8  ;;  %v7987_v49 = vadd.f32 %v2485_v45, %v7671_v1 }
 0x507   : > { %v2543_v16 = vpop.f32.mrf.mxu3 }
 0x508   : > { %v7990_v21 = vadd.f32 %v2543_v16, %v7679_v58  ;;  %5657 = vmatmul.msk.bf16.gmra.mxu0 %vm360_vm0, %v5935_v33  ;;  %5661 = vmatmul.msk.bf16.gmra.mxu1 %vm360_vm0, %v5935_v33 }
 0x50c   : > { %v7994_v54 = vpop.f32.mrf.mxu2  ;;  %v3181_v47 = vpop.permute.xlu2 %3180 }
 0x50d   : > { %10316 = vst [vmem:[#allocation179_spill] sm:$0xff] %v7994_v54  ;;  %v7996_v44 = vpop.f32.mrf.mxu0  ;;  %v7998_v3 = vpop.f32.mrf.mxu1 }
 0x50e   : > { %10317 = vst [vmem:[#allocation180_spill] sm:$0xff] %v7996_v44 }
 0x50f   : > { %10318 = vst [vmem:[#allocation181_spill] sm:$0xff] %v7998_v3  ;;  %v8000_v38 = vpop.f32.mrf.mxu3 }
 0x510   : > { %10319 = vst [vmem:[#allocation182_spill] sm:$0xff] %v8000_v38 }
 0x511   : > { %5666 = vmatmul.msk.bf16.gmra.mxu2 %vm360_vm0, %v5936_v23 }
 0x514   : > { %v2519_v8 = vpop.f32.mrf.mxu2  ;;  %5670 = vmatmul.msk.bf16.gmra.mxu3 %vm360_vm0, %v5936_v23 }
 0x515   : > { %v8005_v58 = vadd.f32 %v2519_v8, %v7697_v25  ;;  %v2461_v1 = vpop.f32.mrf.mxu0  ;;  %v2490_v16 = vpop.f32.mrf.mxu1 }
 0x516   : > { %v8008_v33 = vadd.f32 %v2461_v1, %v7691_v62  ;;  %v8011_v45 = vadd.f32 %v2490_v16, %v7695_v30  ;;  %v3167_v1 = vpop.permute.xlu2 %3166 }
 0x517   : > { %v2548_v54 = vpop.f32.mrf.mxu3 }
 0x518   : > { %v8014_v38 = vadd.f32 %v2548_v54, %v7701_v60  ;;  %5658 = vmatmul.msk.bf16.gmra.mxu0 %vm360_vm0, %v5936_v23  ;;  %5662 = vmatmul.msk.bf16.gmra.mxu1 %vm360_vm0, %v5936_v23 }
 0x51c   : > { %v8018_v3 = vpop.f32.mrf.mxu2 }
 0x51d   : > { %10320 = vst [vmem:[#allocation183_spill] sm:$0xff] %v8018_v3  ;;  %v8020_v25 = vpop.f32.mrf.mxu0  ;;  %v8022_v8 = vpop.f32.mrf.mxu1 }
 0x51e   : > { %10321 = vst [vmem:[#allocation184_spill] sm:$0xff] %v8020_v25  ;;  %v3185_v44 = vpop.permute.xlu0 %3184 }
 0x51f   : > { %10322 = vst [vmem:[#allocation185_spill] sm:$0xff] %v8022_v8  ;;  %v8024_v62 = vpop.f32.mrf.mxu3 }
 0x520   : > { %10323 = vst [vmem:[#allocation186_spill] sm:$0xff] %v8024_v62 }
 0x521   : > { %5667 = vmatmul.msk.bf16.gmra.mxu2 %vm360_vm0, %v7932_v27 }
 0x524   : > { %v2524_v30 = vpop.f32.mrf.mxu2  ;;  %5671 = vmatmul.msk.bf16.gmra.mxu3 %vm360_vm0, %v7932_v27 }
 0x525   : > { %v8031_v60 = vadd.f32 %v2524_v30, %v7723_v13  ;;  %v2466_v23 = vpop.f32.mrf.mxu0  ;;  %v2495_v54 = vpop.f32.mrf.mxu1 }
 0x526   : > { %v8034_v16 = vadd.f32 %v2466_v23, %v7717_v9  ;;  %v8037_v3 = vadd.f32 %v2495_v54, %v7721_v2  ;;  %v3187_v62 = vpop.permute.xlu1 %3186  ;;  %v3183_v25 = vpop.permute.xlu0 %3182 }
 0x527   : > { %v3209_v8 = vsel %vm3198_vm9, %v3185_v44, %v3187_v62  ;;  %v2553_v4 = vpop.f32.mrf.mxu3  ;;  %v3207_v55 = vsel %vm3198_vm9, %v3181_v47, %v3183_v25  ;;  %v3208_v43 = vsel %vm3198_vm9, %v3183_v25, %v3185_v44  ;;  %v3165_v9 = vpop.permute.xlu2 %3164 }
 0x528   : > { %v8043_v13 = vadd.f32 %v2553_v4, %v7730_v51  ;;  %3307 = vmatpush.bf16.msra.mxu2 %v3209_v8  ;;  %5659 = vmatmul.msk.bf16.gmra.mxu0 %vm360_vm0, %v7932_v27  ;;  %v3200_v30 = vsel %vm3198_vm9, %v3165_v9, %v3167_v1 }
 0x529   : > { %5663 = vmatmul.msk.bf16.gmra.mxu1 %vm360_vm0, %v7932_v27  ;;  %3249 = vmatpush.bf16.msra.mxu0 %v3207_v55  ;;  %v8066_v55 = vld [vmem:[%s9821_s3 + $0xa0] sm:$0xff] }
 0x52a   : > { %3278 = vmatpush.bf16.msra.mxu1 %v3208_v43 }
 0x52c   : > { %v8049_v2 = vpop.f32.mrf.mxu2 }
 0x52d   : > { %10324 = vst [vmem:[#allocation187_spill] sm:$0xff] %v8049_v2  ;;  %v8052_v47 = vpop.f32.mrf.mxu0  ;;  %v8054_v44 = vpop.f32.mrf.mxu1 }
 0x52e   : > { %10325 = vst [vmem:[#allocation188_spill] sm:$0xff] %v8052_v47  ;;  %3279 = vmatpush.bf16.msra.mxu1 %v3200_v30  ;;  %v8056_v51 = vpop.permute.xlu1 %3188  ;;  %v3169_v25 = vpop.permute.xlu0 %3168 }
 0x52f   : > { %10326 = vst [vmem:[#allocation189_spill] sm:$0xff] %v8054_v44  ;;  %v3210_v4 = vsel %vm3198_vm9, %v3187_v62, %v8056_v51  ;;  %v8060_v8 = vpop.f32.mrf.mxu3  ;;  %v3201_v43 = vsel %vm3198_vm9, %v3167_v1, %v3169_v25  ;;  %v3043_v47 = vpop.permute.xlu2 %3042 }
 0x530   : > { %10327 = vst [vmem:[#allocation190_spill] sm:$0xff] %v8060_v8  ;;  %3336 = vmatpush.bf16.msra.mxu3 %v3210_v4  ;;  %3308 = vmatpush.bf16.msra.mxu2 %v3201_v43 }
 0x533   : > { %5704 = vmatmul.msk.bf16.vlgmr.msra.gmra.mxu2 %vm360_vm0, %v8066_v55 }
 0x534   : > { %v2799_v27 = vpop.f32.mrf.mxu2 }
 0x535   : > { %v8071_v23 = vadd.f32 %v2799_v27, %v7763_v52  ;;  %v2741_v62 = vpop.f32.mrf.mxu0  ;;  %v2770_v54 = vpop.f32.mrf.mxu1 }
 0x536   : > { %v8074_v30 = vadd.f32 %v2741_v62, %v7739_v41  ;;  %v8077_v1 = vadd.f32 %v2770_v54, %v7747_v37  ;;  %v3163_v4 = vpop.permute.xlu1 %3162  ;;  %v8079_v8 = vpop.permute.xlu0 %3170  ;;  %v8104_v62 = vld [vmem:[%s9821_s3 + $0xa8] sm:$0xff] }
 0x537   : > { %v2828_v2 = vpop.f32.mrf.mxu3  ;;  %v3199_v43 = vsel %vm3198_vm9, %v3163_v4, %v3165_v9  ;;  %v3202_v52 = vsel %vm3198_vm9, %v3169_v25, %v8079_v8 }
 0x538   : > { %v8083_v44 = vadd.f32 %v2828_v2, %v7778_v36  ;;  %3250 = vmatpush.bf16.msra.mxu0 %v3199_v43  ;;  %3337 = vmatpush.bf16.msra.mxu3 %v3202_v52  ;;  %v10332_v43 = vld [vmem:[#allocation60_spill] sm:$0xff] }
 0x539   : > { %5700 = vmatmul.msk.bf16.vlgmr.msra.gmra.mxu1 %vm360_vm0, %v8066_v55 }
 0x53b   : > { %5696 = vmatmul.msk.bf16.vlgmr.msra.gmra.mxu0 %vm360_vm0, %v8066_v55  ;;  %5708 = vmatmul.msk.bf16.vlgmr.msra.gmra.mxu3 %vm360_vm0, %v8066_v55 }
 0x53c   : > { %v8093_v41 = vpop.f32.mrf.mxu2 }
 0x53d   : > { %10328 = vst [vmem:[#allocation191_spill] sm:$0xff] %v8093_v41  ;;  %v8095_v37 = vpop.f32.mrf.mxu0  ;;  %v8097_v36 = vpop.f32.mrf.mxu1 }
 0x53e   : > { %10329 = vst [vmem:[#allocation192_spill] sm:$0xff] %v8095_v37  ;;  %v6021_v9 = vpop.permute.xlu1 %6020 }
 0x53f   : > { %10330 = vst [vmem:[#allocation193_spill] sm:$0xff] %v8097_v36  ;;  %v6023_v2 = vunpack.i.h.bf16 %v6021_v9  ;;  %v6022_v27 = vunpack.i.l.bf16 %v6021_v9  ;;  %v8099_v25 = vpop.f32.mrf.mxu3  ;;  %v10333_v36 = vld [vmem:[#allocation52_spill] sm:$0xff] }
 0x540   : > { %10331 = vst [vmem:[#allocation194_spill] sm:$0xff] %v8099_v25  ;;  %v10334_v25 = vld [vmem:[#allocation54_spill] sm:$0xff] }
 0x541   : > { %v3049_v54 = vsel %vm3044_vm8, %v7867_v11, %v6022_v27  ;;  %v3050_v4 = vsel %vm3044_vm8, %v6022_v27, %v6023_v2  ;;  %v3051_v56 = vsel %vm3044_vm8, %v6023_v2, %v3043_v47 }
 0x542   : > { %v3067_v52 = vmul.f32 %v3050_v4, %v10332_v43  ;;  %v3076_v41 = vmul.f32 %v3050_v4, %v6711_v39  ;;  %v3084_v37 = vmul.f32 %v3049_v54, %v6649_v63  ;;  %v3093_v9 = vmul.f32 %v3049_v54, %v10333_v36 }
 0x543   : > { %v3085_v20 = vmul.f32 %v3050_v4, %v10334_v25  ;;  %v3094_v31 = vmul.f32 %v3050_v4, %v6664_v35  ;;  %5705 = vmatmul.msk.bf16.gmra.mxu2 %vm360_vm0, %v8104_v62 }
 0x544   : > { %v2804_v11 = vpop.f32.mrf.mxu2  ;;  %v3103_v27 = vpack.c.bf16 %v3076_v41, %v3067_v52  ;;  %v3111_v5 = vpack.c.bf16 %v3093_v9, %v3084_v37  ;;  %v3086_v37 = vmul.f32 %v3051_v56, %v6685_v40 }
 0x545   : > { %v8119_v43 = vadd.f32 %v2804_v11, %v7794_v57  ;;  %v2746_v39 = vpop.f32.mrf.mxu0  ;;  %v2775_v63 = vpop.f32.mrf.mxu1  ;;  %v3112_v46 = vpack.c.bf16 %v3094_v31, %v3085_v20  ;;  %v3095_v31 = vmul.f32 %v3051_v56, %v6688_v19  ;;  %v8159_v11 = vld [vmem:[%s9821_s3 + $0xb0] sm:$0xff] }
 0x546   : > { %v8122_v36 = vadd.f32 %v2746_v39, %v7769_v28  ;;  %v8125_v25 = vadd.f32 %v2775_v63, %v7781_v53  ;;  %3174 = vrot.lane.b32.xlu1 %v3103_v27, %s6073_s30  ;;  %3190 = vrot.lane.b32.xlu2 %v3111_v5, %s6073_s30  ;;  %v3068_v39 = vmul.f32 %v3051_v56, %v6728_v6  ;;  %v10335_v63 = vld [vmem:[#allocation66_spill] sm:$0xff]  ;;  %v10336_v5 = vld [vmem:[#allocation67_spill] sm:$0xff] }
 0x547   : > { %3192 = vrot.lane.b32.xlu0 %v3112_v46, %s6073_s30  ;;  %v2833_v41 = vpop.f32.mrf.mxu3  ;;  %v3077_v28 = vmul.f32 %v3051_v56, %v6742_v32  ;;  %v3087_v53 = vmul.f32 %v3043_v47, %v10335_v63  ;;  %v3096_v20 = vmul.f32 %v3043_v47, %v10336_v5  ;;  %v3113_v46 = vpack.c.bf16 %v3095_v31, %v3086_v37  ;;  %v10341_v27 = vld [vmem:[#allocation71_spill] sm:$0xff]  ;;  %v10342_v37 = vld [vmem:[#allocation72_spill] sm:$0xff] }
 0x548   : > { %v8132_v57 = vadd.f32 %v2833_v41, %v7811_v7  ;;  %v3069_v41 = vmul.f32 %v3043_v47, %v10341_v27  ;;  %v3078_v31 = vmul.f32 %v3043_v47, %v10342_v37 }
 0x549   : > { %5701 = vmatmul.msk.bf16.gmra.mxu1 %vm360_vm0, %v8104_v62  ;;  %v3104_v2 = vpack.c.bf16 %v3077_v28, %v3068_v39  ;;  %v3114_v52 = vpack.c.bf16 %v3096_v20, %v3087_v53  ;;  %v10343_v39 = vld [vmem:[#allocation55_spill] sm:$0xff]  ;;  %v10344_v53 = vld [vmem:[#allocation56_spill] sm:$0xff] }
 0x54a   : > { %v3066_v28 = vmul.f32 %v3049_v54, %v10343_v39  ;;  %v3075_v20 = vmul.f32 %v3049_v54, %v10344_v53  ;;  %v10345_v54 = vld [vmem:[#allocation29_spill] sm:$0xff] }
 0x54b   : > { %5697 = vmatmul.msk.bf16.gmra.mxu0 %vm360_vm0, %v8104_v62  ;;  %5709 = vmatmul.msk.bf16.gmra.mxu3 %vm360_vm0, %v8104_v62 }
 0x54c   : > { %v8145_v7 = vpop.f32.mrf.mxu2 }
 0x54d   : > { %10337 = vst [vmem:[#allocation195_spill] sm:$0xff] %v8145_v7  ;;  %v8147_v4 = vpop.f32.mrf.mxu0  ;;  %v8149_v56 = vpop.f32.mrf.mxu1 }
 0x54e   : > { %10338 = vst [vmem:[#allocation196_spill] sm:$0xff] %v8147_v4  ;;  %3194 = vrot.lane.b32.xlu1 %v3113_v46, %s6073_s30  ;;  %3176 = vrot.lane.b32.xlu2 %v3104_v2, %s6073_s30  ;;  %v3105_v2 = vpack.c.bf16 %v3078_v31, %v3069_v41  ;;  %v8204_v31 = vld [vmem:[%s9821_s3 + $0xb8] sm:$0xff] }
 0x54f   : > { %10339 = vst [vmem:[#allocation197_spill] sm:$0xff] %v8149_v56  ;;  %3196 = vrot.lane.b32.xlu0 %v3114_v52, %s6073_s30  ;;  %v8154_v9 = vpop.f32.mrf.mxu3  ;;  %v3102_v56 = vpack.c.bf16 %v3075_v20, %v3066_v28 }
 0x550   : > { %10340 = vst [vmem:[#allocation198_spill] sm:$0xff] %v8154_v9 }
 0x553   : > { %5706 = vmatmul.msk.bf16.gmra.mxu2 %vm360_vm0, %v8159_v11 }
 0x554   : > { %v2809_v46 = vpop.f32.mrf.mxu2 }
 0x555   : > { %v8168_v52 = vadd.f32 %v2809_v46, %v7827_v61  ;;  %v2751_v9 = vpop.f32.mrf.mxu0  ;;  %v2780_v7 = vpop.f32.mrf.mxu1 }
 0x556   : > { %v8171_v4 = vadd.f32 %v2751_v9, %v7801_v14  ;;  %v8174_v47 = vadd.f32 %v2780_v7, %v7814_v59  ;;  %3178 = vrot.lane.b32.xlu1 %v3105_v2, %s6073_s30  ;;  %6025 = vrot.lane.b32.xlu2 %v10345_v54, %s6074_s22 }
 0x557   : > { %3172 = vrot.lane.b32.xlu0 %v3102_v56, %s6073_s30  ;;  %v2838_v41 = vpop.f32.mrf.mxu3  ;;  %v10349_v56 = vld [vmem:[#allocation40_spill] sm:$0xff] }
 0x558   : > { %v8181_v61 = vadd.f32 %v2838_v41, %v7842_v12  ;;  %v10350_v12 = vld [vmem:[#allocation35_spill] sm:$0xff] }
 0x559   : > { %5702 = vmatmul.msk.bf16.gmra.mxu1 %vm360_vm0, %v8159_v11 }
 0x55b   : > { %5698 = vmatmul.msk.bf16.gmra.mxu0 %vm360_vm0, %v8159_v11  ;;  %5710 = vmatmul.msk.bf16.gmra.mxu3 %vm360_vm0, %v8159_v11 }
 0x55c   : > { %v8189_v59 = vpop.f32.mrf.mxu2 }
 0x55d   : > { %10346 = vst [vmem:[#allocation29_spill] sm:$0xff] %v8189_v59  ;;  %v8191_v14 = vpop.f32.mrf.mxu0  ;;  %v8193_v7 = vpop.f32.mrf.mxu1 }
 0x55e   : > { %10347 = vst [vmem:[#allocation199_spill] sm:$0xff] %v8191_v14  ;;  %3547 = vrot.lane.b32.xlu1 %v10349_v56, %s6074_s22 }
 0x55f   : > { %10348 = vst [vmem:[#allocation200_spill] sm:$0xff] %v8193_v7  ;;  %6030 = vrot.lane.b32.xlu0 %v10350_v12, %s6074_s22  ;;  %v8199_v9 = vpop.f32.mrf.mxu3 }
 0x560   : > { %10351 = vst [vmem:[#allocation40_spill] sm:$0xff] %v8199_v9 }
 0x563   : > { %5707 = vmatmul.msk.bf16.gmra.mxu2 %vm360_vm0, %v8204_v31 }
 0x564   : > { %v2814_v28 = vpop.f32.mrf.mxu2 }
 0x565   : > { %v8209_v20 = vadd.f32 %v2814_v28, %v7886_v26  ;;  %v2756_v46 = vpop.f32.mrf.mxu0  ;;  %v2785_v2 = vpop.f32.mrf.mxu1 }
 0x566   : > { %v8212_v54 = vadd.f32 %v2756_v46, %v7835_v29  ;;  %v8215_v41 = vadd.f32 %v2785_v2, %v7846_v22 }
 0x567   : > { %v2843_v56 = vpop.f32.mrf.mxu3 }
 0x568   : > { %v8218_v12 = vadd.f32 %v2843_v56, %v7891_v24 }
 0x569   : > { %5703 = vmatmul.msk.bf16.gmra.mxu1 %vm360_vm0, %v8204_v31 }
 0x56b   : > { %5699 = vmatmul.msk.bf16.gmra.mxu0 %vm360_vm0, %v8204_v31  ;;  %5711 = vmatmul.msk.bf16.gmra.mxu3 %vm360_vm0, %v8204_v31 }
 0x56c   : > { %v8226_v26 = vpop.f32.mrf.mxu2 }
 0x56d   : > { %10352 = vst [vmem:[#allocation35_spill] sm:$0xff] %v8226_v26  ;;  %v8228_v29 = vpop.f32.mrf.mxu0  ;;  %v8230_v28 = vpop.f32.mrf.mxu1 }
 0x56e   : > { %10353 = vst [vmem:[#allocation201_spill] sm:$0xff] %v8228_v29 }
 0x56f   : > { %10354 = vst [vmem:[#allocation202_spill] sm:$0xff] %v8230_v28  ;;  %v8232_v22 = vpop.f32.mrf.mxu3 }
 0x570   : > { %10355 = vst [vmem:[#allocation203_spill] sm:$0xff] %v8232_v22 }
 0x574   : > { %v2915_v46 = vpop.f32.mrf.mxu2 }
 0x575   : > { %v8235_v24 = vadd.f32 %v2915_v46, %v7955_v50  ;;  %v2857_v2 = vpop.f32.mrf.mxu0  ;;  %v2886_v56 = vpop.f32.mrf.mxu1 }
 0x576   : > { %v8238_v9 = vadd.f32 %v2857_v2, %v7958_v15  ;;  %v8241_v59 = vadd.f32 %v2886_v56, %v7961_v0 }
 0x577   : > { %v2944_v7 = vpop.f32.mrf.mxu3 }
 0x578   : > { %v8244_v26 = vadd.f32 %v2944_v7, %v7964_v42 }
 0x57c   : > { %v8246_v29 = vpop.f32.mrf.mxu2 }
 0x57d   : > { %10356 = vst [vmem:[#allocation204_spill] sm:$0xff] %v8246_v29  ;;  %v8248_v28 = vpop.f32.mrf.mxu0  ;;  %v8250_v22 = vpop.f32.mrf.mxu1 }
 0x57e   : > { %10357 = vst [vmem:[#allocation205_spill] sm:$0xff] %v8248_v28 }
 0x57f   : > { %10358 = vst [vmem:[#allocation206_spill] sm:$0xff] %v8250_v22  ;;  %v8252_v50 = vpop.f32.mrf.mxu3 }
 0x580   : > { %10359 = vst [vmem:[#allocation207_spill] sm:$0xff] %v8252_v50 }
 0x584   : > { %v2920_v46 = vpop.f32.mrf.mxu2 }
 0x585   : > { %v8255_v14 = vadd.f32 %v2920_v46, %v7981_v18  ;;  %v2862_v15 = vpop.f32.mrf.mxu0  ;;  %v2891_v2 = vpop.f32.mrf.mxu1 }
 0x586   : > { %v8258_v0 = vadd.f32 %v2862_v15, %v7984_v48  ;;  %v8261_v42 = vadd.f32 %v2891_v2, %v7987_v49 }
 0x587   : > { %v2949_v7 = vpop.f32.mrf.mxu3 }
 0x588   : > { %v8264_v56 = vadd.f32 %v2949_v7, %v7990_v21 }
 0x58c   : > { %v8266_v29 = vpop.f32.mrf.mxu2 }
 0x58d   : > { %10360 = vst [vmem:[#allocation208_spill] sm:$0xff] %v8266_v29  ;;  %v8268_v22 = vpop.f32.mrf.mxu0  ;;  %v8270_v50 = vpop.f32.mrf.mxu1 }
 0x58e   : > { %10361 = vst [vmem:[#allocation209_spill] sm:$0xff] %v8268_v22 }
 0x58f   : > { %10362 = vst [vmem:[#allocation210_spill] sm:$0xff] %v8270_v50  ;;  %v8272_v18 = vpop.f32.mrf.mxu3 }
 0x590   : > { %10363 = vst [vmem:[#allocation211_spill] sm:$0xff] %v8272_v18 }
 0x594   : > { %v2925_v46 = vpop.f32.mrf.mxu2 }
 0x595   : > { %v8275_v28 = vadd.f32 %v2925_v46, %v8005_v58  ;;  %v2867_v48 = vpop.f32.mrf.mxu0  ;;  %v2896_v15 = vpop.f32.mrf.mxu1 }
 0x596   : > { %v8278_v49 = vadd.f32 %v2867_v48, %v8008_v33  ;;  %v8281_v21 = vadd.f32 %v2896_v15, %v8011_v45 }
 0x597   : > { %v2954_v2 = vpop.f32.mrf.mxu3 }
 0x598   : > { %v8284_v7 = vadd.f32 %v2954_v2, %v8014_v38 }
 0x59c   : > { %v8286_v29 = vpop.f32.mrf.mxu2 }
 0x59d   : > { %10364 = vst [vmem:[#allocation212_spill] sm:$0xff] %v8286_v29  ;;  %v8288_v50 = vpop.f32.mrf.mxu0  ;;  %v8290_v18 = vpop.f32.mrf.mxu1 }
 0x59e   : > { %10365 = vst [vmem:[#allocation213_spill] sm:$0xff] %v8288_v50 }
 0x59f   : > { %10366 = vst [vmem:[#allocation214_spill] sm:$0xff] %v8290_v18  ;;  %v8292_v58 = vpop.f32.mrf.mxu3 }
 0x5a0   : > { %10367 = vst [vmem:[#allocation215_spill] sm:$0xff] %v8292_v58  ;;  %v3191_v46 = vpop.permute.xlu2 %3190 }
 0x5a1   : > { %v3211_v33 = vsel %vm3198_vm9, %v8056_v51, %v3191_v46 }
 0x5a2   : > { %3365 = vmatpush.bf16.msrb.mxu0 %v3211_v33 }
 0x5a4   : > { %v2930_v48 = vpop.f32.mrf.mxu2 }
 0x5a5   : > { %v8297_v45 = vadd.f32 %v2930_v48, %v8031_v60  ;;  %v2872_v15 = vpop.f32.mrf.mxu0 }
 0x5a6   : > { %v8300_v38 = vadd.f32 %v2872_v15, %v8034_v16  ;;  %v2901_v2 = vpop.f32.mrf.mxu1 }
 0x5a7   : > { %10368 = vst [vmem:[#allocation216_spill] sm:$0xff] %v8297_v45  ;;  %v8303_v29 = vadd.f32 %v2901_v2, %v8037_v3  ;;  %v2959_v18 = vpop.f32.mrf.mxu3 }
 0x5a8   : > { %10369 = vst [vmem:[#allocation217_spill] sm:$0xff] %v8300_v38  ;;  %v8306_v58 = vadd.f32 %v2959_v18, %v8043_v13  ;;  %v3177_v50 = vpop.permute.xlu2 %3176  ;;  %v10375_v18 = vld [vmem:[#allocation26_spill] sm:$0xff] }
 0x5a9   : > { %10370 = vst [vmem:[#allocation218_spill] sm:$0xff] %v8303_v29 }
 0x5aa   : > { %10371 = vst [vmem:[#allocation219_spill] sm:$0xff] %v8306_v58 }
 0x5ac   : > { %v8310_v51 = vpop.f32.mrf.mxu2 }
 0x5ad   : > { %10373 = vst [vmem:[#allocation221_spill] sm:$0xff] %v8310_v51  ;;  %v8312_v33 = vpop.f32.mrf.mxu0 }
 0x5ae   : > { %v8308_v22 = vpop.f32.mrf.mxu1  ;;  %10374 = vst [vmem:[#allocation222_spill] sm:$0xff] %v8312_v33 }
 0x5af   : > { %10372 = vst [vmem:[#allocation220_spill] sm:$0xff] %v8308_v22  ;;  %v8327_v22 = vpop.f32.mrf.mxu3 }
 0x5b0   : > { %v8314_v60 = vpop.permute.xlu2 %6025  ;;  %10376 = vst [vmem:[#allocation223_spill] sm:$0xff] %v8327_v22 }
 0x5b1   : > { %v6028_v16 = vunpack.i.h.bf16 %v8314_v60  ;;  %v9959_v48 = vunpack.i.l.bf16 %v8314_v60 }
 0x5b3   : > { %v8321_v3 = vsel %vm3555_vm10, %v9959_v48, %v6028_v16 }
 0x5b4   : > { %v3592_v13 = vmul.f32 %v8321_v3, %v10284_v34  ;;  %v3601_v15 = vmul.f32 %v8321_v3, %v10375_v18 }
 0x5b6   : > { %v3281_v2 = vpop.f32.mrf.mxu1  ;;  %v3619_v51 = vpack.c.bf16 %v3601_v15, %v3592_v13  ;;  %v3310_v58 = vpop.f32.mrf.mxu2 }
 0x5b7   : > { %v8330_v33 = vadd.f32 %v3281_v2, %v8077_v1  ;;  %v8333_v45 = vadd.f32 %v3310_v58, %v8071_v23 }
 0x5b8   : > { %v3252_v29 = vpop.f32.mrf.mxu0  ;;  %v3175_v48 = vpop.permute.xlu1 %3174  ;;  %3695 = vrot.lane.b32.xlu2 %v3619_v51, %s6074_s22 }
 0x5b9   : > { %v8337_v34 = vadd.f32 %v3252_v29, %v8074_v30  ;;  %v3193_v38 = vpop.permute.xlu0 %3192  ;;  %v3205_v29 = vsel %vm3198_vm9, %v3175_v48, %v3177_v50 }
 0x5ba   : > { %v3212_v18 = vsel %vm3198_vm9, %v3191_v46, %v3193_v38 }
 0x5bb   : > { %3394 = vmatpush.bf16.msrb.mxu1 %v3212_v18 }
 0x5be   : > { %v8340_v13 = vpop.f32.mrf.mxu1  ;;  %v8342_v15 = vpop.f32.mrf.mxu2 }
 0x5bf   : > { %10377 = vst [vmem:[#allocation224_spill] sm:$0xff] %v8340_v13  ;;  %v3339_v1 = vpop.f32.mrf.mxu3 }
 0x5c0   : > { %10378 = vst [vmem:[#allocation225_spill] sm:$0xff] %v8342_v15  ;;  %v8345_v2 = vadd.f32 %v3339_v1, %v8083_v44  ;;  %v8347_v23 = vpop.f32.mrf.mxu0  ;;  %v3195_v58 = vpop.permute.xlu1 %3194 }
 0x5c1   : > { %10379 = vst [vmem:[#allocation226_spill] sm:$0xff] %v8347_v23  ;;  %v3213_v51 = vsel %vm3198_vm9, %v3193_v38, %v3195_v58  ;;  %v3197_v22 = vpop.permute.xlu0 %3196 }
 0x5c2   : > { %v3214_v30 = vsel %vm3198_vm9, %v3195_v58, %v3197_v22  ;;  %3423 = vmatpush.bf16.msrb.mxu2 %v3213_v51 }
 0x5c3   : > { %3452 = vmatpush.bf16.msrb.mxu3 %v3214_v30 }
 0x5c6   : > { %v3286_v46 = vpop.f32.mrf.mxu1  ;;  %3424 = vmatpush.bf16.msrb.mxu2 %v3205_v29  ;;  %v3315_v15 = vpop.f32.mrf.mxu2 }
 0x5c7   : > { %v8353_v18 = vadd.f32 %v3286_v46, %v8125_v25  ;;  %v8355_v44 = vpop.f32.mrf.mxu3  ;;  %v8358_v1 = vadd.f32 %v3315_v15, %v8119_v43  ;;  %v10387_v46 = vld [vmem:[#allocation31_spill] sm:$0xff] }
 0x5c8   : > { %10381 = vst [vmem:[#allocation228_spill] sm:$0xff] %v8355_v44  ;;  %v3257_v23 = vpop.f32.mrf.mxu0  ;;  %v3179_v38 = vpop.permute.xlu1 %3178 }
 0x5c9   : > { %10380 = vst [vmem:[#allocation227_spill] sm:$0xff] %v8353_v18  ;;  %v8361_v13 = vadd.f32 %v3257_v23, %v8122_v36  ;;  %v3173_v22 = vpop.permute.xlu0 %3172  ;;  %5720 = vmatmul.msk.bf16.vlgmr.msrb.gmra.mxu2 %vm360_vm0, %v8066_v55  ;;  %v3206_v58 = vsel %vm3198_vm9, %v3177_v50, %v3179_v38 }
 0x5ca   : > { %v3203_v25 = vsel %vm3198_vm9, %v8079_v8, %v3173_v22  ;;  %v3204_v51 = vsel %vm3198_vm9, %v3173_v22, %v3175_v48  ;;  %3453 = vmatpush.bf16.msrb.mxu3 %v3206_v58  ;;  %v10388_v22 = vld [vmem:[#allocation32_spill] sm:$0xff] }
 0x5cb   : > { %10382 = vst [vmem:[#allocation229_spill] sm:$0xff] %v8361_v13  ;;  %3366 = vmatpush.bf16.msrb.mxu0 %v3203_v25  ;;  %3395 = vmatpush.bf16.msrb.mxu1 %v3204_v51  ;;  %v10394_v13 = vld [vmem:[#allocation34_spill] sm:$0xff] }
 0x5cd   : > { %5724 = vmatmul.msk.bf16.vlgmr.msrb.gmra.mxu3 %vm360_vm0, %v8066_v55 }
 0x5ce   : > { %5712 = vmatmul.msk.bf16.vlgmr.msrb.gmra.mxu0 %vm360_vm0, %v8066_v55  ;;  %5716 = vmatmul.msk.bf16.vlgmr.msrb.gmra.mxu1 %vm360_vm0, %v8066_v55  ;;  %v8375_v36 = vpop.f32.mrf.mxu1  ;;  %v8377_v43 = vpop.f32.mrf.mxu2 }
 0x5cf   : > { %10383 = vst [vmem:[#allocation230_spill] sm:$0xff] %v8375_v36  ;;  %v3344_v50 = vpop.f32.mrf.mxu3 }
 0x5d0   : > { %10384 = vst [vmem:[#allocation231_spill] sm:$0xff] %v8377_v43  ;;  %v8380_v8 = vadd.f32 %v3344_v50, %v8132_v57  ;;  %v8382_v48 = vpop.f32.mrf.mxu0  ;;  %v8387_v55 = vpop.permute.xlu1 %3547  ;;  %v10389_v43 = vunpack.i.l.bf16 %v8314_v60  ;;  %v10390_v50 = vld [vmem:[#allocation36_spill] sm:$0xff] }
 0x5d1   : > { %10386 = vst [vmem:[#allocation233_spill] sm:$0xff] %v8382_v48  ;;  %v6031_v15 = vpop.permute.xlu0 %6030  ;;  %v10391_v48 = vld [vmem:[#allocation37_spill] sm:$0xff] }
 0x5d2   : > { %10385 = vst [vmem:[#allocation232_spill] sm:$0xff] %v8380_v8  ;;  %v6033_v23 = vunpack.i.h.bf16 %v6031_v15  ;;  %v6032_v30 = vunpack.i.l.bf16 %v6031_v15 }
 0x5d4   : > { %v3558_v29 = vsel %vm3555_vm10, %v6028_v16, %v6032_v30  ;;  %v3590_v38 = vmul.f32 %v6033_v23, %v10387_v46  ;;  %v3599_v58 = vmul.f32 %v6033_v23, %v10388_v22  ;;  %v3556_v57 = vsel %vm3555_vm10, %v6033_v23, %v10389_v43  ;;  %v10393_v46 = vld [vmem:[#allocation33_spill] sm:$0xff] }
 0x5d5   : > { %v3593_v44 = vmul.f32 %v3558_v29, %v10390_v50  ;;  %v3602_v36 = vmul.f32 %v3558_v29, %v10391_v48  ;;  %v3591_v22 = vmul.f32 %v3556_v57, %v10393_v46  ;;  %v3600_v18 = vmul.f32 %v3556_v57, %v10394_v13  ;;  %v10407_v48 = vld [vmem:[#allocation50_spill] sm:$0xff] }
 0x5d6   : > { %v3291_v25 = vpop.f32.mrf.mxu1  ;;  %v3617_v51 = vpack.c.bf16 %v3599_v58, %v3590_v38  ;;  %v3320_v16 = vpop.f32.mrf.mxu2  ;;  %v3559_v58 = vsel %vm3555_vm10, %v6032_v30, %v8387_v55  ;;  %v10396_v30 = vld [vmem:[#allocation43_spill] sm:$0xff] }
 0x5d7   : > { %v8395_v15 = vadd.f32 %v3291_v25, %v8174_v47  ;;  %v8397_v8 = vpop.f32.mrf.mxu3  ;;  %v8402_v38 = vadd.f32 %v3320_v16, %v8168_v52  ;;  %v3620_v43 = vpack.c.bf16 %v3602_v36, %v3593_v44  ;;  %v3618_v25 = vpack.c.bf16 %v3600_v18, %v3591_v22  ;;  %v10395_v44 = vld [vmem:[#allocation42_spill] sm:$0xff]  ;;  %v10398_v22 = vld [vmem:[#allocation57_spill] sm:$0xff] }
 0x5d8   : > { %10392 = vst [vmem:[#allocation234_spill] sm:$0xff] %v8397_v8  ;;  %3691 = vrot.lane.b32.xlu1 %v3617_v51, %s6074_s22  ;;  %v3262_v60 = vpop.f32.mrf.mxu0  ;;  %v3574_v52 = vmul.f32 %v8321_v3, %v10294_v10  ;;  %v3583_v51 = vmul.f32 %v8321_v3, %v10295_v17  ;;  %v3594_v36 = vmul.f32 %v3559_v58, %v10395_v44  ;;  %v10402_v44 = vld [vmem:[#allocation46_spill] sm:$0xff] }
 0x5d9   : > { %v8408_v47 = vadd.f32 %v3262_v60, %v8171_v4  ;;  %5721 = vmatmul.msk.bf16.gmra.mxu2 %vm360_vm0, %v8104_v62  ;;  %3697 = vrot.lane.b32.xlu0 %v3620_v43, %s6074_s22  ;;  %v3603_v16 = vmul.f32 %v3559_v58, %v10396_v30  ;;  %v10397_v4 = vld [vmem:[#allocation49_spill] sm:$0xff]  ;;  %v3584_v60 = vmul.f32 %v3558_v29, %v10398_v22 }
 0x5da   : > { %3693 = vrot.lane.b32.xlu2 %v3618_v25, %s6074_s22  ;;  %v3575_v18 = vmul.f32 %v3558_v29, %v10397_v4  ;;  %v3610_v43 = vpack.c.bf16 %v3583_v51, %v3574_v52  ;;  %v3573_v13 = vmul.f32 %v3556_v57, %v10402_v44  ;;  %v10404_v52 = vld [vmem:[#allocation44_spill] sm:$0xff] }
 0x5db   : > { %v3621_v29 = vpack.c.bf16 %v3603_v16, %v3594_v36  ;;  %v3572_v51 = vmul.f32 %v6033_v23, %v10404_v52 }
 0x5dc   : > { %v3611_v22 = vpack.c.bf16 %v3584_v60, %v3575_v18 }
 0x5dd   : > { %5725 = vmatmul.msk.bf16.gmra.mxu3 %vm360_vm0, %v8104_v62 }
 0x5de   : > { %5713 = vmatmul.msk.bf16.gmra.mxu0 %vm360_vm0, %v8104_v62  ;;  %5717 = vmatmul.msk.bf16.gmra.mxu1 %vm360_vm0, %v8104_v62  ;;  %v8428_v3 = vpop.f32.mrf.mxu1  ;;  %v8430_v25 = vpop.f32.mrf.mxu2  ;;  %v10403_v62 = vld [vmem:[#allocation47_spill] sm:$0xff] }
 0x5df   : > { %10399 = vst [vmem:[#allocation235_spill] sm:$0xff] %v8428_v3  ;;  %v3349_v8 = vpop.f32.mrf.mxu3  ;;  %v3582_v46 = vmul.f32 %v3556_v57, %v10403_v62 }
 0x5e0   : > { %10400 = vst [vmem:[#allocation236_spill] sm:$0xff] %v8430_v25  ;;  %v8433_v30 = vadd.f32 %v3349_v8, %v8181_v61  ;;  %3677 = vrot.lane.b32.xlu1 %v3610_v43, %s6074_s22  ;;  %v8436_v4 = vpop.f32.mrf.mxu0  ;;  %v10405_v25 = vld [vmem:[#allocation45_spill] sm:$0xff]  ;;  %v10406_v61 = vld [vmem:[#allocation48_spill] sm:$0xff]  ;;  %v3585_v43 = vmul.f32 %v3559_v58, %v10407_v48 }
 0x5e1   : > { %10401 = vst [vmem:[#allocation237_spill] sm:$0xff] %v8436_v4  ;;  %3699 = vrot.lane.b32.xlu0 %v3621_v29, %s6074_s22  ;;  %v3581_v3 = vmul.f32 %v6033_v23, %v10405_v25  ;;  %v3576_v8 = vmul.f32 %v3559_v58, %v10406_v61  ;;  %v3609_v4 = vpack.c.bf16 %v3582_v46, %v3573_v13  ;;  %v10410_v13 = vld [vmem:[#allocation53_spill] sm:$0xff] }
 0x5e2   : > { %3679 = vrot.lane.b32.xlu2 %v3611_v22, %s6074_s22 }
 0x5e3   : > { %v3608_v60 = vpack.c.bf16 %v3581_v3, %v3572_v51  ;;  %v3612_v29 = vpack.c.bf16 %v3585_v43, %v3576_v8 }
 0x5e6   : > { %v3296_v50 = vpop.f32.mrf.mxu1  ;;  %v3325_v16 = vpop.f32.mrf.mxu2 }
 0x5e7   : > { %v8447_v36 = vadd.f32 %v3296_v50, %v8215_v41  ;;  %v8449_v18 = vpop.f32.mrf.mxu3  ;;  %v8452_v57 = vadd.f32 %v3325_v16, %v8209_v20  ;;  %v10409_v41 = vld [vmem:[#allocation61_spill] sm:$0xff] }
 0x5e8   : > { %10408 = vst [vmem:[#allocation46_spill] sm:$0xff] %v8449_v18  ;;  %3675 = vrot.lane.b32.xlu1 %v3609_v4, %s6074_s22  ;;  %v3267_v22 = vpop.f32.mrf.mxu0 }
 0x5e9   : > { %v8456_v23 = vadd.f32 %v3267_v22, %v8212_v54  ;;  %5722 = vmatmul.msk.bf16.gmra.mxu2 %vm360_vm0, %v8159_v11  ;;  %3673 = vrot.lane.b32.xlu0 %v3608_v60, %s6074_s22 }
 0x5ea   : > { %3681 = vrot.lane.b32.xlu2 %v3612_v29, %s6074_s22 }
 0x5ed   : > { %5726 = vmatmul.msk.bf16.gmra.mxu3 %vm360_vm0, %v8159_v11 }
 0x5ee   : > { %5714 = vmatmul.msk.bf16.gmra.mxu0 %vm360_vm0, %v8159_v11  ;;  %5718 = vmatmul.msk.bf16.gmra.mxu1 %vm360_vm0, %v8159_v11  ;;  %v8484_v50 = vpop.f32.mrf.mxu1  ;;  %v8488_v4 = vpop.f32.mrf.mxu2 }
 0x5ef   : > { %v3354_v20 = vpop.f32.mrf.mxu3  ;;  %10411 = vst [vmem:[#allocation47_spill] sm:$0xff] %v8484_v50 }
 0x5f0   : > { %v8469_v54 = vadd.f32 %v3354_v20, %v8218_v12  ;;  %3553 = vrot.lane.b32.xlu1 %v10409_v41, %s6074_s22  ;;  %v8486_v58 = vpop.f32.mrf.mxu0  ;;  %10413 = vst [vmem:[#allocation45_spill] sm:$0xff] %v8488_v4 }
 0x5f1   : > { %6035 = vrot.lane.b32.xlu0 %v10410_v13, %s6074_s22  ;;  %10412 = vst [vmem:[#allocation44_spill] sm:$0xff] %v8486_v58 }
 0x5f7   : > { %v8490_v3 = vpop.f32.mrf.mxu3 }
 0x5f8   : > { %10414 = vst [vmem:[#allocation48_spill] sm:$0xff] %v8490_v3 }
 0x5f9   : > { %5723 = vmatmul.msk.bf16.gmra.mxu2 %vm360_vm0, %v8204_v31 }
 0x5fd   : > { %5727 = vmatmul.msk.bf16.gmra.mxu3 %vm360_vm0, %v8204_v31 }
 0x5fe   : > { %5715 = vmatmul.msk.bf16.gmra.mxu0 %vm360_vm0, %v8204_v31  ;;  %5719 = vmatmul.msk.bf16.gmra.mxu1 %vm360_vm0, %v8204_v31 }
 0x612   : > { %v3696_v11 = vpop.permute.xlu2 %3695 }
 0x634   : > { %v3694_v12 = vpop.permute.xlu2 %3693 }
 0x635   : > { %v3719_v46 = vsel %vm3555_vm10, %v3694_v12, %v3696_v11 }
 0x636   : > { %3789 = vmatpush.bf16.msra.mxu1 %v3719_v46 }
 0x63c   : > { %v3680_v51 = vpop.permute.xlu2 %3679 }
 0x64a   : > { %v3692_v8 = vpop.permute.xlu1 %3691 }
 0x64b   : > { %v3718_v43 = vsel %vm3555_vm10, %v3692_v8, %v3694_v12  ;;  %v3368_v16 = vpop.f32.mrf.mxu0  ;;  %v3397_v22 = vpop.f32.mrf.mxu1 }
 0x64c   : > { %v8494_v31 = vadd.f32 %v3368_v16, %v8238_v9  ;;  %v8497_v60 = vadd.f32 %v3397_v22, %v8241_v59  ;;  %v3698_v29 = vpop.permute.xlu0 %3697  ;;  %3760 = vmatpush.bf16.msra.mxu0 %v3718_v43  ;;  %v3426_v20 = vpop.f32.mrf.mxu2  ;;  %v8514_v43 = vld [vmem:[%s9821_s3 + $0xc0] sm:$0xff] }
 0x64d   : > { %v3720_v41 = vsel %vm3555_vm10, %v3696_v11, %v3698_v29  ;;  %v8501_v13 = vadd.f32 %v3426_v20, %v8235_v24  ;;  %v8522_v16 = vpop.permute.xlu2 %3681 }
 0x64e   : > { %3818 = vmatpush.bf16.msra.mxu2 %v3720_v41  ;;  %v3713_v20 = vsel %vm3555_vm10, %v3680_v51, %v8522_v16 }
 0x64f   : > { %10415 = vst [vmem:[#allocation50_spill] sm:$0xff] %v8501_v13 }
 0x650   : > { %v3455_v46 = vpop.f32.mrf.mxu3 }
 0x651   : > { %v8504_v12 = vadd.f32 %v3455_v46, %v8244_v26 }
 0x652   : > { %v3678_v8 = vpop.permute.xlu1 %3677 }
 0x653   : > { %10416 = vst [vmem:[#allocation61_spill] sm:$0xff] %v8504_v12  ;;  %v8506_v3 = vpop.f32.mrf.mxu0  ;;  %v8508_v9 = vpop.f32.mrf.mxu1  ;;  %v3712_v59 = vsel %vm3555_vm10, %v3678_v8, %v3680_v51 }
 0x654   : > { %v8516_v11 = vpop.permute.xlu0 %3699  ;;  %3819 = vmatpush.bf16.msra.mxu2 %v3712_v59  ;;  %v8518_v24 = vpop.f32.mrf.mxu2 }
 0x655   : > { %10417 = vst [vmem:[#allocation53_spill] sm:$0xff] %v8518_v24  ;;  %v3721_v26 = vsel %vm3555_vm10, %v3698_v29, %v8516_v11 }
 0x656   : > { %3847 = vmatpush.bf16.msra.mxu3 %v3721_v26 }
 0x657   : > { %5760 = vmatmul.msk.bf16.vlgmr.msra.gmra.mxu2 %vm360_vm0, %v8514_v43 }
 0x658   : > { %v8526_v22 = vpop.f32.mrf.mxu3 }
 0x659   : > { %10418 = vst [vmem:[#allocation238_spill] sm:$0xff] %v8526_v22 }
 0x65a   : > { %3848 = vmatpush.bf16.msra.mxu3 %v3713_v20  ;;  %v3676_v41 = vpop.permute.xlu1 %3675 }
 0x65b   : > { %v3373_v46 = vpop.f32.mrf.mxu0  ;;  %v3402_v59 = vpop.f32.mrf.mxu1  ;;  %v3711_v4 = vsel %vm3555_vm10, %v3676_v41, %v3678_v8 }
 0x65c   : > { %v8532_v18 = vadd.f32 %v3373_v46, %v8258_v0  ;;  %v8535_v29 = vadd.f32 %v3402_v59, %v8261_v42  ;;  %v3674_v26 = vpop.permute.xlu0 %3673  ;;  %3790 = vmatpush.bf16.msra.mxu1 %v3711_v4  ;;  %v3431_v58 = vpop.f32.mrf.mxu2 }
 0x65d   : > { %5764 = vmatmul.msk.bf16.vlgmr.msra.gmra.mxu3 %vm360_vm0, %v8514_v43  ;;  %v8540_v51 = vadd.f32 %v3431_v58, %v8255_v14  ;;  %v3710_v20 = vsel %vm3555_vm10, %v3674_v26, %v3676_v41  ;;  %v8557_v14 = vld [vmem:[%s9821_s3 + $0xc8] sm:$0xff] }
 0x65e   : > { %10419 = vst [vmem:[#allocation239_spill] sm:$0xff] %v8532_v18  ;;  %3761 = vmatpush.bf16.msra.mxu0 %v3710_v20 }
 0x65f   : > { %10420 = vst [vmem:[#allocation240_spill] sm:$0xff] %v8535_v29  ;;  %5756 = vmatmul.msk.bf16.vlgmr.msra.gmra.mxu1 %vm360_vm0, %v8514_v43 }
 0x660   : > { %10421 = vst [vmem:[#allocation241_spill] sm:$0xff] %v8540_v51  ;;  %v3460_v0 = vpop.f32.mrf.mxu3 }
 0x661   : > { %5752 = vmatmul.msk.bf16.vlgmr.msra.gmra.mxu0 %vm360_vm0, %v8514_v43  ;;  %v8548_v42 = vadd.f32 %v3460_v0, %v8264_v56 }
 0x662   : > { %v3554_v26 = vpop.permute.xlu1 %3553 }
 0x663   : > { %10422 = vst [vmem:[#allocation242_spill] sm:$0xff] %v8548_v42  ;;  %v8550_v4 = vpop.f32.mrf.mxu0  ;;  %v8552_v8 = vpop.f32.mrf.mxu1 }
 0x664   : > { %10423 = vst [vmem:[#allocation243_spill] sm:$0xff] %v8550_v4  ;;  %v6036_v58 = vpop.permute.xlu0 %6035  ;;  %v8559_v41 = vpop.f32.mrf.mxu2  ;;  %v10428_v4 = vld [vmem:[#allocation54_spill] sm:$0xff] }
 0x665   : > { %10424 = vst [vmem:[#allocation244_spill] sm:$0xff] %v8552_v8  ;;  %v6038_v46 = vunpack.i.h.bf16 %v6036_v58  ;;  %v6037_v59 = vunpack.i.l.bf16 %v6036_v58  ;;  %v10427_v58 = vld [vmem:[#allocation52_spill] sm:$0xff] }
 0x666   : > { %10425 = vst [vmem:[#allocation245_spill] sm:$0xff] %v8559_v41  ;;  %v10426_v41 = vld [vmem:[#allocation51_spill] sm:$0xff] }
 0x667   : > { %v3562_v20 = vsel %vm3555_vm10, %v6038_v46, %v3554_v26  ;;  %v3560_v56 = vsel %vm3555_vm10, %v8387_v55, %v6037_v59  ;;  %v3561_v0 = vsel %vm3555_vm10, %v6037_v59, %v6038_v46  ;;  %5761 = vmatmul.msk.bf16.gmra.mxu2 %vm360_vm0, %v8557_v14 }
 0x668   : > { %v8567_v50 = vpop.f32.mrf.mxu3  ;;  %v3597_v42 = vmul.f32 %v3562_v20, %v6685_v40  ;;  %v3606_v51 = vmul.f32 %v3562_v20, %v6688_v19  ;;  %v3595_v8 = vmul.f32 %v3560_v56, %v10426_v41  ;;  %v3604_v22 = vmul.f32 %v3560_v56, %v10427_v58 }
 0x669   : > { %v3596_v29 = vmul.f32 %v3561_v0, %v10428_v4  ;;  %v3605_v12 = vmul.f32 %v3561_v0, %v6664_v35 }
 0x66a   : > { %v3624_v55 = vpack.c.bf16 %v3606_v51, %v3597_v42  ;;  %v3622_v18 = vpack.c.bf16 %v3604_v22, %v3595_v8  ;;  %v3588_v42 = vmul.f32 %v3562_v20, %v6742_v32 }
 0x66b   : > { %v3378_v46 = vpop.f32.mrf.mxu0  ;;  %v3407_v59 = vpop.f32.mrf.mxu1  ;;  %v3623_v24 = vpack.c.bf16 %v3605_v12, %v3596_v29  ;;  %v10429_v12 = vld [vmem:[#allocation60_spill] sm:$0xff] }
 0x66c   : > { %v8576_v13 = vadd.f32 %v3378_v46, %v8278_v49  ;;  %v8579_v40 = vadd.f32 %v3407_v59, %v8281_v21  ;;  %3705 = vrot.lane.b32.xlu0 %v3624_v55, %s6074_s22  ;;  %3701 = vrot.lane.b32.xlu1 %v3622_v18, %s6074_s22  ;;  %v3436_v19 = vpop.f32.mrf.mxu2  ;;  %v3578_v29 = vmul.f32 %v3561_v0, %v10429_v12  ;;  %v10430_v49 = vld [vmem:[#allocation62_spill] sm:$0xff]  ;;  %v8609_v59 = vld [vmem:[%s9821_s3 + $0xd0] sm:$0xff] }
 0x66d   : > { %3703 = vrot.lane.b32.xlu2 %v3623_v24, %s6074_s22  ;;  %5765 = vmatmul.msk.bf16.gmra.mxu3 %vm360_vm0, %v8557_v14  ;;  %v8587_v22 = vadd.f32 %v3436_v19, %v8275_v28  ;;  %v3587_v51 = vmul.f32 %v3561_v0, %v10430_v49  ;;  %v3579_v21 = vmul.f32 %v3562_v20, %v6728_v6 }
 0x66e   : > { %v3598_v18 = vmul.f32 %v3554_v26, %v10335_v63  ;;  %v3607_v24 = vmul.f32 %v3554_v26, %v10336_v5 }
 0x66f   : > { %5757 = vmatmul.msk.bf16.gmra.mxu1 %vm360_vm0, %v8557_v14  ;;  %v3614_v28 = vpack.c.bf16 %v3587_v51, %v3578_v29  ;;  %v3615_v0 = vpack.c.bf16 %v3588_v42, %v3579_v21  ;;  %v3589_v29 = vmul.f32 %v3554_v26, %v10342_v37  ;;  %v3577_v51 = vmul.f32 %v3560_v56, %v10343_v39 }
 0x670   : > { %v3465_v8 = vpop.f32.mrf.mxu3  ;;  %v3625_v20 = vpack.c.bf16 %v3607_v24, %v3598_v18  ;;  %v3586_v21 = vmul.f32 %v3560_v56, %v10344_v53  ;;  %v10434_v56 = vld [vmem:[#allocation216_spill] sm:$0xff] }
 0x671   : > { %5753 = vmatmul.msk.bf16.gmra.mxu0 %vm360_vm0, %v8557_v14  ;;  %v8600_v19 = vadd.f32 %v3465_v8, %v8284_v7  ;;  %v3580_v7 = vmul.f32 %v3554_v26, %v10341_v27  ;;  %v10433_v26 = vld [vmem:[#allocation10_spill] sm:$0xff] }
 0x673   : > { %v8602_v55 = vpop.f32.mrf.mxu0  ;;  %v8604_v46 = vpop.f32.mrf.mxu1  ;;  %v3616_v18 = vpack.c.bf16 %v3589_v29, %v3580_v7 }
 0x674   : > { %3685 = vrot.lane.b32.xlu0 %v3614_v28, %s6074_s22  ;;  %3687 = vrot.lane.b32.xlu1 %v3615_v0, %s6074_s22  ;;  %v8613_v49 = vpop.f32.mrf.mxu2  ;;  %v3613_v28 = vpack.c.bf16 %v3586_v21, %v3577_v51  ;;  %v10431_v0 = vld [vmem:[#allocation217_spill] sm:$0xff]  ;;  %v10435_v51 = vld [vmem:[#allocation219_spill] sm:$0xff] }
 0x675   : > { %3707 = vrot.lane.b32.xlu2 %v3625_v20, %s6074_s22  ;;  %v10432_v20 = vld [vmem:[#allocation218_spill] sm:$0xff] }
 0x677   : > { %5762 = vmatmul.msk.bf16.gmra.mxu2 %vm360_vm0, %v8609_v59 }
 0x678   : > { %v8622_v42 = vpop.f32.mrf.mxu3 }
 0x67b   : > { %v3383_v24 = vpop.f32.mrf.mxu0  ;;  %v3412_v8 = vpop.f32.mrf.mxu1 }
 0x67c   : > { %v8625_v12 = vadd.f32 %v3383_v24, %v10431_v0  ;;  %v8628_v27 = vadd.f32 %v3412_v8, %v10432_v20  ;;  %3689 = vrot.lane.b32.xlu0 %v3616_v18, %s6074_s22  ;;  %4101 = vrot.lane.b32.xlu1 %v10433_v26, %s6075_s6  ;;  %v3441_v37 = vpop.f32.mrf.mxu2  ;;  %v8649_v18 = vld [vmem:[%s9821_s3 + $0xd8] sm:$0xff]  ;;  %v10437_v24 = vld [vmem:[#allocation3_spill] sm:$0xff]  ;;  %v10439_v8 = vld [vmem:[#allocation4_spill] sm:$0xff] }
 0x67d   : > { %3683 = vrot.lane.b32.xlu2 %v3613_v28, %s6074_s22  ;;  %5766 = vmatmul.msk.bf16.gmra.mxu3 %vm360_vm0, %v8609_v59  ;;  %v8637_v7 = vadd.f32 %v3441_v37, %v10434_v56  ;;  %v10438_v37 = vld [vmem:[#allocation9_spill] sm:$0xff]  ;;  %v10440_v28 = vld [vmem:[#allocation2_spill] sm:$0xff]  ;;  %v10441_v0 = vld [vmem:[#allocation7_spill] sm:$0xff]  ;;  %s5899_s22 = sshll.u32 %s10789_s19, 6 }
 0x67e   : > { %v10442_v20 = vld [vmem:[#allocation5_spill] sm:$0xff]  ;;  %v10443_v26 = vld [vmem:[#allocation6_spill] sm:$0xff]  ;;  %v10444_v56 = vld [vmem:[#allocation11_spill] sm:$0xff]  ;;  %s224_s25 = scalar_lea.vmem %s9823_s5, %s5899_s22 }
 0x67f   : > { %5758 = vmatmul.msk.bf16.gmra.mxu1 %vm360_vm0, %v8609_v59 }
 0x680   : > { %v3470_v29 = vpop.f32.mrf.mxu3 }
 0x681   : > { %5754 = vmatmul.msk.bf16.gmra.mxu0 %vm360_vm0, %v8609_v59  ;;  %v8644_v21 = vadd.f32 %v3470_v29, %v10435_v51  ;;  %v10445_v29 = vld [vmem:[#allocation8_spill] sm:$0xff]  ;;  %v10446_v51 = vld [vmem:[#allocation19_spill] sm:$0xff] }
 0x683   : > { %10436 = vst [vmem:[#allocation51_spill] sm:$0xff] %v8644_v21 }
 0x684   : > { %4097 = vrot.lane.b32.xlu0 %v10437_v24, %s6075_s6  ;;  %4099 = vrot.lane.b32.xlu1 %v10438_v37, %s6075_s6  ;;  %v10447_v24 = vld [vmem:[#allocation12_spill] sm:$0xff]  ;;  %v10448_v37 = vld [vmem:[#allocation13_spill] sm:$0xff] }
 0x685   : > { %4103 = vrot.lane.b32.xlu2 %v10439_v8, %s6075_s6  ;;  %v10449_v8 = vld [vmem:[#allocation16_spill] sm:$0xff] }
 0x687   : > { %5763 = vmatmul.msk.bf16.gmra.mxu2 %vm360_vm0, %v8649_v18 }
 0x688   : > { %v8705_v53 = vpop.f32.mrf.mxu3 }
 0x689   : > { %10458 = vst [vmem:[#allocation54_spill] sm:$0xff] %v8705_v53 }
 0x68c   : > { %4083 = vrot.lane.b32.xlu0 %v10440_v28, %s6075_s6  ;;  %4085 = vrot.lane.b32.xlu1 %v10441_v0, %s6075_s6  ;;  %v10450_v28 = vld [vmem:[#allocation15_spill] sm:$0xff]  ;;  %v10451_v0 = vld [vmem:[#allocation14_spill] sm:$0xff] }
 0x68d   : > { %4105 = vrot.lane.b32.xlu2 %v10442_v20, %s6075_s6  ;;  %5767 = vmatmul.msk.bf16.gmra.mxu3 %vm360_vm0, %v8649_v18  ;;  %v10452_v20 = vld [vmem:[#allocation21_spill] sm:$0xff] }
 0x68f   : > { %5759 = vmatmul.msk.bf16.gmra.mxu1 %vm360_vm0, %v8649_v18 }
 0x691   : > { %5755 = vmatmul.msk.bf16.gmra.mxu0 %vm360_vm0, %v8649_v18 }
 0x694   : > { %4081 = vrot.lane.b32.xlu0 %v10443_v26, %s6075_s6  ;;  %4087 = vrot.lane.b32.xlu1 %v10444_v56, %s6075_s6  ;;  %v10453_v26 = vld [vmem:[#allocation17_spill] sm:$0xff]  ;;  %v10454_v56 = vld [vmem:[#allocation18_spill] sm:$0xff] }
 0x695   : > { %4079 = vrot.lane.b32.xlu2 %v10445_v29, %s6075_s6  ;;  %v10455_v29 = vld [vmem:[#allocation22_spill] sm:$0xff] }
 0x69c   : > { %4111 = vrot.lane.b32.xlu0 %v10446_v51, %s6075_s6  ;;  %4107 = vrot.lane.b32.xlu1 %v10447_v24, %s6075_s6  ;;  %v10456_v51 = vld [vmem:[#allocation20_spill] sm:$0xff] }
 0x69d   : > { %4109 = vrot.lane.b32.xlu2 %v10448_v37, %s6075_s6 }
 0x6a4   : > { %4091 = vrot.lane.b32.xlu0 %v10449_v8, %s6075_s6  ;;  %4093 = vrot.lane.b32.xlu1 %v10450_v28, %s6075_s6  ;;  %v8699_v8 = vpop.f32.mrf.mxu2  ;;  %v8701_v28 = vpop.f32.mrf.mxu1 }
 0x6a5   : > { %4113 = vrot.lane.b32.xlu2 %v10451_v0, %s6075_s6  ;;  %10457 = vst [vmem:[#allocation52_spill] sm:$0xff] %v8699_v8  ;;  %v8703_v0 = vpop.f32.mrf.mxu0 }
 0x6ac   : > { %4095 = vrot.lane.b32.xlu0 %v10452_v20, %s6075_s6  ;;  %6040 = vrot.lane.b32.xlu1 %v10453_v26, %s6076_s9 }
 0x6ad   : > { %4089 = vrot.lane.b32.xlu2 %v10454_v56, %s6075_s6 }
 0x6b4   : > { %4464 = vrot.lane.b32.xlu0 %v10455_v29, %s6076_s9 }
 0x6b5   : > { %6045 = vrot.lane.b32.xlu2 %v10456_v51, %s6076_s9 }
 0x6c7   : > { %v3704_v24 = vpop.permute.xlu2 %3703 }
 0x6cf   : > { %v3708_v37 = vpop.permute.xlu2 %3707 }
 0x6d7   : > { %v3684_v20 = vpop.permute.xlu2 %3683 }
 0x6da   : > { %v3821_v26 = vpop.f32.mrf.mxu2 }
 0x6db   : > { %v8708_v56 = vadd.f32 %v3821_v26, %v8333_v45 }
 0x6dc   : > { %v3792_v39 = vpop.f32.mrf.mxu1 }
 0x6dd   : > { %v8711_v29 = vadd.f32 %v3792_v39, %v8330_v33 }
 0x6de   : > { %v3763_v51 = vpop.f32.mrf.mxu0  ;;  %v3706_v32 = vpop.permute.xlu0 %3705 }
 0x6df   : > { %v8714_v6 = vadd.f32 %v3763_v51, %v8337_v34  ;;  %v3724_v5 = vsel %vm3555_vm10, %v3704_v24, %v3706_v32  ;;  %v3725_v63 = vsel %vm3555_vm10, %v3706_v32, %v3708_v37  ;;  %v3702_v21 = vpop.permute.xlu1 %3701  ;;  %v4104_v8 = vpop.permute.xlu2 %4103  ;;  %v3714_v32 = vsel %vm3555_vm10, %v8522_v16, %v3684_v20  ;;  %v10464_v51 = vld [vmem:[#allocation227_spill] sm:$0xff] }
 0x6e0   : > { %v3722_v53 = vsel %vm3555_vm10, %v8516_v11, %v3702_v21  ;;  %v3723_v45 = vsel %vm3555_vm10, %v3702_v21, %v3704_v24  ;;  %v3850_v26 = vpop.f32.mrf.mxu3  ;;  %3934 = vmatpush.bf16.msrb.mxu2 %v3724_v5  ;;  %3963 = vmatpush.bf16.msrb.mxu3 %v3725_v63 }
 0x6e1   : > { %v8722_v39 = vadd.f32 %v3850_v26, %v8345_v2  ;;  %3876 = vmatpush.bf16.msrb.mxu0 %v3722_v53  ;;  %3905 = vmatpush.bf16.msrb.mxu1 %v3723_v45 }
 0x6e2   : > { %v8724_v34 = vpop.f32.mrf.mxu2 }
 0x6e3   : > { %10459 = vst [vmem:[#allocation217_spill] sm:$0xff] %v8724_v34 }
 0x6e4   : > { %v8728_v33 = vpop.f32.mrf.mxu1 }
 0x6e5   : > { %10460 = vst [vmem:[#allocation218_spill] sm:$0xff] %v8728_v33  ;;  %3877 = vmatpush.bf16.msrb.mxu0 %v3714_v32  ;;  %v10466_v33 = vld [vmem:[#allocation232_spill] sm:$0xff] }
 0x6e6   : > { %v8730_v37 = vpop.f32.mrf.mxu0  ;;  %v3686_v11 = vpop.permute.xlu0 %3685 }
 0x6e7   : > { %10461 = vst [vmem:[#allocation10_spill] sm:$0xff] %v8730_v37  ;;  %v3688_v21 = vpop.permute.xlu1 %3687  ;;  %v8732_v24 = vpop.permute.xlu2 %4105  ;;  %v3715_v63 = vsel %vm3555_vm10, %v3684_v20, %v3686_v11 }
 0x6e8   : > { %5768 = vmatmul.msk.bf16.vlgmr.msrb.gmra.mxu0 %vm360_vm0, %v8514_v43  ;;  %v8737_v5 = vpop.f32.mrf.mxu3  ;;  %3906 = vmatpush.bf16.msrb.mxu1 %v3715_v63  ;;  %v3716_v53 = vsel %vm3555_vm10, %v3686_v11, %v3688_v21  ;;  %v10465_v63 = vld [vmem:[#allocation229_spill] sm:$0xff] }
 0x6e9   : > { %10462 = vst [vmem:[#allocation216_spill] sm:$0xff] %v8737_v5  ;;  %3935 = vmatpush.bf16.msrb.mxu2 %v3716_v53 }
 0x6ea   : > { %v3826_v2 = vpop.f32.mrf.mxu2 }
 0x6eb   : > { %v8741_v16 = vadd.f32 %v3826_v2, %v8358_v1  ;;  %5772 = vmatmul.msk.bf16.vlgmr.msrb.gmra.mxu1 %vm360_vm0, %v8514_v43  ;;  %v4127_v2 = vsel %vm4115_vm11, %v4104_v8, %v8732_v24 }
 0x6ec   : > { %5776 = vmatmul.msk.bf16.vlgmr.msrb.gmra.mxu2 %vm360_vm0, %v8514_v43  ;;  %v3797_v20 = vpop.f32.mrf.mxu1 }
 0x6ed   : > { %10463 = vst [vmem:[#allocation219_spill] sm:$0xff] %v8741_v16  ;;  %v8748_v45 = vadd.f32 %v3797_v20, %v10464_v51 }
 0x6ee   : > { %v3768_v26 = vpop.f32.mrf.mxu0  ;;  %v3690_v32 = vpop.permute.xlu0 %3689 }
 0x6ef   : > { %v8751_v11 = vadd.f32 %v3768_v26, %v10465_v63  ;;  %v4102_v53 = vpop.permute.xlu1 %4101  ;;  %v4080_v5 = vpop.permute.xlu2 %4079  ;;  %v3717_v1 = vsel %vm3555_vm10, %v3688_v21, %v3690_v32 }
 0x6f0   : > { %v4126_v34 = vsel %vm4115_vm11, %v4102_v53, %v4104_v8  ;;  %v3855_v37 = vpop.f32.mrf.mxu3  ;;  %3964 = vmatpush.bf16.msrb.mxu3 %v3717_v1 }
 0x6f1   : > { %v8758_v16 = vadd.f32 %v3855_v37, %v10466_v33  ;;  %4224 = vmatpush.bf16.msra.mxu2 %v4126_v34 }
 0x6f2   : > { %v8760_v20 = vpop.f32.mrf.mxu2 }
 0x6f3   : > { %10467 = vst [vmem:[#allocation3_spill] sm:$0xff] %v8760_v20  ;;  %5780 = vmatmul.msk.bf16.vlgmr.msrb.gmra.mxu3 %vm360_vm0, %v8514_v43 }
 0x6f4   : > { %4253 = vmatpush.bf16.msra.mxu3 %v4127_v2  ;;  %v8764_v51 = vpop.f32.mrf.mxu1 }
 0x6f5   : > { %10468 = vst [vmem:[#allocation9_spill] sm:$0xff] %v8764_v51 }
 0x6f6   : > { %v8766_v21 = vpop.f32.mrf.mxu0  ;;  %v4098_v26 = vpop.permute.xlu0 %4097 }
 0x6f7   : > { %10469 = vst [vmem:[#allocation4_spill] sm:$0xff] %v8766_v21  ;;  %v4100_v32 = vpop.permute.xlu1 %4099  ;;  %v4110_v63 = vpop.permute.xlu2 %4109 }
 0x6f8   : > { %v4124_v8 = vsel %vm4115_vm11, %v4098_v26, %v4100_v32  ;;  %v4125_v1 = vsel %vm4115_vm11, %v4100_v32, %v4102_v53  ;;  %5769 = vmatmul.msk.bf16.gmra.mxu0 %vm360_vm0, %v8557_v14  ;;  %v8772_v34 = vpop.f32.mrf.mxu3 }
 0x6f9   : > { %10470 = vst [vmem:[#allocation2_spill] sm:$0xff] %v8772_v34  ;;  %4166 = vmatpush.bf16.msra.mxu0 %v4124_v8  ;;  %4195 = vmatpush.bf16.msra.mxu1 %v4125_v1 }
 0x6fa   : > { %v3831_v33 = vpop.f32.mrf.mxu2 }
 0x6fb   : > { %v8775_v43 = vadd.f32 %v3831_v33, %v8402_v38  ;;  %5773 = vmatmul.msk.bf16.gmra.mxu1 %vm360_vm0, %v8557_v14 }
 0x6fc   : > { %5777 = vmatmul.msk.bf16.gmra.mxu2 %vm360_vm0, %v8557_v14  ;;  %v3802_v37 = vpop.f32.mrf.mxu1 }
 0x6fd   : > { %10471 = vst [vmem:[#allocation7_spill] sm:$0xff] %v8775_v43  ;;  %v8782_v53 = vadd.f32 %v3802_v37, %v8395_v15 }
 0x6fe   : > { %v3773_v2 = vpop.f32.mrf.mxu0  ;;  %v4084_v26 = vpop.permute.xlu0 %4083 }
 0x6ff   : > { %v8785_v32 = vadd.f32 %v3773_v2, %v8408_v47  ;;  %v4086_v8 = vpop.permute.xlu1 %4085  ;;  %v4114_v1 = vpop.permute.xlu2 %4113 }
 0x700   : > { %v3860_v34 = vpop.f32.mrf.mxu3  ;;  %v4118_v38 = vsel %vm4115_vm11, %v4084_v26, %v4086_v8 }
 0x701   : > { %v8789_v33 = vadd.f32 %v3860_v34, %v8433_v30  ;;  %4225 = vmatpush.bf16.msra.mxu2 %v4118_v38 }
 0x702   : > { %v8791_v20 = vpop.f32.mrf.mxu2 }
 0x703   : > { %10472 = vst [vmem:[#allocation5_spill] sm:$0xff] %v8791_v20  ;;  %5781 = vmatmul.msk.bf16.gmra.mxu3 %vm360_vm0, %v8557_v14 }
 0x704   : > { %v8795_v15 = vpop.f32.mrf.mxu1 }
 0x705   : > { %10473 = vst [vmem:[#allocation6_spill] sm:$0xff] %v8795_v15 }
 0x706   : > { %v8797_v37 = vpop.f32.mrf.mxu0  ;;  %v4082_v47 = vpop.permute.xlu0 %4081 }
 0x707   : > { %10474 = vst [vmem:[#allocation11_spill] sm:$0xff] %v8797_v37  ;;  %v4088_v2 = vpop.permute.xlu1 %4087  ;;  %v4090_v21 = vpop.permute.xlu2 %4089  ;;  %v4116_v51 = vsel %vm4115_vm11, %v4080_v5, %v4082_v47  ;;  %v4117_v43 = vsel %vm4115_vm11, %v4082_v47, %v4084_v26 }
 0x708   : > { %5770 = vmatmul.msk.bf16.gmra.mxu0 %vm360_vm0, %v8609_v59  ;;  %v8803_v30 = vpop.f32.mrf.mxu3  ;;  %4196 = vmatpush.bf16.msra.mxu1 %v4117_v43  ;;  %v4119_v34 = vsel %vm4115_vm11, %v4086_v8, %v4088_v2 }
 0x709   : > { %10475 = vst [vmem:[#allocation8_spill] sm:$0xff] %v8803_v30  ;;  %4167 = vmatpush.bf16.msra.mxu0 %v4116_v51  ;;  %4254 = vmatpush.bf16.msra.mxu3 %v4119_v34 }
 0x70a   : > { %v3836_v14 = vpop.f32.mrf.mxu2 }
 0x70b   : > { %v8807_v38 = vadd.f32 %v3836_v14, %v8452_v57  ;;  %5774 = vmatmul.msk.bf16.gmra.mxu1 %vm360_vm0, %v8609_v59 }
 0x70c   : > { %5778 = vmatmul.msk.bf16.gmra.mxu2 %vm360_vm0, %v8609_v59  ;;  %v3807_v5 = vpop.f32.mrf.mxu1 }
 0x70d   : > { %v8814_v26 = vadd.f32 %v3807_v5, %v8447_v36 }
 0x70e   : > { %v3778_v47 = vpop.f32.mrf.mxu0  ;;  %v4112_v43 = vpop.permute.xlu0 %4111 }
 0x70f   : > { %v8817_v8 = vadd.f32 %v3778_v47, %v8456_v23  ;;  %v4130_v51 = vsel %vm4115_vm11, %v4110_v63, %v4112_v43  ;;  %v4131_v57 = vsel %vm4115_vm11, %v4112_v43, %v4114_v1  ;;  %v4108_v34 = vpop.permute.xlu1 %4107  ;;  %v6046_v14 = vpop.permute.xlu2 %6045  ;;  %v10476_v23 = vld [vmem:[#allocation31_spill] sm:$0xff]  ;;  %v10477_v47 = vld [vmem:[#allocation32_spill] sm:$0xff] }
 0x710   : > { %v4128_v30 = vsel %vm4115_vm11, %v8732_v24, %v4108_v34  ;;  %v4129_v20 = vsel %vm4115_vm11, %v4108_v34, %v4110_v63  ;;  %v8824_v37 = vunpack.i.h.bf16 %v6046_v14  ;;  %v3865_v36 = vpop.f32.mrf.mxu3  ;;  %4340 = vmatpush.bf16.msrb.mxu2 %v4130_v51  ;;  %4369 = vmatpush.bf16.msrb.mxu3 %v4131_v57  ;;  %v4120_v24 = vsel %vm4115_vm11, %v4088_v2, %v4090_v21 }
 0x711   : > { %v8827_v5 = vadd.f32 %v3865_v36, %v8469_v54  ;;  %4282 = vmatpush.bf16.msrb.mxu0 %v4128_v30  ;;  %4311 = vmatpush.bf16.msrb.mxu1 %v4129_v20  ;;  %v6047_v34 = vunpack.i.l.bf16 %v6046_v14 }
 0x712   : > { %v4507_v1 = vmul.f32 %v8824_v37, %v10476_v23  ;;  %v4516_v43 = vmul.f32 %v8824_v37, %v10477_v47  ;;  %v10478_v47 = vld [vmem:[#allocation25_spill] sm:$0xff] }
 0x713   : > { %5782 = vmatmul.msk.bf16.gmra.mxu3 %vm360_vm0, %v8609_v59 }
 0x714   : > { %v4534_v63 = vpack.c.bf16 %v4516_v43, %v4507_v1 }
 0x715   : > { %4283 = vmatpush.bf16.msrb.mxu0 %v4120_v24  ;;  %v10479_v24 = vld [vmem:[#allocation26_spill] sm:$0xff] }
 0x716   : > { %4608 = vrot.lane.b32.xlu0 %v4534_v63, %s6077_s10  ;;  %v4092_v54 = vpop.permute.xlu0 %4091 }
 0x717   : > { %v4094_v51 = vpop.permute.xlu1 %4093  ;;  %v4121_v20 = vsel %vm4115_vm11, %v4090_v21, %v4092_v54 }
 0x718   : > { %5771 = vmatmul.msk.bf16.gmra.mxu0 %vm360_vm0, %v8649_v18  ;;  %4312 = vmatpush.bf16.msrb.mxu1 %v4121_v20  ;;  %v4122_v30 = vsel %vm4115_vm11, %v4092_v54, %v4094_v51 }
 0x719   : > { %4341 = vmatpush.bf16.msrb.mxu2 %v4122_v30  ;;  %v10481_v30 = vld [vmem:[#allocation37_spill] sm:$0xff] }
 0x71b   : > { %5775 = vmatmul.msk.bf16.gmra.mxu1 %vm360_vm0, %v8649_v18 }
 0x71c   : > { %5779 = vmatmul.msk.bf16.gmra.mxu2 %vm360_vm0, %v8649_v18 }
 0x71e   : > { %v4096_v59 = vpop.permute.xlu0 %4095 }
 0x71f   : > { %v6041_v2 = vpop.permute.xlu1 %6040  ;;  %v4123_v57 = vsel %vm4115_vm11, %v4094_v51, %v4096_v59  ;;  %v10480_v51 = vld [vmem:[#allocation36_spill] sm:$0xff] }
 0x720   : > { %v6043_v21 = vunpack.i.h.bf16 %v6041_v2  ;;  %v6042_v36 = vunpack.i.l.bf16 %v6041_v2  ;;  %4370 = vmatpush.bf16.msrb.mxu3 %v4123_v57 }
 0x722   : > { %v4474_v23 = vsel %vm4472_vm12, %v6042_v36, %v6043_v21  ;;  %v4475_v1 = vsel %vm4472_vm12, %v6043_v21, %v6047_v34  ;;  %v8859_v21 = vld [vmem:[%s9821_s3 + $0xe0] sm:$0xff] }
 0x723   : > { %5783 = vmatmul.msk.bf16.gmra.mxu3 %vm360_vm0, %v8649_v18  ;;  %v4509_v43 = vmul.f32 %v4474_v23, %v10478_v47  ;;  %v4518_v63 = vmul.f32 %v4474_v23, %v10479_v24  ;;  %v4491_v54 = vmul.f32 %v4474_v23, %v10294_v10  ;;  %v4500_v20 = vmul.f32 %v4474_v23, %v10295_v17  ;;  %v10482_v10 = vld [vmem:[#allocation33_spill] sm:$0xff] }
 0x724   : > { %v4510_v14 = vmul.f32 %v4475_v1, %v10480_v51  ;;  %v4519_v59 = vmul.f32 %v4475_v1, %v10481_v30  ;;  %v4473_v18 = vsel %vm4472_vm12, %v8824_v37, %v6042_v36 }
 0x725   : > { %v4536_v2 = vpack.c.bf16 %v4518_v63, %v4509_v43  ;;  %v4527_v57 = vpack.c.bf16 %v4500_v20, %v4491_v54  ;;  %v4508_v23 = vmul.f32 %v4473_v18, %v10482_v10  ;;  %v10483_v43 = vld [vmem:[#allocation34_spill] sm:$0xff]  ;;  %v4490_v36 = vmul.f32 %v4473_v18, %v10402_v44  ;;  %v10486_v44 = vld [vmem:[#allocation49_spill] sm:$0xff] }
 0x726   : > { %v8863_v47 = vpop.permute.xlu0 %4464  ;;  %v4537_v24 = vpack.c.bf16 %v4519_v59, %v4510_v14  ;;  %v4517_v63 = vmul.f32 %v4473_v18, %v10483_v43  ;;  %v4499_v54 = vmul.f32 %v4473_v18, %v10403_v62  ;;  %v10484_v20 = vld [vmem:[#allocation42_spill] sm:$0xff]  ;;  %v4492_v62 = vmul.f32 %v4475_v1, %v10486_v44  ;;  %v8896_v43 = vld [vmem:[%s9821_s3 + $0xe8] sm:$0xff] }
 0x727   : > { %v4476_v17 = vsel %vm4472_vm12, %v6047_v34, %v8863_v47  ;;  %4612 = vrot.lane.b32.xlu1 %v4536_v2, %s6077_s10  ;;  %4594 = vrot.lane.b32.xlu0 %v4527_v57, %s6077_s10  ;;  %v10485_v34 = vld [vmem:[#allocation43_spill] sm:$0xff]  ;;  %v10487_v57 = vld [vmem:[#allocation57_spill] sm:$0xff]  ;;  %v4498_v10 = vmul.f32 %v8824_v37, %v10405_v25  ;;  %v10496_v44 = vld [vmem:[#allocation82_spill] sm:$0xff] }
 0x728   : > { %4614 = vrot.lane.b32.xlu2 %v4537_v24, %s6077_s10  ;;  %5808 = vmatmul.msk.bf16.vlgmr.msra.gmra.mxu0 %vm360_vm0, %v8859_v21  ;;  %v4511_v51 = vmul.f32 %v4476_v17, %v10484_v20  ;;  %v4520_v14 = vmul.f32 %v4476_v17, %v10485_v34  ;;  %v4535_v30 = vpack.c.bf16 %v4517_v63, %v4508_v23  ;;  %v10492_v20 = vld [vmem:[#allocation93_spill] sm:$0xff] }
 0x729   : > { %v4526_v59 = vpack.c.bf16 %v4499_v54, %v4490_v36  ;;  %v4501_v18 = vmul.f32 %v4475_v1, %v10487_v57  ;;  %v4489_v24 = vmul.f32 %v8824_v37, %v10404_v52  ;;  %v10488_v36 = vld [vmem:[#allocation38_spill] sm:$0xff]  ;;  %v4493_v52 = vmul.f32 %v4476_v17, %v10406_v61  ;;  %v10489_v1 = vld [vmem:[#allocation39_spill] sm:$0xff]  ;;  %v8931_v61 = vld [vmem:[%s9821_s3 + $0xf8] sm:$0xff]  ;;  %v8941_v54 = vpop.f32.mrf.mxu1 }
 0x72a   : > { %v4538_v2 = vpack.c.bf16 %v4520_v14, %v4511_v51  ;;  %v4502_v25 = vmul.f32 %v4476_v17, %v10407_v48  ;;  %v8918_v48 = vld [vmem:[%s9821_s3 + $0xf0] sm:$0xff]  ;;  %v8939_v17 = vpop.f32.mrf.mxu0  ;;  %10491 = vst [vmem:[#allocation12_spill] sm:$0xff] %v8941_v54  ;;  %v10493_v51 = vld [vmem:[#allocation141_spill] sm:$0xff]  ;;  %v10494_v14 = vld [vmem:[#allocation94_spill] sm:$0xff] }
 0x72b   : > { %5812 = vmatmul.msk.bf16.vlgmr.msra.gmra.mxu1 %vm360_vm0, %v8859_v21  ;;  %v4528_v23 = vpack.c.bf16 %v4501_v18, %v4492_v62  ;;  %v4525_v63 = vpack.c.bf16 %v4498_v10, %v4489_v24  ;;  %10490 = vst [vmem:[#allocation19_spill] sm:$0xff] %v8939_v17  ;;  %v1469_v34 = vadd.f32 %v10493_v51, %v10492_v20  ;;  %v8953_v18 = vpop.f32.mrf.mxu2  ;;  %v10498_v24 = vld [vmem:[#allocation27_spill] sm:$0xff]  ;;  %v10503_v51 = vld [vmem:[#allocation146_spill] sm:$0xff] }
 0x72c   : > { %5816 = vmatmul.msk.bf16.vlgmr.msra.gmra.mxu2 %vm360_vm0, %v8859_v21  ;;  %v4529_v37 = vpack.c.bf16 %v4502_v25, %v4493_v52  ;;  %10497 = vst [vmem:[#allocation13_spill] sm:$0xff] %v8953_v18  ;;  %v10500_v25 = vld [vmem:[#allocation205_spill] sm:$0xff]  ;;  %v10518_v17 = vld [vmem:[#allocation239_spill] sm:$0xff] }
 0x72d   : > { %v2052_v62 = vadd.f32 %v10496_v44, %v1469_v34 }
 0x72f   : > { %4610 = vrot.lane.b32.xlu1 %v4535_v30, %s6077_s10  ;;  %4592 = vrot.lane.b32.xlu0 %v4526_v59, %s6077_s10  ;;  %v10495_v30 = vld [vmem:[#allocation142_spill] sm:$0xff]  ;;  %v2570_v10 = vadd.f32 %v10498_v24, %v2052_v62 }
 0x730   : > { %4616 = vrot.lane.b32.xlu2 %v4538_v2, %s6077_s10  ;;  %v1498_v59 = vadd.f32 %v10495_v30, %v10494_v14  ;;  %v10504_v30 = vld [vmem:[#allocation206_spill] sm:$0xff] }
 0x733   : > { %5820 = vmatmul.msk.bf16.vlgmr.msra.gmra.mxu3 %vm360_vm0, %v8859_v21 }
 0x737   : > { %4470 = vrot.lane.b32.xlu0 %v10488_v36, %s6076_s9  ;;  %4596 = vrot.lane.b32.xlu1 %v4528_v23, %s6077_s10 }
 0x738   : > { %4590 = vrot.lane.b32.xlu2 %v4525_v63, %s6077_s10  ;;  %5809 = vmatmul.msk.bf16.gmra.mxu0 %vm360_vm0, %v8896_v43  ;;  %v10499_v63 = vld [vmem:[#allocation83_spill] sm:$0xff] }
 0x739   : > { %v2053_v36 = vadd.f32 %v10499_v63, %v1498_v59  ;;  %v10507_v63 = vld [vmem:[#allocation50_spill] sm:$0xff] }
 0x73b   : > { %5813 = vmatmul.msk.bf16.gmra.mxu1 %vm360_vm0, %v8896_v43 }
 0x73c   : > { %5817 = vmatmul.msk.bf16.gmra.mxu2 %vm360_vm0, %v8896_v43 }
 0x73f   : > { %4598 = vrot.lane.b32.xlu1 %v4529_v37, %s6077_s10  ;;  %v2976_v37 = vadd.f32 %v10500_v25, %v2570_v10  ;;  %v10506_v10 = vld [vmem:[#allocation88_spill] sm:$0xff] }
 0x740   : > { %6050 = vrot.lane.b32.xlu2 %v10489_v1, %s6076_s9  ;;  %v10501_v1 = vld [vmem:[#allocation30_spill] sm:$0xff] }
 0x741   : > { %v2571_v20 = vadd.f32 %v10501_v1, %v2053_v36  ;;  %v3487_v14 = vadd.f32 %v8506_v3, %v2976_v37  ;;  %v10508_v37 = vld [vmem:[#allocation101_spill] sm:$0xff]  ;;  %v10509_v1 = vld [vmem:[#allocation147_spill] sm:$0xff] }
 0x743   : > { %5821 = vmatmul.msk.bf16.gmra.mxu3 %vm360_vm0, %v8896_v43  ;;  %v2977_v59 = vadd.f32 %v10504_v30, %v2571_v20  ;;  %v10510_v20 = vld [vmem:[#allocation168_spill] sm:$0xff]  ;;  %v10511_v30 = vld [vmem:[#allocation103_spill] sm:$0xff] }
 0x745   : > { %v3488_v62 = vadd.f32 %v8508_v9, %v2977_v59  ;;  %v10513_v9 = vld [vmem:[#allocation204_spill] sm:$0xff] }
 0x748   : > { %5810 = vmatmul.msk.bf16.gmra.mxu0 %vm360_vm0, %v8918_v48 }
 0x74b   : > { %5814 = vmatmul.msk.bf16.gmra.mxu1 %vm360_vm0, %v8918_v48 }
 0x74c   : > { %5818 = vmatmul.msk.bf16.gmra.mxu2 %vm360_vm0, %v8918_v48 }
 0x753   : > { %5822 = vmatmul.msk.bf16.gmra.mxu3 %vm360_vm0, %v8918_v48 }
 0x758   : > { %5811 = vmatmul.msk.bf16.gmra.mxu0 %vm360_vm0, %v8931_v61 }
 0x75b   : > { %5815 = vmatmul.msk.bf16.gmra.mxu1 %vm360_vm0, %v8931_v61 }
 0x75c   : > { %5819 = vmatmul.msk.bf16.gmra.mxu2 %vm360_vm0, %v8931_v61 }
 0x763   : > { %5823 = vmatmul.msk.bf16.gmra.mxu3 %vm360_vm0, %v8931_v61 }
 0x765   : > { %v3879_v2 = vpop.f32.mrf.mxu0 }
 0x766   : > { %v8951_v57 = vadd.f32 %v3879_v2, %v8494_v31  ;;  %v10502_v31 = vld [vmem:[#allocation100_spill] sm:$0xff] }
 0x767   : > { %v1527_v34 = vadd.f32 %v10503_v51, %v10502_v31  ;;  %v1474_v31 = vadd.f32 %v10509_v1, %v10508_v37  ;;  %v10519_v1 = vld [vmem:[#allocation91_spill] sm:$0xff] }
 0x768   : > { %v3908_v23 = vpop.f32.mrf.mxu1  ;;  %5824 = vmatmul.msk.bf16.vlgmr.msrb.gmra.mxu0 %vm360_vm0, %v8859_v21 }
 0x769   : > { %v8960_v52 = vadd.f32 %v3908_v23, %v8497_v60  ;;  %v8972_v60 = vpop.f32.mrf.mxu3  ;;  %v2054_v23 = vadd.f32 %v10506_v10, %v1527_v34  ;;  %v10514_v34 = vld [vmem:[#allocation102_spill] sm:$0xff] }
 0x76a   : > { %10505 = vst [vmem:[#allocation16_spill] sm:$0xff] %v8972_v60  ;;  %v10512_v60 = vld [vmem:[#allocation149_spill] sm:$0xff] }
 0x76b   : > { %5828 = vmatmul.msk.bf16.vlgmr.msrb.gmra.mxu1 %vm360_vm0, %v8859_v21  ;;  %v2572_v51 = vadd.f32 %v10510_v20, %v2054_v23 }
 0x76c   : > { %5832 = vmatmul.msk.bf16.vlgmr.msrb.gmra.mxu2 %vm360_vm0, %v8859_v21 }
 0x76d   : > { %v3881_v2 = vpop.f32.mrf.mxu0  ;;  %v2978_v59 = vadd.f32 %v10513_v9, %v2572_v51 }
 0x76e   : > { %v8974_v44 = vadd.f32 %v3881_v2, %v3487_v14  ;;  %v1556_v14 = vadd.f32 %v10512_v60, %v10511_v30  ;;  %v10515_v2 = vld [vmem:[#allocation148_spill] sm:$0xff]  ;;  %v10520_v30 = vld [vmem:[#allocation61_spill] sm:$0xff] }
 0x76f   : > { %v3937_v24 = vpop.f32.mrf.mxu2 }
 0x770   : > { %v8979_v36 = vadd.f32 %v3937_v24, %v10507_v63  ;;  %v3910_v25 = vpop.f32.mrf.mxu1  ;;  %v1503_v24 = vadd.f32 %v10515_v2, %v10514_v34  ;;  %v10516_v63 = vld [vmem:[#allocation89_spill] sm:$0xff]  ;;  %v2055_v20 = vadd.f32 %v10519_v1, %v1556_v14  ;;  %v10523_v2 = vld [vmem:[#allocation90_spill] sm:$0xff]  ;;  %v10529_v1 = vld [vmem:[#allocation207_spill] sm:$0xff] }
 0x771   : > { %v8981_v3 = vadd.f32 %v3910_v25, %v3488_v62  ;;  %v2068_v62 = vadd.f32 %v10516_v63, %v1474_v31  ;;  %v10517_v25 = vld [vmem:[#allocation53_spill] sm:$0xff]  ;;  %v10524_v31 = vld [vmem:[#allocation178_spill] sm:$0xff] }
 0x772   : > { %v3489_v18 = vadd.f32 %v10517_v25, %v2978_v59  ;;  %v2069_v15 = vadd.f32 %v10523_v2, %v1503_v24  ;;  %v2573_v63 = vadd.f32 %v10524_v31, %v2055_v20  ;;  %v10527_v14 = vld [vmem:[#allocation209_spill] sm:$0xff]  ;;  %v10534_v2 = vld [vmem:[#allocation238_spill] sm:$0xff] }
 0x773   : > { %5836 = vmatmul.msk.bf16.vlgmr.msrb.gmra.mxu3 %vm360_vm0, %v8859_v21  ;;  %v10521_v21 = vld [vmem:[#allocation180_spill] sm:$0xff]  ;;  %v10528_v25 = vld [vmem:[#allocation181_spill] sm:$0xff] }
 0x774   : > { %v2586_v51 = vadd.f32 %v10521_v21, %v2068_v62  ;;  %v10531_v62 = vld [vmem:[#allocation154_spill] sm:$0xff] }
 0x775   : > { %v3884_v10 = vpop.f32.mrf.mxu0  ;;  %v10533_v21 = vld [vmem:[#allocation210_spill] sm:$0xff] }
 0x776   : > { %v8996_v37 = vadd.f32 %v3884_v10, %v10518_v17  ;;  %v3966_v23 = vpop.f32.mrf.mxu3  ;;  %v10525_v17 = vld [vmem:[#allocation240_spill] sm:$0xff]  ;;  %v2992_v10 = vadd.f32 %v10527_v14, %v2586_v51 }
 0x777   : > { %v3939_v60 = vpop.f32.mrf.mxu2  ;;  %v9000_v54 = vadd.f32 %v3966_v23, %v10520_v30  ;;  %v2587_v23 = vadd.f32 %v10528_v25, %v2069_v15  ;;  %v2979_v30 = vadd.f32 %v10529_v1, %v2573_v63  ;;  %v10536_v63 = vld [vmem:[#allocation244_spill] sm:$0xff] }
 0x778   : > { %v9003_v9 = vadd.f32 %v3939_v60, %v3489_v18  ;;  %v3913_v34 = vpop.f32.mrf.mxu1  ;;  %5825 = vmatmul.msk.bf16.gmra.mxu0 %vm360_vm0, %v8896_v43  ;;  %v10530_v18 = vld [vmem:[#allocation108_spill] sm:$0xff]  ;;  %v10532_v60 = vld [vmem:[#allocation243_spill] sm:$0xff] }
 0x779   : > { %v9010_v59 = vadd.f32 %v3913_v34, %v10525_v17  ;;  %v1532_v24 = vadd.f32 %v10531_v62, %v10530_v18  ;;  %v3503_v20 = vadd.f32 %v10532_v60, %v2992_v10  ;;  %v2993_v34 = vadd.f32 %v10533_v21, %v2587_v23  ;;  %v10539_v62 = vld [vmem:[#allocation241_spill] sm:$0xff]  ;;  %v10543_v21 = vld [vmem:[#allocation155_spill] sm:$0xff] }
 0x77a   : > { %10522 = vst [vmem:[#allocation15_spill] sm:$0xff] %v9003_v9  ;;  %v3490_v31 = vadd.f32 %v10534_v2, %v2979_v30  ;;  %v10542_v23 = vld [vmem:[#allocation109_spill] sm:$0xff]  ;;  %v10544_v2 = vld [vmem:[#allocation179_spill] sm:$0xff] }
 0x77b   : > { %10526 = vst [vmem:[#allocation14_spill] sm:$0xff] %v9010_v59  ;;  %5829 = vmatmul.msk.bf16.gmra.mxu1 %vm360_vm0, %v8896_v43  ;;  %v3504_v14 = vadd.f32 %v10536_v63, %v2993_v34  ;;  %v10538_v59 = vld [vmem:[#allocation96_spill] sm:$0xff]  ;;  %v1479_v30 = vadd.f32 %v10543_v21, %v10542_v23  ;;  %v10546_v34 = vld [vmem:[#allocation157_spill] sm:$0xff] }
 0x77c   : > { %5833 = vmatmul.msk.bf16.gmra.mxu2 %vm360_vm0, %v8896_v43  ;;  %v2070_v18 = vadd.f32 %v10538_v59, %v1532_v24  ;;  %v10547_v59 = vld [vmem:[#allocation208_spill] sm:$0xff] }
 0x77d   : > { %v3886_v51 = vpop.f32.mrf.mxu0 }
 0x77e   : > { %v9024_v17 = vadd.f32 %v3886_v51, %v3503_v20  ;;  %v3968_v15 = vpop.f32.mrf.mxu3  ;;  %v2588_v20 = vadd.f32 %v10544_v2, %v2070_v18  ;;  %v10552_v2 = vld [vmem:[#allocation99_spill] sm:$0xff] }
 0x77f   : > { %v3942_v25 = vpop.f32.mrf.mxu2  ;;  %v9027_v1 = vadd.f32 %v3968_v15, %v3490_v31  ;;  %v10548_v31 = vld [vmem:[#allocation110_spill] sm:$0xff]  ;;  %v10549_v15 = vld [vmem:[#allocation156_spill] sm:$0xff] }
 0x780   : > { %10535 = vst [vmem:[#allocation21_spill] sm:$0xff] %v9024_v17  ;;  %v9031_v10 = vadd.f32 %v3942_v25, %v10539_v62  ;;  %v3915_v60 = vpop.f32.mrf.mxu1  ;;  %v10545_v17 = vld [vmem:[#allocation111_spill] sm:$0xff]  ;;  %v2994_v24 = vadd.f32 %v10547_v59, %v2588_v20  ;;  %v1508_v25 = vadd.f32 %v10549_v15, %v10548_v31  ;;  %v10550_v62 = vld [vmem:[#allocation97_spill] sm:$0xff]  ;;  %v10555_v15 = vld [vmem:[#allocation144_spill] sm:$0xff] }
 0x781   : > { %10537 = vst [vmem:[#allocation17_spill] sm:$0xff] %v9027_v1  ;;  %v9033_v9 = vadd.f32 %v3915_v60, %v3504_v14  ;;  %v1561_v63 = vadd.f32 %v10546_v34, %v10545_v17  ;;  %v2084_v60 = vadd.f32 %v10550_v62, %v1479_v30  ;;  %v10553_v34 = vld [vmem:[#allocation242_spill] sm:$0xff] }
 0x782   : > { %10540 = vst [vmem:[#allocation18_spill] sm:$0xff] %v9031_v10  ;;  %v9038_v51 = vpop.permute.xlu2 %4614  ;;  %v2085_v30 = vadd.f32 %v10555_v15, %v1508_v25  ;;  %v10556_v62 = vld [vmem:[#allocation182_spill] sm:$0xff] }
 0x783   : > { %10541 = vst [vmem:[#allocation22_spill] sm:$0xff] %v9033_v9  ;;  %5837 = vmatmul.msk.bf16.gmra.mxu3 %vm360_vm0, %v8896_v43  ;;  %v10551_v9 = vld [vmem:[#allocation245_spill] sm:$0xff]  ;;  %v2071_v10 = vadd.f32 %v10552_v2, %v1561_v63  ;;  %v10554_v43 = vld [vmem:[#allocation184_spill] sm:$0xff] }
 0x784   : > { %v3505_v23 = vadd.f32 %v10551_v9, %v2994_v24  ;;  %v2602_v20 = vadd.f32 %v10554_v43, %v2084_v60  ;;  %v10557_v63 = vld [vmem:[#allocation213_spill] sm:$0xff]  ;;  %v10563_v43 = vld [vmem:[#allocation214_spill] sm:$0xff] }
 0x785   : > { %v3889_v14 = vpop.f32.mrf.mxu0  ;;  %v2589_v9 = vadd.f32 %v10556_v62, %v2071_v10  ;;  %v10561_v10 = vld [vmem:[#allocation116_spill] sm:$0xff] }
 0x786   : > { %v9050_v18 = vadd.f32 %v3889_v14, %v8576_v13  ;;  %v3971_v21 = vpop.f32.mrf.mxu3  ;;  %v3008_v24 = vadd.f32 %v10557_v63, %v2602_v20 }
 0x787   : > { %v3944_v17 = vpop.f32.mrf.mxu2  ;;  %v9054_v1 = vadd.f32 %v3971_v21, %v10553_v34  ;;  %v10559_v21 = vld [vmem:[#allocation185_spill] sm:$0xff] }
 0x788   : > { %v9057_v59 = vadd.f32 %v3944_v17, %v3505_v23  ;;  %v3918_v31 = vpop.f32.mrf.mxu1  ;;  %5826 = vmatmul.msk.bf16.gmra.mxu0 %vm360_vm0, %v8918_v48  ;;  %v2603_v60 = vadd.f32 %v10559_v21, %v2085_v30  ;;  %v10560_v23 = vld [vmem:[#allocation211_spill] sm:$0xff]  ;;  %v10562_v17 = vld [vmem:[#allocation162_spill] sm:$0xff] }
 0x789   : > { %v9064_v13 = vadd.f32 %v3918_v31, %v8579_v40  ;;  %v2995_v2 = vadd.f32 %v10560_v23, %v2589_v9  ;;  %v1537_v34 = vadd.f32 %v10562_v17, %v10561_v10  ;;  %v3519_v40 = vadd.f32 %v8602_v55, %v3008_v24  ;;  %v10564_v23 = vld [vmem:[#allocation98_spill] sm:$0xff] }
 0x78a   : > { %v9067_v14 = vpop.permute.xlu2 %4616  ;;  %v3009_v20 = vadd.f32 %v10563_v43, %v2603_v60 }
 0x78b   : > { %10558 = vst [vmem:[#allocation20_spill] sm:$0xff] %v9067_v14  ;;  %v4638_v25 = vsel %vm4626_vm13, %v9038_v51, %v9067_v14  ;;  %5830 = vmatmul.msk.bf16.gmra.mxu1 %vm360_vm0, %v8918_v48  ;;  %v3506_v31 = vadd.f32 %v8567_v50, %v2995_v2  ;;  %v2086_v10 = vadd.f32 %v10564_v23, %v1537_v34  ;;  %v10567_v50 = vld [vmem:[#allocation117_spill] sm:$0xff]  ;;  %v10568_v2 = vld [vmem:[#allocation163_spill] sm:$0xff] }
 0x78c   : > { %4764 = vmatpush.bf16.msra.mxu3 %v4638_v25  ;;  %5834 = vmatmul.msk.bf16.gmra.mxu2 %vm360_vm0, %v8918_v48  ;;  %v3520_v9 = vadd.f32 %v8604_v46, %v3009_v20  ;;  %v9092_v25 = vpop.permute.xlu0 %4608  ;;  %v1484_v17 = vadd.f32 %v10568_v2, %v10567_v50  ;;  %v10570_v46 = vld [vmem:[#allocation119_spill] sm:$0xff]  ;;  %v10571_v20 = vld [vmem:[#allocation165_spill] sm:$0xff] }
 0x78d   : > { %v3891_v15 = vpop.f32.mrf.mxu0 }
 0x78e   : > { %v9083_v30 = vadd.f32 %v3891_v15, %v3519_v40  ;;  %v3973_v62 = vpop.f32.mrf.mxu3  ;;  %v10569_v40 = vld [vmem:[#allocation183_spill] sm:$0xff] }
 0x78f   : > { %v3947_v63 = vpop.f32.mrf.mxu2  ;;  %v9086_v21 = vadd.f32 %v3973_v62, %v3506_v31  ;;  %v2604_v43 = vadd.f32 %v10569_v40, %v2086_v10  ;;  %v1566_v31 = vadd.f32 %v10571_v20, %v10570_v46  ;;  %v10573_v62 = vld [vmem:[#allocation118_spill] sm:$0xff]  ;;  %v10576_v40 = vld [vmem:[#allocation145_spill] sm:$0xff] }
 0x790   : > { %v9090_v55 = vadd.f32 %v3947_v63, %v8587_v22  ;;  %v3920_v24 = vpop.f32.mrf.mxu1  ;;  %v10572_v22 = vld [vmem:[#allocation212_spill] sm:$0xff] }
 0x791   : > { %v9094_v60 = vadd.f32 %v3920_v24, %v3520_v9  ;;  %v3010_v34 = vadd.f32 %v10572_v22, %v2604_v43  ;;  %v10574_v63 = vld [vmem:[#allocation164_spill] sm:$0xff] }
 0x792   : > { %10565 = vst [vmem:[#allocation227_spill] sm:$0xff] %v9090_v55  ;;  %v9099_v15 = vpop.permute.xlu2 %4590  ;;  %v1513_v23 = vadd.f32 %v10574_v63, %v10573_v62  ;;  %v10575_v24 = vld [vmem:[#allocation104_spill] sm:$0xff]  ;;  %v10578_v63 = vld [vmem:[#allocation150_spill] sm:$0xff] }
 0x793   : > { %10566 = vst [vmem:[#allocation229_spill] sm:$0xff] %v9094_v60  ;;  %5838 = vmatmul.msk.bf16.gmra.mxu3 %vm360_vm0, %v8918_v48  ;;  %v2100_v14 = vadd.f32 %v10575_v24, %v1484_v17  ;;  %v3521_v50 = vadd.f32 %v8613_v49, %v3010_v34  ;;  %v2087_v60 = vadd.f32 %v10576_v40, %v1566_v31  ;;  %v10577_v48 = vld [vmem:[#allocation188_spill] sm:$0xff]  ;;  %v10579_v17 = vld [vmem:[#allocation186_spill] sm:$0xff] }
 0x794   : > { %v2101_v55 = vadd.f32 %v10578_v63, %v1513_v23 }
 0x795   : > { %v3894_v9 = vpop.f32.mrf.mxu0  ;;  %v2618_v43 = vadd.f32 %v10577_v48, %v2100_v14  ;;  %v2605_v24 = vadd.f32 %v10579_v17, %v2087_v60  ;;  %v10584_v48 = vld [vmem:[#allocation169_spill] sm:$0xff] }
 0x796   : > { %v9111_v10 = vadd.f32 %v3894_v9, %v8625_v12  ;;  %v3976_v2 = vpop.f32.mrf.mxu3 }
 0x797   : > { %v3949_v46 = vpop.f32.mrf.mxu2  ;;  %v9115_v20 = vadd.f32 %v3976_v2, %v8600_v19  ;;  %v10580_v19 = vld [vmem:[#allocation222_spill] sm:$0xff]  ;;  %v10582_v2 = vld [vmem:[#allocation215_spill] sm:$0xff] }
 0x798   : > { %v9118_v22 = vadd.f32 %v3949_v46, %v3521_v50  ;;  %v3923_v62 = vpop.f32.mrf.mxu1  ;;  %5827 = vmatmul.msk.bf16.gmra.mxu0 %vm360_vm0, %v8931_v61  ;;  %v3024_v34 = vadd.f32 %v10580_v19, %v2618_v43  ;;  %v10581_v50 = vld [vmem:[#allocation189_spill] sm:$0xff]  ;;  %v3011_v60 = vadd.f32 %v10582_v2, %v2605_v24 }
 0x799   : > { %v4613_v12 = vpop.permute.xlu1 %4612  ;;  %v9125_v49 = vadd.f32 %v3923_v62, %v8628_v27  ;;  %v9127_v31 = vpop.permute.xlu0 %4594  ;;  %v2619_v23 = vadd.f32 %v10581_v50, %v2101_v55  ;;  %v10583_v27 = vld [vmem:[#allocation122_spill] sm:$0xff] }
 0x79a   : > { %v4637_v14 = vsel %vm4626_vm13, %v4613_v12, %v9038_v51  ;;  %v9132_v9 = vpop.permute.xlu2 %6050  ;;  %v1542_v43 = vadd.f32 %v10584_v48, %v10583_v27  ;;  %v3535_v62 = vadd.f32 %v8703_v0, %v3024_v34  ;;  %v10585_v51 = vld [vmem:[#allocation220_spill] sm:$0xff]  ;;  %v3522_v63 = vadd.f32 %v8622_v42, %v3011_v60  ;;  %v10586_v60 = vld [vmem:[#allocation107_spill] sm:$0xff] }
 0x79b   : > { %v6053_v40 = vunpack.i.h.bf16 %v9132_v9  ;;  %v6052_v46 = vunpack.i.l.bf16 %v9132_v9  ;;  %4735 = vmatpush.bf16.msra.mxu2 %v4637_v14  ;;  %5831 = vmatmul.msk.bf16.gmra.mxu1 %vm360_vm0, %v8931_v61  ;;  %v3025_v55 = vadd.f32 %v10585_v51, %v2619_v23 }
 0x79c   : > { %5835 = vmatmul.msk.bf16.gmra.mxu2 %vm360_vm0, %v8931_v61 }
 0x79d   : > { %v9149_v17 = vsel %vm4472_vm12, %v8863_v47, %v6052_v46  ;;  %v9152_v24 = vsel %vm4472_vm12, %v6052_v46, %v6053_v40  ;;  %v3896_v19 = vpop.f32.mrf.mxu0  ;;  %v3536_v50 = vadd.f32 %v8701_v28, %v3025_v55  ;;  %v2102_v46 = vadd.f32 %v10586_v60, %v1542_v43  ;;  %v10588_v28 = vld [vmem:[#allocation172_spill] sm:$0xff] }
 0x79e   : > { %v9154_v14 = vadd.f32 %v3896_v19, %v3535_v62  ;;  %v3978_v9 = vpop.f32.mrf.mxu3  ;;  %v4512_v0 = vmul.f32 %v9149_v17, %v10426_v41  ;;  %v4521_v34 = vmul.f32 %v9149_v17, %v10427_v58  ;;  %v4513_v42 = vmul.f32 %v9152_v24, %v10428_v4  ;;  %v10587_v19 = vld [vmem:[#allocation125_spill] sm:$0xff] }
 0x79f   : > { %v3952_v47 = vpop.f32.mrf.mxu2  ;;  %v9163_v23 = vadd.f32 %v3978_v9, %v3522_v63  ;;  %v4522_v2 = vmul.f32 %v9152_v24, %v6664_v35  ;;  %v1571_v55 = vadd.f32 %v10588_v28, %v10587_v19  ;;  %v10589_v63 = vld [vmem:[#allocation187_spill] sm:$0xff] }
 0x7a0   : > { %v9169_v27 = vadd.f32 %v3952_v47, %v8637_v7  ;;  %v3925_v41 = vpop.f32.mrf.mxu1  ;;  %v4539_v48 = vpack.c.bf16 %v4521_v34, %v4512_v0  ;;  %v2620_v9 = vadd.f32 %v10589_v63, %v2102_v46  ;;  %v10590_v7 = vld [vmem:[#allocation221_spill] sm:$0xff] }
 0x7a1   : > { %v9171_v62 = vadd.f32 %v3925_v41, %v3536_v50  ;;  %v4611_v58 = vpop.permute.xlu1 %4610  ;;  %v4593_v51 = vpop.permute.xlu0 %4592  ;;  %v4540_v4 = vpack.c.bf16 %v4522_v2, %v4513_v42  ;;  %v10591_v34 = vld [vmem:[#allocation105_spill] sm:$0xff]  ;;  %v10592_v50 = vld [vmem:[#allocation52_spill] sm:$0xff] }
 0x7a2   : > { %v4635_v35 = vsel %vm4626_vm13, %v9092_v25, %v4611_v58  ;;  %v4636_v43 = vsel %vm4626_vm13, %v4611_v58, %v4613_v12  ;;  %4618 = vrot.lane.b32.xlu0 %v4539_v48, %s6077_s10  ;;  %v3026_v0 = vadd.f32 %v10590_v7, %v2620_v9  ;;  %v2103_v42 = vadd.f32 %v10591_v34, %v1571_v55  ;;  %v9191_v12 = vld [vmem:[%s9821_s3 + $0x100] sm:$0xff]  ;;  %v10593_v48 = vld [vmem:[#allocation51_spill] sm:$0xff] }
 0x7a3   : > { %4620 = vrot.lane.b32.xlu1 %v4540_v4, %s6077_s10  ;;  %4677 = vmatpush.bf16.msra.mxu0 %v4635_v35  ;;  %v4627_v25 = vsel %vm4626_vm13, %v9099_v15, %v4593_v51  ;;  %v4628_v58 = vsel %vm4626_vm13, %v4593_v51, %v9127_v31  ;;  %v10594_v4 = vld [vmem:[#allocation190_spill] sm:$0xff]  ;;  %v10595_v9 = vld [vmem:[#allocation223_spill] sm:$0xff] }
 0x7a4   : > { %4706 = vmatpush.bf16.msra.mxu1 %v4636_v43  ;;  %5839 = vmatmul.msk.bf16.gmra.mxu3 %vm360_vm0, %v8931_v61  ;;  %v3537_v47 = vadd.f32 %v10592_v50, %v3026_v0  ;;  %v2621_v19 = vadd.f32 %v10594_v4, %v2103_v42  ;;  %v10596_v7 = vld [vmem:[#allocation66_spill] sm:$0xff]  ;;  %v10597_v51 = vld [vmem:[#allocation67_spill] sm:$0xff] }
 0x7a5   : > { %v4169_v2 = vpop.f32.mrf.mxu0 }
 0x7a6   : > { %v3981_v60 = vpop.f32.mrf.mxu3  ;;  %v9194_v46 = vadd.f32 %v4169_v2, %v8714_v6  ;;  %v3027_v35 = vadd.f32 %v10595_v9, %v2621_v19 }
 0x7a7   : > { %v3954_v41 = vpop.f32.mrf.mxu2  ;;  %v9197_v61 = vadd.f32 %v3981_v60, %v10593_v48  ;;  %4678 = vmatpush.bf16.msra.mxu0 %v4627_v25  ;;  %v10600_v60 = vld [vmem:[#allocation63_spill] sm:$0xff]  ;;  %v10601_v25 = vld [vmem:[#allocation64_spill] sm:$0xff]  ;;  %v10602_v48 = vld [vmem:[#allocation54_spill] sm:$0xff] }
 0x7a8   : > { %v9202_v28 = vadd.f32 %v3954_v41, %v3537_v47  ;;  %4707 = vmatpush.bf16.msra.mxu1 %v4628_v58  ;;  %v4198_v15 = vpop.f32.mrf.mxu1  ;;  %v10599_v47 = vld [vmem:[#allocation59_spill] sm:$0xff]  ;;  %v3538_v58 = vadd.f32 %v10602_v48, %v3027_v35 }
 0x7a9   : > { %v9205_v55 = vadd.f32 %v4198_v15, %v8711_v29  ;;  %v4471_v63 = vpop.permute.xlu0 %4470  ;;  %v4597_v6 = vpop.permute.xlu1 %4596  ;;  %v10598_v29 = vld [vmem:[#allocation58_spill] sm:$0xff] }
 0x7aa   : > { %v4479_v43 = vsel %vm4472_vm12, %v6053_v40, %v4471_v63  ;;  %v4515_v0 = vmul.f32 %v4471_v63, %v10596_v7  ;;  %5864 = vmatmul.msk.bf16.vlgmr.msra.gmra.mxu0 %vm360_vm0, %v9191_v12  ;;  %v4524_v34 = vmul.f32 %v4471_v63, %v10597_v51  ;;  %v4629_v42 = vsel %vm4626_vm13, %v9127_v31, %v4597_v6 }
 0x7ab   : > { %5868 = vmatmul.msk.bf16.vlgmr.msra.gmra.mxu1 %vm360_vm0, %v9191_v12  ;;  %v4514_v50 = vmul.f32 %v4479_v43, %v10598_v29  ;;  %v4523_v2 = vmul.f32 %v4479_v43, %v10599_v47  ;;  %4736 = vmatpush.bf16.msra.mxu2 %v4629_v42  ;;  %v4496_v40 = vmul.f32 %v4479_v43, %v10600_v60  ;;  %v10604_v29 = vld [vmem:[#allocation56_spill] sm:$0xff]  ;;  %v10606_v60 = vld [vmem:[#allocation62_spill] sm:$0xff] }
 0x7ac   : > { %v4505_v41 = vmul.f32 %v4479_v43, %v10601_v25  ;;  %v4542_v4 = vpack.c.bf16 %v4524_v34, %v4515_v0  ;;  %v10603_v0 = vld [vmem:[#allocation55_spill] sm:$0xff] }
 0x7ad   : > { %v4541_v19 = vpack.c.bf16 %v4523_v2, %v4514_v50  ;;  %v9222_v15 = vpop.f32.mrf.mxu0  ;;  %v4494_v34 = vmul.f32 %v9149_v17, %v10603_v0  ;;  %v4503_v50 = vmul.f32 %v9149_v17, %v10604_v29  ;;  %v10605_v2 = vld [vmem:[#allocation60_spill] sm:$0xff] }
 0x7ae   : > { %v3983_v9 = vpop.f32.mrf.mxu3  ;;  %v4532_v31 = vpack.c.bf16 %v4505_v41, %v4496_v40  ;;  %4624 = vrot.lane.b32.xlu1 %v4542_v4, %s6077_s10  ;;  %5872 = vmatmul.msk.bf16.vlgmr.msra.gmra.mxu2 %vm360_vm0, %v9191_v12  ;;  %v4504_v40 = vmul.f32 %v9152_v24, %v10606_v60  ;;  %v4967_v41 = vld [vmem:[%s9822_s4] sm:$0xff] }
 0x7af   : > { %v9227_v7 = vadd.f32 %v3983_v9, %v3538_v58  ;;  %v4227_v51 = vpop.f32.mrf.mxu2  ;;  %4622 = vrot.lane.b32.xlu2 %v4541_v19, %s6077_s10  ;;  %v4530_v25 = vpack.c.bf16 %v4503_v50, %v4494_v34  ;;  %v10608_v34 = vld [vmem:[#allocation72_spill] sm:$0xff] }
 0x7b0   : > { %v9230_v42 = vadd.f32 %v4227_v51, %v8708_v56  ;;  %4604 = vrot.lane.b32.xlu0 %v4532_v31, %s6077_s10  ;;  %v9234_v35 = vpop.f32.mrf.mxu1  ;;  %v4495_v56 = vmul.f32 %v9152_v24, %v10605_v2  ;;  %v10607_v51 = vld [vmem:[#allocation71_spill] sm:$0xff]  ;;  %v4506_v29 = vmul.f32 %v4471_v63, %v10608_v34 }
 0x7b1   : > { %v9236_v43 = vpop.permute.xlu1 %4598  ;;  %v4497_v0 = vmul.f32 %v4471_v63, %v10607_v51  ;;  %v10609_v2 = vld [vmem:[#allocation219_spill] sm:$0xff] }
 0x7b2   : > { %v4630_v47 = vsel %vm4626_vm13, %v4597_v6, %v9236_v43  ;;  %v4531_v58 = vpack.c.bf16 %v4504_v40, %v4495_v56  ;;  %v9256_v6 = vld [vmem:[%s9821_s3 + $0x108] sm:$0xff]  ;;  %v4971_v40 = vld [vmem:[%s9822_s4 + $0x20] sm:$0xff] }
 0x7b3   : > { %4765 = vmatpush.bf16.msra.mxu3 %v4630_v47  ;;  %v4533_v47 = vpack.c.bf16 %v4506_v29, %v4497_v0 }
 0x7b5   : > { %v4174_v48 = vpop.f32.mrf.mxu0 }
 0x7b6   : > { %5876 = vmatmul.msk.bf16.vlgmr.msra.gmra.mxu3 %vm360_vm0, %v9191_v12  ;;  %v4256_v17 = vpop.f32.mrf.mxu3  ;;  %v9259_v4 = vadd.f32 %v4174_v48, %v8751_v11  ;;  %4600 = vrot.lane.b32.xlu1 %v4530_v25, %s6077_s10  ;;  %v4970_v11 = vld [vmem:[%s9822_s4 + $0x18] sm:$0xff]  ;;  %v4973_v25 = vld [vmem:[%s9822_s4 + $0x30] sm:$0xff] }
 0x7b7   : > { %v9262_v24 = vpop.f32.mrf.mxu2  ;;  %v9265_v19 = vadd.f32 %v4256_v17, %v8722_v39  ;;  %4602 = vrot.lane.b32.xlu2 %v4531_v58, %s6077_s10  ;;  %v4968_v39 = vld [vmem:[%s9822_s4 + $0x8] sm:$0xff]  ;;  %v9309_v58 = vld [vmem:[%s9821_s3 + $0x110] sm:$0xff] }
 0x7b8   : > { %4977 = vperm.xlu0 %5977, %v4967_v41   ;;  %v4203_v9 = vpop.f32.mrf.mxu1  ;;  %v4969_v41 = vld [vmem:[%s9822_s4 + $0x10] sm:$0xff] }
 0x7b9   : > { %v9269_v31 = vadd.f32 %v4203_v9, %v8748_v45 }
 0x7ba   : > { %5865 = vmatmul.msk.bf16.gmra.mxu0 %vm360_vm0, %v9256_v6 }
 0x7bb   : > { %5869 = vmatmul.msk.bf16.gmra.mxu1 %vm360_vm0, %v9256_v6 }
 0x7bd   : > { %v9283_v45 = vpop.f32.mrf.mxu0 }
 0x7be   : > { %v9285_v50 = vpop.f32.mrf.mxu3  ;;  %4982 = vperm.xlu1 %5978, %v4968_v39   ;;  %5873 = vmatmul.msk.bf16.gmra.mxu2 %vm360_vm0, %v9256_v6 }
 0x7bf   : > { %v4232_v63 = vpop.f32.mrf.mxu2  ;;  %4606 = vrot.lane.b32.xlu2 %v4533_v47, %s6077_s10 }
 0x7c0   : > { %v9290_v56 = vadd.f32 %v4232_v63, %v10609_v2  ;;  %4992 = vperm.xlu0 %5977, %v4970_v11   ;;  %v9293_v60 = vpop.f32.mrf.mxu1  ;;  %v10610_v11 = vld [vmem:[#allocation7_spill] sm:$0xff] }
 0x7c5   : > { %v4179_v48 = vpop.f32.mrf.mxu0 }
 0x7c6   : > { %5877 = vmatmul.msk.bf16.gmra.mxu3 %vm360_vm0, %v9256_v6  ;;  %v4261_v17 = vpop.f32.mrf.mxu3  ;;  %v9312_v9 = vadd.f32 %v4179_v48, %v8785_v32  ;;  %4997 = vperm.xlu1 %5978, %v4971_v40   ;;  %v4974_v32 = vld [vmem:[%s9822_s4 + $0x38] sm:$0xff] }
 0x7c7   : > { %v9314_v51 = vpop.f32.mrf.mxu2  ;;  %v9317_v0 = vadd.f32 %v4261_v17, %v8758_v16  ;;  %4987 = vperm.xlu2 %6054, %v4969_v41  }
 0x7c8   : > { %5007 = vperm.xlu0 %5977, %v4973_v25   ;;  %v4208_v34 = vpop.f32.mrf.mxu1  ;;  %v9345_v25 = vld [vmem:[%s9821_s3 + $0x118] sm:$0xff] }
 0x7c9   : > { %v9320_v29 = vadd.f32 %v4208_v34, %v8782_v53 }
 0x7ca   : > { %5866 = vmatmul.msk.bf16.gmra.mxu0 %vm360_vm0, %v9309_v58 }
 0x7cb   : > { %5870 = vmatmul.msk.bf16.gmra.mxu1 %vm360_vm0, %v9309_v58 }
 0x7cd   : > { %v9329_v39 = vpop.f32.mrf.mxu0 }
 0x7ce   : > { %v9331_v16 = vpop.f32.mrf.mxu3  ;;  %5012 = vperm.xlu1 %5978, %v4974_v32   ;;  %5874 = vmatmul.msk.bf16.gmra.mxu2 %vm360_vm0, %v9309_v58  ;;  %v4972_v32 = vld [vmem:[%s9822_s4 + $0x28] sm:$0xff] }
 0x7cf   : > { %v4237_v53 = vpop.f32.mrf.mxu2  ;;  %5002 = vperm.xlu2 %6054, %v4972_v32  }
 0x7d0   : > { %v9336_v47 = vadd.f32 %v4237_v53, %v10610_v11  ;;  %v9338_v63 = vpop.f32.mrf.mxu1 }
 0x7d5   : > { %v4184_v2 = vpop.f32.mrf.mxu0 }
 0x7d6   : > { %5878 = vmatmul.msk.bf16.gmra.mxu3 %vm360_vm0, %v9309_v58  ;;  %v4266_v40 = vpop.f32.mrf.mxu3  ;;  %v9348_v41 = vadd.f32 %v4184_v2, %v8817_v8 }
 0x7d7   : > { %v9350_v48 = vpop.f32.mrf.mxu2  ;;  %v9353_v17 = vadd.f32 %v4266_v40, %v8789_v33 }
 0x7d8   : > { %10611 = vst [vmem:[#allocation232_spill] sm:$0xff] %v9348_v41  ;;  %v4213_v34 = vpop.f32.mrf.mxu1 }
 0x7d9   : > { %10612 = vst [vmem:[#allocation31_spill] sm:$0xff] %v9353_v17  ;;  %v9359_v53 = vadd.f32 %v4213_v34, %v8814_v26 }
 0x7da   : > { %5867 = vmatmul.msk.bf16.gmra.mxu0 %vm360_vm0, %v9345_v25 }
 0x7db   : > { %10613 = vst [vmem:[#allocation32_spill] sm:$0xff] %v9359_v53  ;;  %5871 = vmatmul.msk.bf16.gmra.mxu1 %vm360_vm0, %v9345_v25 }
 0x7dd   : > { %v9365_v8 = vpop.f32.mrf.mxu0 }
 0x7de   : > { %10614 = vst [vmem:[#allocation25_spill] sm:$0xff] %v9365_v8  ;;  %v9367_v11 = vpop.f32.mrf.mxu3  ;;  %5875 = vmatmul.msk.bf16.gmra.mxu2 %vm360_vm0, %v9345_v25 }
 0x7df   : > { %10615 = vst [vmem:[#allocation26_spill] sm:$0xff] %v9367_v11  ;;  %v4242_v33 = vpop.f32.mrf.mxu2 }
 0x7e0   : > { %v9372_v2 = vadd.f32 %v4242_v33, %v8807_v38  ;;  %v9374_v26 = vpop.f32.mrf.mxu1 }
 0x7e1   : > { %10617 = vst [vmem:[#allocation37_spill] sm:$0xff] %v9374_v26 }
 0x7e2   : > { %10616 = vst [vmem:[#allocation36_spill] sm:$0xff] %v9372_v2 }
 0x7e5   : > { %v4285_v40 = vpop.f32.mrf.mxu0 }
 0x7e6   : > { %5879 = vmatmul.msk.bf16.gmra.mxu3 %vm360_vm0, %v9345_v25  ;;  %v4271_v34 = vpop.f32.mrf.mxu3  ;;  %v9379_v32 = vadd.f32 %v4285_v40, %v8951_v57 }
 0x7e7   : > { %v9381_v8 = vpop.f32.mrf.mxu2  ;;  %v9384_v11 = vadd.f32 %v4271_v34, %v8827_v5 }
 0x7e8   : > { %10618 = vst [vmem:[#allocation33_spill] sm:$0xff] %v9379_v32  ;;  %v4314_v17 = vpop.f32.mrf.mxu1 }
 0x7e9   : > { %v9387_v53 = vadd.f32 %v4314_v17, %v8960_v52 }
 0x7eb   : > { %10619 = vst [vmem:[#allocation34_spill] sm:$0xff] %v9387_v53  ;;  %v10625_v53 = vld [vmem:[#allocation15_spill] sm:$0xff] }
 0x7ed   : > { %v4287_v38 = vpop.f32.mrf.mxu0 }
 0x7ee   : > { %v9389_v33 = vpop.f32.mrf.mxu3  ;;  %v9392_v2 = vadd.f32 %v4287_v38, %v8974_v44 }
 0x7ef   : > { %10620 = vst [vmem:[#allocation42_spill] sm:$0xff] %v9389_v33  ;;  %v4343_v26 = vpop.f32.mrf.mxu2  ;;  %v10629_v33 = vld [vmem:[#allocation17_spill] sm:$0xff] }
 0x7f0   : > { %10621 = vst [vmem:[#allocation43_spill] sm:$0xff] %v9392_v2  ;;  %v9395_v41 = vadd.f32 %v4343_v26, %v8979_v36  ;;  %v4316_v57 = vpop.f32.mrf.mxu1  ;;  %v10627_v2 = vld [vmem:[#allocation14_spill] sm:$0xff] }
 0x7f1   : > { %v9398_v40 = vadd.f32 %v4316_v57, %v8981_v3  ;;  %v10628_v3 = vld [vmem:[#allocation21_spill] sm:$0xff] }
 0x7f2   : > { %10622 = vst [vmem:[#allocation49_spill] sm:$0xff] %v9395_v41 }
 0x7f3   : > { %10623 = vst [vmem:[#allocation57_spill] sm:$0xff] %v9398_v40 }
 0x7f5   : > { %v4290_v5 = vpop.f32.mrf.mxu0 }
 0x7f6   : > { %v4372_v34 = vpop.f32.mrf.mxu3  ;;  %v9401_v32 = vadd.f32 %v4290_v5, %v8996_v37  ;;  %v10630_v5 = vld [vmem:[#allocation18_spill] sm:$0xff] }
 0x7f7   : > { %v4345_v52 = vpop.f32.mrf.mxu2  ;;  %v9404_v17 = vadd.f32 %v4372_v34, %v9000_v54  ;;  %v10631_v34 = vld [vmem:[#allocation22_spill] sm:$0xff] }
 0x7f8   : > { %10624 = vst [vmem:[#allocation38_spill] sm:$0xff] %v9401_v32  ;;  %v9407_v44 = vadd.f32 %v4345_v52, %v10625_v53  ;;  %v4319_v38 = vpop.f32.mrf.mxu1 }
 0x7f9   : > { %v9410_v36 = vadd.f32 %v4319_v38, %v10627_v2 }
 0x7fa   : > { %10626 = vst [vmem:[#allocation39_spill] sm:$0xff] %v9407_v44 }
 0x7fd   : > { %v4292_v26 = vpop.f32.mrf.mxu0 }
 0x7fe   : > { %v4374_v41 = vpop.f32.mrf.mxu3  ;;  %v9413_v57 = vadd.f32 %v4292_v26, %v10628_v3 }
 0x7ff   : > { %v4348_v40 = vpop.f32.mrf.mxu2  ;;  %v9416_v37 = vadd.f32 %v4374_v41, %v10629_v33 }
 0x800   : > { %v9419_v32 = vadd.f32 %v4348_v40, %v10630_v5  ;;  %v4321_v54 = vpop.f32.mrf.mxu1 }
 0x801   : > { %v9422_v53 = vadd.f32 %v4321_v54, %v10631_v34 }
 0x803   : > { %10632 = vst [vmem:[#allocation93_spill] sm:$0xff] %v9422_v53 }
 0x805   : > { %v4295_v52 = vpop.f32.mrf.mxu0 }
 0x806   : > { %v4377_v44 = vpop.f32.mrf.mxu3  ;;  %v9425_v2 = vadd.f32 %v4295_v52, %v9050_v18  ;;  %v10636_v52 = vld [vmem:[#allocation227_spill] sm:$0xff] }
 0x807   : > { %v4350_v38 = vpop.f32.mrf.mxu2  ;;  %v9428_v26 = vadd.f32 %v4377_v44, %v9054_v1 }
 0x808   : > { %10633 = vst [vmem:[#allocation141_spill] sm:$0xff] %v9425_v2  ;;  %v9431_v3 = vadd.f32 %v4350_v38, %v9057_v59  ;;  %v4324_v41 = vpop.f32.mrf.mxu1  ;;  %v10637_v59 = vld [vmem:[#allocation229_spill] sm:$0xff] }
 0x809   : > { %v9434_v33 = vadd.f32 %v4324_v41, %v9064_v13  ;;  %v4623_v44 = vpop.permute.xlu2 %4622  ;;  %v10639_v13 = vld [vmem:[#allocation20_spill] sm:$0xff] }
 0x80b   : > { %10634 = vst [vmem:[#allocation94_spill] sm:$0xff] %v9434_v33 }
 0x80d   : > { %v4297_v40 = vpop.f32.mrf.mxu0 }
 0x80e   : > { %v4379_v5 = vpop.f32.mrf.mxu3  ;;  %v9437_v54 = vadd.f32 %v4297_v40, %v9083_v30 }
 0x80f   : > { %v4353_v34 = vpop.f32.mrf.mxu2  ;;  %v9440_v18 = vadd.f32 %v4379_v5, %v9086_v21 }
 0x810   : > { %10635 = vst [vmem:[#allocation142_spill] sm:$0xff] %v9437_v54  ;;  %v9443_v2 = vadd.f32 %v4353_v34, %v10636_v52  ;;  %v4326_v1 = vpop.f32.mrf.mxu1 }
 0x811   : > { %v9446_v38 = vadd.f32 %v4326_v1, %v10637_v59 }
 0x813   : > { %10638 = vst [vmem:[#allocation82_spill] sm:$0xff] %v9446_v38 }
 0x814   : > { %v4619_v53 = vpop.permute.xlu0 %4618 }
 0x815   : > { %v4639_v41 = vsel %vm4626_vm13, %v10639_v13, %v4619_v53  ;;  %v4621_v33 = vpop.permute.xlu1 %4620  ;;  %v4300_v54 = vpop.f32.mrf.mxu0 }
 0x816   : > { %v4640_v30 = vsel %vm4626_vm13, %v4619_v53, %v4621_v33  ;;  %v4641_v40 = vsel %vm4626_vm13, %v4621_v33, %v4623_v44  ;;  %4793 = vmatpush.bf16.msrb.mxu0 %v4639_v41  ;;  %v4382_v21 = vpop.f32.mrf.mxu3  ;;  %v9453_v5 = vadd.f32 %v4300_v54, %v9111_v10  ;;  %v4603_v33 = vpop.permute.xlu2 %4602 }
 0x817   : > { %4822 = vmatpush.bf16.msrb.mxu1 %v4640_v30  ;;  %4851 = vmatpush.bf16.msrb.mxu2 %v4641_v40  ;;  %v4355_v34 = vpop.f32.mrf.mxu2  ;;  %v9456_v52 = vadd.f32 %v4382_v21, %v9115_v20  ;;  %v10644_v30 = vld [vmem:[#allocation23_spill] sm:$0xff]  ;;  %v10645_v20 = vld [vmem:[#allocation124_spill] sm:$0xff] }
 0x818   : > { %10640 = vst [vmem:[#allocation27_spill] sm:$0xff] %v9453_v5  ;;  %v9459_v1 = vadd.f32 %v4355_v34, %v9118_v22  ;;  %v4329_v59 = vpop.f32.mrf.mxu1  ;;  %v1382_v40 = vadd.f32 %v10645_v20, %v10644_v30  ;;  %v10647_v34 = vld [vmem:[#allocation41_spill] sm:$0xff]  ;;  %v10651_v30 = vld [vmem:[#allocation170_spill] sm:$0xff]  ;;  %v10652_v20 = vld [vmem:[#allocation151_spill] sm:$0xff] }
 0x819   : > { %v9462_v53 = vadd.f32 %v4329_v59, %v9125_v49  ;;  %v10648_v49 = vld [vmem:[#allocation123_spill] sm:$0xff] }
 0x81a   : > { %v1353_v59 = vadd.f32 %v10648_v49, %v10647_v34  ;;  %v10653_v49 = vld [vmem:[#allocation153_spill] sm:$0xff] }
 0x81b   : > { %10641 = vst [vmem:[#allocation83_spill] sm:$0xff] %v9462_v53 }
 0x81d   : > { %v4302_v13 = vpop.f32.mrf.mxu0 }
 0x81e   : > { %v4384_v41 = vpop.f32.mrf.mxu3  ;;  %v9465_v38 = vadd.f32 %v4302_v13, %v9154_v14 }
 0x81f   : > { %v4358_v10 = vpop.f32.mrf.mxu2  ;;  %v9468_v54 = vadd.f32 %v4384_v41, %v9163_v23  ;;  %v10650_v41 = vld [vmem:[#allocation171_spill] sm:$0xff] }
 0x820   : > { %10642 = vst [vmem:[#allocation205_spill] sm:$0xff] %v9465_v38  ;;  %v9473_v22 = vadd.f32 %v4358_v10, %v9169_v27  ;;  %v4331_v21 = vpop.f32.mrf.mxu1  ;;  %v4625_v53 = vpop.permute.xlu1 %4624  ;;  %v2049_v38 = vadd.f32 %v10650_v41, %v1382_v40  ;;  %v2048_v27 = vadd.f32 %v10651_v30, %v1353_v59 }
 0x821   : > { %10643 = vst [vmem:[#allocation30_spill] sm:$0xff] %v9468_v54  ;;  %v9478_v5 = vadd.f32 %v4331_v21, %v9171_v62  ;;  %v4642_v14 = vsel %vm4626_vm13, %v4623_v44, %v4625_v53  ;;  %v4607_v10 = vpop.permute.xlu2 %4606  ;;  %v10654_v53 = vld [vmem:[#allocation193_spill] sm:$0xff] }
 0x822   : > { %10646 = vst [vmem:[#allocation100_spill] sm:$0xff] %v9473_v22  ;;  %v4605_v13 = vpop.permute.xlu0 %4604  ;;  %4880 = vmatpush.bf16.msrb.mxu3 %v4642_v14  ;;  %v2567_v22 = vadd.f32 %v10652_v20, %v2049_v38  ;;  %v2566_v54 = vadd.f32 %v10653_v49, %v2048_v27  ;;  %v10658_v20 = vld [vmem:[#allocation128_spill] sm:$0xff] }
 0x823   : > { %10649 = vst [vmem:[#allocation146_spill] sm:$0xff] %v9478_v5  ;;  %v4633_v23 = vsel %vm4626_vm13, %v4603_v33, %v4605_v13  ;;  %v4634_v34 = vsel %vm4626_vm13, %v4605_v13, %v4607_v10  ;;  %v10657_v10 = vld [vmem:[#allocation65_spill] sm:$0xff]  ;;  %v10659_v49 = vld [vmem:[#allocation224_spill] sm:$0xff] }
 0x824   : > { %4852 = vmatpush.bf16.msrb.mxu2 %v4633_v23  ;;  %v2973_v21 = vadd.f32 %v10654_v53, %v2567_v22  ;;  %v10656_v23 = vld [vmem:[#allocation192_spill] sm:$0xff]  ;;  %v10679_v5 = vld [vmem:[#allocation217_spill] sm:$0xff] }
 0x825   : > { %v2972_v13 = vadd.f32 %v10656_v23, %v2566_v54  ;;  %v10660_v54 = vld [vmem:[#allocation226_spill] sm:$0xff] }
 0x826   : > { %4881 = vmatpush.bf16.msrb.mxu3 %v4634_v34  ;;  %v1411_v34 = vadd.f32 %v10658_v20, %v10657_v10  ;;  %v3484_v22 = vadd.f32 %v10659_v49, %v2973_v21  ;;  %v10664_v20 = vld [vmem:[#allocation69_spill] sm:$0xff] }
 0x827   : > { %5888 = vmatmul.msk.bf16.vlgmr.msrb.gmra.mxu2 %vm360_vm0, %v9191_v12  ;;  %v4360_v62 = vpop.f32.mrf.mxu2  ;;  %v4387_v44 = vpop.f32.mrf.mxu3  ;;  %v10665_v49 = vld [vmem:[#allocation129_spill] sm:$0xff] }
 0x828   : > { %v9491_v40 = vadd.f32 %v4360_v62, %v9202_v28  ;;  %v9494_v59 = vadd.f32 %v4387_v44, %v9197_v61  ;;  %v4680_v14 = vpop.f32.mrf.mxu0  ;;  %v4709_v38 = vpop.f32.mrf.mxu1  ;;  %v10661_v44 = vld [vmem:[#allocation218_spill] sm:$0xff] }
 0x829   : > { %v4903_v41 = vadd.f32 %v4680_v14, %v9194_v46  ;;  %v4601_v30 = vpop.permute.xlu1 %4600  ;;  %v4904_v27 = vadd.f32 %v4709_v38, %v9205_v55  ;;  %5892 = vmatmul.msk.bf16.vlgmr.msrb.gmra.mxu3 %vm360_vm0, %v9191_v12  ;;  %v3483_v46 = vadd.f32 %v10660_v54, %v2972_v13  ;;  %v3995_v21 = vadd.f32 %v10661_v44, %v3484_v22  ;;  %v10662_v14 = vld [vmem:[#allocation10_spill] sm:$0xff] }
 0x82a   : > { %10655 = vst [vmem:[#allocation206_spill] sm:$0xff] %v9491_v40  ;;  %v9502_v53 = vpop.permute.xlu0 %4977  ;;  %v4631_v61 = vsel %vm4626_vm13, %v9236_v43, %v4601_v30  ;;  %v4632_v28 = vsel %vm4626_vm13, %v4601_v30, %v4603_v33  ;;  %v10663_v43 = vld [vmem:[#allocation173_spill] sm:$0xff]  ;;  %v1358_v22 = vadd.f32 %v10665_v49, %v10664_v20 }
 0x82b   : > { %4794 = vmatpush.bf16.msrb.mxu0 %v4631_v61  ;;  %4823 = vmatpush.bf16.msrb.mxu1 %v4632_v28  ;;  %v5015_v55 = vadd.f32 %v9502_v53, %v4903_v41  ;;  %v5016_v62 = vadd.f32 %v9502_v53, %v4904_v27  ;;  %v3994_v38 = vadd.f32 %v10662_v14, %v3483_v46  ;;  %v10666_v61 = vld [vmem:[#allocation70_spill] sm:$0xff] }
 0x82c   : > { %v2050_v33 = vadd.f32 %v10663_v43, %v1411_v34  ;;  %v4401_v41 = vadd.f32 %v9234_v35, %v3995_v21  ;;  %v10667_v28 = vld [vmem:[#allocation130_spill] sm:$0xff]  ;;  %v10670_v35 = vld [vmem:[#allocation68_spill] sm:$0xff]  ;;  %v10671_v21 = vld [vmem:[#allocation131_spill] sm:$0xff] }
 0x82d   : > { %v5079_v23 = vmax.f32 %v5015_v55, 0.0  ;;  %v5080_v10 = vmax.f32 %v5016_v62, 0.0  ;;  %v4400_v13 = vadd.f32 %v9222_v15, %v3994_v38  ;;  %v1387_v54 = vadd.f32 %v10667_v28, %v10666_v61  ;;  %v10674_v28 = vld [vmem:[#allocation176_spill] sm:$0xff] }
 0x82e   : > { %5880 = vmatmul.msk.bf16.vlgmr.msrb.gmra.mxu0 %vm360_vm0, %v9191_v12  ;;  %5884 = vmatmul.msk.bf16.vlgmr.msrb.gmra.mxu1 %vm360_vm0, %v9191_v12  ;;  %v10669_v12 = vld [vmem:[#allocation106_spill] sm:$0xff]  ;;  %v1440_v38 = vadd.f32 %v10671_v21, %v10670_v35  ;;  %v10676_v35 = vld [vmem:[#allocation175_spill] sm:$0xff] }
 0x82f   : > { %v4389_v30 = vpop.f32.mrf.mxu3  ;;  %v5143_v27 = vadd.f32 %v5080_v10, %v5079_v23  ;;  %v2568_v44 = vadd.f32 %v10669_v12, %v2050_v33  ;;  %v10672_v10 = vld [vmem:[#allocation191_spill] sm:$0xff]  ;;  %v2065_v33 = vadd.f32 %v10674_v28, %v1387_v54  ;;  %v10680_v54 = vld [vmem:[#allocation112_spill] sm:$0xff] }
 0x830   : > { %v9526_v46 = vadd.f32 %v4389_v30, %v9227_v7  ;;  %v4682_v55 = vpop.f32.mrf.mxu0  ;;  %v4711_v62 = vpop.f32.mrf.mxu1  ;;  %v10673_v30 = vld [vmem:[#allocation174_spill] sm:$0xff]  ;;  %v2051_v21 = vadd.f32 %v10676_v35, %v1440_v38 }
 0x831   : > { %v4911_v34 = vadd.f32 %v4682_v55, %v4400_v13  ;;  %v9529_v14 = vpop.permute.xlu1 %4982  ;;  %v4912_v15 = vadd.f32 %v4711_v62, %v4401_v41  ;;  %v4738_v23 = vpop.f32.mrf.mxu2  ;;  %v2974_v43 = vadd.f32 %v10672_v10, %v2568_v44  ;;  %v2064_v61 = vadd.f32 %v10673_v30, %v1358_v22  ;;  %v10675_v13 = vld [vmem:[#allocation225_spill] sm:$0xff]  ;;  %v10678_v10 = vld [vmem:[#allocation158_spill] sm:$0xff] }
 0x832   : > { %10668 = vst [vmem:[#allocation88_spill] sm:$0xff] %v9526_v46  ;;  %v4905_v7 = vadd.f32 %v4738_v23, %v9230_v42  ;;  %v10677_v46 = vld [vmem:[#allocation152_spill] sm:$0xff]  ;;  %v9547_v22 = vpop.permute.xlu2 %4987  ;;  %v2569_v23 = vadd.f32 %v10680_v54, %v2051_v21  ;;  %v10686_v35 = vld [vmem:[#allocation230_spill] sm:$0xff]  ;;  %v10689_v54 = vld [vmem:[#allocation9_spill] sm:$0xff] }
 0x833   : > { %v5023_v20 = vadd.f32 %v9529_v14, %v4911_v34  ;;  %v5024_v49 = vadd.f32 %v9529_v14, %v4912_v15  ;;  %v3485_v55 = vadd.f32 %v10675_v13, %v2974_v43  ;;  %v2582_v44 = vadd.f32 %v10677_v46, %v2064_v61  ;;  %v10681_v43 = vld [vmem:[#allocation196_spill] sm:$0xff] }
 0x834   : > { %v5017_v62 = vadd.f32 %v9502_v53, %v4905_v7  ;;  %v2583_v34 = vadd.f32 %v10678_v10, %v2065_v33  ;;  %v10683_v13 = vld [vmem:[#allocation76_spill] sm:$0xff] }
 0x835   : > { %v5087_v12 = vmax.f32 %v5023_v20, 0.0  ;;  %v5088_v41 = vmax.f32 %v5024_v49, 0.0  ;;  %v3996_v15 = vadd.f32 %v10679_v5, %v3485_v55  ;;  %v2988_v20 = vadd.f32 %v10681_v43, %v2582_v44  ;;  %v10682_v49 = vld [vmem:[#allocation197_spill] sm:$0xff]  ;;  %v10684_v55 = vld [vmem:[#allocation132_spill] sm:$0xff] }
 0x836   : > { %v5081_v42 = vmax.f32 %v5017_v62, 0.0  ;;  %v2989_v7 = vadd.f32 %v10682_v49, %v2583_v34  ;;  %v10690_v49 = vld [vmem:[#allocation4_spill] sm:$0xff] }
 0x837   : > { %v5152_v40 = vadd.f32 %v5088_v41, %v5087_v12  ;;  %5889 = vmatmul.msk.bf16.gmra.mxu2 %vm360_vm0, %v9256_v6  ;;  %v4402_v46 = vadd.f32 %v9262_v24, %v3996_v15  ;;  %v1416_v12 = vadd.f32 %v10684_v55, %v10683_v13  ;;  %v10685_v41 = vld [vmem:[#allocation194_spill] sm:$0xff]  ;;  %v10687_v24 = vld [vmem:[#allocation233_spill] sm:$0xff]  ;;  %v10688_v15 = vld [vmem:[#allocation228_spill] sm:$0xff] }
 0x838   : > { %v4685_v38 = vpop.f32.mrf.mxu0  ;;  %v4714_v30 = vpop.f32.mrf.mxu1  ;;  %v5144_v61 = vadd.f32 %v5143_v27, %v5081_v42  ;;  %v2975_v62 = vadd.f32 %v10685_v41, %v2569_v23  ;;  %v3500_v21 = vadd.f32 %v10686_v35, %v2989_v7  ;;  %v3499_v27 = vadd.f32 %v10687_v24, %v2988_v20  ;;  %v10692_v20 = vld [vmem:[#allocation216_spill] sm:$0xff]  ;;  %v10693_v35 = vld [vmem:[#allocation78_spill] sm:$0xff] }
 0x839   : > { %v4919_v5 = vadd.f32 %v4685_v38, %v9259_v4  ;;  %v4920_v28 = vadd.f32 %v4714_v30, %v9269_v31  ;;  %v4767_v33 = vpop.f32.mrf.mxu3  ;;  %v4740_v44 = vpop.f32.mrf.mxu2  ;;  %5893 = vmatmul.msk.bf16.gmra.mxu3 %vm360_vm0, %v9256_v6 }
 0x83a   : > { %v4906_v10 = vadd.f32 %v4767_v33, %v9265_v19  ;;  %v4913_v34 = vadd.f32 %v4740_v44, %v4402_v46  ;;  %v3486_v42 = vadd.f32 %v10688_v15, %v2975_v62  ;;  %v4011_v43 = vadd.f32 %v10689_v54, %v3500_v21  ;;  %v10691_v33 = vld [vmem:[#allocation177_spill] sm:$0xff]  ;;  %v10697_v15 = vld [vmem:[#allocation115_spill] sm:$0xff] }
 0x83b   : > { %v5031_v4 = vadd.f32 %v9547_v22, %v4919_v5  ;;  %v5032_v31 = vadd.f32 %v9547_v22, %v4920_v28  ;;  %v4010_v7 = vadd.f32 %v10690_v49, %v3499_v27  ;;  %v2066_v13 = vadd.f32 %v10691_v33, %v1416_v12  ;;  %v10694_v21 = vld [vmem:[#allocation133_spill] sm:$0xff]  ;;  %v10696_v12 = vld [vmem:[#allocation134_spill] sm:$0xff] }
 0x83c   : > { %v5018_v23 = vadd.f32 %v9502_v53, %v4906_v10  ;;  %v5025_v19 = vadd.f32 %v9529_v14, %v4913_v34  ;;  %v3997_v46 = vadd.f32 %v10692_v20, %v3486_v42  ;;  %v4417_v28 = vadd.f32 %v9293_v60, %v4011_v43  ;;  %v10695_v10 = vld [vmem:[#allocation79_spill] sm:$0xff]  ;;  %v10698_v43 = vld [vmem:[#allocation77_spill] sm:$0xff] }
 0x83d   : > { %v5095_v38 = vmax.f32 %v5031_v4, 0.0  ;;  %v5096_v30 = vmax.f32 %v5032_v31, 0.0  ;;  %v4416_v5 = vadd.f32 %v9283_v45, %v4010_v7  ;;  %v1363_v44 = vadd.f32 %v10694_v21, %v10693_v35  ;;  %v9588_v7 = vpop.permute.xlu0 %4992 }
 0x83e   : > { %v5082_v55 = vmax.f32 %v5018_v23, 0.0  ;;  %5881 = vmatmul.msk.bf16.gmra.mxu0 %vm360_vm0, %v9256_v6  ;;  %5885 = vmatmul.msk.bf16.gmra.mxu1 %vm360_vm0, %v9256_v6  ;;  %v5089_v41 = vmax.f32 %v5025_v19, 0.0  ;;  %v1392_v24 = vadd.f32 %v10696_v12, %v10695_v10  ;;  %v4403_v27 = vadd.f32 %v9285_v50, %v3997_v46  ;;  %v10699_v23 = vld [vmem:[#allocation135_spill] sm:$0xff]  ;;  %v10704_v12 = vld [vmem:[#allocation126_spill] sm:$0xff] }
 0x83f   : > { %v5161_v62 = vadd.f32 %v5096_v30, %v5095_v38  ;;  %v2584_v6 = vadd.f32 %v10697_v15, %v2066_v13  ;;  %v1445_v49 = vadd.f32 %v10699_v23, %v10698_v43  ;;  %v10700_v30 = vld [vmem:[#allocation195_spill] sm:$0xff]  ;;  %v10701_v13 = vld [vmem:[#allocation24_spill] sm:$0xff]  ;;  %v10706_v15 = vld [vmem:[#allocation113_spill] sm:$0xff] }
 0x840   : > { %v9583_v34 = vadd.f32 %v5144_v61, %v5082_v55  ;;  %v4687_v4 = vpop.f32.mrf.mxu0  ;;  %v4716_v31 = vpop.f32.mrf.mxu1  ;;  %v5153_v42 = vadd.f32 %v5152_v40, %v5089_v41  ;;  %v2080_v40 = vadd.f32 %v10701_v13, %v1363_v44  ;;  %v10702_v46 = vld [vmem:[#allocation127_spill] sm:$0xff] }
 0x841   : > { %v4927_v45 = vadd.f32 %v4687_v4, %v4416_v5  ;;  %v4928_v54 = vadd.f32 %v4716_v31, %v4417_v28  ;;  %v4769_v60 = vpop.f32.mrf.mxu3  ;;  %v4743_v19 = vpop.f32.mrf.mxu2  ;;  %v2990_v33 = vadd.f32 %v10700_v30, %v2584_v6  ;;  %v2081_v55 = vadd.f32 %v10702_v46, %v1392_v24  ;;  %v10703_v28 = vld [vmem:[#allocation231_spill] sm:$0xff]  ;;  %v10705_v4 = vld [vmem:[#allocation161_spill] sm:$0xff] }
 0x842   : > { %v4914_v38 = vadd.f32 %v4769_v60, %v4403_v27  ;;  %v4921_v20 = vadd.f32 %v4743_v19, %v9290_v56  ;;  %v2067_v27 = vadd.f32 %v10704_v12, %v1445_v49  ;;  %v2598_v31 = vadd.f32 %v10705_v4, %v2080_v40  ;;  %v10707_v56 = vld [vmem:[#allocation3_spill] sm:$0xff]  ;;  %v9617_v12 = vpop.permute.xlu1 %4997 }
 0x843   : > { %v5039_v50 = vadd.f32 %v9588_v7, %v4927_v45  ;;  %v5040_v61 = vadd.f32 %v9588_v7, %v4928_v54  ;;  %v3501_v41 = vadd.f32 %v10703_v28, %v2990_v33  ;;  %v2599_v6 = vadd.f32 %v10706_v15, %v2081_v55  ;;  %v10708_v24 = vld [vmem:[#allocation167_spill] sm:$0xff]  ;;  %v10711_v55 = vld [vmem:[#allocation84_spill] sm:$0xff] }
 0x844   : > { %v5026_v5 = vadd.f32 %v9529_v14, %v4914_v38  ;;  %v5033_v10 = vadd.f32 %v9547_v22, %v4921_v20  ;;  %v2585_v43 = vadd.f32 %v10708_v24, %v2067_v27  ;;  %v10709_v23 = vld [vmem:[#allocation199_spill] sm:$0xff]  ;;  %v10710_v38 = vld [vmem:[#allocation200_spill] sm:$0xff] }
 0x845   : > { %v5103_v35 = vmax.f32 %v5039_v50, 0.0  ;;  %v5104_v21 = vmax.f32 %v5040_v61, 0.0  ;;  %v4012_v54 = vadd.f32 %v10707_v56, %v3501_v41  ;;  %v3004_v19 = vadd.f32 %v10709_v23, %v2598_v31  ;;  %v10713_v41 = vld [vmem:[#allocation198_spill] sm:$0xff]  ;;  %v10719_v23 = vld [vmem:[#allocation73_spill] sm:$0xff] }
 0x846   : > { %v5090_v45 = vmax.f32 %v5026_v5, 0.0  ;;  %v5097_v60 = vmax.f32 %v5033_v10, 0.0  ;;  %v3005_v30 = vadd.f32 %v10710_v38, %v2599_v6  ;;  %v10712_v5 = vld [vmem:[#allocation136_spill] sm:$0xff]  ;;  %v10716_v31 = vld [vmem:[#allocation234_spill] sm:$0xff] }
 0x847   : > { %v5170_v44 = vadd.f32 %v5104_v21, %v5103_v35  ;;  %5890 = vmatmul.msk.bf16.gmra.mxu2 %vm360_vm0, %v9309_v58  ;;  %v4418_v61 = vadd.f32 %v9314_v51, %v4012_v54  ;;  %v1421_v28 = vadd.f32 %v10712_v5, %v10711_v55  ;;  %v2991_v35 = vadd.f32 %v10713_v41, %v2585_v43  ;;  %v10714_v21 = vld [vmem:[#allocation235_spill] sm:$0xff]  ;;  %v10715_v51 = vld [vmem:[#allocation237_spill] sm:$0xff]  ;;  %v10717_v6 = vld [vmem:[#allocation6_spill] sm:$0xff] }
 0x848   : > { %v9608_v33 = vadd.f32 %v5153_v42, %v5090_v45  ;;  %v4690_v49 = vpop.f32.mrf.mxu0  ;;  %v4719_v50 = vpop.f32.mrf.mxu1  ;;  %v5162_v20 = vadd.f32 %v5161_v62, %v5097_v60  ;;  %v3516_v10 = vadd.f32 %v10714_v21, %v3005_v30  ;;  %v10718_v54 = vld [vmem:[#allocation11_spill] sm:$0xff]  ;;  %v10721_v55 = vld [vmem:[#allocation85_spill] sm:$0xff]  ;;  %v10723_v41 = vld [vmem:[#allocation86_spill] sm:$0xff] }
 0x849   : > { %v4935_v13 = vadd.f32 %v4690_v49, %v9312_v9  ;;  %v4936_v40 = vadd.f32 %v4719_v50, %v9320_v29  ;;  %v4772_v46 = vpop.f32.mrf.mxu3  ;;  %v4745_v42 = vpop.f32.mrf.mxu2  ;;  %5894 = vmatmul.msk.bf16.gmra.mxu3 %vm360_vm0, %v9309_v58  ;;  %v3515_v9 = vadd.f32 %v10715_v51, %v3004_v19  ;;  %v3502_v15 = vadd.f32 %v10716_v31, %v2991_v35  ;;  %v10720_v19 = vld [vmem:[#allocation2_spill] sm:$0xff]  ;;  %v10722_v5 = vld [vmem:[#allocation137_spill] sm:$0xff]  ;;  %v10725_v51 = vld [vmem:[#allocation159_spill] sm:$0xff] }
 0x84a   : > { %v4922_v27 = vadd.f32 %v4772_v46, %v9317_v0  ;;  %v4929_v4 = vadd.f32 %v4745_v42, %v4418_v61  ;;  %v4027_v45 = vadd.f32 %v10717_v6, %v3516_v10  ;;  %v2082_v38 = vadd.f32 %v10719_v23, %v1421_v28  ;;  %v9638_v46 = vpop.permute.xlu2 %5002  ;;  %v10724_v35 = vld [vmem:[#allocation138_spill] sm:$0xff]  ;;  %v10727_v31 = vld [vmem:[#allocation139_spill] sm:$0xff] }
 0x84b   : > { %v5047_v29 = vadd.f32 %v9617_v12, %v4935_v13  ;;  %v5048_v62 = vadd.f32 %v9617_v12, %v4936_v40  ;;  %v4026_v60 = vadd.f32 %v10718_v54, %v3515_v9  ;;  %v4013_v30 = vadd.f32 %v10720_v19, %v3502_v15 }
 0x84c   : > { %v5034_v56 = vadd.f32 %v9547_v22, %v4922_v27  ;;  %v5041_v43 = vadd.f32 %v9588_v7, %v4929_v4  ;;  %v4433_v61 = vadd.f32 %v9338_v63, %v4027_v45  ;;  %v1368_v28 = vadd.f32 %v10722_v5, %v10721_v55  ;;  %v10726_v4 = vld [vmem:[#allocation87_spill] sm:$0xff]  ;;  %v10733_v55 = vld [vmem:[#allocation120_spill] sm:$0xff]  ;;  %v10734_v5 = vld [vmem:[#allocation166_spill] sm:$0xff] }
 0x84d   : > { %v5111_v24 = vmax.f32 %v5047_v29, 0.0  ;;  %v5112_v0 = vmax.f32 %v5048_v62, 0.0  ;;  %v4432_v50 = vadd.f32 %v9329_v39, %v4026_v60  ;;  %v1397_v21 = vadd.f32 %v10724_v35, %v10723_v41 }
 0x84e   : > { %v5098_v49 = vmax.f32 %v5034_v56, 0.0  ;;  %5882 = vmatmul.msk.bf16.gmra.mxu0 %vm360_vm0, %v9309_v58  ;;  %5886 = vmatmul.msk.bf16.gmra.mxu1 %vm360_vm0, %v9309_v58  ;;  %v5105_v40 = vmax.f32 %v5041_v43, 0.0  ;;  %v4419_v10 = vadd.f32 %v9331_v16, %v4013_v30  ;;  %v2600_v39 = vadd.f32 %v10725_v51, %v2082_v38  ;;  %v10728_v56 = vld [vmem:[#allocation29_spill] sm:$0xff]  ;;  %v10730_v43 = vld [vmem:[#allocation75_spill] sm:$0xff]  ;;  %v10731_v38 = vld [vmem:[#allocation236_spill] sm:$0xff] }
 0x84f   : > { %v5179_v13 = vadd.f32 %v5112_v0, %v5111_v24  ;;  %v1450_v15 = vadd.f32 %v10727_v31, %v10726_v4  ;;  %v10729_v24 = vld [vmem:[#allocation28_spill] sm:$0xff] }
 0x850   : > { %v9645_v42 = vadd.f32 %v5162_v20, %v5098_v49  ;;  %v4692_v27 = vpop.f32.mrf.mxu0  ;;  %v4721_v58 = vpop.f32.mrf.mxu1  ;;  %v5171_v9 = vadd.f32 %v5170_v44, %v5105_v40  ;;  %v3006_v54 = vadd.f32 %v10728_v56, %v2600_v39  ;;  %v2096_v0 = vadd.f32 %v10729_v24, %v1368_v28  ;;  %v10737_v39 = vld [vmem:[#allocation201_spill] sm:$0xff]  ;;  %v10739_v56 = vld [vmem:[#allocation232_spill] sm:$0xff] }
 0x851   : > { %v4943_v63 = vadd.f32 %v4692_v27, %v4432_v50  ;;  %v4944_v29 = vadd.f32 %v4721_v58, %v4433_v61  ;;  %v4774_v62 = vpop.f32.mrf.mxu3  ;;  %v4748_v6 = vpop.f32.mrf.mxu2  ;;  %v2097_v44 = vadd.f32 %v10730_v43, %v1397_v21  ;;  %v10732_v61 = vld [vmem:[#allocation74_spill] sm:$0xff]  ;;  %v10741_v24 = vld [vmem:[#allocation92_spill] sm:$0xff] }
 0x852   : > { %v4930_v45 = vadd.f32 %v4774_v62, %v4419_v10  ;;  %v4937_v60 = vadd.f32 %v4748_v6, %v9336_v47  ;;  %v3517_v19 = vadd.f32 %v10731_v38, %v3006_v54  ;;  %v2083_v40 = vadd.f32 %v10732_v61, %v1450_v15  ;;  %v10735_v10 = vld [vmem:[#allocation5_spill] sm:$0xff]  ;;  %v10736_v58 = vld [vmem:[#allocation114_spill] sm:$0xff]  ;;  %v10744_v38 = vld [vmem:[#allocation47_spill] sm:$0xff] }
 0x853   : > { %v5055_v16 = vadd.f32 %v9638_v46, %v4943_v63  ;;  %v5056_v20 = vadd.f32 %v9638_v46, %v4944_v29  ;;  %v2614_v47 = vadd.f32 %v10733_v55, %v2096_v0  ;;  %v2615_v41 = vadd.f32 %v10734_v5, %v2097_v44  ;;  %v10738_v29 = vld [vmem:[#allocation202_spill] sm:$0xff]  ;;  %v10742_v0 = vld [vmem:[#allocation140_spill] sm:$0xff] }
 0x854   : > { %v5042_v23 = vadd.f32 %v9588_v7, %v4930_v45  ;;  %v5049_v30 = vadd.f32 %v9617_v12, %v4937_v60  ;;  %v4028_v27 = vadd.f32 %v10735_v10, %v3517_v19  ;;  %v2601_v51 = vadd.f32 %v10736_v58, %v2083_v40  ;;  %v10740_v60 = vld [vmem:[#allocation32_spill] sm:$0xff] }
 0x855   : > { %v5119_v49 = vmax.f32 %v5055_v16, 0.0  ;;  %v5120_v50 = vmax.f32 %v5056_v20, 0.0  ;;  %v3020_v63 = vadd.f32 %v10737_v39, %v2614_v47  ;;  %v3021_v62 = vadd.f32 %v10738_v29, %v2615_v41  ;;  %v10743_v44 = vld [vmem:[#allocation40_spill] sm:$0xff]  ;;  %v10747_v47 = vld [vmem:[#allocation46_spill] sm:$0xff] }
 0x856   : > { %v5106_v35 = vmax.f32 %v5042_v23, 0.0  ;;  %v5113_v28 = vmax.f32 %v5049_v30, 0.0  ;;  %v4434_v6 = vadd.f32 %v9350_v48, %v4028_v27  ;;  %v1426_v43 = vadd.f32 %v10742_v0, %v10741_v24  ;;  %v9677_v30 = vpop.permute.xlu0 %5007  ;;  %v10746_v48 = vld [vmem:[#allocation44_spill] sm:$0xff]  ;;  %v10749_v27 = vld [vmem:[#allocation19_spill] sm:$0xff]  ;;  %v10754_v24 = vld [vmem:[#allocation26_spill] sm:$0xff] }
 0x857   : > { %5891 = vmatmul.msk.bf16.gmra.mxu2 %vm360_vm0, %v9345_v25  ;;  %v5188_v21 = vadd.f32 %v5120_v50, %v5119_v49  ;;  %v3007_v23 = vadd.f32 %v10743_v44, %v2601_v51  ;;  %v3532_v19 = vadd.f32 %v10744_v38, %v3021_v62  ;;  %v10745_v49 = vld [vmem:[#allocation31_spill] sm:$0xff]  ;;  %v10748_v41 = vld [vmem:[#allocation12_spill] sm:$0xff] }
 0x858   : > { %v9668_v4 = vadd.f32 %v5171_v9, %v5106_v35  ;;  %v4695_v31 = vpop.f32.mrf.mxu0  ;;  %v4724_v15 = vpop.f32.mrf.mxu1  ;;  %v5180_v45 = vadd.f32 %v5179_v13, %v5113_v28  ;;  %v3531_v13 = vadd.f32 %v10746_v48, %v3020_v63  ;;  %v10750_v29 = vld [vmem:[#allocation80_spill] sm:$0xff] }
 0x859   : > { %v4951_v54 = vadd.f32 %v4695_v31, %v10739_v56  ;;  %v4952_v16 = vadd.f32 %v4724_v15, %v10740_v60  ;;  %v4777_v20 = vpop.f32.mrf.mxu3  ;;  %v4750_v9 = vpop.f32.mrf.mxu2  ;;  %5895 = vmatmul.msk.bf16.gmra.mxu3 %vm360_vm0, %v9345_v25  ;;  %v3518_v5 = vadd.f32 %v10747_v47, %v3007_v23  ;;  %v4043_v35 = vadd.f32 %v10748_v41, %v3532_v19  ;;  %v10751_v63 = vld [vmem:[#allocation8_spill] sm:$0xff] }
 0x85a   : > { %v4938_v50 = vadd.f32 %v4777_v20, %v10745_v49  ;;  %v4945_v55 = vadd.f32 %v4750_v9, %v4434_v6  ;;  %v4042_v28 = vadd.f32 %v10749_v27, %v3531_v13  ;;  %v2098_v62 = vadd.f32 %v10750_v29, %v1426_v43  ;;  %v10752_v6 = vld [vmem:[#allocation25_spill] sm:$0xff]  ;;  %v10755_v38 = vld [vmem:[#allocation160_spill] sm:$0xff]  ;;  %v10756_v13 = vld [vmem:[#allocation95_spill] sm:$0xff] }
 0x85b   : > { %v5063_v61 = vadd.f32 %v9677_v30, %v4951_v54  ;;  %v5064_v40 = vadd.f32 %v9677_v30, %v4952_v16  ;;  %v4029_v31 = vadd.f32 %v10751_v63, %v3518_v5  ;;  %v10753_v54 = vld [vmem:[#allocation37_spill] sm:$0xff]  ;;  %v10758_v5 = vld [vmem:[#allocation35_spill] sm:$0xff] }
 0x85c   : > { %v5050_v10 = vadd.f32 %v9617_v12, %v4938_v50  ;;  %v5057_v39 = vadd.f32 %v9638_v46, %v4945_v55  ;;  %v4448_v56 = vadd.f32 %v10752_v6, %v4042_v28  ;;  %v4449_v60 = vadd.f32 %v10753_v54, %v4043_v35  ;;  %v10760_v28 = vld [vmem:[#allocation45_spill] sm:$0xff] }
 0x85d   : > { %v5127_v58 = vmax.f32 %v5063_v61, 0.0  ;;  %v5128_v51 = vmax.f32 %v5064_v40, 0.0  ;;  %v4435_v0 = vadd.f32 %v10754_v24, %v4029_v31  ;;  %v2616_v19 = vadd.f32 %v10755_v38, %v2098_v62  ;;  %v9704_v40 = vpop.permute.xlu1 %5012  ;;  %v10761_v62 = vld [vmem:[#allocation81_spill] sm:$0xff]  ;;  %v10764_v38 = vld [vmem:[#allocation203_spill] sm:$0xff] }
 0x85e   : > { %v5114_v15 = vmax.f32 %v5050_v10, 0.0  ;;  %5883 = vmatmul.msk.bf16.gmra.mxu0 %vm360_vm0, %v9345_v25  ;;  %5887 = vmatmul.msk.bf16.gmra.mxu1 %vm360_vm0, %v9345_v25  ;;  %v5121_v20 = vmax.f32 %v5057_v39, 0.0  ;;  %v10757_v25 = vld [vmem:[#allocation143_spill] sm:$0xff]  ;;  %v10759_v10 = vld [vmem:[#allocation36_spill] sm:$0xff]  ;;  %vm5223_vm0 = vcmask 7168  }
 0x85f   : > { %v5197_v16 = vadd.f32 %v5128_v51, %v5127_v58  ;;  %v1455_v61 = vadd.f32 %v10757_v25, %v10756_v13  ;;  %v3022_v41 = vadd.f32 %v10758_v5, %v2616_v19  ;;  %v10765_v13 = vld [vmem:[#allocation48_spill] sm:$0xff] }
 0x860   : > { %v9699_v44 = vadd.f32 %v5180_v45, %v5114_v15  ;;  %v4697_v43 = vpop.f32.mrf.mxu0  ;;  %v4726_v23 = vpop.f32.mrf.mxu1  ;;  %v5189_v9 = vadd.f32 %v5188_v21, %v5121_v20  ;;  %v10762_v15 = vld [vmem:[#allocation13_spill] sm:$0xff] }
 0x861   : > { %v4959_v49 = vadd.f32 %v4697_v43, %v4448_v56  ;;  %v4960_v50 = vadd.f32 %v4726_v23, %v4449_v60  ;;  %v4779_v48 = vpop.f32.mrf.mxu3  ;;  %v4753_v55 = vpop.f32.mrf.mxu2  ;;  %v3533_v58 = vadd.f32 %v10760_v28, %v3022_v41  ;;  %v2099_v63 = vadd.f32 %v10761_v62, %v1455_v61  ;;  %v10763_v60 = vld [vmem:[#allocation121_spill] sm:$0xff] }
 0x862   : > { %v4946_v47 = vadd.f32 %v4779_v48, %v4435_v0  ;;  %v4953_v27 = vadd.f32 %v4753_v55, %v10759_v10 }
 0x863   : > { %v5071_v45 = vadd.f32 %v9704_v40, %v4959_v49  ;;  %v5072_v35 = vadd.f32 %v9704_v40, %v4960_v50  ;;  %v4044_v6 = vadd.f32 %v10762_v15, %v3533_v58  ;;  %v2617_v20 = vadd.f32 %v10763_v60, %v2099_v63  ;;  %v10769_v63 = vld [vmem:[#allocation33_spill] sm:$0xff]  ;;  %v10770_v15 = vld [vmem:[#allocation34_spill] sm:$0xff] }
 0x864   : > { %v5058_v21 = vadd.f32 %v9638_v46, %v4946_v47  ;;  %v5065_v29 = vadd.f32 %v9677_v30, %v4953_v27  ;;  %v10766_v47 = vld [vmem:[#allocation16_spill] sm:$0xff] }
 0x865   : > { %v5135_v51 = vmax.f32 %v5071_v45, 0.0  ;;  %v5136_v39 = vmax.f32 %v5072_v35, 0.0  ;;  %v4450_v0 = vadd.f32 %v9381_v8, %v4044_v6  ;;  %v3023_v19 = vadd.f32 %v10764_v38, %v2617_v20  ;;  %v10767_v45 = vld [vmem:[#allocation42_spill] sm:$0xff] }
 0x866   : > { %v5122_v31 = vmax.f32 %v5058_v21, 0.0  ;;  %v5129_v54 = vmax.f32 %v5065_v29, 0.0 }
 0x867   : > { %v5206_v56 = vadd.f32 %v5136_v39, %v5135_v51  ;;  %v3534_v25 = vadd.f32 %v10765_v13, %v3023_v19  ;;  %v10768_v51 = vld [vmem:[#allocation49_spill] sm:$0xff] }
 0x868   : > { %v9716_v24 = vadd.f32 %v5189_v9, %v5122_v31  ;;  %v5198_v43 = vadd.f32 %v5197_v16, %v5129_v54 }
 0x869   : > { %v4782_v23 = vpop.f32.mrf.mxu3  ;;  %v4755_v49 = vpop.f32.mrf.mxu2  ;;  %v4045_v5 = vadd.f32 %v10766_v47, %v3534_v25  ;;  %v10772_v47 = vld [vmem:[#allocation43_spill] sm:$0xff] }
 0x86a   : > { %v4954_v50 = vadd.f32 %v4782_v23, %v9384_v11  ;;  %v4961_v48 = vadd.f32 %v4755_v49, %v4450_v0 }
 0x86b   : > { %v4451_v8 = vadd.f32 %v10767_v45, %v4045_v5 }
 0x86c   : > { %v5066_v61 = vadd.f32 %v9677_v30, %v4954_v50  ;;  %v5073_v55 = vadd.f32 %v9704_v40, %v4961_v48 }
 0x86e   : > { %v5130_v9 = vmax.f32 %v5066_v61, 0.0  ;;  %v5137_v41 = vmax.f32 %v5073_v55, 0.0  ;;  %v10771_v61 = vld [vmem:[#allocation39_spill] sm:$0xff] }
 0x870   : > { %v9726_v16 = vadd.f32 %v5198_v43, %v5130_v9  ;;  %v5207_v35 = vadd.f32 %v5206_v56, %v5137_v41  ;;  %v10773_v9 = vld [vmem:[#allocation57_spill] sm:$0xff] }
 0x871   : > { %v4784_v10 = vpop.f32.mrf.mxu3 }
 0x872   : > { %v4962_v27 = vadd.f32 %v4784_v10, %v4451_v8 }
 0x874   : > { %v5074_v11 = vadd.f32 %v9704_v40, %v4962_v27 }
 0x876   : > { %v5138_v21 = vmax.f32 %v5074_v11, 0.0 }
 0x878   : > { %v9729_v28 = vadd.f32 %v5207_v35, %v5138_v21 }
 0x8aa   : > { %v4854_v58 = vpop.f32.mrf.mxu2 }
 0x8ab   : > { %v4909_v39 = vadd.f32 %v4854_v58, %v10768_v51  ;;  %v4796_v29 = vpop.f32.mrf.mxu0  ;;  %v4825_v62 = vpop.f32.mrf.mxu1 }
 0x8ac   : > { %v4907_v31 = vadd.f32 %v4796_v29, %v10769_v63  ;;  %v4908_v6 = vadd.f32 %v4825_v62, %v10770_v15  ;;  %v4883_v54 = vpop.f32.mrf.mxu3 }
 0x8ad   : > { %v4910_v20 = vadd.f32 %v4883_v54, %v9404_v17  ;;  %v5021_v0 = vadd.f32 %v9502_v53, %v4909_v39 }
 0x8ae   : > { %v5019_v60 = vadd.f32 %v9502_v53, %v4907_v31  ;;  %v5020_v56 = vadd.f32 %v9502_v53, %v4908_v6  ;;  %v10774_v6 = vld [vmem:[#allocation38_spill] sm:$0xff] }
 0x8af   : > { %v5022_v23 = vadd.f32 %v9502_v53, %v4910_v20  ;;  %v5085_v50 = vmax.f32 %v5021_v0, 0.0 }
 0x8b0   : > { %v5083_v43 = vmax.f32 %v5019_v60, 0.0  ;;  %v5084_v19 = vmax.f32 %v5020_v56, 0.0 }
 0x8b1   : > { %v5086_v17 = vmax.f32 %v5022_v23, 0.0 }
 0x8b2   : > { %v5146_v38 = vadd.f32 %v9583_v34, %v5083_v43  ;;  %v4856_v49 = vpop.f32.mrf.mxu2 }
 0x8b3   : > { %v4798_v48 = vpop.f32.mrf.mxu0  ;;  %v4827_v13 = vpop.f32.mrf.mxu1  ;;  %v4917_v55 = vadd.f32 %v4856_v49, %v10771_v61 }
 0x8b4   : > { %v5147_v25 = vadd.f32 %v5146_v38, %v5084_v19  ;;  %v4915_v5 = vadd.f32 %v4798_v48, %v10772_v47  ;;  %v4916_v41 = vadd.f32 %v4827_v13, %v10773_v9  ;;  %v4885_v45 = vpop.f32.mrf.mxu3 }
 0x8b5   : > { %v4918_v34 = vadd.f32 %v4885_v45, %v9416_v37  ;;  %v5029_v10 = vadd.f32 %v9529_v14, %v4917_v55  ;;  %v10775_v55 = vld [vmem:[#allocation93_spill] sm:$0xff] }
 0x8b6   : > { %v5027_v8 = vadd.f32 %v9529_v14, %v4915_v5  ;;  %v5028_v53 = vadd.f32 %v9529_v14, %v4916_v41  ;;  %v5148_v35 = vadd.f32 %v5147_v25, %v5085_v50 }
 0x8b7   : > { %v5030_v21 = vadd.f32 %v9529_v14, %v4918_v34  ;;  %v5093_v31 = vmax.f32 %v5029_v10, 0.0 }
 0x8b8   : > { %v5091_v27 = vmax.f32 %v5027_v8, 0.0  ;;  %v5149_v11 = vadd.f32 %v5148_v35, %v5086_v17  ;;  %v5092_v51 = vmax.f32 %v5028_v53, 0.0 }
 0x8b9   : > { %v5094_v60 = vmax.f32 %v5030_v21, 0.0 }
 0x8ba   : > { %v5155_v58 = vadd.f32 %v9608_v33, %v5091_v27  ;;  %v4859_v39 = vpop.f32.mrf.mxu2  ;;  %5150 = vadd.xlane.f32.xlu2 %v5149_v11 }
 0x8bb   : > { %v4925_v29 = vadd.f32 %v4859_v39, %v9419_v32  ;;  %v4801_v62 = vpop.f32.mrf.mxu0  ;;  %v4830_v63 = vpop.f32.mrf.mxu1  ;;  %v10777_v39 = vld [vmem:[#allocation94_spill] sm:$0xff] }
 0x8bc   : > { %v5156_v15 = vadd.f32 %v5155_v58, %v5092_v51  ;;  %v4923_v37 = vadd.f32 %v4801_v62, %v10774_v6  ;;  %v4924_v54 = vadd.f32 %v4830_v63, %v9410_v36  ;;  %v4888_v56 = vpop.f32.mrf.mxu3  ;;  %v10776_v51 = vld [vmem:[#allocation141_spill] sm:$0xff] }
 0x8bd   : > { %v4926_v33 = vadd.f32 %v4888_v56, %v9428_v26  ;;  %v5037_v43 = vadd.f32 %v9547_v22, %v4925_v29 }
 0x8be   : > { %v5035_v20 = vadd.f32 %v9547_v22, %v4923_v37  ;;  %v5036_v14 = vadd.f32 %v9547_v22, %v4924_v54  ;;  %v5157_v0 = vadd.f32 %v5156_v15, %v5093_v31 }
 0x8bf   : > { %v5038_v38 = vadd.f32 %v9547_v22, %v4926_v33  ;;  %v5101_v36 = vmax.f32 %v5037_v43, 0.0 }
 0x8c0   : > { %v5099_v32 = vmax.f32 %v5035_v20, 0.0  ;;  %v5158_v23 = vadd.f32 %v5157_v0, %v5094_v60  ;;  %v5100_v49 = vmax.f32 %v5036_v14, 0.0 }
 0x8c1   : > { %v5102_v5 = vmax.f32 %v5038_v38, 0.0  ;;  %v10779_v38 = vld [vmem:[#allocation82_spill] sm:$0xff] }
 0x8c2   : > { %v5164_v19 = vadd.f32 %v9645_v42, %v5099_v32  ;;  %v4861_v50 = vpop.f32.mrf.mxu2  ;;  %5159 = vadd.xlane.f32.xlu0 %v5158_v23  ;;  %v10778_v23 = vld [vmem:[#allocation142_spill] sm:$0xff] }
 0x8c3   : > { %v4803_v48 = vpop.f32.mrf.mxu0  ;;  %v4832_v13 = vpop.f32.mrf.mxu1  ;;  %v4933_v61 = vadd.f32 %v4861_v50, %v9431_v3 }
 0x8c4   : > { %v5165_v25 = vadd.f32 %v5164_v19, %v5100_v49  ;;  %v4931_v26 = vadd.f32 %v4803_v48, %v9413_v57  ;;  %v4932_v47 = vadd.f32 %v4832_v13, %v10775_v55  ;;  %v4890_v9 = vpop.f32.mrf.mxu3 }
 0x8c5   : > { %v4934_v42 = vadd.f32 %v4890_v9, %v9440_v18  ;;  %v5045_v45 = vadd.f32 %v9588_v7, %v4933_v61  ;;  %v10781_v9 = vld [vmem:[#allocation100_spill] sm:$0xff] }
 0x8c6   : > { %v5043_v41 = vadd.f32 %v9588_v7, %v4931_v26  ;;  %v5044_v22 = vadd.f32 %v9588_v7, %v4932_v47  ;;  %v5166_v17 = vadd.f32 %v5165_v25, %v5101_v36 }
 0x8c7   : > { %v5046_v34 = vadd.f32 %v9588_v7, %v4934_v42  ;;  %v5109_v21 = vmax.f32 %v5045_v45, 0.0 }
 0x8c8   : > { %v5107_v8 = vmax.f32 %v5043_v41, 0.0  ;;  %v5167_v53 = vadd.f32 %v5166_v17, %v5102_v5  ;;  %v5108_v57 = vmax.f32 %v5044_v22, 0.0 }
 0x8c9   : > { %v5110_v62 = vmax.f32 %v5046_v34, 0.0  ;;  %v10783_v34 = vld [vmem:[#allocation83_spill] sm:$0xff] }
 0x8ca   : > { %v5173_v3 = vadd.f32 %v9668_v4, %v5107_v8  ;;  %v4864_v35 = vpop.f32.mrf.mxu2  ;;  %5168 = vadd.xlane.f32.xlu1 %v5167_v53  ;;  %v10782_v8 = vld [vmem:[#allocation27_spill] sm:$0xff] }
 0x8cb   : > { %v4941_v10 = vadd.f32 %v4864_v35, %v9443_v2  ;;  %v4806_v27 = vpop.f32.mrf.mxu0  ;;  %v4835_v11 = vpop.f32.mrf.mxu1 }
 0x8cc   : > { %v5174_v58 = vadd.f32 %v5173_v3, %v5108_v57  ;;  %v4939_v18 = vadd.f32 %v4806_v27, %v10776_v51  ;;  %v4940_v29 = vadd.f32 %v4835_v11, %v10777_v39  ;;  %v4893_v63 = vpop.f32.mrf.mxu3 }
 0x8cd   : > { %v4942_v4 = vadd.f32 %v4893_v63, %v9456_v52  ;;  %v5053_v6 = vadd.f32 %v9617_v12, %v4941_v10 }
 0x8ce   : > { %v5051_v31 = vadd.f32 %v9617_v12, %v4939_v18  ;;  %v5052_v7 = vadd.f32 %v9617_v12, %v4940_v29  ;;  %v5175_v15 = vadd.f32 %v5174_v58, %v5109_v21 }
 0x8cf   : > { %v5054_v54 = vadd.f32 %v9617_v12, %v4942_v4  ;;  %v5117_v14 = vmax.f32 %v5053_v6, 0.0  ;;  %v10784_v4 = vld [vmem:[#allocation206_spill] sm:$0xff]  ;;  %v10785_v6 = vld [vmem:[#allocation205_spill] sm:$0xff] }
 0x8d0   : > { %v5115_v2 = vmax.f32 %v5051_v31, 0.0  ;;  %v5176_v37 = vadd.f32 %v5175_v15, %v5110_v62  ;;  %v5116_v56 = vmax.f32 %v5052_v7, 0.0 }
 0x8d1   : > { %v5118_v49 = vmax.f32 %v5054_v54, 0.0 }
 0x8d2   : > { %v5182_v60 = vadd.f32 %v9699_v44, %v5115_v2  ;;  %v4866_v20 = vpop.f32.mrf.mxu2  ;;  %5177 = vadd.xlane.f32.xlu2 %v5176_v37  ;;  %v10780_v44 = vld [vmem:[#allocation30_spill] sm:$0xff] }
 0x8d3   : > { %v4808_v33 = vpop.f32.mrf.mxu0  ;;  %v4837_v0 = vpop.f32.mrf.mxu1  ;;  %v4949_v32 = vadd.f32 %v4866_v20, %v9459_v1  ;;  %v10786_v2 = vld [vmem:[#allocation146_spill] sm:$0xff] }
 0x8d4   : > { %v5183_v43 = vadd.f32 %v5182_v60, %v5116_v56  ;;  %v4947_v52 = vadd.f32 %v4808_v33, %v10778_v23  ;;  %v4948_v19 = vadd.f32 %v4837_v0, %v10779_v38  ;;  %v4895_v50 = vpop.f32.mrf.mxu3 }
 0x8d5   : > { %v4950_v48 = vadd.f32 %v4895_v50, %v10780_v44  ;;  %v5061_v25 = vadd.f32 %v9638_v46, %v4949_v32 }
 0x8d6   : > { %v5059_v36 = vadd.f32 %v9638_v46, %v4947_v52  ;;  %v5060_v12 = vadd.f32 %v9638_v46, %v4948_v19  ;;  %v5184_v13 = vadd.f32 %v5183_v43, %v5117_v14 }
 0x8d7   : > { %v5062_v55 = vadd.f32 %v9638_v46, %v4950_v48  ;;  %v5125_v17 = vmax.f32 %v5061_v25, 0.0 }
 0x8d8   : > { %v5123_v61 = vmax.f32 %v5059_v36, 0.0  ;;  %v5185_v26 = vadd.f32 %v5184_v13, %v5118_v49  ;;  %v5124_v47 = vmax.f32 %v5060_v12, 0.0 }
 0x8d9   : > { %v5126_v57 = vmax.f32 %v5062_v55, 0.0 }
 0x8da   : > { %v5191_v1 = vadd.f32 %v9716_v24, %v5123_v61  ;;  %v4869_v5 = vpop.f32.mrf.mxu2  ;;  %5186 = vadd.xlane.f32.xlu2 %v5185_v26 }
 0x8db   : > { %v4957_v41 = vadd.f32 %v4869_v5, %v10781_v9  ;;  %v4811_v22 = vpop.f32.mrf.mxu0  ;;  %v4840_v42 = vpop.f32.mrf.mxu1 }
 0x8dc   : > { %v5192_v45 = vadd.f32 %v5191_v1, %v5124_v47  ;;  %v4955_v53 = vadd.f32 %v4811_v22, %v10782_v8  ;;  %v4956_v3 = vadd.f32 %v4840_v42, %v10783_v34  ;;  %v4898_v35 = vpop.f32.mrf.mxu3 }
 0x8dd   : > { %v4958_v24 = vadd.f32 %v4898_v35, %v9494_v59  ;;  %v5069_v11 = vadd.f32 %v9677_v30, %v4957_v41 }
 0x8de   : > { %v5067_v10 = vadd.f32 %v9677_v30, %v4955_v53  ;;  %v5068_v46 = vadd.f32 %v9677_v30, %v4956_v3  ;;  %v5193_v27 = vadd.f32 %v5192_v45, %v5125_v17 }
 0x8df   : > { %v5070_v51 = vadd.f32 %v9677_v30, %v4958_v24  ;;  %v5133_v62 = vmax.f32 %v5069_v11, 0.0 }
 0x8e0   : > { %v5131_v21 = vmax.f32 %v5067_v10, 0.0  ;;  %v5194_v58 = vadd.f32 %v5193_v27, %v5126_v57  ;;  %v5132_v39 = vmax.f32 %v5068_v46, 0.0 }
 0x8e1   : > { %v5134_v54 = vmax.f32 %v5070_v51, 0.0 }
 0x8e2   : > { %v5200_v18 = vadd.f32 %v9726_v16, %v5131_v21  ;;  %v4871_v29 = vpop.f32.mrf.mxu2  ;;  %5195 = vadd.xlane.f32.xlu0 %v5194_v58  ;;  %v10787_v16 = vld [vmem:[#allocation88_spill] sm:$0xff] }
 0x8e3   : > { %v4813_v63 = vpop.f32.mrf.mxu0  ;;  %v4842_v31 = vpop.f32.mrf.mxu1  ;;  %v4965_v15 = vadd.f32 %v4871_v29, %v10784_v4 }
 0x8e4   : > { %v5201_v7 = vadd.f32 %v5200_v18, %v5132_v39  ;;  %v4963_v59 = vadd.f32 %v4813_v63, %v10785_v6  ;;  %v4964_v37 = vadd.f32 %v4842_v31, %v10786_v2  ;;  %v4900_v60 = vpop.f32.mrf.mxu3 }
 0x8e5   : > { %v4966_v20 = vadd.f32 %v4900_v60, %v10787_v16  ;;  %v5077_v33 = vadd.f32 %v9704_v40, %v4965_v15 }
 0x8e6   : > { %v5075_v56 = vadd.f32 %v9704_v40, %v4963_v59  ;;  %v5076_v30 = vadd.f32 %v9704_v40, %v4964_v37  ;;  %v5202_v14 = vadd.f32 %v5201_v7, %v5133_v62 }
 0x8e7   : > { %v5078_v52 = vadd.f32 %v9704_v40, %v4966_v20  ;;  %v5141_v38 = vmax.f32 %v5077_v33, 0.0 }
 0x8e8   : > { %v5139_v0 = vmax.f32 %v5075_v56, 0.0  ;;  %v5203_v43 = vadd.f32 %v5202_v14, %v5134_v54  ;;  %v5140_v23 = vmax.f32 %v5076_v30, 0.0 }
 0x8e9   : > { %v5142_v49 = vmax.f32 %v5078_v52, 0.0 }
 0x8ea   : > { %v5209_v32 = vadd.f32 %v9729_v28, %v5139_v0  ;;  %5204 = vadd.xlane.f32.xlu1 %v5203_v43 }
 0x8ec   : > { %v5210_v19 = vadd.f32 %v5209_v32, %v5140_v23 }
 0x8ee   : > { %v5211_v50 = vadd.f32 %v5210_v19, %v5141_v38 }
 0x8f0   : > { %v5212_v36 = vadd.f32 %v5211_v50, %v5142_v49 }
 0x8f2   : > { %5213 = vadd.xlane.f32.xlu2 %v5212_v36 }
 0x92d   : > { %v5151_v12 = vpop.xlane.xlu2 %5150 }
 0x92e   : > { %v5215_v44 = vmul.f32 0.0009765625, %v5151_v12 }
 0x930   : > { %5224 = vst.msk [vmem:[%s224_s25] sm:$0xff] %vm5223_vm0, %v5215_v44 }
 0x935   : > { %v5160_v28 = vpop.xlane.xlu0 %5159 }
 0x936   : > { %v5216_v48 = vmul.f32 0.0009765625, %v5160_v28 }
 0x938   : > { %5225 = vst.msk [vmem:[%s224_s25 + $0x8] sm:$0xff] %vm5223_vm0, %v5216_v48 }
 0x93d   : > { %v5169_v40 = vpop.xlane.xlu1 %5168 }
 0x93e   : > { %v5217_v13 = vmul.f32 0.0009765625, %v5169_v40 }
 0x940   : > { %5226 = vst.msk [vmem:[%s224_s25 + $0x10] sm:$0xff] %vm5223_vm0, %v5217_v13 }
 0x945   : > { %v5178_v25 = vpop.xlane.xlu2 %5177 }
 0x946   : > { %v5218_v61 = vmul.f32 0.0009765625, %v5178_v25 }
 0x948   : > { %5227 = vst.msk [vmem:[%s224_s25 + $0x18] sm:$0xff] %vm5223_vm0, %v5218_v61 }
 0x94d   : > { %v5187_v26 = vpop.xlane.xlu2 %5186 }
 0x94e   : > { %v5219_v55 = vmul.f32 0.0009765625, %v5187_v26 }
 0x950   : > { %5228 = vst.msk [vmem:[%s224_s25 + $0x20] sm:$0xff] %vm5223_vm0, %v5219_v55 }
 0x955   : > { %v5196_v1 = vpop.xlane.xlu0 %5195 }
 0x956   : > { %v5220_v47 = vmul.f32 0.0009765625, %v5196_v1 }
 0x958   : > { %5229 = vst.msk [vmem:[%s224_s25 + $0x28] sm:$0xff] %vm5223_vm0, %v5220_v47 }
 0x95d   : > { %v5205_v5 = vpop.xlane.xlu1 %5204 }
 0x95e   : > { %v5221_v9 = vmul.f32 0.0009765625, %v5205_v5 }
 0x960   : > { %5230 = vst.msk [vmem:[%s224_s25 + $0x30] sm:$0xff] %vm5223_vm0, %v5221_v9 }
 0x965   : > { %v5214_v41 = vpop.xlane.xlu2 %5213 }
 0x966   : > { %v5222_v22 = vmul.f32 0.0009765625, %v5214_v41 }
 0x968   : > { %5231 = vst.msk [vmem:[%s224_s25 + $0x38] sm:$0xff] %vm5223_vm0, %v5222_v22 }
 0x969 PF: > { %s15_s18 = sadd.s32 1, %s6061_s18  }
 0x96a   : > { %p12_p4 = scmp.ge.s32.totalorder %s15_s18, 4  }
 0x96c   :  { %14 = sbr.rel (!%p12_p4) target bundleno = 1 (0x1), region = 78 }

</bundles_post_ra>
